<compile_context>
chip_gen: v7x
topology: tpu7x:2x2x1
jax: 0.10.0
libtpu: 0.0.40
codegen_flags: <defaults>
</compile_context>

<pallas_src>
import functools
import math

import numpy as np
import jax
import jax.numpy as jnp
from jax.experimental import pallas as pl
from jax.experimental.pallas import tpu as pltpu


VMEM_LIMIT = 48 * 1024 * 1024  # comfortably under v7x's 64 MiB physical VMEM


# -----------------------------------------------------------------------------
# Conv (stride 1) kernels: shifted-row-slice matmuls over a flattened padded
# activation slab.  Output is emitted in a "wide" (B, Hout*Wp, Cout) layout
# (the kw-1 wrap-around columns per row are discarded by the wrapper).
# -----------------------------------------------------------------------------
def _conv_accumulate(x_ref, w_ref, b_ref, n, taps):
    # x_ref: (1, Hp*Wp + kw-1, Cin) f32; w_ref: (kh*kw, Cin, Ct) bf16; b_ref: (1, Ct) f32
    xb = x_ref[0].astype(jnp.bfloat16)
    ct = w_ref.shape[-1]
    acc = jnp.zeros((n, ct), jnp.float32)
    for t, off in enumerate(taps):
        acc = acc + jnp.dot(xb[off:off + n, :], w_ref[t],
                            preferred_element_type=jnp.float32)
    return acc + b_ref[...]


def _conv_kernel(x_ref, w_ref, b_ref, o_ref, *, taps, act, channel_softmax):
    n = o_ref.shape[1]
    acc = _conv_accumulate(x_ref, w_ref, b_ref, n, taps)
    if act:
        acc = jnp.where(acc >= 0.0, acc, 0.01 * acc)          # LeakyReLU(0.01)
    if channel_softmax:                                        # Softmax(dim=channels)
        m = jnp.max(acc, axis=1, keepdims=True)
        e = jnp.exp(acc - m)
        acc = e * pl.reciprocal(jnp.sum(e, axis=1, keepdims=True), approx=True)
    o_ref[0] = acc


def _conv_spatial_softmax_kernel(x_ref, w_ref, b_ref, m_ref, o_ref, *, taps):
    # Softmax over the spatial positions, per output channel.  m_ref is an
    # additive mask (0 valid / -1e30 for the kw-1 wrap-around columns).
    n = o_ref.shape[1]
    acc = _conv_accumulate(x_ref, w_ref, b_ref, n, taps) + m_ref[...]
    mx = jnp.max(acc, axis=0, keepdims=True)
    e = jnp.exp(acc - mx)
    o_ref[0] = e * pl.reciprocal(jnp.sum(e, axis=0, keepdims=True), approx=True)


@functools.lru_cache(maxsize=None)
def _get_conv_call(B, Hp, Wp, Cin, Hout, Wout, Cout, kh, kw, act, softmax_kind):
    n = Hout * Wp                      # "wide" output rows
    rows = Hp * Wp + kw - 1            # flattened padded input rows
    ct = Cout if Cout <= 256 else 256  # Cout tile (512 / 1024 -> 2 / 4 tiles)
    assert Cout % ct == 0
    n_co = Cout // ct
    taps = tuple(dy * Wp + dx for dy in range(kh) for dx in range(kw))

    cost = pl.CostEstimate(
        flops=2 * B * n * Cin * Cout * kh * kw,
        transcendentals=(B * n * Cout) if softmax_kind else 0,
        bytes_accessed=4 * B * rows * Cin + 2 * kh * kw * Cin * Cout + 4 * B * n * Cout,
    )

    in_specs = [
        pl.BlockSpec((1, rows, Cin), lambda b, co: (b, 0, 0)),
        pl.BlockSpec((kh * kw, Cin, ct), lambda b, co: (0, 0, co)),
        pl.BlockSpec((1, ct), lambda b, co: (0, co)),
    ]
    if softmax_kind == "spatial":
        assert n_co == 1
        in_specs.append(pl.BlockSpec((n, 1), lambda b, co: (0, 0)))
        kern = functools.partial(_conv_spatial_softmax_kernel, taps=taps)
    else:
        if softmax_kind == "channel":
            assert n_co == 1
        kern = functools.partial(_conv_kernel, taps=taps, act=act,
                                 channel_softmax=(softmax_kind == "channel"))

    call = pl.pallas_call(
        kern,
        out_shape=jax.ShapeDtypeStruct((B, n, Cout), jnp.float32),
        grid=(B, n_co),
        in_specs=in_specs,
        out_specs=pl.BlockSpec((1, n, ct), lambda b, co: (b, 0, co)),
        compiler_params=pltpu.CompilerParams(
            dimension_semantics=("parallel", "parallel"),
            vmem_limit_bytes=VMEM_LIMIT),
        cost_estimate=cost,
    )
    return jax.jit(call)


def conv2d(x, p, *, act=True, softmax_kind=None):
    """x: (B,H,W,Cin) f32 NHWC.  p['w']: (k*k,Cin,Cout) bf16, p['b']: (1,Cout) f32."""
    w, b = p['w'], p['b']
    ksq, Cin, Cout = w.shape
    k = 3 if ksq == 9 else 2
    pad = 1
    B, H, W, _ = x.shape
    Hout = H + 2 * pad - k + 1
    Wout = W + 2 * pad - k + 1
    Hp, Wp = H + 2 * pad, W + 2 * pad

    xp = jnp.pad(x, ((0, 0), (pad, pad), (pad, pad), (0, 0)))
    flat = jnp.pad(xp.reshape(B, Hp * Wp, Cin), ((0, 0), (0, k - 1), (0, 0)))

    call = _get_conv_call(B, Hp, Wp, Cin, Hout, Wout, Cout, k, k, bool(act),
                          softmax_kind)
    if softmax_kind == "spatial":
        col = np.arange(Hout * Wp, dtype=np.int64) % Wp
        madd = jnp.asarray(
            np.where(col < Wout, 0.0, -1e30).astype(np.float32).reshape(-1, 1))
        wide = call(flat, w, b, madd)
    else:
        wide = call(flat, w, b)
    return wide.reshape(B, Hout, Wp, Cout)[:, :, :Wout, :]


# -----------------------------------------------------------------------------
# ConvTranspose2d(C, C, kernel_size=2, stride=2) as a single matmul kernel.
# -----------------------------------------------------------------------------
def _convt_kernel(x_ref, w_ref, b_ref, o_ref):
    xb = x_ref[0].astype(jnp.bfloat16)
    o_ref[0] = jnp.dot(xb, w_ref[...],
                       preferred_element_type=jnp.float32) + b_ref[...]


@functools.lru_cache(maxsize=None)
def _get_convt_call(B, HW, Cin, Cout4):
    cost = pl.CostEstimate(flops=2 * B * HW * Cin * Cout4, transcendentals=0,
                           bytes_accessed=4 * B * HW * (Cin + Cout4) + 2 * Cin * Cout4)
    call = pl.pallas_call(
        _convt_kernel,
        out_shape=jax.ShapeDtypeStruct((B, HW, Cout4), jnp.float32),
        grid=(B,),
        in_specs=[pl.BlockSpec((1, HW, Cin), lambda b: (b, 0, 0)),
                  pl.BlockSpec((Cin, Cout4), lambda b: (0, 0)),
                  pl.BlockSpec((1, Cout4), lambda b: (0, 0))],
        out_specs=pl.BlockSpec((1, HW, Cout4), lambda b: (b, 0, 0)),
        compiler_params=pltpu.CompilerParams(
            dimension_semantics=("parallel",),
            vmem_limit_bytes=VMEM_LIMIT),
        cost_estimate=cost,
    )
    return jax.jit(call)


def conv_transpose2x2(x, p):
    B, H, W, Cin = x.shape
    w, b = p['w'], p['b']                 # w: (Cin, 4*Cout) bf16 [(dy,dx,co) cols]
    Cout4 = w.shape[1]
    Cout = Cout4 // 4
    y = _get_convt_call(B, H * W, Cin, Cout4)(x.reshape(B, H * W, Cin), w, b)
    y = y.reshape(B, H, W, 2, 2, Cout)
    y = jnp.transpose(y, (0, 1, 3, 2, 4, 5)).reshape(B, 2 * H, 2 * W, Cout)
    return y


# -----------------------------------------------------------------------------
# MaxPool2d(2) and global average pooling kernels.
# -----------------------------------------------------------------------------
def _maxpool_kernel(x_ref, o_ref):
    x = x_ref[0]                               # (H2, 2, W2, 2*C)
    a = jnp.maximum(x[:, 0], x[:, 1])          # max over the row pair
    c = o_ref.shape[-1]
    o_ref[0] = jnp.maximum(a[:, :, :c], a[:, :, c:])   # max over the column pair


@functools.lru_cache(maxsize=None)
def _get_maxpool_call(B, H2, W2, C):
    call = pl.pallas_call(
        _maxpool_kernel,
        out_shape=jax.ShapeDtypeStruct((B, H2, W2, C), jnp.float32),
        grid=(B,),
        in_specs=[pl.BlockSpec((1, H2, 2, W2, 2 * C), lambda b: (b, 0, 0, 0, 0))],
        out_specs=pl.BlockSpec((1, H2, W2, C), lambda b: (b, 0, 0, 0)),
        compiler_params=pltpu.CompilerParams(dimension_semantics=("parallel",)),
    )
    return jax.jit(call)


def maxpool2(x):
    B, H, W, C = x.shape
    xr = x.reshape(B, H // 2, 2, W // 2, 2 * C)     # free row-major regrouping
    return _get_maxpool_call(B, H // 2, W // 2, C)(xr)


def _gap_kernel(x_ref, o_ref, *, inv_hw):
    o_ref[0] = jnp.sum(x_ref[0], axis=0, keepdims=True) * inv_hw


@functools.lru_cache(maxsize=None)
def _get_gap_call(B, HW, C):
    kern = functools.partial(_gap_kernel, inv_hw=1.0 / HW)
    call = pl.pallas_call(
        kern,
        out_shape=jax.ShapeDtypeStruct((B, 1, C), jnp.float32),
        grid=(B,),
        in_specs=[pl.BlockSpec((1, HW, C), lambda b: (b, 0, 0))],
        out_specs=pl.BlockSpec((1, 1, C), lambda b: (b, 0, 0)),
        compiler_params=pltpu.CompilerParams(dimension_semantics=("parallel",)),
    )
    return jax.jit(call)


def global_avg_pool(x):
    B, H, W, C = x.shape
    return _get_gap_call(B, H * W, C)(x.reshape(B, H * W, C))   # (B,1,C)


def pooled_skip(x, size):
    g = global_avg_pool(x)
    B, _, C = g.shape
    return jnp.broadcast_to(g.reshape(B, 1, 1, C), (B, size, size, C))


# -----------------------------------------------------------------------------
# Parameter init (random weights; layout pre-baked for the kernels, bf16).
# -----------------------------------------------------------------------------
def init_params(key, K=9, c=1):
    ks = iter(jax.random.split(key, 128))

    def conv(cin, cout, k=3):
        scale = 1.0 / math.sqrt(cin * k * k)
        w = scale * jax.random.normal(next(ks), (k, k, cin, cout), jnp.float32)
        return {'w': w.reshape(k * k, cin, cout).astype(jnp.bfloat16),
                'b': jnp.zeros((1, cout), jnp.float32)}

    def convt(cin, cout):
        scale = 1.0 / math.sqrt(cin * 4)
        w = scale * jax.random.normal(next(ks), (cin, cout, 2, 2), jnp.float32)
        w = jnp.transpose(w, (0, 2, 3, 1)).reshape(cin, 4 * cout)  # (ci,dy,dx,co)
        return {'w': w.astype(jnp.bfloat16),
                'b': jnp.zeros((1, 4 * cout), jnp.float32)}

    def down_p(cin, cout):
        return {'c1': conv(cin, cout), 'c2': conv(cout, cout)}

    def up_p(cin, feat_c, cout):
        return {'up': convt(cin, cin), 'c1': conv(cin, cout),
                'c2': conv(cout, cout), 'feat': conv(feat_c + cout, cout)}

    p = {}
    p['inc_rgb'] = conv(3, 64)
    p['inc_gray'] = conv(1, 64)
    p['down1'] = down_p(64, 64)
    p['down2'] = down_p(64, 128)
    p['down3'] = down_p(128, 256)
    p['down4'] = down_p(256, 512)
    p['down5'] = down_p(512, 1024)
    p['feat'] = conv(1024, 1024)
    p['up1'] = up_p(1024, 1024, 512)
    p['up2'] = up_p(512, 512, 256)
    p['up3'] = up_p(256, 256, 128)
    p['up4'] = up_p(128, 128, 64)
    p['up5'] = up_p(64, 64, 64)
    p['kernel_up1'] = up_p(1024, 1024, 512)
    p['kernel_up2'] = up_p(512, 512, 256)
    p['kernel_up3'] = up_p(256, 256, 256)
    p['kernel_up4'] = up_p(256, 128, 128)
    p['kernel_up5'] = up_p(128, 64, 64)
    p['masks_end'] = {'c0': conv(64, 64), 'c1': conv(64, 64), 'c2': conv(64, K * 3)}
    p['kernels_end'] = {'c0': conv(64, 64, k=2), 'c1': conv(64, 64), 'c2': conv(64, K * c)}
    return p


# -----------------------------------------------------------------------------
# TwoHeadsNetwork forward
# -----------------------------------------------------------------------------
def double_conv(p, x):
    x = conv2d(x, p['c1'])
    return conv2d(x, p['c2'])


def up_block(p, x1, x2):
    x1 = conv_transpose2x2(x1, p['up'])
    x1 = conv2d(x1, p['c1'])
    x1 = conv2d(x1, p['c2'])
    # TODO(synk): the diffX/diffY F.pad re-alignment path (inputs not divisible
    # by 32) is not implemented; sizes always match here.
    x = jnp.concatenate([x2, x1], axis=-1) if x2 is not None else x1
    return conv2d(x, p['feat'])


def two_heads_forward(params, x_nchw, *, K=9, blur_kernel_size=33, c=1):
    # TODO(synk): blur_kernel_size==65 branch (kernel_up6) and the
    # no_softmax=True variant are not implemented (defaults only).
    assert blur_kernel_size == 33
    B, Cin, H, W = x_nchw.shape
    assert H % 32 == 0 and W % 32 == 0

    x = jnp.transpose(x_nchw, (0, 2, 3, 1)).astype(jnp.float32)    # NHWC
    inc = params['inc_rgb'] if Cin == 3 else params['inc_gray']
    x1 = conv2d(x, inc)

    x1_feat = double_conv(params['down1'], x1); x2 = maxpool2(x1_feat)
    x2_feat = double_conv(params['down2'], x2); x3 = maxpool2(x2_feat)
    x3_feat = double_conv(params['down3'], x3); x4 = maxpool2(x3_feat)
    x4_feat = double_conv(params['down4'], x4); x5 = maxpool2(x4_feat)
    x5_feat = double_conv(params['down5'], x5); x6 = maxpool2(x5_feat)
    x6_feat = conv2d(x6, params['feat'])

    feat6_gap = global_avg_pool(x6_feat).reshape(B, 1, 1, -1)
    feat5_gap = pooled_skip(x5_feat, 2)
    feat4_gap = pooled_skip(x4_feat, 4)
    feat3_gap = pooled_skip(x3_feat, 8)
    feat2_gap = pooled_skip(x2_feat, 16)
    feat1_gap = pooled_skip(x1_feat, 32)

    # ---- kernel head ----
    k1 = up_block(params['kernel_up1'], feat6_gap, feat5_gap)
    k2 = up_block(params['kernel_up2'], k1, feat4_gap)
    k3 = up_block(params['kernel_up3'], k2, feat3_gap)
    k4 = up_block(params['kernel_up4'], k3, feat2_gap)
    k5 = up_block(params['kernel_up5'], k4, feat1_gap)

    ke = params['kernels_end']
    kk = conv2d(k5, ke['c0'])                                     # 2x2 conv, pad 1 -> 33x33
    kk = conv2d(kk, ke['c1'])
    kk = conv2d(kk, ke['c2'], act=False, softmax_kind='spatial')  # softmax over 33*33
    kernels = jnp.transpose(kk, (0, 3, 1, 2)).reshape(
        B, K, c, blur_kernel_size, blur_kernel_size)

    # ---- mask head ----
    x7 = up_block(params['up1'], x6_feat, x5_feat)
    x8 = up_block(params['up2'], x7, x4_feat)
    x9 = up_block(params['up3'], x8, x3_feat)
    x10 = up_block(params['up4'], x9, x2_feat)
    x11 = up_block(params['up5'], x10, x1_feat)

    me = params['masks_end']
    m = conv2d(x11, me['c0'])
    m = conv2d(m, me['c1'])
    m = conv2d(m, me['c2'], act=False, softmax_kind='channel')    # Softmax(dim=1)
    logits = jnp.transpose(m, (0, 3, 1, 2))                       # (B, K*3, H, W)
    return kernels, logits


if __name__ == "__main__":
    key = jax.random.PRNGKey(0)
    kp, kx = jax.random.split(key)
    K, c = 9, 1
    params = init_params(kp, K=K, c=c)

    B, H, W = 2, 32, 32       # smallest spatial size the 5-level U-Net supports
    x = jax.random.normal(kx, (B, 3, H, W), jnp.float32)

    kernels, logits = two_heads_forward(params, x, K=K, blur_kernel_size=33, c=c)
    kernels = jax.block_until_ready(kernels)
    logits = jax.block_until_ready(logits)

    assert kernels.shape == (B, K, c, 33, 33)
    assert logits.shape == (B, K * 3, H, W)
    assert bool(jnp.all(jnp.isfinite(kernels)))
    assert bool(jnp.all(jnp.isfinite(logits)))
    # softmax sanity: blur kernels sum to ~1 over space, masks sum to ~1 over channels
    assert bool(jnp.allclose(jnp.sum(kernels, axis=(3, 4)), 1.0, atol=1e-2))
    assert bool(jnp.allclose(jnp.sum(logits, axis=1), 1.0, atol=1e-2))
    print("KERNEL_OK")
</pallas_src>

<mosaic_0001>
module attributes {stable_mosaic.version = 11 : i64} {
  func.func @_conv_kernel(%arg0: i32, %arg1: i32, %arg2: memref<1x1158x3xf32, #tpu.memory_space<vmem>>, %arg3: memref<9x3x64xbf16, #tpu.memory_space<vmem>>, %arg4: memref<1x64xf32, #tpu.memory_space<vmem>>, %arg5: memref<1x1088x64xf32, #tpu.memory_space<vmem>>) attributes {dimension_semantics = [#tpu.dimension_semantics<parallel>, #tpu.dimension_semantics<parallel>], iteration_bounds = array<i64: 2, 1>, scalar_prefetch = 0 : i64, scratch_operands = 0 : i64, tpu.core_type = #tpu.core_type<tc>, window_params = [{transform_indices = @transform_0, window_bounds = array<i64: 1, 1158, 3>}, {transform_indices = @transform_1, window_bounds = array<i64: 9, 3, 64>}, {transform_indices = @transform_2, window_bounds = array<i64: 1, 64>}, {transform_indices = @transform_3, window_bounds = array<i64: 1, 1088, 64>}]} {
    %c0 = arith.constant 0 : index
    %c0_0 = arith.constant 0 : index
    %c0_1 = arith.constant 0 : index
    %0 = vector.load %arg2[%c0, %c0_0, %c0_1] : memref<1x1158x3xf32, #tpu.memory_space<vmem>>, vector<1x1158x3xf32>
    %1 = vector.shape_cast %0 : vector<1x1158x3xf32> to vector<1158x3xf32>
    %2 = arith.truncf %1 : vector<1158x3xf32> to vector<1158x3xbf16>
    %cst = arith.constant 0.000000e+00 : f32
    %3 = vector.broadcast %cst : f32 to vector<1088x64xf32>
    %4 = vector.extract_strided_slice %2 {offsets = [0, 0], sizes = [1088, 3], strides = [1, 1]} : vector<1158x3xbf16> to vector<1088x3xbf16>
    %c0_2 = arith.constant 0 : index
    %c0_3 = arith.constant 0 : index
    %c0_4 = arith.constant 0 : index
    %5 = vector.load %arg3[%c0_2, %c0_3, %c0_4] : memref<9x3x64xbf16, #tpu.memory_space<vmem>>, vector<1x3x64xbf16>
    %6 = vector.shape_cast %5 : vector<1x3x64xbf16> to vector<3x64xbf16>
    %cst_5 = arith.constant dense<0.000000e+00> : vector<1088x64xf32>
    %7 = tpu.matmul %4, %6, %cst_5 {dimension_numbers = #tpu.dot_dimension_numbers<[1], [0], [0], [1], [0, 0, 1, 1], [], []>} : vector<1088x3xbf16>, vector<3x64xbf16>, vector<1088x64xf32> -> vector<1088x64xf32>
    %8 = arith.addf %3, %7 : vector<1088x64xf32>
    %9 = vector.extract_strided_slice %2 {offsets = [1, 0], sizes = [1088, 3], strides = [1, 1]} : vector<1158x3xbf16> to vector<1088x3xbf16>
    %c1 = arith.constant 1 : index
    %c0_6 = arith.constant 0 : index
    %c0_7 = arith.constant 0 : index
    %10 = vector.load %arg3[%c1, %c0_6, %c0_7] : memref<9x3x64xbf16, #tpu.memory_space<vmem>>, vector<1x3x64xbf16>
    %11 = vector.shape_cast %10 : vector<1x3x64xbf16> to vector<3x64xbf16>
    %cst_8 = arith.constant dense<0.000000e+00> : vector<1088x64xf32>
    %12 = tpu.matmul %9, %11, %cst_8 {dimension_numbers = #tpu.dot_dimension_numbers<[1], [0], [0], [1], [0, 0, 1, 1], [], []>} : vector<1088x3xbf16>, vector<3x64xbf16>, vector<1088x64xf32> -> vector<1088x64xf32>
    %13 = arith.addf %8, %12 : vector<1088x64xf32>
    %14 = vector.extract_strided_slice %2 {offsets = [2, 0], sizes = [1088, 3], strides = [1, 1]} : vector<1158x3xbf16> to vector<1088x3xbf16>
    %c2 = arith.constant 2 : index
    %c0_9 = arith.constant 0 : index
    %c0_10 = arith.constant 0 : index
    %15 = vector.load %arg3[%c2, %c0_9, %c0_10] : memref<9x3x64xbf16, #tpu.memory_space<vmem>>, vector<1x3x64xbf16>
    %16 = vector.shape_cast %15 : vector<1x3x64xbf16> to vector<3x64xbf16>
    %cst_11 = arith.constant dense<0.000000e+00> : vector<1088x64xf32>
    %17 = tpu.matmul %14, %16, %cst_11 {dimension_numbers = #tpu.dot_dimension_numbers<[1], [0], [0], [1], [0, 0, 1, 1], [], []>} : vector<1088x3xbf16>, vector<3x64xbf16>, vector<1088x64xf32> -> vector<1088x64xf32>
    %18 = arith.addf %13, %17 : vector<1088x64xf32>
    %19 = vector.extract_strided_slice %2 {offsets = [34, 0], sizes = [1088, 3], strides = [1, 1]} : vector<1158x3xbf16> to vector<1088x3xbf16>
    %c3 = arith.constant 3 : index
    %c0_12 = arith.constant 0 : index
    %c0_13 = arith.constant 0 : index
    %20 = vector.load %arg3[%c3, %c0_12, %c0_13] : memref<9x3x64xbf16, #tpu.memory_space<vmem>>, vector<1x3x64xbf16>
    %21 = vector.shape_cast %20 : vector<1x3x64xbf16> to vector<3x64xbf16>
    %cst_14 = arith.constant dense<0.000000e+00> : vector<1088x64xf32>
    %22 = tpu.matmul %19, %21, %cst_14 {dimension_numbers = #tpu.dot_dimension_numbers<[1], [0], [0], [1], [0, 0, 1, 1], [], []>} : vector<1088x3xbf16>, vector<3x64xbf16>, vector<1088x64xf32> -> vector<1088x64xf32>
    %23 = arith.addf %18, %22 : vector<1088x64xf32>
    %24 = vector.extract_strided_slice %2 {offsets = [35, 0], sizes = [1088, 3], strides = [1, 1]} : vector<1158x3xbf16> to vector<1088x3xbf16>
    %c4 = arith.constant 4 : index
    %c0_15 = arith.constant 0 : index
    %c0_16 = arith.constant 0 : index
    %25 = vector.load %arg3[%c4, %c0_15, %c0_16] : memref<9x3x64xbf16, #tpu.memory_space<vmem>>, vector<1x3x64xbf16>
    %26 = vector.shape_cast %25 : vector<1x3x64xbf16> to vector<3x64xbf16>
    %cst_17 = arith.constant dense<0.000000e+00> : vector<1088x64xf32>
    %27 = tpu.matmul %24, %26, %cst_17 {dimension_numbers = #tpu.dot_dimension_numbers<[1], [0], [0], [1], [0, 0, 1, 1], [], []>} : vector<1088x3xbf16>, vector<3x64xbf16>, vector<1088x64xf32> -> vector<1088x64xf32>
    %28 = arith.addf %23, %27 : vector<1088x64xf32>
    %29 = vector.extract_strided_slice %2 {offsets = [36, 0], sizes = [1088, 3], strides = [1, 1]} : vector<1158x3xbf16> to vector<1088x3xbf16>
    %c5 = arith.constant 5 : index
    %c0_18 = arith.constant 0 : index
    %c0_19 = arith.constant 0 : index
    %30 = vector.load %arg3[%c5, %c0_18, %c0_19] : memref<9x3x64xbf16, #tpu.memory_space<vmem>>, vector<1x3x64xbf16>
    %31 = vector.shape_cast %30 : vector<1x3x64xbf16> to vector<3x64xbf16>
    %cst_20 = arith.constant dense<0.000000e+00> : vector<1088x64xf32>
    %32 = tpu.matmul %29, %31, %cst_20 {dimension_numbers = #tpu.dot_dimension_numbers<[1], [0], [0], [1], [0, 0, 1, 1], [], []>} : vector<1088x3xbf16>, vector<3x64xbf16>, vector<1088x64xf32> -> vector<1088x64xf32>
    %33 = arith.addf %28, %32 : vector<1088x64xf32>
    %34 = vector.extract_strided_slice %2 {offsets = [68, 0], sizes = [1088, 3], strides = [1, 1]} : vector<1158x3xbf16> to vector<1088x3xbf16>
    %c6 = arith.constant 6 : index
    %c0_21 = arith.constant 0 : index
    %c0_22 = arith.constant 0 : index
    %35 = vector.load %arg3[%c6, %c0_21, %c0_22] : memref<9x3x64xbf16, #tpu.memory_space<vmem>>, vector<1x3x64xbf16>
    %36 = vector.shape_cast %35 : vector<1x3x64xbf16> to vector<3x64xbf16>
    %cst_23 = arith.constant dense<0.000000e+00> : vector<1088x64xf32>
    %37 = tpu.matmul %34, %36, %cst_23 {dimension_numbers = #tpu.dot_dimension_numbers<[1], [0], [0], [1], [0, 0, 1, 1], [], []>} : vector<1088x3xbf16>, vector<3x64xbf16>, vector<1088x64xf32> -> vector<1088x64xf32>
    %38 = arith.addf %33, %37 : vector<1088x64xf32>
    %39 = vector.extract_strided_slice %2 {offsets = [69, 0], sizes = [1088, 3], strides = [1, 1]} : vector<1158x3xbf16> to vector<1088x3xbf16>
    %c7 = arith.constant 7 : index
    %c0_24 = arith.constant 0 : index
    %c0_25 = arith.constant 0 : index
    %40 = vector.load %arg3[%c7, %c0_24, %c0_25] : memref<9x3x64xbf16, #tpu.memory_space<vmem>>, vector<1x3x64xbf16>
    %41 = vector.shape_cast %40 : vector<1x3x64xbf16> to vector<3x64xbf16>
    %cst_26 = arith.constant dense<0.000000e+00> : vector<1088x64xf32>
    %42 = tpu.matmul %39, %41, %cst_26 {dimension_numbers = #tpu.dot_dimension_numbers<[1], [0], [0], [1], [0, 0, 1, 1], [], []>} : vector<1088x3xbf16>, vector<3x64xbf16>, vector<1088x64xf32> -> vector<1088x64xf32>
    %43 = arith.addf %38, %42 : vector<1088x64xf32>
    %44 = vector.extract_strided_slice %2 {offsets = [70, 0], sizes = [1088, 3], strides = [1, 1]} : vector<1158x3xbf16> to vector<1088x3xbf16>
    %c8 = arith.constant 8 : index
    %c0_27 = arith.constant 0 : index
    %c0_28 = arith.constant 0 : index
    %45 = vector.load %arg3[%c8, %c0_27, %c0_28] : memref<9x3x64xbf16, #tpu.memory_space<vmem>>, vector<1x3x64xbf16>
    %46 = vector.shape_cast %45 : vector<1x3x64xbf16> to vector<3x64xbf16>
    %cst_29 = arith.constant dense<0.000000e+00> : vector<1088x64xf32>
    %47 = tpu.matmul %44, %46, %cst_29 {dimension_numbers = #tpu.dot_dimension_numbers<[1], [0], [0], [1], [0, 0, 1, 1], [], []>} : vector<1088x3xbf16>, vector<3x64xbf16>, vector<1088x64xf32> -> vector<1088x64xf32>
    %48 = arith.addf %43, %47 : vector<1088x64xf32>
    %c0_30 = arith.constant 0 : index
    %c0_31 = arith.constant 0 : index
    %49 = vector.load %arg4[%c0_30, %c0_31] : memref<1x64xf32, #tpu.memory_space<vmem>>, vector<1x64xf32>
    %50 = vector.broadcast %49 : vector<1x64xf32> to vector<1088x64xf32>
    %51 = arith.addf %48, %50 : vector<1088x64xf32>
    %cst_32 = arith.constant 0.000000e+00 : f32
    %52 = vector.broadcast %cst_32 : f32 to vector<1088x64xf32>
    %53 = arith.cmpf oge, %51, %52 : vector<1088x64xf32>
    %cst_33 = arith.constant 0.00999999977 : f32
    %54 = vector.broadcast %cst_33 : f32 to vector<1088x64xf32>
    %55 = arith.mulf %54, %51 : vector<1088x64xf32>
    %56 = arith.select %53, %51, %55 : vector<1088x64xi1>, vector<1088x64xf32>
    %c0_34 = arith.constant 0 : index
    %c0_35 = arith.constant 0 : index
    %c0_36 = arith.constant 0 : index
    %57 = vector.load %arg5[%c0_34, %c0_35, %c0_36] : memref<1x1088x64xf32, #tpu.memory_space<vmem>>, vector<1x1088x64xf32>
    %58 = vector.shape_cast %57 : vector<1x1088x64xf32> to vector<1088x64xf32>
    %59 = vector.shape_cast %56 : vector<1088x64xf32> to vector<1x1088x64xf32>
    tpu.vector_store %arg5[%c0_34, %c0_35, %c0_36], %59 {strides = array<i32>} : memref<1x1088x64xf32, #tpu.memory_space<vmem>>, vector<1x1088x64xf32>,
    return
  }
  func.func @transform_0(%arg0: i32, %arg1: i32) -> (i32, i32, i32) {
    %c0_i32 = arith.constant 0 : i32
    %c0_i32_0 = arith.constant 0 : i32
    %c0_i32_1 = arith.constant 0 : i32
    return %arg0, %c0_i32, %c0_i32_0 : i32, i32, i32
  }
  func.func @transform_1(%arg0: i32, %arg1: i32) -> (i32, i32, i32) {
    %c0_i32 = arith.constant 0 : i32
    %c0_i32_0 = arith.constant 0 : i32
    %c0_i32_1 = arith.constant 0 : i32
    return %c0_i32, %c0_i32_0, %arg1 : i32, i32, i32
  }
  func.func @transform_2(%arg0: i32, %arg1: i32) -> (i32, i32) {
    %c0_i32 = arith.constant 0 : i32
    %c0_i32_0 = arith.constant 0 : i32
    return %c0_i32, %arg1 : i32, i32
  }
  func.func @transform_3(%arg0: i32, %arg1: i32) -> (i32, i32, i32) {
    %c0_i32 = arith.constant 0 : i32
    %c0_i32_0 = arith.constant 0 : i32
    return %arg0, %c0_i32, %arg1 : i32, i32, i32
  }
}

</mosaic_0001>

<bundles_post_ra>
// kernel: tpu_custom_call.1
= control target key start
LH: loop header
LB: loop body
LE: loop exit
PB: predicated region body
PF: predicated region fallthrough
CT: control target
= control target key end

     0   :  { %s14077_s12 = smov 0   ;;  %s14079_s13 = smov 0   ;;  %s17778_s0 = inlined_call_operand.vmem [shape: f32[2,1158,3], index: 0, kind: input, shape index: {}]   ;;  %s17779_s1 = inlined_call_operand.vmem [shape: bf16[9,3,64], index: 1, kind: input, shape index: {}]   ;;  %s17780_s2 = inlined_call_operand.vmem [shape: f32[1,64], index: 2, kind: input, shape index: {}]   ;;  %s17781_s3 = inlined_call_operand.vmem [shape: f32[2,1088,64], index: 3, kind: output, shape index: {}]  }
   0x1   :  { %s14081_s14 = smov 0  }
   0x2 LB: > { %s25_s15 = sadd.s32 1, %s14050_s13  ;;  %p10424_p0 = scmp.ge.s32.totalorder %s14054_s14, 1  ;;  %s14054_s14 = sphi %s14081_s14, %s13_s14   ;;  %s14050_s13 = sphi %s14079_s13, %s18896_s13   ;;  %s14046_s12 = sphi %s14077_s12, %s18895_s12  }
   0x3   : > { %p27_p1 = scmp.ge.s32.totalorder %s25_s15, 2  ;;  %p168_p2 = scmp.lt.s32.totalorder %s14054_s14, 3 }
   0x5   : > { %s18898_s15 = smov (%p27_p1, %s25_s15), 0  ;;  %p169_p3 = pnand %p10424_p0, %p168_p2 }
   0x7   : > { %172 = sbr.rel (%p169_p3) target bundleno = 1474 (0x5c2), region = 32 }
   0xe   : > { %v10427_v0 = vld [vmem:[%s17779_s1 + $0x2] sm:$0x3]  ;;  %vm1198_vm0 = vcmask 1040384   ;;  %vm1199_vm1 = vcmask 1041408   ;;  %p202_p4 = scmp.lt.s32.totalorder %s14046_s12, 1  ;;  %v14056_v1 = vmov 65535  }
   0xf   : > { %v1200_v2 = vsel %vm1198_vm0, 4294967295, %v14056_v1  ;;  %v10702_v3 = vld [vmem:[%s17779_s1 + $0x8] sm:$0x3]  ;;  %v441_v5 = vld [vmem:[%s17779_s1] sm:$0x3]  ;;  %vm993_vm3 = vcmask 23552  }
  0x10   : > { %v14101_v4 = vsel %vm1199_vm1, %v1200_v2, 0  ;;  %s18900_s12 = smov (!%p202_p4, %s14046_s12), 1  ;;  %v10771_v9 = vld [vmem:[%s17779_s1 + $0xa] sm:$0x3]  ;;  %vm444_vm2 = vsmask.f32 7424 }
  0x11   : > { %v1203_v6 = vand.u32 %v10427_v0, %v14101_v4  ;;  %v14110_v7 = vand.u32 %v10702_v3, %v14101_v4  ;;  %v14113_v8 = vand.u32 %v14101_v4, %v441_v5  ;;  %s14003_s24 = smul.u32 1160, %s18900_s12  ;;  %v14120_v10 = vand.u32 %v10771_v9, %v14101_v4 }
  0x12   : > { %vm4359_vm4 = vsmask.f32 6400  ;;  %vm5569_vm5 = vcmask 1045504   ;;  %vm2569_vm6 = vcmask 1046528   ;;  %vm7359_vm7 = vsmask.f32 5376 }
  0x13   : > { %18164 = vst [vmem:[#allocation2_spill] sm:$0xff] %v14110_v7  ;;  %11671 = vmatprep.subr.bf16.mxu1 %v1203_v6  ;;  %12223 = vmatprep.subr.bf16.mxu0 %v14110_v7  ;;  %s14127_s27 = scalar_lea.vmem %s17778_s0, %s14003_s24  ;;  %vm8567_vm8 = vcmask 1044480   ;;  %s14004_s17 = smul.u32 1088, %s18900_s12  ;;  %vm10176_vm9 = vcmask 523264  }
  0x14   : > { %11672 = vmatpush3.bf16.msra.mxu1 %v1203_v6  ;;  %12224 = vmatpush3.bf16.msra.mxu0 %v14110_v7  ;;  %v223_v11 = vld [vmem:[%s14127_s27] sm:$0xff]  ;;  %v224_v12 = vld [vmem:[%s14127_s27 + $0x8] sm:$0xff]  ;;  %v225_v13 = vld [vmem:[%s14127_s27 + $0x10] sm:$0xff] }
  0x15   : > { %11809 = vmatprep.subr.bf16.mxu1 %v14113_v8  ;;  %12361 = vmatprep.subr.bf16.mxu0 %v14120_v10  ;;  %v226_v14 = vld [vmem:[%s14127_s27 + $0x18] sm:$0xff]  ;;  %v14135_v15 = vpack.c.bf16 %v224_v12, %v223_v11  ;;  %v227_v16 = vld [vmem:[%s14127_s27 + $0x20] sm:$0xff]  ;;  %v228_v17 = vld [vmem:[%s14127_s27 + $0x28] sm:$0xff]  ;;  %s17197_s19 = scalar_lea.vmem %s17781_s3, %s14004_s17 }
  0x16   : > { %v14139_v18 = vpack.c.bf16 %v226_v14, %v225_v13  ;;  %v229_v19 = vld [vmem:[%s14127_s27 + $0x30] sm:$0xff]  ;;  %v230_v20 = vld [vmem:[%s14127_s27 + $0x38] sm:$0xff]  ;;  %v14143_v21 = vpack.c.bf16 %v228_v17, %v227_v16  ;;  %v231_v22 = vld [vmem:[%s14127_s27 + $0x40] sm:$0xff] }
  0x17   : > { %v446_v23 = vshrl.u32 %v14135_v15, 16  ;;  %v448_v24 = vshll.u32 %v14135_v15, 16  ;;  %v14148_v25 = vpack.c.bf16 %v230_v20, %v229_v19  ;;  %v232_v26 = vld [vmem:[%s14127_s27 + $0x48] sm:$0xff]  ;;  %v233_v43 = vld [vmem:[%s14127_s27 + $0x50] sm:$0xff]  ;;  %v234_v44 = vld [vmem:[%s14127_s27 + $0x58] sm:$0xff] }
  0x18   : > { %v453_v27 = vshll.u32 %v14139_v18, 16  ;;  %v457_v28 = vshrl.u32 %v14139_v18, 16  ;;  %v461_v29 = vshll.u32 %v14143_v21, 16  ;;  %v465_v30 = vshrl.u32 %v14143_v21, 16  ;;  %v235_v49 = vld [vmem:[%s14127_s27 + $0x60] sm:$0xff]  ;;  %v236_v50 = vld [vmem:[%s14127_s27 + $0x68] sm:$0xff] }
  0x19   : > { %v450_v31 = vrot.slane %v448_v24, 1  ;;  %v469_v32 = vshll.u32 %v14148_v25, 16  ;;  %v473_v33 = vshrl.u32 %v14148_v25, 16  ;;  %v14157_v34 = vpack.c.bf16 %v232_v26, %v231_v22  ;;  %v237_v59 = vld [vmem:[%s14127_s27 + $0x70] sm:$0xff]  ;;  %v238_v60 = vld [vmem:[%s14127_s27 + $0x78] sm:$0xff]  ;;  %v239_v16 = vld [vmem:[%s14127_s27 + $0x80] sm:$0xff] }
  0x1a   : > { %v455_v35 = vrot.slane %v453_v27, 1  ;;  %v4360_v36 = vrot.slane %v465_v30, 1  ;;  %v4361_v37 = vrot.slane %v461_v29, 2  ;;  %v463_v38 = vrot.slane %v461_v29, 1  ;;  %v240_v17 = vld [vmem:[%s14127_s27 + $0x88] sm:$0xff] }
  0x1b   : > { %18165 = vst [vmem:[#allocation3_spill] sm:$0xff] %v14157_v34  ;;  %v451_v39 = vor.u32 %v450_v31, %v446_v23  ;;  %v4363_v40 = vrot.slane %v473_v33, 1  ;;  %v4364_v41 = vrot.slane %v469_v32, 2  ;;  %v14160_v42 = vshll.u32 %v14157_v34, 16 }
  0x1c   : > { %v459_v45 = vor.u32 %v457_v28, %v455_v35  ;;  %v4362_v46 = vor.u32 %v4361_v37, %v4360_v36  ;;  %v14165_v47 = vshrl.u32 %v14157_v34, 16  ;;  %v467_v48 = vor.u32 %v465_v30, %v463_v38  ;;  %v241_v28 = vld [vmem:[%s14127_s27 + $0x90] sm:$0xff]  ;;  %v244_v36 = vld [vmem:[%s14127_s27 + $0xa8] sm:$0xff] }
  0x1d   : > { %18166 = vst [vmem:[#allocation4_spill] sm:$0xff] %v14160_v42  ;;  %v456_v51 = vsel %vm444_vm2, %v451_v39, %v455_v35  ;;  %v4365_v52 = vor.u32 %v4364_v41, %v4363_v40  ;;  %v4368_v53 = vrot.slane %v14160_v42, 2  ;;  %v471_v54 = vrot.slane %v469_v32, 1  ;;  %v243_v35 = vld [vmem:[%s14127_s27 + $0xa0] sm:$0xff] }
  0x1e   : > { %18167 = vst [vmem:[#allocation5_spill] sm:$0xff] %v14165_v47  ;;  %11673 = vmatprep.mubr.msk.bf16.mxu1 %vm993_vm3, %v456_v51  ;;  %v464_v55 = vsel %vm444_vm2, %v459_v45, %v463_v38  ;;  %v4367_v56 = vrot.slane %v14165_v47, 1  ;;  %v14174_v57 = vpack.c.bf16 %v234_v44, %v233_v43  ;;  %v479_v58 = vrot.slane %v14160_v42, 1 }
  0x1f   : > { %v4366_v61 = vsel %vm4359_vm4, %v4362_v46, %v4365_v52  ;;  %11674 = vmatmul.mubr.msk.bf16.vlgmr.msra.gmra.mrb[0].mxu1 %vm993_vm3, %v464_v55  ;;  %v472_v62 = vsel %vm444_vm2, %v467_v48, %v471_v54  ;;  %v475_v63 = vor.u32 %v473_v33, %v471_v54  ;;  %v14182_v0 = vpack.c.bf16 %v236_v50, %v235_v49  ;;  %v242_v33 = vld [vmem:[%s14127_s27 + $0x98] sm:$0xff]  ;;  %v245_v48 = vld [vmem:[%s14127_s27 + $0xb0] sm:$0xff] }
  0x20   : > { %18168 = vst [vmem:[#allocation6_spill] sm:$0xff] %v14174_v57  ;;  %12225 = vmatprep.mubr.msk.bf16.mxu0 %vm993_vm3, %v4366_v61  ;;  %11810 = vmatpush3.bf16.msra.mxu1 %v14113_v8  ;;  %v4369_v1 = vor.u32 %v4368_v53, %v4367_v56  ;;  %v14187_v2 = vshll.u32 %v14174_v57, 16  ;;  %v14190_v3 = vshrl.u32 %v14174_v57, 16  ;;  %v483_v5 = vor.u32 %v14165_v47, %v479_v58  ;;  %v246_v49 = vld [vmem:[%s14127_s27 + $0xb8] sm:$0xff] }
  0x21   : > { %18169 = vst [vmem:[#allocation7_spill] sm:$0xff] %v14182_v0  ;;  %11677 = vmatprep.mubr.msk.bf16.mxu1 %vm993_vm3, %v472_v62  ;;  %v14195_v6 = vshll.u32 %v14182_v0, 16  ;;  %v14198_v9 = vshrl.u32 %v14182_v0, 16  ;;  %v14200_v11 = vpack.c.bf16 %v238_v60, %v237_v59  ;;  %v480_v26 = vsel %vm444_vm2, %v475_v63, %v479_v58 }
  0x22   : > { %18170 = vst [vmem:[#allocation8_spill] sm:$0xff] %v14187_v2  ;;  %18171 = vst [vmem:[#allocation9_spill] sm:$0xff] %v14190_v3  ;;  %v4370_v8 = vsel %vm4359_vm4, %v4365_v52, %v4369_v1  ;;  %v4371_v12 = vrot.slane %v14190_v3, 1  ;;  %v4372_v13 = vrot.slane %v14187_v2, 2  ;;  %v487_v14 = vrot.slane %v14187_v2, 1  ;;  %v286_v2 = vld [vmem:[%s14127_s27 + $0x1f8] sm:$0xff] }
  0x23   : > { %18172 = vst [vmem:[#allocation10_spill] sm:$0xff] %v14195_v6  ;;  %18173 = vst [vmem:[#allocation11_spill] sm:$0xff] %v14198_v9  ;;  %12226 = vmatmul.mubr.msk.bf16.vlgmr.msra.gmra.mrb[0].mxu0 %vm993_vm3, %v4370_v8  ;;  %v4375_v19 = vrot.slane %v14198_v9, 1  ;;  %v4376_v20 = vrot.slane %v14195_v6, 2  ;;  %v14212_v22 = vshll.u32 %v14200_v11, 16  ;;  %v14215_v23 = vshrl.u32 %v14200_v11, 16 }
  0x24   : > { %18174 = vst [vmem:[#allocation12_spill] sm:$0xff] %v14200_v11  ;;  %12362 = vmatpush3.bf16.msra.mxu0 %v14120_v10  ;;  %v4373_v24 = vor.u32 %v4372_v13, %v4371_v12  ;;  %v488_v27 = vsel %vm444_vm2, %v483_v5, %v487_v14  ;;  %v14223_v32 = vpack.c.bf16 %v240_v17, %v239_v16  ;;  %v495_v37 = vrot.slane %v14195_v6, 1  ;;  %v248_v5 = vld [vmem:[%s14127_s27 + $0xc8] sm:$0xff] }
  0x25   : > { %18175 = vst [vmem:[#allocation13_spill] sm:$0xff] %v14212_v22  ;;  %18176 = vst [vmem:[#allocation14_spill] sm:$0xff] %v14215_v23  ;;  %v4377_v29 = vor.u32 %v4376_v20, %v4375_v19  ;;  %v4379_v30 = vrot.slane %v14215_v23, 1  ;;  %v4380_v31 = vrot.slane %v14212_v22, 2  ;;  %v491_v39 = vor.u32 %v14190_v3, %v487_v14  ;;  %v249_v20 = vld [vmem:[%s14127_s27 + $0xd0] sm:$0xff] }
  0x26   : > { %18177 = vst [vmem:[#allocation15_spill] sm:$0xff] %v14223_v32  ;;  %v4374_v10 = vsel %vm4359_vm4, %v4369_v1, %v4373_v24  ;;  %v14234_v40 = vshll.u32 %v14223_v32, 16  ;;  %v14237_v41 = vshrl.u32 %v14223_v32, 16  ;;  %v499_v44 = vor.u32 %v14198_v9, %v495_v37  ;;  %v247_v1 = vld [vmem:[%s14127_s27 + $0xc0] sm:$0xff]  ;;  %v285_v9 = vld [vmem:[%s14127_s27 + $0x1f0] sm:$0xff] }
  0x27   : > { %12229 = vmatprep.mubr.msk.bf16.mxu0 %vm993_vm3, %v4374_v10  ;;  %11678 = vmatmul.mubr.msk.bf16.gmra.mrb[4].mxu1 %vm993_vm3, %v480_v26  ;;  %v4381_v38 = vor.u32 %v4380_v31, %v4379_v30  ;;  %v4378_v43 = vsel %vm4359_vm4, %v4373_v24, %v4377_v29  ;;  %v14242_v45 = vpack.c.bf16 %v242_v33, %v241_v28  ;;  %v503_v53 = vrot.slane %v14212_v22, 1  ;;  %v250_v24 = vld [vmem:[%s14127_s27 + $0xd8] sm:$0xff] }
  0x28   : > { %18178 = vst [vmem:[#allocation16_spill] sm:$0xff] %v14234_v40  ;;  %18179 = vst [vmem:[#allocation17_spill] sm:$0xff] %v14237_v41  ;;  %11681 = vmatprep.mubr.msk.bf16.mxu1 %vm993_vm3, %v488_v27  ;;  %v14244_v46 = vpack.c.bf16 %v244_v36, %v243_v35  ;;  %v4383_v51 = vrot.slane %v14237_v41, 1  ;;  %v4384_v52 = vrot.slane %v14234_v40, 2  ;;  %v496_v56 = vsel %vm444_vm2, %v491_v39, %v495_v37 }
  0x29   : > { %18180 = vst [vmem:[#allocation18_spill] sm:$0xff] %v14242_v45  ;;  %v4382_v50 = vsel %vm4359_vm4, %v4377_v29, %v4381_v38  ;;  %v14253_v54 = vshll.u32 %v14242_v45, 16  ;;  %v14256_v55 = vshrl.u32 %v14242_v45, 16  ;;  %v14263_v59 = vpack.c.bf16 %v246_v49, %v245_v48 }
  0x2a   : > { %18181 = vst [vmem:[#allocation19_spill] sm:$0xff] %v14244_v46  ;;  %v14261_v58 = vshll.u32 %v14244_v46, 16  ;;  %v4385_v60 = vor.u32 %v4384_v52, %v4383_v51  ;;  %v14269_v63 = vshrl.u32 %v14244_v46, 16  ;;  %v504_v8 = vsel %vm444_vm2, %v499_v44, %v503_v53  ;;  %v252_v51 = vld [vmem:[%s14127_s27 + $0xe8] sm:$0xff] }
  0x2b   : > { %18182 = vst [vmem:[#allocation20_spill] sm:$0xff] %v14253_v54  ;;  %18183 = vst [vmem:[#allocation21_spill] sm:$0xff] %v14256_v55  ;;  %12230 = vmatmul.mubr.msk.bf16.gmra.mrb[4].mxu0 %vm993_vm3, %v4378_v43  ;;  %v4387_v61 = vrot.slane %v14256_v55, 1  ;;  %v4388_v62 = vrot.slane %v14253_v54, 2  ;;  %v14275_v12 = vshll.u32 %v14263_v59, 16  ;;  %v14278_v13 = vshrl.u32 %v14263_v59, 16 }
  0x2c   : > { %18184 = vst [vmem:[#allocation22_spill] sm:$0xff] %v14261_v58  ;;  %18185 = vst [vmem:[#allocation23_spill] sm:$0xff] %v14263_v59  ;;  %12233 = vmatprep.mubr.msk.bf16.mxu0 %vm993_vm3, %v4382_v50  ;;  %v511_v16 = vrot.slane %v14234_v40, 1  ;;  %v507_v17 = vor.u32 %v14215_v23, %v503_v53  ;;  %v14283_v19 = vpack.c.bf16 %v248_v5, %v247_v1  ;;  %v4391_v27 = vrot.slane %v14269_v63, 1  ;;  %v251_v50 = vld [vmem:[%s14127_s27 + $0xe0] sm:$0xff]  ;;  %v253_v53 = vld [vmem:[%s14127_s27 + $0xf0] sm:$0xff] }
  0x2d   : > { %18186 = vst [vmem:[#allocation24_spill] sm:$0xff] %v14269_v63  ;;  %18187 = vst [vmem:[#allocation25_spill] sm:$0xff] %v14275_v12  ;;  %v4389_v14 = vor.u32 %v4388_v62, %v4387_v61  ;;  %v4386_v26 = vsel %vm4359_vm4, %v4381_v38, %v4385_v60  ;;  %v4392_v28 = vrot.slane %v14261_v58, 2  ;;  %v519_v31 = vrot.slane %v14253_v54, 1  ;;  %v280_v40 = vld [vmem:[%s14127_s27 + $0x1c8] sm:$0xff] }
  0x2e   : > { %18188 = vst [vmem:[#allocation26_spill] sm:$0xff] %v14278_v13  ;;  %18189 = vst [vmem:[#allocation27_spill] sm:$0xff] %v14283_v19  ;;  %v515_v29 = vor.u32 %v14237_v41, %v511_v16  ;;  %v4395_v33 = vrot.slane %v14278_v13, 1  ;;  %v4396_v35 = vrot.slane %v14275_v12, 2  ;;  %v14296_v36 = vpack.c.bf16 %v250_v24, %v249_v20 }
  0x2f   : > { %11682 = vmatmul.mubr.msk.bf16.gmra.mrb[8].mxu1 %vm993_vm3, %v496_v56  ;;  %v4390_v30 = vsel %vm4359_vm4, %v4385_v60, %v4389_v14  ;;  %v14300_v10 = vshll.u32 %v14283_v19, 16  ;;  %v14303_v37 = vshrl.u32 %v14283_v19, 16  ;;  %v512_v38 = vsel %vm444_vm2, %v507_v17, %v511_v16  ;;  %v254_v56 = vld [vmem:[%s14127_s27 + $0xf8] sm:$0xff] }
  0x30   : > { %11685 = vmatprep.mubr.msk.bf16.mxu1 %vm993_vm3, %v504_v8  ;;  %18190 = vst [vmem:[#allocation28_spill] sm:$0xff] %v14296_v36  ;;  %v4393_v39 = vor.u32 %v4392_v28, %v4391_v27  ;;  %v520_v43 = vsel %vm444_vm2, %v515_v29, %v519_v31  ;;  %v4397_v44 = vor.u32 %v4396_v35, %v4395_v33  ;;  %v14309_v48 = vshll.u32 %v14296_v36, 16 }
  0x31   : > { %18191 = vst [vmem:[#allocation29_spill] sm:$0xff] %v14300_v10  ;;  %18192 = vst [vmem:[#allocation30_spill] sm:$0xff] %v14303_v37  ;;  %v14312_v49 = vshrl.u32 %v14296_v36, 16  ;;  %v527_v52 = vrot.slane %v14261_v58, 1  ;;  %v523_v60 = vor.u32 %v14256_v55, %v519_v31  ;;  %v4399_v61 = vrot.slane %v14303_v37, 1  ;;  %v269_v58 = vld [vmem:[%s14127_s27 + $0x170] sm:$0xff] }
  0x32   : > { %18193 = vst [vmem:[#allocation31_spill] sm:$0xff] %v14309_v48  ;;  %v4400_v62 = vrot.slane %v14300_v10, 2  ;;  %v4394_v1 = vsel %vm4359_vm4, %v4389_v14, %v4393_v39  ;;  %v535_v8 = vrot.slane %v14275_v12, 1  ;;  %v14327_v16 = vpack.c.bf16 %v252_v51, %v251_v50  ;;  %v257_v50 = vld [vmem:[%s14127_s27 + $0x110] sm:$0xff]  ;;  %v258_v51 = vld [vmem:[%s14127_s27 + $0x118] sm:$0xff] }
  0x33   : > { %12234 = vmatmul.mubr.msk.bf16.gmra.mrb[8].mxu0 %vm993_vm3, %v4386_v26  ;;  %18194 = vst [vmem:[#allocation32_spill] sm:$0xff] %v14312_v49  ;;  %v531_v5 = vor.u32 %v14269_v63, %v527_v52  ;;  %v4398_v17 = vsel %vm4359_vm4, %v4393_v39, %v4397_v44  ;;  %v4403_v20 = vrot.slane %v14312_v49, 1  ;;  %v4404_v24 = vrot.slane %v14309_v48, 2  ;;  %v255_v39 = vld [vmem:[%s14127_s27 + $0x100] sm:$0xff]  ;;  %v270_v63 = vld [vmem:[%s14127_s27 + $0x178] sm:$0xff] }
  0x34   : > { %12237 = vmatprep.mubr.msk.bf16.mxu0 %vm993_vm3, %v4390_v30  ;;  %18195 = vst [vmem:[#allocation33_spill] sm:$0xff] %v14327_v16  ;;  %v14332_v26 = vpack.c.bf16 %v254_v56, %v253_v53  ;;  %v4401_v14 = vor.u32 %v4400_v62, %v4399_v61  ;;  %v528_v27 = vsel %vm444_vm2, %v523_v60, %v527_v52  ;;  %v543_v28 = vrot.slane %v14300_v10, 1  ;;  %v264_v10 = vld [vmem:[%s14127_s27 + $0x148] sm:$0xff] }
  0x35   : > { %v14339_v29 = vshll.u32 %v14327_v16, 16  ;;  %v14342_v30 = vshrl.u32 %v14327_v16, 16  ;;  %v536_v31 = vsel %vm444_vm2, %v531_v5, %v535_v8  ;;  %v4405_v33 = vor.u32 %v4404_v24, %v4403_v20 }
  0x36   : > { %18196 = vst [vmem:[#allocation34_spill] sm:$0xff] %v14332_v26  ;;  %v14346_v35 = vshll.u32 %v14332_v26, 16  ;;  %v4402_v52 = vsel %vm4359_vm4, %v4397_v44, %v4401_v14  ;;  %v539_v53 = vor.u32 %v14278_v13, %v535_v8  ;;  %v547_v56 = vor.u32 %v14303_v37, %v543_v28 }
  0x37   : > { %11686 = vmatmul.mubr.msk.bf16.gmra.mrb[12].mxu1 %vm993_vm3, %v512_v38  ;;  %18197 = vst [vmem:[#allocation35_spill] sm:$0xff] %v14339_v29  ;;  %18198 = vst [vmem:[#allocation36_spill] sm:$0xff] %v14342_v30  ;;  %v14349_v38 = vshrl.u32 %v14332_v26, 16  ;;  %v4407_v60 = vrot.slane %v14342_v30, 1  ;;  %v4408_v61 = vrot.slane %v14339_v29, 2  ;;  %v551_v62 = vrot.slane %v14309_v48, 1 }
  0x38   : > { %11689 = vmatprep.mubr.msk.bf16.mxu1 %vm993_vm3, %v520_v43  ;;  %18199 = vst [vmem:[#allocation37_spill] sm:$0xff] %v14346_v35  ;;  %v256_v43 = vld [vmem:[%s14127_s27 + $0x108] sm:$0xff]  ;;  %v4406_v5 = vsel %vm4359_vm4, %v4401_v14, %v4405_v33  ;;  %v4412_v8 = vrot.slane %v14346_v35, 2  ;;  %v544_v20 = vsel %vm444_vm2, %v539_v53, %v543_v28  ;;  %v259_v28 = vld [vmem:[%s14127_s27 + $0x120] sm:$0xff]  ;;  %v261_v53 = vld [vmem:[%s14127_s27 + $0x130] sm:$0xff] }
  0x39   : > { %18200 = vst [vmem:[#allocation38_spill] sm:$0xff] %v14349_v38  ;;  %v4411_v44 = vrot.slane %v14349_v38, 1  ;;  %v4409_v24 = vor.u32 %v4408_v61, %v4407_v60  ;;  %v262_v60 = vld [vmem:[%s14127_s27 + $0x138] sm:$0xff] }
  0x3b   : > { %12238 = vmatmul.mubr.msk.bf16.gmra.mrb[12].mxu0 %vm993_vm3, %v4394_v1  ;;  %v14363_v1 = vpack.c.bf16 %v256_v43, %v255_v39  ;;  %v4413_v39 = vor.u32 %v4412_v8, %v4411_v44  ;;  %v559_v43 = vrot.slane %v14339_v29, 1  ;;  %v4410_v44 = vsel %vm4359_vm4, %v4405_v33, %v4409_v24 }
  0x3c   : > { %12241 = vmatprep.mubr.msk.bf16.mxu0 %vm993_vm3, %v4398_v17  ;;  %v14368_v17 = vpack.c.bf16 %v258_v51, %v257_v50 }
  0x3d   : > { %18201 = vst [vmem:[#allocation39_spill] sm:$0xff] %v14363_v1  ;;  %v14375_v14 = vshll.u32 %v14363_v1, 16  ;;  %v563_v61 = vor.u32 %v14342_v30, %v559_v43 }
  0x3e   : > { %18202 = vst [vmem:[#allocation40_spill] sm:$0xff] %v14368_v17  ;;  %v14382_v50 = vshll.u32 %v14368_v17, 16  ;;  %v14385_v51 = vshrl.u32 %v14368_v17, 16 }
  0x3f   : > { %11690 = vmatmul.mubr.msk.bf16.gmra.mrb[16].mxu1 %vm993_vm3, %v528_v27  ;;  %v552_v27 = vsel %vm444_vm2, %v547_v56, %v551_v62  ;;  %18203 = vst [vmem:[#allocation41_spill] sm:$0xff] %v14375_v14  ;;  %v555_v56 = vor.u32 %v14312_v49, %v551_v62  ;;  %v4416_v29 = vrot.slane %v14375_v14, 2  ;;  %v263_v49 = vld [vmem:[%s14127_s27 + $0x140] sm:$0xff] }
  0x40   : > { %11693 = vmatprep.mubr.msk.bf16.mxu1 %vm993_vm3, %v536_v31  ;;  %v14378_v31 = vshrl.u32 %v14363_v1, 16  ;;  %18205 = vst [vmem:[#allocation43_spill] sm:$0xff] %v14382_v50  ;;  %18206 = vst [vmem:[#allocation44_spill] sm:$0xff] %v14385_v51  ;;  %v4419_v62 = vrot.slane %v14385_v51, 1  ;;  %v4420_v30 = vrot.slane %v14382_v50, 2 }
  0x41   : > { %v560_v33 = vsel %vm444_vm2, %v555_v56, %v559_v43  ;;  %v266_v56 = vld [vmem:[%s14127_s27 + $0x158] sm:$0xff] }
  0x42   : > { %18204 = vst [vmem:[#allocation42_spill] sm:$0xff] %v14378_v31  ;;  %v4415_v8 = vrot.slane %v14378_v31, 1  ;;  %v4421_v37 = vor.u32 %v4420_v30, %v4419_v62 }
  0x43   : > { %12242 = vmatmul.mubr.msk.bf16.gmra.mrb[16].mxu0 %vm993_vm3, %v4402_v52  ;;  %v260_v52 = vld [vmem:[%s14127_s27 + $0x128] sm:$0xff] }
  0x44   : > { %12245 = vmatprep.mubr.msk.bf16.mxu0 %vm993_vm3, %v4406_v5  ;;  %v567_v5 = vrot.slane %v14346_v35, 1  ;;  %v14399_v48 = vpack.c.bf16 %v260_v52, %v259_v28  ;;  %v14404_v35 = vpack.c.bf16 %v262_v60, %v261_v53  ;;  %v575_v53 = vrot.slane %v14375_v14, 1 }
  0x45   : > { %v583_v14 = vrot.slane %v14382_v50, 1 }
  0x46   : > { %18207 = vst [vmem:[#allocation45_spill] sm:$0xff] %v14399_v48  ;;  %18208 = vst [vmem:[#allocation46_spill] sm:$0xff] %v14404_v35  ;;  %v568_v28 = vsel %vm444_vm2, %v563_v61, %v567_v5  ;;  %v14411_v52 = vshll.u32 %v14399_v48, 16  ;;  %v14420_v60 = vshll.u32 %v14404_v35, 16  ;;  %v14423_v43 = vshrl.u32 %v14404_v35, 16 }
  0x47   : > { %11694 = vmatmul.mubr.msk.bf16.gmra.mrb[20].mxu1 %vm993_vm3, %v544_v20  ;;  %v4414_v20 = vsel %vm4359_vm4, %v4409_v24, %v4413_v39  ;;  %v14414_v24 = vshrl.u32 %v14399_v48, 16  ;;  %v571_v61 = vor.u32 %v14349_v38, %v567_v5 }
  0x48   : > { %11697 = vmatprep.mubr.msk.bf16.mxu1 %vm993_vm3, %v552_v27  ;;  %v4417_v27 = vor.u32 %v4416_v29, %v4415_v8  ;;  %18209 = vst [vmem:[#allocation47_spill] sm:$0xff] %v14411_v52  ;;  %18211 = vst [vmem:[#allocation49_spill] sm:$0xff] %v14420_v60  ;;  %v265_v29 = vld [vmem:[%s14127_s27 + $0x150] sm:$0xff]  ;;  %v14430_v8 = vpack.c.bf16 %v264_v10, %v263_v49  ;;  %v4424_v62 = vrot.slane %v14411_v52, 2  ;;  %v4427_v5 = vrot.slane %v14423_v43, 1 }
  0x49   : > { %18210 = vst [vmem:[#allocation48_spill] sm:$0xff] %v14414_v24  ;;  %18212 = vst [vmem:[#allocation50_spill] sm:$0xff] %v14423_v43  ;;  %v4428_v10 = vrot.slane %v14420_v60, 2  ;;  %v14440_v49 = vpack.c.bf16 %v266_v56, %v265_v29  ;;  %v267_v56 = vld [vmem:[%s14127_s27 + $0x160] sm:$0xff]  ;;  %v591_v13 = vrot.slane %v14411_v52, 1  ;;  %v14476_v52 = vpack.c.bf16 %v270_v63, %v269_v58 }
  0x4a   : > { %18213 = vst [vmem:[#allocation51_spill] sm:$0xff] %v14430_v8  ;;  %v4418_v30 = vsel %vm4359_vm4, %v4413_v39, %v4417_v27  ;;  %v14444_v39 = vshll.u32 %v14430_v8, 16 }
  0x4b   : > { %12246 = vmatmul.mubr.msk.bf16.gmra.mrb[20].mxu0 %vm993_vm3, %v4410_v44  ;;  %v579_v44 = vor.u32 %v14378_v31, %v575_v53  ;;  %18214 = vst [vmem:[#allocation52_spill] sm:$0xff] %v14440_v49  ;;  %v4429_v38 = vor.u32 %v4428_v10, %v4427_v5  ;;  %v14453_v12 = vshll.u32 %v14440_v49, 16  ;;  %v14456_v29 = vshrl.u32 %v14440_v49, 16  ;;  %18220 = vst [vmem:[#allocation58_spill] sm:$0xff] %v14476_v52 }
  0x4c   : > { %12249 = vmatprep.mubr.msk.bf16.mxu0 %vm993_vm3, %v4414_v20  ;;  %v4423_v20 = vrot.slane %v14414_v24, 1  ;;  %18215 = vst [vmem:[#allocation53_spill] sm:$0xff] %v14444_v39  ;;  %v14490_v58 = vshll.u32 %v14476_v52, 16  ;;  %v14493_v63 = vshrl.u32 %v14476_v52, 16 }
  0x4d   : > { %v584_v31 = vsel %vm444_vm2, %v579_v44, %v583_v14  ;;  %18217 = vst [vmem:[#allocation55_spill] sm:$0xff] %v14453_v12  ;;  %18218 = vst [vmem:[#allocation56_spill] sm:$0xff] %v14456_v29  ;;  %v4432_v44 = vrot.slane %v14444_v39, 2 }
  0x4e   : > { %v4425_v50 = vor.u32 %v4424_v62, %v4423_v20  ;;  %v595_v62 = vor.u32 %v14414_v24, %v591_v13  ;;  %18223 = vst [vmem:[#allocation61_spill] sm:$0xff] %v14490_v58  ;;  %18224 = vst [vmem:[#allocation62_spill] sm:$0xff] %v14493_v63 }
  0x4f   : > { %11698 = vmatmul.mubr.msk.bf16.gmra.mrb[24].mxu1 %vm993_vm3, %v560_v33  ;;  %v4422_v33 = vsel %vm4359_vm4, %v4417_v27, %v4421_v37  ;;  %v576_v27 = vsel %vm444_vm2, %v571_v61, %v575_v53  ;;  %v587_v53 = vor.u32 %v14385_v51, %v583_v14  ;;  %v4435_v14 = vrot.slane %v14456_v29, 1 }
  0x50   : > { %11701 = vmatprep.mubr.msk.bf16.mxu1 %vm993_vm3, %v568_v28  ;;  %v14447_v28 = vshrl.u32 %v14430_v8, 16  ;;  %v4426_v20 = vsel %vm4359_vm4, %v4421_v37, %v4425_v50  ;;  %v4430_v10 = vsel %vm4359_vm4, %v4425_v50, %v4429_v38 }
  0x52   : > { %18216 = vst [vmem:[#allocation54_spill] sm:$0xff] %v14447_v28  ;;  %v4431_v61 = vrot.slane %v14447_v28, 1 }
  0x53   : > { %12250 = vmatmul.mubr.msk.bf16.gmra.mrb[24].mxu0 %vm993_vm3, %v4418_v30  ;;  %v268_v30 = vld [vmem:[%s14127_s27 + $0x168] sm:$0xff] }
  0x54   : > { %12253 = vmatprep.mubr.msk.bf16.mxu0 %vm993_vm3, %v4422_v33  ;;  %v599_v33 = vrot.slane %v14420_v60, 1  ;;  %v14471_v5 = vpack.c.bf16 %v268_v30, %v267_v56  ;;  %v4433_v37 = vor.u32 %v4432_v44, %v4431_v61  ;;  %v607_v56 = vrot.slane %v14444_v39, 1  ;;  %v271_v61 = vld [vmem:[%s14127_s27 + $0x180] sm:$0xff]  ;;  %v272_v44 = vld [vmem:[%s14127_s27 + $0x188] sm:$0xff] }
  0x55   : > { %v14507_v51 = vpack.c.bf16 %v272_v44, %v271_v61 }
  0x56   : > { %18219 = vst [vmem:[#allocation57_spill] sm:$0xff] %v14471_v5  ;;  %v14483_v50 = vshll.u32 %v14471_v5, 16  ;;  %v14486_v30 = vshrl.u32 %v14471_v5, 16  ;;  %v600_v60 = vsel %vm444_vm2, %v595_v62, %v599_v33  ;;  %v611_v39 = vor.u32 %v14447_v28, %v607_v56 }
  0x57   : > { %11702 = vmatmul.mubr.msk.bf16.gmra.mrb[28].mxu1 %vm993_vm3, %v576_v27  ;;  %v4436_v27 = vrot.slane %v14453_v12, 2  ;;  %18225 = vst [vmem:[#allocation63_spill] sm:$0xff] %v14507_v51 }
  0x58   : > { %11705 = vmatprep.mubr.msk.bf16.mxu1 %vm993_vm3, %v584_v31  ;;  %v592_v31 = vsel %vm444_vm2, %v587_v53, %v591_v13  ;;  %18221 = vst [vmem:[#allocation59_spill] sm:$0xff] %v14483_v50  ;;  %18222 = vst [vmem:[#allocation60_spill] sm:$0xff] %v14486_v30  ;;  %v273_v13 = vld [vmem:[%s14127_s27 + $0x190] sm:$0xff]  ;;  %v274_v53 = vld [vmem:[%s14127_s27 + $0x198] sm:$0xff]  ;;  %v4439_v62 = vrot.slane %v14486_v30, 1 }
  0x59   : > { %v4437_v24 = vor.u32 %v4436_v27, %v4435_v14  ;;  %v4440_v14 = vrot.slane %v14483_v50, 2  ;;  %v615_v27 = vrot.slane %v14453_v12, 1  ;;  %v14522_v12 = vshrl.u32 %v14507_v51, 16 }
  0x5b   : > { %12254 = vmatmul.mubr.msk.bf16.gmra.mrb[28].mxu0 %vm993_vm3, %v4426_v20  ;;  %v4434_v20 = vsel %vm4359_vm4, %v4429_v38, %v4433_v37  ;;  %v4438_v54 = vsel %vm4359_vm4, %v4433_v37, %v4437_v24  ;;  %v4443_v38 = vrot.slane %v14493_v63, 1  ;;  %v4441_v61 = vor.u32 %v4440_v14, %v4439_v62  ;;  %18228 = vst [vmem:[#allocation66_spill] sm:$0xff] %v14522_v12 }
  0x5c   : > { %12257 = vmatprep.mubr.msk.bf16.mxu0 %vm993_vm3, %v4430_v10  ;;  %v603_v10 = vor.u32 %v14423_v43, %v599_v33  ;;  %v4444_v33 = vrot.slane %v14490_v58, 2  ;;  %v616_v44 = vsel %vm444_vm2, %v611_v39, %v615_v27  ;;  %v14519_v37 = vshll.u32 %v14507_v51, 16 }
  0x5d   : > { %v623_v43 = vrot.slane %v14483_v50, 1  ;;  %v619_v39 = vor.u32 %v14456_v29, %v615_v27  ;;  %v631_v14 = vrot.slane %v14490_v58, 1  ;;  %v279_v29 = vld [vmem:[%s14127_s27 + $0x1c0] sm:$0xff] }
  0x5e   : > { %18227 = vst [vmem:[#allocation65_spill] sm:$0xff] %v14519_v37  ;;  %v4445_v28 = vor.u32 %v4444_v33, %v4443_v38  ;;  %v4442_v38 = vsel %vm4359_vm4, %v4437_v24, %v4441_v61  ;;  %v4447_v33 = vrot.slane %v14522_v12, 1  ;;  %v4448_v50 = vrot.slane %v14519_v37, 2 }
  0x5f   : > { %11706 = vmatmul.mubr.msk.bf16.gmra.mrb[32].mxu1 %vm993_vm3, %v592_v31  ;;  %v14512_v31 = vpack.c.bf16 %v274_v53, %v273_v13  ;;  %v627_v62 = vor.u32 %v14486_v30, %v623_v43  ;;  %v624_v24 = vsel %vm444_vm2, %v619_v39, %v623_v43  ;;  %v639_v43 = vrot.slane %v14519_v37, 1 }
  0x60   : > { %11709 = vmatprep.mubr.msk.bf16.mxu1 %vm993_vm3, %v600_v60  ;;  %v608_v60 = vsel %vm444_vm2, %v603_v10, %v607_v56  ;;  %v275_v56 = vld [vmem:[%s14127_s27 + $0x1a0] sm:$0xff]  ;;  %v278_v10 = vld [vmem:[%s14127_s27 + $0x1b8] sm:$0xff]  ;;  %v14577_v41 = vpack.c.bf16 %v280_v40, %v279_v29 }
  0x61   : > { %18226 = vst [vmem:[#allocation64_spill] sm:$0xff] %v14512_v31  ;;  %v14526_v13 = vshll.u32 %v14512_v31, 16  ;;  %v14529_v53 = vshrl.u32 %v14512_v31, 16 }
  0x62   : > { %18237 = vst [vmem:[#allocation75_spill] sm:$0xff] %v14577_v41 }
  0x63   : > { %12258 = vmatmul.mubr.msk.bf16.gmra.mrb[32].mxu0 %vm993_vm3, %v4434_v20  ;;  %18229 = vst [vmem:[#allocation67_spill] sm:$0xff] %v14526_v13  ;;  %18230 = vst [vmem:[#allocation68_spill] sm:$0xff] %v14529_v53  ;;  %v277_v20 = vld [vmem:[%s14127_s27 + $0x1b0] sm:$0xff]  ;;  %v4451_v27 = vrot.slane %v14529_v53, 1  ;;  %v4452_v30 = vrot.slane %v14526_v13, 2  ;;  %v647_v23 = vrot.slane %v14526_v13, 1 }
  0x64   : > { %12261 = vmatprep.mubr.msk.bf16.mxu0 %vm993_vm3, %v4438_v54  ;;  %v276_v54 = vld [vmem:[%s14127_s27 + $0x1a8] sm:$0xff]  ;;  %v14548_v58 = vpack.c.bf16 %v278_v10, %v277_v20 }
  0x65   : > { %v14543_v55 = vpack.c.bf16 %v276_v54, %v275_v56  ;;  %v632_v56 = vsel %vm444_vm2, %v627_v62, %v631_v14  ;;  %v10840_v20 = vld [vmem:[%s17779_s1 + $0xc] sm:$0x3]  ;;  %v4453_v10 = vor.u32 %v4452_v30, %v4451_v27  ;;  %v281_v62 = vld [vmem:[%s14127_s27 + $0x1d0] sm:$0xff] }
  0x66   : > { %18232 = vst [vmem:[#allocation70_spill] sm:$0xff] %v14548_v58  ;;  %v14567_v39 = vshll.u32 %v14548_v58, 16  ;;  %v14580_v30 = vand.u32 %v10840_v20, %v14101_v4 }
  0x67   : > { %11710 = vmatmul.mubr.msk.bf16.gmra.mrb[36].mxu1 %vm993_vm3, %v608_v60  ;;  %18231 = vst [vmem:[#allocation69_spill] sm:$0xff] %v14543_v55  ;;  %v4446_v60 = vsel %vm4359_vm4, %v4441_v61, %v4445_v28  ;;  %v14555_v54 = vshll.u32 %v14543_v55, 16  ;;  %v14558_v61 = vshrl.u32 %v14543_v55, 16 }
  0x68   : > { %11713 = vmatprep.mubr.msk.bf16.mxu1 %vm993_vm3, %v616_v44  ;;  %v4449_v44 = vor.u32 %v4448_v50, %v4447_v33  ;;  %18235 = vst [vmem:[#allocation73_spill] sm:$0xff] %v14567_v39  ;;  %v14570_v50 = vshrl.u32 %v14548_v58, 16  ;;  %v635_v33 = vor.u32 %v14493_v63, %v631_v14  ;;  %v4460_v29 = vrot.slane %v14567_v39, 2  ;;  %12499 = vmatprep.subr.bf16.mxu0 %v14580_v30  ;;  %v284_v63 = vld [vmem:[%s14127_s27 + $0x1e8] sm:$0xff] }
  0x69   : > { %18233 = vst [vmem:[#allocation71_spill] sm:$0xff] %v14555_v54  ;;  %18234 = vst [vmem:[#allocation72_spill] sm:$0xff] %v14558_v61  ;;  %v4455_v37 = vrot.slane %v14558_v61, 1  ;;  %v4456_v22 = vrot.slane %v14555_v54, 2  ;;  %v655_v6 = vrot.slane %v14555_v54, 1  ;;  %v14627_v54 = vpack.c.bf16 %v286_v2, %v285_v9 }
  0x6a   : > { %18236 = vst [vmem:[#allocation74_spill] sm:$0xff] %v14570_v50  ;;  %v4450_v27 = vsel %vm4359_vm4, %v4445_v28, %v4449_v44  ;;  %v4454_v14 = vsel %vm4359_vm4, %v4449_v44, %v4453_v10  ;;  %v4459_v40 = vrot.slane %v14570_v50, 1  ;;  %v14595_v28 = vshll.u32 %v14577_v41, 16 }
  0x6b   : > { %12262 = vmatmul.mubr.msk.bf16.gmra.mrb[36].mxu0 %vm993_vm3, %v4442_v38  ;;  %v282_v38 = vld [vmem:[%s14127_s27 + $0x1d8] sm:$0xff]  ;;  %v640_v44 = vsel %vm444_vm2, %v635_v33, %v639_v43  ;;  %v4457_v20 = vor.u32 %v4456_v22, %v4455_v37  ;;  %18244 = vst [vmem:[#allocation82_spill] sm:$0xff] %v14627_v54  ;;  %v14641_v2 = vshll.u32 %v14627_v54, 16  ;;  %v14644_v9 = vshrl.u32 %v14627_v54, 16 }
  0x6c   : > { %12265 = vmatprep.mubr.msk.bf16.mxu0 %vm993_vm3, %v4446_v60  ;;  %v643_v60 = vor.u32 %v14522_v12, %v639_v43  ;;  %18239 = vst [vmem:[#allocation77_spill] sm:$0xff] %v14595_v28  ;;  %v651_v43 = vor.u32 %v14529_v53, %v647_v23  ;;  %v4464_v37 = vrot.slane %v14595_v28, 2 }
  0x6d   : > { %v4458_v33 = vsel %vm4359_vm4, %v4453_v10, %v4457_v20  ;;  %v671_v10 = vrot.slane %v14595_v28, 1  ;;  %18247 = vst [vmem:[#allocation85_spill] sm:$0xff] %v14641_v2  ;;  %18248 = vst [vmem:[#allocation86_spill] sm:$0xff] %v14644_v9 }
  0x6e   : > { %v648_v13 = vsel %vm444_vm2, %v643_v60, %v647_v23  ;;  %v659_v60 = vor.u32 %v14558_v61, %v655_v6 }
  0x6f   : > { %11714 = vmatmul.mubr.msk.bf16.gmra.mrb[40].mxu1 %vm993_vm3, %v624_v24  ;;  %v14590_v24 = vpack.c.bf16 %v282_v38, %v281_v62  ;;  %v4461_v62 = vor.u32 %v4460_v29, %v4459_v40 }
  0x70   : > { %11717 = vmatprep.mubr.msk.bf16.mxu1 %vm993_vm3, %v632_v56  ;;  %v14598_v56 = vshrl.u32 %v14577_v41, 16 }
  0x71   : > { %18238 = vst [vmem:[#allocation76_spill] sm:$0xff] %v14590_v24  ;;  %v14604_v38 = vshll.u32 %v14590_v24, 16  ;;  %v14607_v12 = vshrl.u32 %v14590_v24, 16  ;;  %v4462_v29 = vsel %vm4359_vm4, %v4457_v20, %v4461_v62 }
  0x72   : > { %18240 = vst [vmem:[#allocation78_spill] sm:$0xff] %v14598_v56  ;;  %v4463_v22 = vrot.slane %v14598_v56, 1  ;;  %v675_v28 = vor.u32 %v14598_v56, %v671_v10 }
  0x73   : > { %12266 = vmatmul.mubr.msk.bf16.gmra.mrb[40].mxu0 %vm993_vm3, %v4450_v27  ;;  %18241 = vst [vmem:[#allocation79_spill] sm:$0xff] %v14604_v38  ;;  %18242 = vst [vmem:[#allocation80_spill] sm:$0xff] %v14607_v12  ;;  %v283_v27 = vld [vmem:[%s14127_s27 + $0x1e0] sm:$0xff]  ;;  %v4467_v23 = vrot.slane %v14607_v12, 1 }
  0x74   : > { %12269 = vmatprep.mubr.msk.bf16.mxu0 %vm993_vm3, %v4454_v14  ;;  %v663_v14 = vrot.slane %v14567_v39, 1  ;;  %v14622_v40 = vpack.c.bf16 %v284_v63, %v283_v27  ;;  %v656_v63 = vsel %vm444_vm2, %v651_v43, %v655_v6  ;;  %v289_v6 = vld [vmem:[%s14127_s27 + $0x210] sm:$0xff]  ;;  %v290_v43 = vld [vmem:[%s14127_s27 + $0x218] sm:$0xff] }
  0x76   : > { %18243 = vst [vmem:[#allocation81_spill] sm:$0xff] %v14622_v40  ;;  %v14634_v20 = vshll.u32 %v14622_v40, 16  ;;  %v14637_v27 = vshrl.u32 %v14622_v40, 16  ;;  %v664_v39 = vsel %vm444_vm2, %v659_v60, %v663_v14 }
  0x77   : > { %11718 = vmatmul.mubr.msk.bf16.gmra.mrb[44].mxu1 %vm993_vm3, %v640_v44  ;;  %v4468_v44 = vrot.slane %v14604_v38, 2 }
  0x78   : > { %11721 = vmatprep.mubr.msk.bf16.mxu1 %vm993_vm3, %v648_v13  ;;  %v4465_v13 = vor.u32 %v4464_v37, %v4463_v22  ;;  %18245 = vst [vmem:[#allocation83_spill] sm:$0xff] %v14634_v20  ;;  %18246 = vst [vmem:[#allocation84_spill] sm:$0xff] %v14637_v27  ;;  %v287_v22 = vld [vmem:[%s14127_s27 + $0x200] sm:$0xff]  ;;  %v288_v37 = vld [vmem:[%s14127_s27 + $0x208] sm:$0xff]  ;;  %v4471_v60 = vrot.slane %v14637_v27, 1 }
  0x79   : > { %v4469_v61 = vor.u32 %v4468_v44, %v4467_v23  ;;  %v4472_v23 = vrot.slane %v14634_v20, 2  ;;  %v679_v44 = vrot.slane %v14604_v38, 1  ;;  %v14658_v53 = vpack.c.bf16 %v288_v37, %v287_v22 }
  0x7b   : > { %12270 = vmatmul.mubr.msk.bf16.gmra.mrb[44].mxu0 %vm993_vm3, %v4458_v33  ;;  %v4466_v33 = vsel %vm4359_vm4, %v4461_v62, %v4465_v13  ;;  %18249 = vst [vmem:[#allocation87_spill] sm:$0xff] %v14658_v53  ;;  %v4470_v3 = vsel %vm4359_vm4, %v4465_v13, %v4469_v61  ;;  %v4475_v62 = vrot.slane %v14644_v9, 1  ;;  %v4473_v22 = vor.u32 %v4472_v23, %v4471_v60 }
  0x7c   : > { %12273 = vmatprep.mubr.msk.bf16.mxu0 %vm993_vm3, %v4462_v29  ;;  %v667_v29 = vor.u32 %v14570_v50, %v663_v14  ;;  %v4476_v14 = vrot.slane %v14641_v2, 2  ;;  %v680_v37 = vsel %vm444_vm2, %v675_v28, %v679_v44  ;;  %v14670_v13 = vshll.u32 %v14658_v53, 16 }
  0x7d   : > { %v14673_v38 = vshrl.u32 %v14658_v53, 16  ;;  %v687_v50 = vrot.slane %v14634_v20, 1  ;;  %v683_v28 = vor.u32 %v14607_v12, %v679_v44  ;;  %v695_v23 = vrot.slane %v14641_v2, 1 }
  0x7e   : > { %18251 = vst [vmem:[#allocation89_spill] sm:$0xff] %v14670_v13  ;;  %v4477_v56 = vor.u32 %v4476_v14, %v4475_v62  ;;  %v4474_v62 = vsel %vm4359_vm4, %v4469_v61, %v4473_v22  ;;  %v4480_v20 = vrot.slane %v14670_v13, 2  ;;  %v703_v12 = vrot.slane %v14670_v13, 1 }
  0x7f   : > { %11722 = vmatmul.mubr.msk.bf16.gmra.mrb[48].mxu1 %vm993_vm3, %v656_v63  ;;  %v14663_v63 = vpack.c.bf16 %v290_v43, %v289_v6  ;;  %18252 = vst [vmem:[#allocation90_spill] sm:$0xff] %v14673_v38  ;;  %v691_v60 = vor.u32 %v14637_v27, %v687_v50  ;;  %v4479_v14 = vrot.slane %v14673_v38, 1  ;;  %v688_v61 = vsel %vm444_vm2, %v683_v28, %v687_v50  ;;  %v295_v50 = vld [vmem:[%s14127_s27 + $0x240] sm:$0xff] }
  0x80   : > { %11725 = vmatprep.mubr.msk.bf16.mxu1 %vm993_vm3, %v664_v39  ;;  %v672_v39 = vsel %vm444_vm2, %v667_v29, %v671_v10  ;;  %v291_v10 = vld [vmem:[%s14127_s27 + $0x220] sm:$0xff]  ;;  %v294_v29 = vld [vmem:[%s14127_s27 + $0x238] sm:$0xff]  ;;  %v4478_v47 = vsel %vm4359_vm4, %v4473_v22, %v4477_v56  ;;  %v707_v28 = vor.u32 %v14673_v38, %v703_v12 }
  0x81   : > { %18250 = vst [vmem:[#allocation88_spill] sm:$0xff] %v14663_v63  ;;  %v14677_v6 = vshll.u32 %v14663_v63, 16  ;;  %v14680_v43 = vshrl.u32 %v14663_v63, 16 }
  0x83   : > { %12274 = vmatmul.mubr.msk.bf16.gmra.mrb[48].mxu0 %vm993_vm3, %v4466_v33  ;;  %18253 = vst [vmem:[#allocation91_spill] sm:$0xff] %v14677_v6  ;;  %18254 = vst [vmem:[#allocation92_spill] sm:$0xff] %v14680_v43  ;;  %v293_v33 = vld [vmem:[%s14127_s27 + $0x230] sm:$0xff]  ;;  %v4483_v44 = vrot.slane %v14680_v43, 1 }
  0x84   : > { %12277 = vmatprep.mubr.msk.bf16.mxu0 %vm993_vm3, %v4470_v3  ;;  %v292_v3 = vld [vmem:[%s14127_s27 + $0x228] sm:$0xff]  ;;  %v14699_v27 = vpack.c.bf16 %v294_v29, %v293_v33 }
  0x85   : > { %v14694_v42 = vpack.c.bf16 %v292_v3, %v291_v10  ;;  %v696_v10 = vsel %vm444_vm2, %v691_v60, %v695_v23 }
  0x86   : > { %18256 = vst [vmem:[#allocation94_spill] sm:$0xff] %v14699_v27  ;;  %v14713_v33 = vshll.u32 %v14699_v27, 16  ;;  %v14716_v29 = vshrl.u32 %v14699_v27, 16 }
  0x87   : > { %11726 = vmatmul.mubr.msk.bf16.gmra.mrb[52].mxu1 %vm993_vm3, %v672_v39  ;;  %18255 = vst [vmem:[#allocation93_spill] sm:$0xff] %v14694_v42  ;;  %v4484_v39 = vrot.slane %v14677_v6, 2  ;;  %v14706_v3 = vshll.u32 %v14694_v42, 16  ;;  %v14709_v22 = vshrl.u32 %v14694_v42, 16 }
  0x88   : > { %11729 = vmatprep.mubr.msk.bf16.mxu1 %vm993_vm3, %v680_v37  ;;  %v4481_v37 = vor.u32 %v4480_v20, %v4479_v14  ;;  %18259 = vst [vmem:[#allocation97_spill] sm:$0xff] %v14713_v33  ;;  %18260 = vst [vmem:[#allocation98_spill] sm:$0xff] %v14716_v29  ;;  %v699_v20 = vor.u32 %v14644_v9, %v695_v23  ;;  %v4491_v23 = vrot.slane %v14716_v29, 1  ;;  %v4492_v13 = vrot.slane %v14713_v33, 2  ;;  %v298_v9 = vld [vmem:[%s14127_s27 + $0x258] sm:$0xff] }
  0x89   : > { %18257 = vst [vmem:[#allocation95_spill] sm:$0xff] %v14706_v3  ;;  %18258 = vst [vmem:[#allocation96_spill] sm:$0xff] %v14709_v22  ;;  %v4485_v2 = vor.u32 %v4484_v39, %v4483_v44  ;;  %v4488_v14 = vrot.slane %v14706_v3, 2 }
  0x8a   : > { %v4482_v60 = vsel %vm4359_vm4, %v4477_v56, %v4481_v37  ;;  %v704_v56 = vsel %vm444_vm2, %v699_v20, %v703_v12 }
  0x8b   : > { %12278 = vmatmul.mubr.msk.bf16.gmra.mrb[52].mxu0 %vm993_vm3, %v4474_v62  ;;  %v4487_v62 = vrot.slane %v14709_v22, 1  ;;  %v4486_v39 = vsel %vm4359_vm4, %v4481_v37, %v4485_v2 }
  0x8c   : > { %12281 = vmatprep.mubr.msk.bf16.mxu0 %vm993_vm3, %v4478_v47  ;;  %v296_v47 = vld [vmem:[%s14127_s27 + $0x248] sm:$0xff] }
  0x8d   : > { %v14727_v44 = vpack.c.bf16 %v296_v47, %v295_v50  ;;  %v4493_v47 = vor.u32 %v4492_v13, %v4491_v23 }
  0x8f   : > { %11730 = vmatmul.mubr.msk.bf16.gmra.mrb[56].mxu1 %vm993_vm3, %v688_v61  ;;  %18261 = vst [vmem:[#allocation99_spill] sm:$0xff] %v14727_v44  ;;  %v711_v61 = vrot.slane %v14677_v6, 1  ;;  %v14737_v38 = vshll.u32 %v14727_v44, 16  ;;  %v14740_v50 = vshrl.u32 %v14727_v44, 16  ;;  %v297_v6 = vld [vmem:[%s14127_s27 + $0x250] sm:$0xff] }
  0x90   : > { %11733 = vmatprep.mubr.msk.bf16.mxu1 %vm993_vm3, %v696_v10  ;;  %v4489_v10 = vor.u32 %v4488_v14, %v4487_v62  ;;  %v14755_v23 = vpack.c.bf16 %v298_v9, %v297_v6  ;;  %v301_v9 = vld [vmem:[%s14127_s27 + $0x270] sm:$0xff]  ;;  %v302_v6 = vld [vmem:[%s14127_s27 + $0x278] sm:$0xff] }
  0x91   : > { %18262 = vst [vmem:[#allocation100_spill] sm:$0xff] %v14737_v38  ;;  %18263 = vst [vmem:[#allocation101_spill] sm:$0xff] %v14740_v50  ;;  %v712_v37 = vsel %vm444_vm2, %v707_v28, %v711_v61  ;;  %v715_v20 = vor.u32 %v14680_v43, %v711_v61  ;;  %v4495_v62 = vrot.slane %v14740_v50, 1  ;;  %v4496_v14 = vrot.slane %v14737_v38, 2 }
  0x92   : > { %v4490_v12 = vsel %vm4359_vm4, %v4485_v2, %v4489_v10  ;;  %v4494_v13 = vsel %vm4359_vm4, %v4489_v10, %v4493_v47  ;;  %18264 = vst [vmem:[#allocation102_spill] sm:$0xff] %v14755_v23  ;;  %v5570_v10 = vrot.slane %v14143_v21, 2 }
  0x93   : > { %12282 = vmatmul.mubr.msk.bf16.gmra.mrb[56].mxu0 %vm993_vm3, %v4482_v60  ;;  %v719_v60 = vrot.slane %v14706_v3, 1  ;;  %v14760_v61 = vor.u32 %v4496_v14, %v4495_v62 }
  0x94   : > { %12285 = vmatprep.mubr.msk.bf16.mxu0 %vm993_vm3, %v4486_v39  ;;  %v727_v39 = vrot.slane %v14713_v33, 1  ;;  %v14768_v33 = vshll.u32 %v14755_v23, 16 }
  0x95   : > { %v723_v28 = vor.u32 %v14709_v22, %v719_v60  ;;  %v720_v2 = vsel %vm444_vm2, %v715_v20, %v719_v60  ;;  %18265 = vst [vmem:[#allocation103_spill] sm:$0xff] %v14760_v61  ;;  %v5571_v22 = vrot.slane %v14148_v25, 2  ;;  %v735_v60 = vrot.slane %v14737_v38, 1 }
  0x96   : > { %18266 = vst [vmem:[#allocation104_spill] sm:$0xff] %v14768_v33  ;;  %v4498_v20 = vsel %vm4359_vm4, %v4493_v47, %v14760_v61  ;;  %v731_v62 = vor.u32 %v14716_v29, %v727_v39  ;;  %v5573_v47 = vrot.slane %v14157_v34, 2 }
  0x97   : > { %11734 = vmatmul.mubr.msk.bf16.gmra.mrb[60].mxu1 %vm993_vm3, %v704_v56  ;;  %v299_v56 = vld [vmem:[%s14127_s27 + $0x260] sm:$0xff]  ;;  %v728_v3 = vsel %vm444_vm2, %v723_v28, %v727_v39  ;;  %v5572_v14 = vsel %vm5569_vm5, %v5570_v10, %v5571_v22  ;;  %v743_v28 = vrot.slane %v14768_v33, 1  ;;  %v14793_v39 = vshrl.u32 %v14755_v23, 16  ;;  %v304_v10 = vld [vmem:[%s14127_s27 + $0x288] sm:$0xff]  ;;  %v306_v33 = vld [vmem:[%s14127_s27 + $0x298] sm:$0xff] }
  0x98   : > { %11737 = vmatprep.mubr.msk.bf16.mxu1 %vm993_vm3, %v712_v37  ;;  %v300_v37 = vld [vmem:[%s14127_s27 + $0x268] sm:$0xff] }
  0x99   : > { %18270 = vst [vmem:[#allocation108_spill] sm:$0xff] %v14793_v39  ;;  %v747_v38 = vor.u32 %v14793_v39, %v743_v28 }
  0x9b   : > { %12286 = vmatmul.mubr.msk.bf16.gmra.mrb[60].mxu0 %vm993_vm3, %v4490_v12  ;;  %v14774_v12 = vpack.c.bf16 %v300_v37, %v299_v56  ;;  %v303_v37 = vld [vmem:[%s14127_s27 + $0x280] sm:$0xff] }
  0x9c   : > { %12289 = vmatprep.mubr.msk.bf16.mxu0 %vm993_vm3, %v4494_v13  ;;  %v739_v13 = vor.u32 %v14740_v50, %v735_v60 }
  0x9d   : > { %18267 = vst [vmem:[#allocation105_spill] sm:$0xff] %v14774_v12  ;;  %v14787_v56 = vshll.u32 %v14774_v12, 16 }
  0x9e   : > { %v744_v61 = vsel %vm444_vm2, %v739_v13, %v743_v28  ;;  %v5574_v13 = vsel %vm5569_vm5, %v5571_v22, %v5573_v47 }
  0x9f   : > { %11738 = vmatmul.mubr.msk.bf16.gmra.mrb[64].mxu1 %vm993_vm3, %v720_v2  ;;  %v14783_v2 = vpack.c.bf16 %v302_v6, %v301_v9  ;;  %18269 = vst [vmem:[#allocation107_spill] sm:$0xff] %v14787_v56  ;;  %v5575_v9 = vrot.slane %v14174_v57, 2  ;;  %v14800_v6 = vshrl.u32 %v14774_v12, 16 }
  0xa0   : > { %11741 = vmatprep.mubr.msk.bf16.mxu1 %vm993_vm3, %v728_v3  ;;  %v736_v3 = vsel %vm444_vm2, %v731_v62, %v735_v60  ;;  %v751_v60 = vrot.slane %v14787_v56, 1  ;;  %v14809_v62 = vpack.c.bf16 %v304_v10, %v303_v37 }
  0xa1   : > { %18268 = vst [vmem:[#allocation106_spill] sm:$0xff] %v14783_v2  ;;  %18271 = vst [vmem:[#allocation109_spill] sm:$0xff] %v14800_v6  ;;  %v14815_v50 = vsel %vm5569_vm5, %v5573_v47, %v5575_v9  ;;  %v14831_v28 = vshrl.u32 %v14783_v2, 16  ;;  %v308_v47 = vld [vmem:[%s14127_s27 + $0x2a8] sm:$0xff] }
  0xa2   : > { %18273 = vst [vmem:[#allocation111_spill] sm:$0xff] %v14809_v62  ;;  %18274 = vst [vmem:[#allocation112_spill] sm:$0xff] %v14815_v50  ;;  %v755_v29 = vor.u32 %v14800_v6, %v751_v60  ;;  %v14823_v37 = vshll.u32 %v14809_v62, 16  ;;  %v752_v22 = vsel %vm444_vm2, %v747_v38, %v751_v60  ;;  %v10564_v38 = vld [vmem:[%s17779_s1 + $0x4] sm:$0x3]  ;;  %v309_v60 = vld [vmem:[%s14127_s27 + $0x2b0] sm:$0xff] }
  0xa3   : > { %12290 = vmatmul.mubr.msk.bf16.gmra.mrb[64].mxu0 %vm993_vm3, %v4498_v20  ;;  %v14803_v20 = vshll.u32 %v14783_v2, 16  ;;  %18277 = vst [vmem:[#allocation115_spill] sm:$0xff] %v14831_v28  ;;  %v14858_v7 = vand.u32 %v10564_v38, %v14101_v4  ;;  %v312_v38 = vld [vmem:[%s14127_s27 + $0x2c8] sm:$0xff] }
  0xa4   : > { %12363 = vmatprep.mubr.msk.bf16.mxu0 %vm993_vm3, %v5572_v14  ;;  %v305_v14 = vld [vmem:[%s14127_s27 + $0x290] sm:$0xff]  ;;  %18276 = vst [vmem:[#allocation114_spill] sm:$0xff] %v14823_v37  ;;  %v767_v56 = vrot.slane %v14823_v37, 1 }
  0xa5   : > { %18272 = vst [vmem:[#allocation110_spill] sm:$0xff] %v14803_v20  ;;  %v759_v43 = vrot.slane %v14803_v20, 1  ;;  %v310_v20 = vld [vmem:[%s14127_s27 + $0x2b8] sm:$0xff]  ;;  %11947 = vmatprep.subr.bf16.mxu1 %v14858_v7 }
  0xa7   : > { %11742 = vmatmul.mubr.msk.bf16.gmra.mrb[68].mxu1 %vm993_vm3, %v736_v3  ;;  %v14819_v3 = vpack.c.bf16 %v306_v33, %v305_v14  ;;  %v307_v33 = vld [vmem:[%s14127_s27 + $0x2a0] sm:$0xff]  ;;  %v760_v10 = vsel %vm444_vm2, %v755_v29, %v759_v43  ;;  %v5579_v14 = vrot.slane %v14200_v11, 2  ;;  %v763_v39 = vor.u32 %v14831_v28, %v759_v43  ;;  %v313_v28 = vld [vmem:[%s14127_s27 + $0x2d0] sm:$0xff] }
  0xa8   : > { %11745 = vmatprep.mubr.msk.bf16.mxu1 %vm993_vm3, %v744_v61  ;;  %v5577_v61 = vrot.slane %v14182_v0, 2  ;;  %v14850_v6 = vpack.c.bf16 %v308_v47, %v307_v33  ;;  %v14865_v47 = vpack.c.bf16 %v310_v20, %v309_v60  ;;  %v311_v20 = vld [vmem:[%s14127_s27 + $0x2c0] sm:$0xff] }
  0xa9   : > { %18275 = vst [vmem:[#allocation113_spill] sm:$0xff] %v14819_v3 }
  0xaa   : > { %18280 = vst [vmem:[#allocation118_spill] sm:$0xff] %v14850_v6  ;;  %v14853_v29 = vsel %vm5569_vm5, %v5575_v9, %v5577_v61  ;;  %18283 = vst [vmem:[#allocation121_spill] sm:$0xff] %v14865_v47  ;;  %v14871_v43 = vshll.u32 %v14850_v6, 16  ;;  %v768_v9 = vsel %vm444_vm2, %v763_v39, %v767_v56  ;;  %v14885_v37 = vshrl.u32 %v14850_v6, 16 }
  0xab   : > { %12364 = vmatmul.mubr.msk.bf16.vlgmr.msra.gmra.mrb[0].mxu0 %vm993_vm3, %v5574_v13  ;;  %v14838_v13 = vshrl.u32 %v14809_v62, 16  ;;  %18281 = vst [vmem:[#allocation119_spill] sm:$0xff] %v14853_v29  ;;  %v14894_v39 = vpack.c.bf16 %v312_v38, %v311_v20  ;;  %v14918_v20 = vshrl.u32 %v14865_v47, 16  ;;  %v315_v38 = vld [vmem:[%s14127_s27 + $0x2e0] sm:$0xff] }
  0xac   : > { %12500 = vmatpush3.bf16.msra.mxu0 %v14580_v30  ;;  %12367 = vmatprep.mubr.msk.bf16.mxu0 %vm993_vm3, %v14815_v50  ;;  %v14841_v30 = vshll.u32 %v14819_v3, 16  ;;  %v14861_v50 = vsel %vm5569_vm5, %v5577_v61, %v5579_v14  ;;  %18284 = vst [vmem:[#allocation122_spill] sm:$0xff] %v14871_v43  ;;  %v5581_v61 = vrot.slane %v14223_v32, 2  ;;  %18286 = vst [vmem:[#allocation124_spill] sm:$0xff] %v14885_v37 }
  0xad   : > { %18278 = vst [vmem:[#allocation116_spill] sm:$0xff] %v14838_v13  ;;  %18282 = vst [vmem:[#allocation120_spill] sm:$0xff] %v14861_v50 }
  0xae   : > { %18279 = vst [vmem:[#allocation117_spill] sm:$0xff] %v14841_v30  ;;  %v775_v33 = vrot.slane %v14841_v30, 1  ;;  %v5583_v30 = vrot.slane %v14242_v45, 2  ;;  %18288 = vst [vmem:[#allocation126_spill] sm:$0xff] %v14894_v39 }
  0xaf   : > { %11746 = vmatmul.mubr.msk.bf16.gmra.mrb[72].mxu1 %vm993_vm3, %v752_v22  ;;  %v771_v22 = vor.u32 %v14838_v13, %v767_v56  ;;  %v14888_v13 = vshll.u32 %v14865_v47, 16  ;;  %v783_v56 = vrot.slane %v14871_v43, 1  ;;  %18293 = vst [vmem:[#allocation131_spill] sm:$0xff] %v14918_v20 }
  0xb0   : > { %11749 = vmatprep.mubr.msk.bf16.mxu1 %vm993_vm3, %v760_v10  ;;  %v14878_v10 = vshrl.u32 %v14819_v3, 16  ;;  %v14902_v45 = vsel %vm5569_vm5, %v5581_v61, %v5583_v30 }
  0xb1   : > { %v776_v60 = vsel %vm444_vm2, %v771_v22, %v775_v33  ;;  %18287 = vst [vmem:[#allocation125_spill] sm:$0xff] %v14888_v13  ;;  %v14897_v22 = vsel %vm5569_vm5, %v5579_v14, %v5581_v61  ;;  %18290 = vst [vmem:[#allocation128_spill] sm:$0xff] %v14902_v45  ;;  %v787_v32 = vor.u32 %v14885_v37, %v783_v56  ;;  %v14911_v14 = vshll.u32 %v14894_v39, 16 }
  0xb2   : > { %18285 = vst [vmem:[#allocation123_spill] sm:$0xff] %v14878_v10  ;;  %18289 = vst [vmem:[#allocation127_spill] sm:$0xff] %v14897_v22  ;;  %v5585_v61 = vrot.slane %v14244_v46, 2 }
  0xb3   : > { %12368 = vmatmul.mubr.msk.bf16.gmra.mrb[4].mxu0 %vm993_vm3, %v14853_v29  ;;  %v779_v29 = vor.u32 %v14878_v10, %v775_v33  ;;  %18292 = vst [vmem:[#allocation130_spill] sm:$0xff] %v14911_v14  ;;  %v317_v10 = vld [vmem:[%s14127_s27 + $0x2f0] sm:$0xff] }
  0xb4   : > { %12371 = vmatprep.mubr.msk.bf16.mxu0 %vm993_vm3, %v14861_v50  ;;  %v314_v50 = vld [vmem:[%s14127_s27 + $0x2d8] sm:$0xff] }
  0xb5   : > { %v14906_v43 = vpack.c.bf16 %v314_v50, %v313_v28  ;;  %v784_v33 = vsel %vm444_vm2, %v779_v29, %v783_v56  ;;  %v5587_v28 = vrot.slane %v14263_v59, 2  ;;  %v799_v29 = vrot.slane %v14911_v14, 1 }
  0xb7   : > { %11750 = vmatmul.mubr.msk.bf16.gmra.mrb[76].mxu1 %vm993_vm3, %v768_v9  ;;  %v791_v9 = vrot.slane %v14888_v13, 1  ;;  %18291 = vst [vmem:[#allocation129_spill] sm:$0xff] %v14906_v43  ;;  %v14925_v13 = vshrl.u32 %v14894_v39, 16  ;;  %v14928_v37 = vshll.u32 %v14906_v43, 16  ;;  %v14942_v59 = vsel %vm5569_vm5, %v5585_v61, %v5587_v28 }
  0xb8   : > { %11753 = vmatprep.mubr.msk.bf16.mxu1 %vm993_vm3, %v776_v60  ;;  %v316_v60 = vld [vmem:[%s14127_s27 + $0x2e8] sm:$0xff]  ;;  %18298 = vst [vmem:[#allocation136_spill] sm:$0xff] %v14942_v59 }
  0xb9   : > { %v792_v50 = vsel %vm444_vm2, %v787_v32, %v791_v9  ;;  %18294 = vst [vmem:[#allocation132_spill] sm:$0xff] %v14925_v13  ;;  %18295 = vst [vmem:[#allocation133_spill] sm:$0xff] %v14928_v37  ;;  %v14934_v56 = vpack.c.bf16 %v316_v60, %v315_v38  ;;  %v14937_v32 = vsel %vm5569_vm5, %v5583_v30, %v5585_v61  ;;  %v5589_v61 = vrot.slane %v14283_v19, 2  ;;  %v319_v60 = vld [vmem:[%s14127_s27 + $0x300] sm:$0xff] }
  0xba   : > { %18297 = vst [vmem:[#allocation135_spill] sm:$0xff] %v14937_v32  ;;  %v803_v46 = vor.u32 %v14925_v13, %v799_v29  ;;  %v14958_v38 = vshrl.u32 %v14906_v43, 16 }
  0xbb   : > { %12372 = vmatmul.mubr.msk.bf16.gmra.mrb[8].mxu0 %vm993_vm3, %v14897_v22  ;;  %18296 = vst [vmem:[#allocation134_spill] sm:$0xff] %v14934_v56  ;;  %v795_v22 = vor.u32 %v14918_v20, %v791_v9  ;;  %v14951_v30 = vshll.u32 %v14934_v56, 16  ;;  %v321_v20 = vld [vmem:[%s14127_s27 + $0x310] sm:$0xff] }
  0xbc   : > { %12375 = vmatprep.mubr.msk.bf16.mxu0 %vm993_vm3, %v14902_v45  ;;  %v318_v45 = vld [vmem:[%s14127_s27 + $0x2f8] sm:$0xff]  ;;  %18301 = vst [vmem:[#allocation139_spill] sm:$0xff] %v14958_v38 }
  0xbd   : > { %v14946_v14 = vpack.c.bf16 %v318_v45, %v317_v10  ;;  %18300 = vst [vmem:[#allocation138_spill] sm:$0xff] %v14951_v30  ;;  %v800_v9 = vsel %vm444_vm2, %v795_v22, %v799_v29  ;;  %v5591_v10 = vrot.slane %v14296_v36, 2  ;;  %v815_v22 = vrot.slane %v14951_v30, 1 }
  0xbf   : > { %11754 = vmatmul.mubr.msk.bf16.gmra.mrb[80].mxu1 %vm993_vm3, %v784_v33  ;;  %v807_v33 = vrot.slane %v14928_v37, 1  ;;  %18299 = vst [vmem:[#allocation137_spill] sm:$0xff] %v14946_v14  ;;  %v14965_v37 = vshrl.u32 %v14934_v56, 16  ;;  %v14968_v13 = vshll.u32 %v14946_v14, 16  ;;  %v14982_v36 = vsel %vm5569_vm5, %v5589_v61, %v5591_v10 }
  0xc0   : > { %11757 = vmatprep.mubr.msk.bf16.mxu1 %vm993_vm3, %v792_v50  ;;  %v320_v50 = vld [vmem:[%s14127_s27 + $0x308] sm:$0xff]  ;;  %18306 = vst [vmem:[#allocation144_spill] sm:$0xff] %v14982_v36 }
  0xc1   : > { %v808_v45 = vsel %vm444_vm2, %v803_v46, %v807_v33  ;;  %18302 = vst [vmem:[#allocation140_spill] sm:$0xff] %v14965_v37  ;;  %18303 = vst [vmem:[#allocation141_spill] sm:$0xff] %v14968_v13  ;;  %v14974_v29 = vpack.c.bf16 %v320_v50, %v319_v60  ;;  %v14977_v46 = vsel %vm5569_vm5, %v5587_v28, %v5589_v61  ;;  %v5593_v61 = vrot.slane %v14327_v16, 2  ;;  %v323_v50 = vld [vmem:[%s14127_s27 + $0x320] sm:$0xff] }
  0xc2   : > { %18305 = vst [vmem:[#allocation143_spill] sm:$0xff] %v14977_v46  ;;  %v819_v19 = vor.u32 %v14965_v37, %v815_v22  ;;  %v14998_v60 = vshrl.u32 %v14946_v14, 16 }
  0xc3   : > { %12376 = vmatmul.mubr.msk.bf16.gmra.mrb[12].mxu0 %vm993_vm3, %v14937_v32  ;;  %18304 = vst [vmem:[#allocation142_spill] sm:$0xff] %v14974_v29  ;;  %v811_v32 = vor.u32 %v14958_v38, %v807_v33  ;;  %v14991_v28 = vshll.u32 %v14974_v29, 16  ;;  %v325_v38 = vld [vmem:[%s14127_s27 + $0x330] sm:$0xff] }
  0xc4   : > { %12379 = vmatprep.mubr.msk.bf16.mxu0 %vm993_vm3, %v14942_v59  ;;  %v322_v59 = vld [vmem:[%s14127_s27 + $0x318] sm:$0xff]  ;;  %18309 = vst [vmem:[#allocation147_spill] sm:$0xff] %v14998_v60 }
  0xc5   : > { %v14986_v30 = vpack.c.bf16 %v322_v59, %v321_v20  ;;  %18308 = vst [vmem:[#allocation146_spill] sm:$0xff] %v14991_v28  ;;  %v816_v33 = vsel %vm444_vm2, %v811_v32, %v815_v22  ;;  %v5595_v20 = vrot.slane %v14332_v26, 2  ;;  %v831_v32 = vrot.slane %v14991_v28, 1 }
  0xc7   : > { %11758 = vmatmul.mubr.msk.bf16.gmra.mrb[84].mxu1 %vm993_vm3, %v800_v9  ;;  %v823_v9 = vrot.slane %v14968_v13, 1  ;;  %18307 = vst [vmem:[#allocation145_spill] sm:$0xff] %v14986_v30  ;;  %v15005_v13 = vshrl.u32 %v14974_v29, 16  ;;  %v15008_v37 = vshll.u32 %v14986_v30, 16  ;;  %v15022_v26 = vsel %vm5569_vm5, %v5593_v61, %v5595_v20 }
  0xc8   : > { %11761 = vmatprep.mubr.msk.bf16.mxu1 %vm993_vm3, %v808_v45  ;;  %v324_v45 = vld [vmem:[%s14127_s27 + $0x328] sm:$0xff]  ;;  %18314 = vst [vmem:[#allocation152_spill] sm:$0xff] %v15022_v26 }
  0xc9   : > { %v824_v59 = vsel %vm444_vm2, %v819_v19, %v823_v9  ;;  %18310 = vst [vmem:[#allocation148_spill] sm:$0xff] %v15005_v13  ;;  %18311 = vst [vmem:[#allocation149_spill] sm:$0xff] %v15008_v37  ;;  %v15014_v22 = vpack.c.bf16 %v324_v45, %v323_v50  ;;  %v15017_v19 = vsel %vm5569_vm5, %v5591_v10, %v5593_v61  ;;  %v5597_v61 = vrot.slane %v14363_v1, 2  ;;  %v327_v45 = vld [vmem:[%s14127_s27 + $0x340] sm:$0xff] }
  0xca   : > { %18313 = vst [vmem:[#allocation151_spill] sm:$0xff] %v15017_v19  ;;  %v835_v16 = vor.u32 %v15005_v13, %v831_v32  ;;  %v15038_v50 = vshrl.u32 %v14986_v30, 16 }
  0xcb   : > { %12380 = vmatmul.mubr.msk.bf16.gmra.mrb[16].mxu0 %vm993_vm3, %v14977_v46  ;;  %18312 = vst [vmem:[#allocation150_spill] sm:$0xff] %v15014_v22  ;;  %v827_v46 = vor.u32 %v14998_v60, %v823_v9  ;;  %v15031_v10 = vshll.u32 %v15014_v22, 16  ;;  %v329_v60 = vld [vmem:[%s14127_s27 + $0x350] sm:$0xff] }
  0xcc   : > { %12383 = vmatprep.mubr.msk.bf16.mxu0 %vm993_vm3, %v14982_v36  ;;  %v326_v36 = vld [vmem:[%s14127_s27 + $0x338] sm:$0xff]  ;;  %18317 = vst [vmem:[#allocation155_spill] sm:$0xff] %v15038_v50 }
  0xcd   : > { %v15026_v28 = vpack.c.bf16 %v326_v36, %v325_v38  ;;  %18316 = vst [vmem:[#allocation154_spill] sm:$0xff] %v15031_v10  ;;  %v832_v9 = vsel %vm444_vm2, %v827_v46, %v831_v32  ;;  %v5599_v38 = vrot.slane %v14368_v17, 2  ;;  %v847_v46 = vrot.slane %v15031_v10, 1 }
  0xcf   : > { %11762 = vmatmul.mubr.msk.bf16.gmra.mrb[88].mxu1 %vm993_vm3, %v816_v33  ;;  %v839_v33 = vrot.slane %v15008_v37, 1  ;;  %18315 = vst [vmem:[#allocation153_spill] sm:$0xff] %v15026_v28  ;;  %v15045_v37 = vshrl.u32 %v15014_v22, 16  ;;  %v15048_v13 = vshll.u32 %v15026_v28, 16  ;;  %v15062_v17 = vsel %vm5569_vm5, %v5597_v61, %v5599_v38 }
  0xd0   : > { %11765 = vmatprep.mubr.msk.bf16.mxu1 %vm993_vm3, %v824_v59  ;;  %v328_v59 = vld [vmem:[%s14127_s27 + $0x348] sm:$0xff]  ;;  %18322 = vst [vmem:[#allocation160_spill] sm:$0xff] %v15062_v17 }
  0xd1   : > { %v840_v36 = vsel %vm444_vm2, %v835_v16, %v839_v33  ;;  %18318 = vst [vmem:[#allocation156_spill] sm:$0xff] %v15045_v37  ;;  %18319 = vst [vmem:[#allocation157_spill] sm:$0xff] %v15048_v13  ;;  %v15054_v32 = vpack.c.bf16 %v328_v59, %v327_v45  ;;  %v15057_v16 = vsel %vm5569_vm5, %v5595_v20, %v5597_v61  ;;  %v5601_v61 = vrot.slane %v14399_v48, 2  ;;  %v331_v59 = vld [vmem:[%s14127_s27 + $0x360] sm:$0xff] }
  0xd2   : > { %18321 = vst [vmem:[#allocation159_spill] sm:$0xff] %v15057_v16  ;;  %v851_v1 = vor.u32 %v15045_v37, %v847_v46  ;;  %v15078_v45 = vshrl.u32 %v15026_v28, 16 }
  0xd3   : > { %12384 = vmatmul.mubr.msk.bf16.gmra.mrb[20].mxu0 %vm993_vm3, %v15017_v19  ;;  %18320 = vst [vmem:[#allocation158_spill] sm:$0xff] %v15054_v32  ;;  %v843_v19 = vor.u32 %v15038_v50, %v839_v33  ;;  %v15071_v20 = vshll.u32 %v15054_v32, 16  ;;  %v333_v50 = vld [vmem:[%s14127_s27 + $0x370] sm:$0xff] }
  0xd4   : > { %12387 = vmatprep.mubr.msk.bf16.mxu0 %vm993_vm3, %v15022_v26  ;;  %v330_v26 = vld [vmem:[%s14127_s27 + $0x358] sm:$0xff]  ;;  %18325 = vst [vmem:[#allocation163_spill] sm:$0xff] %v15078_v45 }
  0xd5   : > { %v15066_v10 = vpack.c.bf16 %v330_v26, %v329_v60  ;;  %18324 = vst [vmem:[#allocation162_spill] sm:$0xff] %v15071_v20  ;;  %v848_v33 = vsel %vm444_vm2, %v843_v19, %v847_v46  ;;  %v5603_v60 = vrot.slane %v14404_v35, 2  ;;  %v863_v19 = vrot.slane %v15071_v20, 1 }
  0xd7   : > { %11766 = vmatmul.mubr.msk.bf16.gmra.mrb[92].mxu1 %vm993_vm3, %v832_v9  ;;  %v855_v9 = vrot.slane %v15048_v13, 1  ;;  %18323 = vst [vmem:[#allocation161_spill] sm:$0xff] %v15066_v10  ;;  %v15085_v13 = vshrl.u32 %v15054_v32, 16  ;;  %v15088_v37 = vshll.u32 %v15066_v10, 16  ;;  %v15102_v35 = vsel %vm5569_vm5, %v5601_v61, %v5603_v60 }
  0xd8   : > { %11769 = vmatprep.mubr.msk.bf16.mxu1 %vm993_vm3, %v840_v36  ;;  %v332_v36 = vld [vmem:[%s14127_s27 + $0x368] sm:$0xff]  ;;  %18330 = vst [vmem:[#allocation168_spill] sm:$0xff] %v15102_v35 }
  0xd9   : > { %v856_v26 = vsel %vm444_vm2, %v851_v1, %v855_v9  ;;  %18326 = vst [vmem:[#allocation164_spill] sm:$0xff] %v15085_v13  ;;  %18327 = vst [vmem:[#allocation165_spill] sm:$0xff] %v15088_v37  ;;  %v15094_v46 = vpack.c.bf16 %v332_v36, %v331_v59  ;;  %v15097_v1 = vsel %vm5569_vm5, %v5599_v38, %v5601_v61  ;;  %v5605_v61 = vrot.slane %v14430_v8, 2  ;;  %v335_v36 = vld [vmem:[%s14127_s27 + $0x380] sm:$0xff] }
  0xda   : > { %18329 = vst [vmem:[#allocation167_spill] sm:$0xff] %v15097_v1  ;;  %v867_v48 = vor.u32 %v15085_v13, %v863_v19  ;;  %v15118_v59 = vshrl.u32 %v15066_v10, 16 }
  0xdb   : > { %12388 = vmatmul.mubr.msk.bf16.gmra.mrb[24].mxu0 %vm993_vm3, %v15057_v16  ;;  %18328 = vst [vmem:[#allocation166_spill] sm:$0xff] %v15094_v46  ;;  %v859_v16 = vor.u32 %v15078_v45, %v855_v9  ;;  %v15111_v38 = vshll.u32 %v15094_v46, 16  ;;  %v337_v45 = vld [vmem:[%s14127_s27 + $0x390] sm:$0xff] }
  0xdc   : > { %12391 = vmatprep.mubr.msk.bf16.mxu0 %vm993_vm3, %v15062_v17  ;;  %v334_v17 = vld [vmem:[%s14127_s27 + $0x378] sm:$0xff]  ;;  %18333 = vst [vmem:[#allocation171_spill] sm:$0xff] %v15118_v59 }
  0xdd   : > { %v15106_v20 = vpack.c.bf16 %v334_v17, %v333_v50  ;;  %18332 = vst [vmem:[#allocation170_spill] sm:$0xff] %v15111_v38  ;;  %v864_v9 = vsel %vm444_vm2, %v859_v16, %v863_v19  ;;  %v5607_v50 = vrot.slane %v14440_v49, 2  ;;  %v879_v16 = vrot.slane %v15111_v38, 1 }
  0xdf   : > { %11770 = vmatmul.mubr.msk.bf16.gmra.mrb[96].mxu1 %vm993_vm3, %v848_v33  ;;  %v871_v33 = vrot.slane %v15088_v37, 1  ;;  %18331 = vst [vmem:[#allocation169_spill] sm:$0xff] %v15106_v20  ;;  %v15125_v37 = vshrl.u32 %v15094_v46, 16  ;;  %v15128_v13 = vshll.u32 %v15106_v20, 16  ;;  %v15142_v49 = vsel %vm5569_vm5, %v5605_v61, %v5607_v50 }
  0xe0   : > { %11773 = vmatprep.mubr.msk.bf16.mxu1 %vm993_vm3, %v856_v26  ;;  %v336_v26 = vld [vmem:[%s14127_s27 + $0x388] sm:$0xff]  ;;  %18338 = vst [vmem:[#allocation176_spill] sm:$0xff] %v15142_v49 }
  0xe1   : > { %v872_v17 = vsel %vm444_vm2, %v867_v48, %v871_v33  ;;  %18334 = vst [vmem:[#allocation172_spill] sm:$0xff] %v15125_v37  ;;  %18335 = vst [vmem:[#allocation173_spill] sm:$0xff] %v15128_v13  ;;  %v15134_v19 = vpack.c.bf16 %v336_v26, %v335_v36  ;;  %v15137_v48 = vsel %vm5569_vm5, %v5603_v60, %v5605_v61  ;;  %v5609_v61 = vrot.slane %v14471_v5, 2  ;;  %v339_v26 = vld [vmem:[%s14127_s27 + $0x3a0] sm:$0xff] }
  0xe2   : > { %18337 = vst [vmem:[#allocation175_spill] sm:$0xff] %v15137_v48  ;;  %v883_v8 = vor.u32 %v15125_v37, %v879_v16  ;;  %v15158_v36 = vshrl.u32 %v15106_v20, 16 }
  0xe3   : > { %12392 = vmatmul.mubr.msk.bf16.gmra.mrb[28].mxu0 %vm993_vm3, %v15097_v1  ;;  %18336 = vst [vmem:[#allocation174_spill] sm:$0xff] %v15134_v19  ;;  %v875_v1 = vor.u32 %v15118_v59, %v871_v33  ;;  %v15151_v60 = vshll.u32 %v15134_v19, 16  ;;  %v341_v59 = vld [vmem:[%s14127_s27 + $0x3b0] sm:$0xff] }
  0xe4   : > { %12395 = vmatprep.mubr.msk.bf16.mxu0 %vm993_vm3, %v15102_v35  ;;  %v338_v35 = vld [vmem:[%s14127_s27 + $0x398] sm:$0xff]  ;;  %18341 = vst [vmem:[#allocation179_spill] sm:$0xff] %v15158_v36 }
  0xe5   : > { %v15146_v38 = vpack.c.bf16 %v338_v35, %v337_v45  ;;  %18340 = vst [vmem:[#allocation178_spill] sm:$0xff] %v15151_v60  ;;  %v880_v33 = vsel %vm444_vm2, %v875_v1, %v879_v16  ;;  %v5611_v45 = vrot.slane %v14476_v52, 2  ;;  %v895_v1 = vrot.slane %v15151_v60, 1 }
  0xe7   : > { %11774 = vmatmul.mubr.msk.bf16.gmra.mrb[100].mxu1 %vm993_vm3, %v864_v9  ;;  %v887_v9 = vrot.slane %v15128_v13, 1  ;;  %18339 = vst [vmem:[#allocation177_spill] sm:$0xff] %v15146_v38  ;;  %v15165_v13 = vshrl.u32 %v15134_v19, 16  ;;  %v15168_v37 = vshll.u32 %v15146_v38, 16  ;;  %v15182_v52 = vsel %vm5569_vm5, %v5609_v61, %v5611_v45 }
  0xe8   : > { %11777 = vmatprep.mubr.msk.bf16.mxu1 %vm993_vm3, %v872_v17  ;;  %v340_v17 = vld [vmem:[%s14127_s27 + $0x3a8] sm:$0xff]  ;;  %18346 = vst [vmem:[#allocation184_spill] sm:$0xff] %v15182_v52 }
  0xe9   : > { %v888_v35 = vsel %vm444_vm2, %v883_v8, %v887_v9  ;;  %18342 = vst [vmem:[#allocation180_spill] sm:$0xff] %v15165_v13  ;;  %18343 = vst [vmem:[#allocation181_spill] sm:$0xff] %v15168_v37  ;;  %v15174_v16 = vpack.c.bf16 %v340_v17, %v339_v26  ;;  %v15177_v8 = vsel %vm5569_vm5, %v5607_v50, %v5609_v61  ;;  %v5613_v61 = vrot.slane %v14507_v51, 2  ;;  %v343_v17 = vld [vmem:[%s14127_s27 + $0x3c0] sm:$0xff] }
  0xea   : > { %18345 = vst [vmem:[#allocation183_spill] sm:$0xff] %v15177_v8  ;;  %v899_v5 = vor.u32 %v15165_v13, %v895_v1  ;;  %v15198_v26 = vshrl.u32 %v15146_v38, 16 }
  0xeb   : > { %12396 = vmatmul.mubr.msk.bf16.gmra.mrb[32].mxu0 %vm993_vm3, %v15137_v48  ;;  %18344 = vst [vmem:[#allocation182_spill] sm:$0xff] %v15174_v16  ;;  %v891_v48 = vor.u32 %v15158_v36, %v887_v9  ;;  %v15191_v50 = vshll.u32 %v15174_v16, 16  ;;  %v345_v36 = vld [vmem:[%s14127_s27 + $0x3d0] sm:$0xff] }
  0xec   : > { %12399 = vmatprep.mubr.msk.bf16.mxu0 %vm993_vm3, %v15142_v49  ;;  %v342_v49 = vld [vmem:[%s14127_s27 + $0x3b8] sm:$0xff]  ;;  %18349 = vst [vmem:[#allocation187_spill] sm:$0xff] %v15198_v26 }
  0xed   : > { %v15186_v60 = vpack.c.bf16 %v342_v49, %v341_v59  ;;  %18348 = vst [vmem:[#allocation186_spill] sm:$0xff] %v15191_v50  ;;  %v896_v9 = vsel %vm444_vm2, %v891_v48, %v895_v1  ;;  %v5615_v59 = vrot.slane %v14512_v31, 2  ;;  %v911_v48 = vrot.slane %v15191_v50, 1 }
  0xef   : > { %11778 = vmatmul.mubr.msk.bf16.gmra.mrb[104].mxu1 %vm993_vm3, %v880_v33  ;;  %v903_v33 = vrot.slane %v15168_v37, 1  ;;  %18347 = vst [vmem:[#allocation185_spill] sm:$0xff] %v15186_v60  ;;  %v15205_v37 = vshrl.u32 %v15174_v16, 16  ;;  %v15208_v13 = vshll.u32 %v15186_v60, 16  ;;  %v15222_v31 = vsel %vm5569_vm5, %v5613_v61, %v5615_v59 }
  0xf0   : > { %11781 = vmatprep.mubr.msk.bf16.mxu1 %vm993_vm3, %v888_v35  ;;  %v344_v35 = vld [vmem:[%s14127_s27 + $0x3c8] sm:$0xff]  ;;  %18354 = vst [vmem:[#allocation192_spill] sm:$0xff] %v15222_v31 }
  0xf1   : > { %v904_v49 = vsel %vm444_vm2, %v899_v5, %v903_v33  ;;  %18350 = vst [vmem:[#allocation188_spill] sm:$0xff] %v15205_v37  ;;  %18351 = vst [vmem:[#allocation189_spill] sm:$0xff] %v15208_v13  ;;  %v15214_v1 = vpack.c.bf16 %v344_v35, %v343_v17  ;;  %v15217_v5 = vsel %vm5569_vm5, %v5611_v45, %v5613_v61  ;;  %v5617_v61 = vrot.slane %v14543_v55, 2  ;;  %v347_v35 = vld [vmem:[%s14127_s27 + $0x3e0] sm:$0xff] }
  0xf2   : > { %18353 = vst [vmem:[#allocation191_spill] sm:$0xff] %v15217_v5  ;;  %v915_v51 = vor.u32 %v15205_v37, %v911_v48  ;;  %v15238_v17 = vshrl.u32 %v15186_v60, 16 }
  0xf3   : > { %12400 = vmatmul.mubr.msk.bf16.gmra.mrb[36].mxu0 %vm993_vm3, %v15177_v8  ;;  %18352 = vst [vmem:[#allocation190_spill] sm:$0xff] %v15214_v1  ;;  %v907_v8 = vor.u32 %v15198_v26, %v903_v33  ;;  %v15231_v45 = vshll.u32 %v15214_v1, 16  ;;  %v349_v26 = vld [vmem:[%s14127_s27 + $0x3f0] sm:$0xff] }
  0xf4   : > { %12403 = vmatprep.mubr.msk.bf16.mxu0 %vm993_vm3, %v15182_v52  ;;  %v346_v52 = vld [vmem:[%s14127_s27 + $0x3d8] sm:$0xff]  ;;  %18357 = vst [vmem:[#allocation195_spill] sm:$0xff] %v15238_v17 }
  0xf5   : > { %v15226_v50 = vpack.c.bf16 %v346_v52, %v345_v36  ;;  %18356 = vst [vmem:[#allocation194_spill] sm:$0xff] %v15231_v45  ;;  %v912_v33 = vsel %vm444_vm2, %v907_v8, %v911_v48  ;;  %v5619_v36 = vrot.slane %v14548_v58, 2  ;;  %v927_v8 = vrot.slane %v15231_v45, 1 }
  0xf7   : > { %11782 = vmatmul.mubr.msk.bf16.gmra.mrb[108].mxu1 %vm993_vm3, %v896_v9  ;;  %v919_v9 = vrot.slane %v15208_v13, 1  ;;  %18355 = vst [vmem:[#allocation193_spill] sm:$0xff] %v15226_v50  ;;  %v15245_v13 = vshrl.u32 %v15214_v1, 16  ;;  %v15248_v37 = vshll.u32 %v15226_v50, 16  ;;  %v15262_v58 = vsel %vm5569_vm5, %v5617_v61, %v5619_v36 }
  0xf8   : > { %11785 = vmatprep.mubr.msk.bf16.mxu1 %vm993_vm3, %v904_v49  ;;  %v348_v49 = vld [vmem:[%s14127_s27 + $0x3e8] sm:$0xff]  ;;  %18362 = vst [vmem:[#allocation200_spill] sm:$0xff] %v15262_v58 }
  0xf9   : > { %v920_v52 = vsel %vm444_vm2, %v915_v51, %v919_v9  ;;  %18358 = vst [vmem:[#allocation196_spill] sm:$0xff] %v15245_v13  ;;  %18359 = vst [vmem:[#allocation197_spill] sm:$0xff] %v15248_v37  ;;  %v15254_v48 = vpack.c.bf16 %v348_v49, %v347_v35  ;;  %v15257_v51 = vsel %vm5569_vm5, %v5615_v59, %v5617_v61  ;;  %v5621_v61 = vrot.slane %v14577_v41, 2  ;;  %v351_v49 = vld [vmem:[%s14127_s27 + $0x400] sm:$0xff] }
  0xfa   : > { %18361 = vst [vmem:[#allocation199_spill] sm:$0xff] %v15257_v51  ;;  %v931_v55 = vor.u32 %v15245_v13, %v927_v8  ;;  %v15278_v35 = vshrl.u32 %v15226_v50, 16 }
  0xfb   : > { %12404 = vmatmul.mubr.msk.bf16.gmra.mrb[40].mxu0 %vm993_vm3, %v15217_v5  ;;  %18360 = vst [vmem:[#allocation198_spill] sm:$0xff] %v15254_v48  ;;  %v923_v5 = vor.u32 %v15238_v17, %v919_v9  ;;  %v15271_v59 = vshll.u32 %v15254_v48, 16  ;;  %v353_v17 = vld [vmem:[%s14127_s27 + $0x410] sm:$0xff] }
  0xfc   : > { %12407 = vmatprep.mubr.msk.bf16.mxu0 %vm993_vm3, %v15222_v31  ;;  %v350_v31 = vld [vmem:[%s14127_s27 + $0x3f8] sm:$0xff]  ;;  %18365 = vst [vmem:[#allocation203_spill] sm:$0xff] %v15278_v35 }
  0xfd   : > { %v15266_v45 = vpack.c.bf16 %v350_v31, %v349_v26  ;;  %18364 = vst [vmem:[#allocation202_spill] sm:$0xff] %v15271_v59  ;;  %v928_v9 = vsel %vm444_vm2, %v923_v5, %v927_v8  ;;  %v5623_v26 = vrot.slane %v14590_v24, 2  ;;  %v943_v5 = vrot.slane %v15271_v59, 1 }
  0xff   : > { %11786 = vmatmul.mubr.msk.bf16.gmra.mrb[112].mxu1 %vm993_vm3, %v912_v33  ;;  %v935_v33 = vrot.slane %v15248_v37, 1  ;;  %18363 = vst [vmem:[#allocation201_spill] sm:$0xff] %v15266_v45  ;;  %v15285_v37 = vshrl.u32 %v15254_v48, 16  ;;  %v15288_v13 = vshll.u32 %v15266_v45, 16  ;;  %v15302_v24 = vsel %vm5569_vm5, %v5621_v61, %v5623_v26 }
 0x100   : > { %11789 = vmatprep.mubr.msk.bf16.mxu1 %vm993_vm3, %v920_v52  ;;  %v352_v52 = vld [vmem:[%s14127_s27 + $0x408] sm:$0xff]  ;;  %18370 = vst [vmem:[#allocation208_spill] sm:$0xff] %v15302_v24 }
 0x101   : > { %v936_v31 = vsel %vm444_vm2, %v931_v55, %v935_v33  ;;  %18366 = vst [vmem:[#allocation204_spill] sm:$0xff] %v15285_v37  ;;  %18367 = vst [vmem:[#allocation205_spill] sm:$0xff] %v15288_v13  ;;  %v15294_v8 = vpack.c.bf16 %v352_v52, %v351_v49  ;;  %v15297_v55 = vsel %vm5569_vm5, %v5619_v36, %v5621_v61  ;;  %v5625_v61 = vrot.slane %v14622_v40, 2  ;;  %v355_v52 = vld [vmem:[%s14127_s27 + $0x420] sm:$0xff] }
 0x102   : > { %18369 = vst [vmem:[#allocation207_spill] sm:$0xff] %v15297_v55  ;;  %v947_v41 = vor.u32 %v15285_v37, %v943_v5  ;;  %v15318_v49 = vshrl.u32 %v15266_v45, 16 }
 0x103   : > { %12408 = vmatmul.mubr.msk.bf16.gmra.mrb[44].mxu0 %vm993_vm3, %v15257_v51  ;;  %18368 = vst [vmem:[#allocation206_spill] sm:$0xff] %v15294_v8  ;;  %v939_v51 = vor.u32 %v15278_v35, %v935_v33  ;;  %v15311_v36 = vshll.u32 %v15294_v8, 16  ;;  %v357_v35 = vld [vmem:[%s14127_s27 + $0x430] sm:$0xff] }
 0x104   : > { %12411 = vmatprep.mubr.msk.bf16.mxu0 %vm993_vm3, %v15262_v58  ;;  %v354_v58 = vld [vmem:[%s14127_s27 + $0x418] sm:$0xff]  ;;  %18373 = vst [vmem:[#allocation211_spill] sm:$0xff] %v15318_v49 }
 0x105   : > { %v15306_v59 = vpack.c.bf16 %v354_v58, %v353_v17  ;;  %18372 = vst [vmem:[#allocation210_spill] sm:$0xff] %v15311_v36  ;;  %v944_v33 = vsel %vm444_vm2, %v939_v51, %v943_v5  ;;  %v5627_v17 = vrot.slane %v14627_v54, 2  ;;  %v959_v51 = vrot.slane %v15311_v36, 1  ;;  %v360_v36 = vld [vmem:[%s14127_s27 + $0x448] sm:$0xff] }
 0x107   : > { %11790 = vmatmul.mubr.msk.bf16.gmra.mrb[116].mxu1 %vm993_vm3, %v928_v9  ;;  %v951_v9 = vrot.slane %v15288_v13, 1  ;;  %18371 = vst [vmem:[#allocation209_spill] sm:$0xff] %v15306_v59  ;;  %v15325_v13 = vshrl.u32 %v15294_v8, 16  ;;  %v15328_v37 = vshll.u32 %v15306_v59, 16  ;;  %v15342_v54 = vsel %vm5569_vm5, %v5625_v61, %v5627_v17 }
 0x108   : > { %11793 = vmatprep.mubr.msk.bf16.mxu1 %vm993_vm3, %v936_v31  ;;  %v356_v31 = vld [vmem:[%s14127_s27 + $0x428] sm:$0xff]  ;;  %18378 = vst [vmem:[#allocation216_spill] sm:$0xff] %v15342_v54 }
 0x109   : > { %v952_v58 = vsel %vm444_vm2, %v947_v41, %v951_v9  ;;  %18374 = vst [vmem:[#allocation212_spill] sm:$0xff] %v15325_v13  ;;  %18375 = vst [vmem:[#allocation213_spill] sm:$0xff] %v15328_v37  ;;  %v15334_v5 = vpack.c.bf16 %v356_v31, %v355_v52  ;;  %v955_v41 = vor.u32 %v15318_v49, %v951_v9  ;;  %v15358_v52 = vshrl.u32 %v15306_v59, 16 }
 0x10a   : > { %v963_v40 = vor.u32 %v15325_v13, %v959_v51 }
 0x10b   : > { %12412 = vmatmul.mubr.msk.bf16.gmra.mrb[48].mxu0 %vm993_vm3, %v15297_v55  ;;  %18376 = vst [vmem:[#allocation214_spill] sm:$0xff] %v15334_v5  ;;  %v15337_v55 = vsel %vm5569_vm5, %v5623_v26, %v5625_v61  ;;  %v15351_v26 = vshll.u32 %v15334_v5, 16  ;;  %v960_v9 = vsel %vm444_vm2, %v955_v41, %v959_v51  ;;  %v5629_v61 = vrot.slane %v14658_v53, 2  ;;  %18381 = vst [vmem:[#allocation219_spill] sm:$0xff] %v15358_v52 }
 0x10c   : > { %12415 = vmatprep.mubr.msk.bf16.mxu0 %vm993_vm3, %v15302_v24  ;;  %v358_v24 = vld [vmem:[%s14127_s27 + $0x438] sm:$0xff]  ;;  %18377 = vst [vmem:[#allocation215_spill] sm:$0xff] %v15337_v55 }
 0x10d   : > { %v15346_v8 = vpack.c.bf16 %v358_v24, %v357_v35  ;;  %18380 = vst [vmem:[#allocation218_spill] sm:$0xff] %v15351_v26  ;;  %v5631_v24 = vrot.slane %v14663_v63, 2  ;;  %v15363_v35 = vshrl.u32 %v15334_v5, 16  ;;  %v975_v51 = vrot.slane %v15351_v26, 1 }
 0x10e   : > { %v15373_v41 = vsel %vm5569_vm5, %v5627_v17, %v5629_v61  ;;  %v5653_v26 = vrot.slane %v14894_v39, 2 }
 0x10f   : > { %11794 = vmatmul.mubr.msk.bf16.gmra.mrb[120].mxu1 %vm993_vm3, %v944_v33  ;;  %v967_v33 = vrot.slane %v15328_v37, 1  ;;  %18379 = vst [vmem:[#allocation217_spill] sm:$0xff] %v15346_v8  ;;  %18382 = vst [vmem:[#allocation220_spill] sm:$0xff] %v15363_v35  ;;  %v359_v37 = vld [vmem:[%s14127_s27 + $0x440] sm:$0xff]  ;;  %v15380_v49 = vsel %vm5569_vm5, %v5629_v61, %v5631_v24  ;;  %v5635_v61 = vrot.slane %v14699_v27, 2 }
 0x110   : > { %11797 = vmatprep.mubr.msk.bf16.mxu1 %vm993_vm3, %v952_v58  ;;  %v15366_v58 = vshll.u32 %v15346_v8, 16  ;;  %v15377_v13 = vpack.c.bf16 %v360_v36, %v359_v37  ;;  %v15391_v37 = vshrl.u32 %v15346_v8, 16 }
 0x111   : > { %v968_v31 = vsel %vm444_vm2, %v963_v40, %v967_v33  ;;  %v971_v40 = vor.u32 %v15358_v52, %v967_v33  ;;  %v18391_v52 = vld [vmem:[#allocation15_spill] sm:$0xff] }
 0x112   : > { %18383 = vst [vmem:[#allocation221_spill] sm:$0xff] %v15366_v58  ;;  %18384 = vst [vmem:[#allocation222_spill] sm:$0xff] %v15391_v37  ;;  %v15394_v36 = vshll.u32 %v15377_v13, 16 }
 0x113   : > { %12416 = vmatmul.mubr.msk.bf16.gmra.mrb[52].mxu0 %vm993_vm3, %v15337_v55  ;;  %v983_v55 = vrot.slane %v15366_v58, 1  ;;  %v976_v17 = vsel %vm444_vm2, %v971_v40, %v975_v51 }
 0x114   : > { %12419 = vmatprep.mubr.msk.bf16.mxu0 %vm993_vm3, %v15342_v54  ;;  %v979_v54 = vor.u32 %v15363_v35, %v975_v51  ;;  %18385 = vst [vmem:[#allocation223_spill] sm:$0xff] %v15394_v36  ;;  %v991_v40 = vrot.slane %v15394_v36, 1  ;;  %v5655_v35 = vrot.slane %v14906_v43, 2 }
 0x115   : > { %v987_v51 = vor.u32 %v15391_v37, %v983_v55  ;;  %v5651_v37 = vrot.slane %v14865_v47, 2 }
 0x116   : > { %v984_v33 = vsel %vm444_vm2, %v979_v54, %v983_v55 }
 0x117   : > { %11798 = vmatmul.mubr.msk.bf16.gmra.mrb[124].mxu1 %vm993_vm3, %v960_v9  ;;  %v5633_v9 = vrot.slane %v14694_v42, 2  ;;  %v992_v54 = vsel %vm444_vm2, %v987_v51, %v991_v40  ;;  %v5643_v51 = vrot.slane %v14783_v2, 2 }
 0x118   : > { %11801 = vmatprep.mubr.msk.bf16.mxu1 %vm993_vm3, %v968_v31 }
 0x119   : > { %v15400_v31 = vsel %vm5569_vm5, %v5631_v24, %v5633_v9  ;;  %v15406_v58 = vsel %vm5569_vm5, %v5633_v9, %v5635_v61  ;;  %v5637_v24 = vrot.slane %v14727_v44, 2 }
 0x11b   : > { %12420 = vmatmul.mubr.msk.bf16.gmra.mrb[56].mxu0 %vm993_vm3, %v15373_v41  ;;  %v15417_v55 = vsel %vm5569_vm5, %v5635_v61, %v5637_v24 }
 0x11c   : > { %12423 = vmatprep.mubr.msk.bf16.mxu0 %vm993_vm3, %v15380_v49 }
 0x11f   : > { %11802 = vmatmul.mubr.msk.bf16.gmra.mrb[128].mxu1 %vm993_vm3, %v976_v17  ;;  %v5639_v17 = vrot.slane %v14755_v23, 2 }
 0x120   : > { %11805 = vmatprep.mubr.msk.bf16.mxu1 %vm993_vm3, %v984_v33  ;;  %v5641_v33 = vrot.slane %v14774_v12, 2 }
 0x121   : > { %v15422_v9 = vsel %vm5569_vm5, %v5637_v24, %v5639_v17  ;;  %v5647_v24 = vrot.slane %v14819_v3, 2 }
 0x122   : > { %v15434_v61 = vsel %vm5569_vm5, %v5639_v17, %v5641_v33  ;;  %v15439_v40 = vsel %vm5569_vm5, %v5641_v33, %v5643_v51 }
 0x123   : > { %12424 = vmatmul.mubr.msk.bf16.gmra.mrb[60].mxu0 %vm993_vm3, %v15400_v31 }
 0x124   : > { %12427 = vmatprep.mubr.msk.bf16.mxu0 %vm993_vm3, %v15406_v58 }
 0x127   : > { %11806 = vmatmul.mubr.msk.bf16.gmra.mrb[132].mxu1 %vm993_vm3, %v992_v54  ;;  %v5645_v54 = vrot.slane %v14809_v62, 2 }
 0x128   : > { %11811 = vmatprep.mubr.msk.bf16.mxu1 %vm993_vm3, %v14135_v15 }
 0x129   : > { %v15457_v33 = vsel %vm5569_vm5, %v5643_v51, %v5645_v54  ;;  %v15462_v36 = vsel %vm5569_vm5, %v5645_v54, %v5647_v24 }
 0x12a   : > { %18386 = vst [vmem:[#allocation224_spill] sm:$0xff] %v15457_v33  ;;  %18387 = vst [vmem:[#allocation225_spill] sm:$0xff] %v15462_v36 }
 0x12b   : > { %12428 = vmatmul.mubr.msk.bf16.gmra.mrb[64].mxu0 %vm993_vm3, %v15417_v55 }
 0x12c   : > { %12431 = vmatprep.mubr.msk.bf16.mxu0 %vm993_vm3, %v15422_v9 }
 0x12f   : > { %11812 = vmatmul.mubr.msk.bf16.vlgmr.msra.gmra.mrb[0].mxu1 %vm993_vm3, %v14139_v18 }
 0x130   : > { %11948 = vmatpush3.bf16.msra.mxu1 %v14858_v7  ;;  %11815 = vmatprep.mubr.msk.bf16.mxu1 %vm993_vm3, %v14143_v21  ;;  %v10909_v7 = vld [vmem:[%s17779_s1 + $0xe] sm:$0x3] }
 0x131   : > { %v15451_v17 = vand.u32 %v10909_v7, %v14101_v4  ;;  %v5649_v7 = vrot.slane %v14850_v6, 2 }
 0x133   : > { %12432 = vmatmul.mubr.msk.bf16.gmra.mrb[68].mxu0 %vm993_vm3, %v15434_v61  ;;  %12637 = vmatprep.subr.bf16.mxu0 %v15451_v17  ;;  %v15473_v51 = vsel %vm5569_vm5, %v5647_v24, %v5649_v7  ;;  %v15478_v54 = vsel %vm5569_vm5, %v5649_v7, %v5651_v37  ;;  %v15489_v24 = vsel %vm5569_vm5, %v5651_v37, %v5653_v26 }
 0x134   : > { %12435 = vmatprep.mubr.msk.bf16.mxu0 %vm993_vm3, %v15439_v40  ;;  %18388 = vst [vmem:[#allocation226_spill] sm:$0xff] %v15473_v51  ;;  %18389 = vst [vmem:[#allocation227_spill] sm:$0xff] %v15478_v54  ;;  %v15494_v7 = vsel %vm5569_vm5, %v5653_v26, %v5655_v35 }
 0x135   : > { %18390 = vst [vmem:[#allocation228_spill] sm:$0xff] %v15489_v24  ;;  %18392 = vst [vmem:[#allocation229_spill] sm:$0xff] %v15494_v7 }
 0x137   : > { %11816 = vmatmul.mubr.msk.bf16.gmra.mrb[4].mxu1 %vm993_vm3, %v14148_v25 }
 0x138   : > { %11819 = vmatprep.mubr.msk.bf16.mxu1 %vm993_vm3, %v14157_v34  ;;  %v18437_v34 = vld [vmem:[#allocation82_spill] sm:$0xff] }
 0x13b   : > { %12436 = vmatmul.mubr.msk.bf16.gmra.mrb[72].mxu0 %vm993_vm3, %v15457_v33 }
 0x13c   : > { %12439 = vmatprep.mubr.msk.bf16.mxu0 %vm993_vm3, %v15462_v36  ;;  %v18434_v36 = vld [vmem:[#allocation76_spill] sm:$0xff] }
 0x13f   : > { %11820 = vmatmul.mubr.msk.bf16.gmra.mrb[8].mxu1 %vm993_vm3, %v14174_v57  ;;  %v364_v57 = vld [vmem:[%s14127_s27 + $0x468] sm:$0xff] }
 0x140   : > { %11823 = vmatprep.mubr.msk.bf16.mxu1 %vm993_vm3, %v14182_v0  ;;  %v18430_v0 = vld [vmem:[#allocation70_spill] sm:$0xff] }
 0x143   : > { %12440 = vmatmul.mubr.msk.bf16.gmra.mrb[76].mxu0 %vm993_vm3, %v15473_v51  ;;  %v5659_v51 = vrot.slane %v14946_v14, 2 }
 0x144   : > { %12443 = vmatprep.mubr.msk.bf16.mxu0 %vm993_vm3, %v15478_v54  ;;  %v5657_v54 = vrot.slane %v14934_v56, 2 }
 0x146   : > { %v15505_v37 = vsel %vm5569_vm5, %v5655_v35, %v5657_v54  ;;  %v15510_v26 = vsel %vm5569_vm5, %v5657_v54, %v5659_v51 }
 0x147   : > { %11824 = vmatmul.mubr.msk.bf16.gmra.mrb[12].mxu1 %vm993_vm3, %v14200_v11  ;;  %v18393_v11 = vld [vmem:[#allocation18_spill] sm:$0xff]  ;;  %18394 = vst [vmem:[#allocation230_spill] sm:$0xff] %v15505_v37  ;;  %18396 = vst [vmem:[#allocation231_spill] sm:$0xff] %v15510_v26 }
 0x148   : > { %11827 = vmatprep.mubr.msk.bf16.mxu1 %vm993_vm3, %v18391_v52  ;;  %v18395_v52 = vld [vmem:[#allocation19_spill] sm:$0xff] }
 0x14b   : > { %12444 = vmatmul.mubr.msk.bf16.gmra.mrb[80].mxu0 %vm993_vm3, %v15489_v24  ;;  %v5663_v24 = vrot.slane %v14986_v30, 2 }
 0x14c   : > { %12447 = vmatprep.mubr.msk.bf16.mxu0 %vm993_vm3, %v15494_v7  ;;  %v5661_v7 = vrot.slane %v14974_v29, 2 }
 0x14e   : > { %v15521_v35 = vsel %vm5569_vm5, %v5659_v51, %v5661_v7  ;;  %v15526_v54 = vsel %vm5569_vm5, %v5661_v7, %v5663_v24 }
 0x14f   : > { %11828 = vmatmul.mubr.msk.bf16.gmra.mrb[16].mxu1 %vm993_vm3, %v18393_v11  ;;  %v18397_v11 = vld [vmem:[#allocation23_spill] sm:$0xff]  ;;  %18398 = vst [vmem:[#allocation232_spill] sm:$0xff] %v15521_v35  ;;  %18400 = vst [vmem:[#allocation233_spill] sm:$0xff] %v15526_v54 }
 0x150   : > { %11831 = vmatprep.mubr.msk.bf16.mxu1 %vm993_vm3, %v18395_v52  ;;  %v18399_v52 = vld [vmem:[#allocation27_spill] sm:$0xff] }
 0x153   : > { %12448 = vmatmul.mubr.msk.bf16.gmra.mrb[84].mxu0 %vm993_vm3, %v15505_v37  ;;  %v5667_v37 = vrot.slane %v15026_v28, 2 }
 0x154   : > { %12451 = vmatprep.mubr.msk.bf16.mxu0 %vm993_vm3, %v15510_v26  ;;  %v5665_v26 = vrot.slane %v15014_v22, 2 }
 0x156   : > { %v15537_v51 = vsel %vm5569_vm5, %v5663_v24, %v5665_v26  ;;  %v15542_v7 = vsel %vm5569_vm5, %v5665_v26, %v5667_v37 }
 0x157   : > { %11832 = vmatmul.mubr.msk.bf16.gmra.mrb[20].mxu1 %vm993_vm3, %v18397_v11  ;;  %v18401_v11 = vld [vmem:[#allocation28_spill] sm:$0xff]  ;;  %18402 = vst [vmem:[#allocation234_spill] sm:$0xff] %v15537_v51  ;;  %18404 = vst [vmem:[#allocation235_spill] sm:$0xff] %v15542_v7 }
 0x158   : > { %11835 = vmatprep.mubr.msk.bf16.mxu1 %vm993_vm3, %v18399_v52  ;;  %v18403_v52 = vld [vmem:[#allocation33_spill] sm:$0xff] }
 0x15b   : > { %12452 = vmatmul.mubr.msk.bf16.gmra.mrb[88].mxu0 %vm993_vm3, %v15521_v35  ;;  %v5671_v35 = vrot.slane %v15066_v10, 2 }
 0x15c   : > { %12455 = vmatprep.mubr.msk.bf16.mxu0 %vm993_vm3, %v15526_v54  ;;  %v5669_v54 = vrot.slane %v15054_v32, 2 }
 0x15e   : > { %v15553_v24 = vsel %vm5569_vm5, %v5667_v37, %v5669_v54  ;;  %v15558_v26 = vsel %vm5569_vm5, %v5669_v54, %v5671_v35 }
 0x15f   : > { %11836 = vmatmul.mubr.msk.bf16.gmra.mrb[24].mxu1 %vm993_vm3, %v18401_v11  ;;  %v18405_v11 = vld [vmem:[#allocation34_spill] sm:$0xff]  ;;  %18406 = vst [vmem:[#allocation236_spill] sm:$0xff] %v15553_v24  ;;  %18408 = vst [vmem:[#allocation237_spill] sm:$0xff] %v15558_v26 }
 0x160   : > { %11839 = vmatprep.mubr.msk.bf16.mxu1 %vm993_vm3, %v18403_v52  ;;  %v18407_v52 = vld [vmem:[#allocation39_spill] sm:$0xff] }
 0x163   : > { %12456 = vmatmul.mubr.msk.bf16.gmra.mrb[92].mxu0 %vm993_vm3, %v15537_v51  ;;  %v5675_v51 = vrot.slane %v15106_v20, 2 }
 0x164   : > { %12459 = vmatprep.mubr.msk.bf16.mxu0 %vm993_vm3, %v15542_v7  ;;  %v5673_v7 = vrot.slane %v15094_v46, 2 }
 0x166   : > { %v15569_v37 = vsel %vm5569_vm5, %v5671_v35, %v5673_v7  ;;  %v15574_v54 = vsel %vm5569_vm5, %v5673_v7, %v5675_v51 }
 0x167   : > { %11840 = vmatmul.mubr.msk.bf16.gmra.mrb[28].mxu1 %vm993_vm3, %v18405_v11  ;;  %v18409_v11 = vld [vmem:[#allocation40_spill] sm:$0xff]  ;;  %18410 = vst [vmem:[#allocation238_spill] sm:$0xff] %v15569_v37  ;;  %18412 = vst [vmem:[#allocation239_spill] sm:$0xff] %v15574_v54 }
 0x168   : > { %11843 = vmatprep.mubr.msk.bf16.mxu1 %vm993_vm3, %v18407_v52  ;;  %v18411_v52 = vld [vmem:[#allocation45_spill] sm:$0xff] }
 0x16b   : > { %12460 = vmatmul.mubr.msk.bf16.gmra.mrb[96].mxu0 %vm993_vm3, %v15553_v24  ;;  %v5679_v24 = vrot.slane %v15146_v38, 2 }
 0x16c   : > { %12463 = vmatprep.mubr.msk.bf16.mxu0 %vm993_vm3, %v15558_v26  ;;  %v5677_v26 = vrot.slane %v15134_v19, 2 }
 0x16e   : > { %v15585_v35 = vsel %vm5569_vm5, %v5675_v51, %v5677_v26  ;;  %v15590_v7 = vsel %vm5569_vm5, %v5677_v26, %v5679_v24 }
 0x16f   : > { %11844 = vmatmul.mubr.msk.bf16.gmra.mrb[32].mxu1 %vm993_vm3, %v18409_v11  ;;  %v18413_v11 = vld [vmem:[#allocation46_spill] sm:$0xff]  ;;  %18414 = vst [vmem:[#allocation240_spill] sm:$0xff] %v15585_v35  ;;  %18416 = vst [vmem:[#allocation241_spill] sm:$0xff] %v15590_v7 }
 0x170   : > { %11847 = vmatprep.mubr.msk.bf16.mxu1 %vm993_vm3, %v18411_v52  ;;  %v18415_v52 = vld [vmem:[#allocation51_spill] sm:$0xff] }
 0x173   : > { %12464 = vmatmul.mubr.msk.bf16.gmra.mrb[100].mxu0 %vm993_vm3, %v15569_v37  ;;  %v5683_v37 = vrot.slane %v15186_v60, 2 }
 0x174   : > { %12467 = vmatprep.mubr.msk.bf16.mxu0 %vm993_vm3, %v15574_v54  ;;  %v5681_v54 = vrot.slane %v15174_v16, 2 }
 0x176   : > { %v15601_v51 = vsel %vm5569_vm5, %v5679_v24, %v5681_v54  ;;  %v15606_v26 = vsel %vm5569_vm5, %v5681_v54, %v5683_v37 }
 0x177   : > { %11848 = vmatmul.mubr.msk.bf16.gmra.mrb[36].mxu1 %vm993_vm3, %v18413_v11  ;;  %v18417_v11 = vld [vmem:[#allocation52_spill] sm:$0xff]  ;;  %18418 = vst [vmem:[#allocation242_spill] sm:$0xff] %v15601_v51  ;;  %18420 = vst [vmem:[#allocation243_spill] sm:$0xff] %v15606_v26 }
 0x178   : > { %11851 = vmatprep.mubr.msk.bf16.mxu1 %vm993_vm3, %v18415_v52  ;;  %v18419_v52 = vld [vmem:[#allocation57_spill] sm:$0xff] }
 0x17b   : > { %12468 = vmatmul.mubr.msk.bf16.gmra.mrb[104].mxu0 %vm993_vm3, %v15585_v35  ;;  %v5687_v35 = vrot.slane %v15226_v50, 2 }
 0x17c   : > { %12471 = vmatprep.mubr.msk.bf16.mxu0 %vm993_vm3, %v15590_v7  ;;  %v5685_v7 = vrot.slane %v15214_v1, 2 }
 0x17e   : > { %v15617_v24 = vsel %vm5569_vm5, %v5683_v37, %v5685_v7  ;;  %v15622_v54 = vsel %vm5569_vm5, %v5685_v7, %v5687_v35 }
 0x17f   : > { %11852 = vmatmul.mubr.msk.bf16.gmra.mrb[40].mxu1 %vm993_vm3, %v18417_v11  ;;  %v18421_v11 = vld [vmem:[#allocation58_spill] sm:$0xff]  ;;  %18422 = vst [vmem:[#allocation244_spill] sm:$0xff] %v15617_v24  ;;  %18424 = vst [vmem:[#allocation245_spill] sm:$0xff] %v15622_v54 }
 0x180   : > { %11855 = vmatprep.mubr.msk.bf16.mxu1 %vm993_vm3, %v18419_v52  ;;  %v18423_v52 = vld [vmem:[#allocation63_spill] sm:$0xff] }
 0x183   : > { %12472 = vmatmul.mubr.msk.bf16.gmra.mrb[108].mxu0 %vm993_vm3, %v15601_v51  ;;  %v5691_v51 = vrot.slane %v15266_v45, 2 }
 0x184   : > { %12475 = vmatprep.mubr.msk.bf16.mxu0 %vm993_vm3, %v15606_v26  ;;  %v5689_v26 = vrot.slane %v15254_v48, 2 }
 0x186   : > { %v15633_v37 = vsel %vm5569_vm5, %v5687_v35, %v5689_v26  ;;  %v15638_v7 = vsel %vm5569_vm5, %v5689_v26, %v5691_v51 }
 0x187   : > { %11856 = vmatmul.mubr.msk.bf16.gmra.mrb[44].mxu1 %vm993_vm3, %v18421_v11  ;;  %v18425_v11 = vld [vmem:[#allocation64_spill] sm:$0xff]  ;;  %18426 = vst [vmem:[#allocation246_spill] sm:$0xff] %v15633_v37  ;;  %18428 = vst [vmem:[#allocation247_spill] sm:$0xff] %v15638_v7 }
 0x188   : > { %11859 = vmatprep.mubr.msk.bf16.mxu1 %vm993_vm3, %v18423_v52  ;;  %v18427_v52 = vld [vmem:[#allocation69_spill] sm:$0xff] }
 0x18b   : > { %12476 = vmatmul.mubr.msk.bf16.gmra.mrb[112].mxu0 %vm993_vm3, %v15617_v24 }
 0x18c   : > { %12479 = vmatprep.mubr.msk.bf16.mxu0 %vm993_vm3, %v15622_v54  ;;  %v18429_v54 = vld [vmem:[#allocation206_spill] sm:$0xff] }
 0x18d   : > { %v5693_v24 = vrot.slane %v18429_v54, 2 }
 0x18f   : > { %11860 = vmatmul.mubr.msk.bf16.gmra.mrb[48].mxu1 %vm993_vm3, %v18425_v11  ;;  %v5695_v11 = vrot.slane %v15306_v59, 2  ;;  %v15649_v35 = vsel %vm5569_vm5, %v5691_v51, %v5693_v24  ;;  %v361_v51 = vld [vmem:[%s14127_s27 + $0x450] sm:$0xff] }
 0x190   : > { %11863 = vmatprep.mubr.msk.bf16.mxu1 %vm993_vm3, %v18427_v52  ;;  %18431 = vst [vmem:[#allocation248_spill] sm:$0xff] %v15649_v35  ;;  %v18432_v52 = vld [vmem:[#allocation75_spill] sm:$0xff] }
 0x191   : > { %v15654_v26 = vsel %vm5569_vm5, %v5693_v24, %v5695_v11 }
 0x192   : > { %18433 = vst [vmem:[#allocation249_spill] sm:$0xff] %v15654_v26 }
 0x193   : > { %12480 = vmatmul.mubr.msk.bf16.gmra.mrb[116].mxu0 %vm993_vm3, %v15633_v37  ;;  %v5699_v37 = vrot.slane %v15346_v8, 2 }
 0x194   : > { %12483 = vmatprep.mubr.msk.bf16.mxu0 %vm993_vm3, %v15638_v7  ;;  %v5697_v7 = vrot.slane %v15334_v5, 2 }
 0x196   : > { %v15667_v24 = vsel %vm5569_vm5, %v5695_v11, %v5697_v7  ;;  %v363_v11 = vld [vmem:[%s14127_s27 + $0x460] sm:$0xff] }
 0x197   : > { %11864 = vmatmul.mubr.msk.bf16.gmra.mrb[52].mxu1 %vm993_vm3, %v18430_v0  ;;  %v362_v0 = vld [vmem:[%s14127_s27 + $0x458] sm:$0xff] }
 0x198   : > { %11867 = vmatprep.mubr.msk.bf16.mxu1 %vm993_vm3, %v18432_v52  ;;  %v18435_v52 = vld [vmem:[#allocation81_spill] sm:$0xff]  ;;  %v15674_v33 = vpack.c.bf16 %v362_v0, %v361_v51  ;;  %v15691_v0 = vpack.c.bf16 %v364_v57, %v363_v11  ;;  %v18438_v57 = vld [vmem:[#allocation112_spill] sm:$0xff] }
 0x199   : > { %v18440_v11 = vld [vmem:[#allocation120_spill] sm:$0xff] }
 0x19a   : > { %18436 = vst [vmem:[#allocation250_spill] sm:$0xff] %v15674_v33 }
 0x19b   : > { %12484 = vmatmul.mubr.msk.bf16.gmra.mrb[120].mxu0 %vm993_vm3, %v15649_v35  ;;  %v15672_v35 = vsel %vm5569_vm5, %v5697_v7, %v5699_v37 }
 0x19c   : > { %12487 = vmatprep.mubr.msk.bf16.mxu0 %vm993_vm3, %v15654_v26  ;;  %v5701_v26 = vrot.slane %v15377_v13, 2 }
 0x19e   : > { %v15687_v7 = vsel %vm5569_vm5, %v5699_v37, %v5701_v26 }
 0x19f   : > { %11868 = vmatmul.mubr.msk.bf16.gmra.mrb[56].mxu1 %vm993_vm3, %v18434_v36  ;;  %v5703_v36 = vrot.slane %v15674_v33, 2  ;;  %v18090_v33 = vrot.slane %v15691_v0, 2 }
 0x1a0   : > { %11871 = vmatprep.mubr.msk.bf16.mxu1 %vm993_vm3, %v18435_v52 }
 0x1a1   : > { %v15694_v51 = vsel %vm5569_vm5, %v5701_v26, %v5703_v36  ;;  %v15706_v37 = vsel %vm5569_vm5, %v5703_v36, %v18090_v33  ;;  %v18439_v26 = vld [vmem:[#allocation119_spill] sm:$0xff]  ;;  %v10633_v36 = vld [vmem:[%s17779_s1 + $0x6] sm:$0x3]  ;;  %v18442_v33 = vld [vmem:[#allocation128_spill] sm:$0xff] }
 0x1a3   : > { %12488 = vmatmul.mubr.msk.bf16.gmra.mrb[124].mxu0 %vm993_vm3, %v15667_v24 }
 0x1a4   : > { %12491 = vmatprep.mubr.msk.bf16.mxu0 %vm993_vm3, %v15672_v35 }
 0x1a7   : > { %11872 = vmatmul.mubr.msk.bf16.gmra.mrb[60].mxu1 %vm993_vm3, %v18437_v34 }
 0x1a8   : > { %11875 = vmatprep.mubr.msk.bf16.mxu1 %vm993_vm3, %v14658_v53 }
 0x1ab   : > { %12492 = vmatmul.mubr.msk.bf16.gmra.mrb[128].mxu0 %vm993_vm3, %v15687_v7 }
 0x1ac   : > { %12495 = vmatprep.mubr.msk.bf16.mxu0 %vm993_vm3, %v15694_v51 }
 0x1af   : > { %11876 = vmatmul.mubr.msk.bf16.gmra.mrb[64].mxu1 %vm993_vm3, %v14663_v63 }
 0x1b0   : > { %11879 = vmatprep.mubr.msk.bf16.mxu1 %vm993_vm3, %v14694_v42 }
 0x1b3   : > { %12496 = vmatmul.mubr.msk.bf16.gmra.mrb[132].mxu0 %vm993_vm3, %v15706_v37 }
 0x1b4   : > { %12501 = vmatprep.mubr.msk.bf16.mxu0 %vm993_vm3, %v18438_v57  ;;  %v15727_v57 = vand.u32 %v10633_v36, %v14101_v4  ;;  %v18444_v36 = vld [vmem:[#allocation136_spill] sm:$0xff] }
 0x1b6   : > { %12085 = vmatprep.subr.bf16.mxu1 %v15727_v57 }
 0x1b7   : > { %11880 = vmatmul.mubr.msk.bf16.gmra.mrb[68].mxu1 %vm993_vm3, %v14699_v27 }
 0x1b8   : > { %11883 = vmatprep.mubr.msk.bf16.mxu1 %vm993_vm3, %v14727_v44 }
 0x1bb   : > { %12502 = vmatmul.mubr.msk.bf16.vlgmr.msra.gmra.mrb[0].mxu0 %vm993_vm3, %v18439_v26  ;;  %v18441_v26 = vld [vmem:[#allocation127_spill] sm:$0xff] }
 0x1bc   : > { %12638 = vmatpush3.bf16.msra.mxu0 %v15451_v17  ;;  %12505 = vmatprep.mubr.msk.bf16.mxu0 %vm993_vm3, %v18440_v11  ;;  %v18443_v17 = vld [vmem:[#allocation135_spill] sm:$0xff] }
 0x1bd   : > { %v18445_v11 = vld [vmem:[#allocation143_spill] sm:$0xff] }
 0x1bf   : > { %11884 = vmatmul.mubr.msk.bf16.gmra.mrb[72].mxu1 %vm993_vm3, %v14755_v23 }
 0x1c0   : > { %11887 = vmatprep.mubr.msk.bf16.mxu1 %vm993_vm3, %v14774_v12 }
 0x1c3   : > { %12506 = vmatmul.mubr.msk.bf16.gmra.mrb[4].mxu0 %vm993_vm3, %v18441_v26  ;;  %v18447_v26 = vld [vmem:[#allocation151_spill] sm:$0xff] }
 0x1c4   : > { %12509 = vmatprep.mubr.msk.bf16.mxu0 %vm993_vm3, %v18442_v33  ;;  %v18446_v33 = vld [vmem:[#allocation144_spill] sm:$0xff] }
 0x1c7   : > { %11888 = vmatmul.mubr.msk.bf16.gmra.mrb[76].mxu1 %vm993_vm3, %v14783_v2 }
 0x1c8   : > { %11891 = vmatprep.mubr.msk.bf16.mxu1 %vm993_vm3, %v14809_v62 }
 0x1cb   : > { %12510 = vmatmul.mubr.msk.bf16.gmra.mrb[8].mxu0 %vm993_vm3, %v18443_v17  ;;  %v18448_v17 = vld [vmem:[#allocation152_spill] sm:$0xff] }
 0x1cc   : > { %12513 = vmatprep.mubr.msk.bf16.mxu0 %vm993_vm3, %v18444_v36  ;;  %v18449_v36 = vld [vmem:[#allocation159_spill] sm:$0xff] }
 0x1cf   : > { %11892 = vmatmul.mubr.msk.bf16.gmra.mrb[80].mxu1 %vm993_vm3, %v14819_v3 }
 0x1d0   : > { %11895 = vmatprep.mubr.msk.bf16.mxu1 %vm993_vm3, %v14850_v6 }
 0x1d3   : > { %12514 = vmatmul.mubr.msk.bf16.gmra.mrb[12].mxu0 %vm993_vm3, %v18445_v11  ;;  %v18450_v11 = vld [vmem:[#allocation160_spill] sm:$0xff] }
 0x1d4   : > { %12517 = vmatprep.mubr.msk.bf16.mxu0 %vm993_vm3, %v18446_v33  ;;  %v18451_v33 = vld [vmem:[#allocation167_spill] sm:$0xff] }
 0x1d7   : > { %11896 = vmatmul.mubr.msk.bf16.gmra.mrb[84].mxu1 %vm993_vm3, %v14865_v47 }
 0x1d8   : > { %11899 = vmatprep.mubr.msk.bf16.mxu1 %vm993_vm3, %v14894_v39 }
 0x1db   : > { %12518 = vmatmul.mubr.msk.bf16.gmra.mrb[16].mxu0 %vm993_vm3, %v18447_v26  ;;  %v18452_v26 = vld [vmem:[#allocation168_spill] sm:$0xff] }
 0x1dc   : > { %12521 = vmatprep.mubr.msk.bf16.mxu0 %vm993_vm3, %v18448_v17  ;;  %v18453_v17 = vld [vmem:[#allocation175_spill] sm:$0xff] }
 0x1df   : > { %11900 = vmatmul.mubr.msk.bf16.gmra.mrb[88].mxu1 %vm993_vm3, %v14906_v43 }
 0x1e0   : > { %11903 = vmatprep.mubr.msk.bf16.mxu1 %vm993_vm3, %v14934_v56 }
 0x1e3   : > { %12522 = vmatmul.mubr.msk.bf16.gmra.mrb[20].mxu0 %vm993_vm3, %v18449_v36  ;;  %v18454_v36 = vld [vmem:[#allocation176_spill] sm:$0xff] }
 0x1e4   : > { %12525 = vmatprep.mubr.msk.bf16.mxu0 %vm993_vm3, %v18450_v11  ;;  %v18455_v11 = vld [vmem:[#allocation183_spill] sm:$0xff] }
 0x1e7   : > { %11904 = vmatmul.mubr.msk.bf16.gmra.mrb[92].mxu1 %vm993_vm3, %v14946_v14 }
 0x1e8   : > { %11907 = vmatprep.mubr.msk.bf16.mxu1 %vm993_vm3, %v14974_v29 }
 0x1eb   : > { %12526 = vmatmul.mubr.msk.bf16.gmra.mrb[24].mxu0 %vm993_vm3, %v18451_v33  ;;  %v18456_v33 = vld [vmem:[#allocation184_spill] sm:$0xff] }
 0x1ec   : > { %12529 = vmatprep.mubr.msk.bf16.mxu0 %vm993_vm3, %v18452_v26  ;;  %v18457_v26 = vld [vmem:[#allocation191_spill] sm:$0xff] }
 0x1ef   : > { %11908 = vmatmul.mubr.msk.bf16.gmra.mrb[96].mxu1 %vm993_vm3, %v14986_v30 }
 0x1f0   : > { %11911 = vmatprep.mubr.msk.bf16.mxu1 %vm993_vm3, %v15014_v22 }
 0x1f3   : > { %12530 = vmatmul.mubr.msk.bf16.gmra.mrb[28].mxu0 %vm993_vm3, %v18453_v17  ;;  %v18458_v17 = vld [vmem:[#allocation192_spill] sm:$0xff] }
 0x1f4   : > { %12533 = vmatprep.mubr.msk.bf16.mxu0 %vm993_vm3, %v18454_v36  ;;  %v18459_v36 = vld [vmem:[#allocation199_spill] sm:$0xff] }
 0x1f7   : > { %11912 = vmatmul.mubr.msk.bf16.gmra.mrb[100].mxu1 %vm993_vm3, %v15026_v28 }
 0x1f8   : > { %11915 = vmatprep.mubr.msk.bf16.mxu1 %vm993_vm3, %v15054_v32 }
 0x1fb   : > { %12534 = vmatmul.mubr.msk.bf16.gmra.mrb[32].mxu0 %vm993_vm3, %v18455_v11  ;;  %v18460_v11 = vld [vmem:[#allocation200_spill] sm:$0xff] }
 0x1fc   : > { %12537 = vmatprep.mubr.msk.bf16.mxu0 %vm993_vm3, %v18456_v33  ;;  %v18461_v33 = vld [vmem:[#allocation207_spill] sm:$0xff] }
 0x1ff   : > { %11916 = vmatmul.mubr.msk.bf16.gmra.mrb[104].mxu1 %vm993_vm3, %v15066_v10 }
 0x200   : > { %11919 = vmatprep.mubr.msk.bf16.mxu1 %vm993_vm3, %v15094_v46 }
 0x203   : > { %12538 = vmatmul.mubr.msk.bf16.gmra.mrb[36].mxu0 %vm993_vm3, %v18457_v26  ;;  %v18462_v26 = vld [vmem:[#allocation208_spill] sm:$0xff] }
 0x204   : > { %12541 = vmatprep.mubr.msk.bf16.mxu0 %vm993_vm3, %v18458_v17  ;;  %v18463_v17 = vld [vmem:[#allocation215_spill] sm:$0xff] }
 0x207   : > { %11920 = vmatmul.mubr.msk.bf16.gmra.mrb[108].mxu1 %vm993_vm3, %v15106_v20 }
 0x208   : > { %11923 = vmatprep.mubr.msk.bf16.mxu1 %vm993_vm3, %v15134_v19 }
 0x20b   : > { %12542 = vmatmul.mubr.msk.bf16.gmra.mrb[40].mxu0 %vm993_vm3, %v18459_v36  ;;  %v18464_v36 = vld [vmem:[#allocation216_spill] sm:$0xff] }
 0x20c   : > { %12545 = vmatprep.mubr.msk.bf16.mxu0 %vm993_vm3, %v18460_v11 }
 0x20f   : > { %11924 = vmatmul.mubr.msk.bf16.gmra.mrb[112].mxu1 %vm993_vm3, %v15146_v38 }
 0x210   : > { %11927 = vmatprep.mubr.msk.bf16.mxu1 %vm993_vm3, %v15174_v16 }
 0x213   : > { %12546 = vmatmul.mubr.msk.bf16.gmra.mrb[44].mxu0 %vm993_vm3, %v18461_v33  ;;  %v18468_v33 = vld [vmem:[#allocation224_spill] sm:$0xff] }
 0x214   : > { %12549 = vmatprep.mubr.msk.bf16.mxu0 %vm993_vm3, %v18462_v26 }
 0x217   : > { %11928 = vmatmul.mubr.msk.bf16.gmra.mrb[116].mxu1 %vm993_vm3, %v15186_v60 }
 0x218   : > { %11931 = vmatprep.mubr.msk.bf16.mxu1 %vm993_vm3, %v15214_v1 }
 0x21b   : > { %12550 = vmatmul.mubr.msk.bf16.gmra.mrb[48].mxu0 %vm993_vm3, %v18463_v17 }
 0x21c   : > { %12553 = vmatprep.mubr.msk.bf16.mxu0 %vm993_vm3, %v18464_v36 }
 0x21f   : > { %11932 = vmatmul.mubr.msk.bf16.gmra.mrb[120].mxu1 %vm993_vm3, %v15226_v50 }
 0x220   : > { %11935 = vmatprep.mubr.msk.bf16.mxu1 %vm993_vm3, %v15254_v48 }
 0x223   : > { %12554 = vmatmul.mubr.msk.bf16.gmra.mrb[52].mxu0 %vm993_vm3, %v15373_v41  ;;  %v2571_v41 = vrot.slane %v14139_v18, 1 }
 0x224   : > { %12557 = vmatprep.mubr.msk.bf16.mxu0 %vm993_vm3, %v15380_v49  ;;  %v2570_v49 = vrot.slane %v14135_v15, 1  ;;  %v2575_v15 = vrot.slane %v14148_v25, 1 }
 0x227   : > { %11936 = vmatmul.mubr.msk.bf16.gmra.mrb[124].mxu1 %vm993_vm3, %v15266_v45 }
 0x228   : > { %11939 = vmatprep.mubr.msk.bf16.mxu1 %vm993_vm3, %v18429_v54 }
 0x22b   : > { %12558 = vmatmul.mubr.msk.bf16.gmra.mrb[56].mxu0 %vm993_vm3, %v15400_v31  ;;  %v2572_v31 = vsel %vm2569_vm6, %v2570_v49, %v2571_v41  ;;  %v18470_v49 = vld [vmem:[#allocation7_spill] sm:$0xff] }
 0x22c   : > { %12561 = vmatprep.mubr.msk.bf16.mxu0 %vm993_vm3, %v15406_v58  ;;  %v2573_v58 = vrot.slane %v14143_v21, 1  ;;  %v18465_v21 = vld [vmem:[#allocation3_spill] sm:$0xff] }
 0x22d   : > { %v2577_v25 = vrot.slane %v18465_v21, 1  ;;  %v18486_v21 = vld [vmem:[#allocation28_spill] sm:$0xff] }
 0x22e   : > { %v2574_v18 = vsel %vm2569_vm6, %v2571_v41, %v2573_v58  ;;  %v2581_v41 = vrot.slane %v18470_v49, 1  ;;  %v18480_v49 = vld [vmem:[#allocation23_spill] sm:$0xff] }
 0x22f   : > { %11940 = vmatmul.mubr.msk.bf16.gmra.mrb[128].mxu1 %vm993_vm3, %v15306_v59  ;;  %v15878_v26 = vsel %vm2569_vm6, %v2575_v15, %v2577_v25 }
 0x230   : > { %11943 = vmatprep.mubr.msk.bf16.mxu1 %vm993_vm3, %v15334_v5 }
 0x233   : > { %12562 = vmatmul.mubr.msk.bf16.gmra.mrb[60].mxu0 %vm993_vm3, %v15417_v55  ;;  %v15864_v55 = vsel %vm2569_vm6, %v2573_v58, %v2575_v15  ;;  %v18472_v15 = vld [vmem:[#allocation226_spill] sm:$0xff] }
 0x234   : > { %12565 = vmatprep.mubr.msk.bf16.mxu0 %vm993_vm3, %v15422_v9  ;;  %v18466_v9 = vld [vmem:[#allocation6_spill] sm:$0xff] }
 0x235   : > { %v2579_v11 = vrot.slane %v18466_v9, 1  ;;  %v2591_v9 = vrot.slane %v18480_v49, 1 }
 0x237   : > { %11944 = vmatmul.mubr.msk.bf16.gmra.mrb[132].mxu1 %vm993_vm3, %v15346_v8  ;;  %v15884_v17 = vsel %vm2569_vm6, %v2577_v25, %v2579_v11 }
 0x238   : > { %11949 = vmatprep.mubr.msk.bf16.mxu1 %vm993_vm3, %v2572_v31  ;;  %v18471_v31 = vld [vmem:[#allocation12_spill] sm:$0xff] }
 0x239   : > { %v2583_v58 = vrot.slane %v18471_v31, 1 }
 0x23b   : > { %12566 = vmatmul.mubr.msk.bf16.gmra.mrb[64].mxu0 %vm993_vm3, %v15434_v61  ;;  %v18467_v61 = vld [vmem:[#allocation2_spill] sm:$0xff]  ;;  %v15904_v25 = vsel %vm2569_vm6, %v2581_v41, %v2583_v58 }
 0x23c   : > { %12569 = vmatprep.mubr.msk.bf16.mxu0 %vm993_vm3, %v15439_v40  ;;  %v18469_v40 = vld [vmem:[#allocation225_spill] sm:$0xff] }
 0x23f   : > { %11950 = vmatmul.mubr.msk.bf16.vlgmr.msra.gmra.mrb[0].mxu1 %vm993_vm3, %v2574_v18  ;;  %v18473_v18 = vld [vmem:[#allocation227_spill] sm:$0xff] }
 0x240   : > { %12086 = vmatpush3.bf16.msra.mxu1 %v15727_v57  ;;  %11953 = vmatprep.mubr.msk.bf16.mxu1 %vm993_vm3, %v15864_v55  ;;  %v10978_v57 = vld [vmem:[%s17779_s1 + $0x10] sm:$0x3] }
 0x241   : > { %12913 = vmatprep.subr.bf16.mxu1 %v18467_v61  ;;  %v15887_v36 = vand.u32 %v10978_v57, %v14101_v4  ;;  %v15901_v4 = vsel %vm2569_vm6, %v2579_v11, %v2581_v41  ;;  %v18475_v57 = vld [vmem:[#allocation18_spill] sm:$0xff] }
 0x242   : > { %v2587_v31 = vrot.slane %v18475_v57, 1 }
 0x243   : > { %12570 = vmatmul.mubr.msk.bf16.gmra.mrb[68].mxu0 %vm993_vm3, %v18468_v33  ;;  %12775 = vmatprep.subr.bf16.mxu0 %v15887_v36  ;;  %v18474_v33 = vld [vmem:[#allocation15_spill] sm:$0xff] }
 0x244   : > { %12573 = vmatprep.mubr.msk.bf16.mxu0 %vm993_vm3, %v18469_v40  ;;  %v2585_v40 = vrot.slane %v18474_v33, 1  ;;  %v18479_v33 = vld [vmem:[#allocation19_spill] sm:$0xff] }
 0x245   : > { %v2589_v57 = vrot.slane %v18479_v33, 1  ;;  %v18485_v33 = vld [vmem:[#allocation27_spill] sm:$0xff] }
 0x246   : > { %v15917_v11 = vsel %vm2569_vm6, %v2583_v58, %v2585_v40  ;;  %v15920_v41 = vsel %vm2569_vm6, %v2585_v40, %v2587_v31  ;;  %v2593_v49 = vrot.slane %v18485_v33, 1  ;;  %v18491_v33 = vld [vmem:[#allocation33_spill] sm:$0xff] }
 0x247   : > { %11954 = vmatmul.mubr.msk.bf16.gmra.mrb[4].mxu1 %vm993_vm3, %v15878_v26  ;;  %18478 = vst [vmem:[#allocation112_spill] sm:$0xff] %v15920_v41  ;;  %v15933_v58 = vsel %vm2569_vm6, %v2587_v31, %v2589_v57  ;;  %v15936_v40 = vsel %vm2569_vm6, %v2589_v57, %v2591_v9 }
 0x248   : > { %11957 = vmatprep.mubr.msk.bf16.mxu1 %vm993_vm3, %v15884_v17  ;;  %18483 = vst [vmem:[#allocation119_spill] sm:$0xff] %v15933_v58  ;;  %18484 = vst [vmem:[#allocation120_spill] sm:$0xff] %v15936_v40  ;;  %v15949_v31 = vsel %vm2569_vm6, %v2591_v9, %v2593_v49 }
 0x249   : > { %18489 = vst [vmem:[#allocation127_spill] sm:$0xff] %v15949_v31 }
 0x24b   : > { %12574 = vmatmul.mubr.msk.bf16.gmra.mrb[72].mxu0 %vm993_vm3, %v18472_v15  ;;  %v18476_v15 = vld [vmem:[#allocation228_spill] sm:$0xff] }
 0x24c   : > { %12577 = vmatprep.mubr.msk.bf16.mxu0 %vm993_vm3, %v18473_v18  ;;  %v18477_v18 = vld [vmem:[#allocation229_spill] sm:$0xff] }
 0x24f   : > { %11958 = vmatmul.mubr.msk.bf16.gmra.mrb[8].mxu1 %vm993_vm3, %v15901_v4 }
 0x250   : > { %11961 = vmatprep.mubr.msk.bf16.mxu1 %vm993_vm3, %v15904_v25 }
 0x253   : > { %12578 = vmatmul.mubr.msk.bf16.gmra.mrb[76].mxu0 %vm993_vm3, %v18476_v15  ;;  %v18481_v15 = vld [vmem:[#allocation230_spill] sm:$0xff] }
 0x254   : > { %12581 = vmatprep.mubr.msk.bf16.mxu0 %vm993_vm3, %v18477_v18  ;;  %v18482_v18 = vld [vmem:[#allocation231_spill] sm:$0xff] }
 0x257   : > { %11962 = vmatmul.mubr.msk.bf16.gmra.mrb[12].mxu1 %vm993_vm3, %v15917_v11 }
 0x258   : > { %11965 = vmatprep.mubr.msk.bf16.mxu1 %vm993_vm3, %v15920_v41  ;;  %v2595_v41 = vrot.slane %v18486_v21, 1  ;;  %v2597_v21 = vrot.slane %v18491_v33, 1  ;;  %v18497_v33 = vld [vmem:[#allocation39_spill] sm:$0xff] }
 0x25a   : > { %v15952_v57 = vsel %vm2569_vm6, %v2593_v49, %v2595_v41  ;;  %v15965_v9 = vsel %vm2569_vm6, %v2595_v41, %v2597_v21 }
 0x25b   : > { %12582 = vmatmul.mubr.msk.bf16.gmra.mrb[80].mxu0 %vm993_vm3, %v18481_v15  ;;  %v18487_v15 = vld [vmem:[#allocation232_spill] sm:$0xff]  ;;  %18490 = vst [vmem:[#allocation128_spill] sm:$0xff] %v15952_v57  ;;  %18495 = vst [vmem:[#allocation135_spill] sm:$0xff] %v15965_v9 }
 0x25c   : > { %12585 = vmatprep.mubr.msk.bf16.mxu0 %vm993_vm3, %v18482_v18  ;;  %v18488_v18 = vld [vmem:[#allocation233_spill] sm:$0xff] }
 0x25f   : > { %11966 = vmatmul.mubr.msk.bf16.gmra.mrb[16].mxu1 %vm993_vm3, %v15933_v58 }
 0x260   : > { %11969 = vmatprep.mubr.msk.bf16.mxu1 %vm993_vm3, %v15936_v40  ;;  %v18492_v40 = vld [vmem:[#allocation34_spill] sm:$0xff] }
 0x261   : > { %v2599_v58 = vrot.slane %v18492_v40, 1  ;;  %v2601_v40 = vrot.slane %v18497_v33, 1  ;;  %v18503_v33 = vld [vmem:[#allocation45_spill] sm:$0xff] }
 0x263   : > { %12586 = vmatmul.mubr.msk.bf16.gmra.mrb[84].mxu0 %vm993_vm3, %v18487_v15  ;;  %v18493_v15 = vld [vmem:[#allocation234_spill] sm:$0xff]  ;;  %v15968_v49 = vsel %vm2569_vm6, %v2597_v21, %v2599_v58  ;;  %v15981_v41 = vsel %vm2569_vm6, %v2599_v58, %v2601_v40 }
 0x264   : > { %12589 = vmatprep.mubr.msk.bf16.mxu0 %vm993_vm3, %v18488_v18  ;;  %v18494_v18 = vld [vmem:[#allocation235_spill] sm:$0xff]  ;;  %18496 = vst [vmem:[#allocation136_spill] sm:$0xff] %v15968_v49  ;;  %18501 = vst [vmem:[#allocation143_spill] sm:$0xff] %v15981_v41 }
 0x267   : > { %11970 = vmatmul.mubr.msk.bf16.gmra.mrb[20].mxu1 %vm993_vm3, %v15949_v31 }
 0x268   : > { %11973 = vmatprep.mubr.msk.bf16.mxu1 %vm993_vm3, %v15952_v57  ;;  %v18498_v57 = vld [vmem:[#allocation40_spill] sm:$0xff] }
 0x269   : > { %v2603_v31 = vrot.slane %v18498_v57, 1  ;;  %v2605_v57 = vrot.slane %v18503_v33, 1  ;;  %v18509_v33 = vld [vmem:[#allocation51_spill] sm:$0xff] }
 0x26b   : > { %12590 = vmatmul.mubr.msk.bf16.gmra.mrb[88].mxu0 %vm993_vm3, %v18493_v15  ;;  %v18499_v15 = vld [vmem:[#allocation236_spill] sm:$0xff]  ;;  %v15984_v21 = vsel %vm2569_vm6, %v2601_v40, %v2603_v31  ;;  %v15997_v58 = vsel %vm2569_vm6, %v2603_v31, %v2605_v57 }
 0x26c   : > { %12593 = vmatprep.mubr.msk.bf16.mxu0 %vm993_vm3, %v18494_v18  ;;  %v18500_v18 = vld [vmem:[#allocation237_spill] sm:$0xff]  ;;  %18502 = vst [vmem:[#allocation144_spill] sm:$0xff] %v15984_v21  ;;  %18507 = vst [vmem:[#allocation151_spill] sm:$0xff] %v15997_v58 }
 0x26f   : > { %11974 = vmatmul.mubr.msk.bf16.gmra.mrb[24].mxu1 %vm993_vm3, %v15965_v9 }
 0x270   : > { %11977 = vmatprep.mubr.msk.bf16.mxu1 %vm993_vm3, %v15968_v49  ;;  %v18504_v49 = vld [vmem:[#allocation46_spill] sm:$0xff] }
 0x271   : > { %v2607_v9 = vrot.slane %v18504_v49, 1  ;;  %v2609_v49 = vrot.slane %v18509_v33, 1  ;;  %v18515_v33 = vld [vmem:[#allocation57_spill] sm:$0xff] }
 0x273   : > { %12594 = vmatmul.mubr.msk.bf16.gmra.mrb[92].mxu0 %vm993_vm3, %v18499_v15  ;;  %v18505_v15 = vld [vmem:[#allocation238_spill] sm:$0xff]  ;;  %v16000_v40 = vsel %vm2569_vm6, %v2605_v57, %v2607_v9  ;;  %v16013_v31 = vsel %vm2569_vm6, %v2607_v9, %v2609_v49 }
 0x274   : > { %12597 = vmatprep.mubr.msk.bf16.mxu0 %vm993_vm3, %v18500_v18  ;;  %v18506_v18 = vld [vmem:[#allocation239_spill] sm:$0xff]  ;;  %18508 = vst [vmem:[#allocation152_spill] sm:$0xff] %v16000_v40  ;;  %18513 = vst [vmem:[#allocation159_spill] sm:$0xff] %v16013_v31 }
 0x277   : > { %11978 = vmatmul.mubr.msk.bf16.gmra.mrb[28].mxu1 %vm993_vm3, %v15981_v41 }
 0x278   : > { %11981 = vmatprep.mubr.msk.bf16.mxu1 %vm993_vm3, %v15984_v21  ;;  %v18510_v21 = vld [vmem:[#allocation52_spill] sm:$0xff] }
 0x279   : > { %v2611_v41 = vrot.slane %v18510_v21, 1  ;;  %v2613_v21 = vrot.slane %v18515_v33, 1  ;;  %v18521_v33 = vld [vmem:[#allocation63_spill] sm:$0xff] }
 0x27b   : > { %12598 = vmatmul.mubr.msk.bf16.gmra.mrb[96].mxu0 %vm993_vm3, %v18505_v15  ;;  %v18511_v15 = vld [vmem:[#allocation240_spill] sm:$0xff]  ;;  %v16016_v57 = vsel %vm2569_vm6, %v2609_v49, %v2611_v41  ;;  %v16029_v9 = vsel %vm2569_vm6, %v2611_v41, %v2613_v21 }
 0x27c   : > { %12601 = vmatprep.mubr.msk.bf16.mxu0 %vm993_vm3, %v18506_v18  ;;  %v18512_v18 = vld [vmem:[#allocation241_spill] sm:$0xff]  ;;  %18514 = vst [vmem:[#allocation160_spill] sm:$0xff] %v16016_v57  ;;  %18519 = vst [vmem:[#allocation167_spill] sm:$0xff] %v16029_v9 }
 0x27f   : > { %11982 = vmatmul.mubr.msk.bf16.gmra.mrb[32].mxu1 %vm993_vm3, %v15997_v58 }
 0x280   : > { %11985 = vmatprep.mubr.msk.bf16.mxu1 %vm993_vm3, %v16000_v40  ;;  %v18516_v40 = vld [vmem:[#allocation58_spill] sm:$0xff] }
 0x281   : > { %v2615_v58 = vrot.slane %v18516_v40, 1  ;;  %v2617_v40 = vrot.slane %v18521_v33, 1  ;;  %v18527_v33 = vld [vmem:[#allocation69_spill] sm:$0xff] }
 0x283   : > { %12602 = vmatmul.mubr.msk.bf16.gmra.mrb[100].mxu0 %vm993_vm3, %v18511_v15  ;;  %v18517_v15 = vld [vmem:[#allocation242_spill] sm:$0xff]  ;;  %v16032_v49 = vsel %vm2569_vm6, %v2613_v21, %v2615_v58  ;;  %v16045_v41 = vsel %vm2569_vm6, %v2615_v58, %v2617_v40 }
 0x284   : > { %12605 = vmatprep.mubr.msk.bf16.mxu0 %vm993_vm3, %v18512_v18  ;;  %v18518_v18 = vld [vmem:[#allocation243_spill] sm:$0xff]  ;;  %18520 = vst [vmem:[#allocation168_spill] sm:$0xff] %v16032_v49  ;;  %18525 = vst [vmem:[#allocation175_spill] sm:$0xff] %v16045_v41 }
 0x287   : > { %11986 = vmatmul.mubr.msk.bf16.gmra.mrb[36].mxu1 %vm993_vm3, %v16013_v31 }
 0x288   : > { %11989 = vmatprep.mubr.msk.bf16.mxu1 %vm993_vm3, %v16016_v57  ;;  %v18522_v57 = vld [vmem:[#allocation64_spill] sm:$0xff] }
 0x289   : > { %v2619_v31 = vrot.slane %v18522_v57, 1  ;;  %v2621_v57 = vrot.slane %v18527_v33, 1 }
 0x28b   : > { %12606 = vmatmul.mubr.msk.bf16.gmra.mrb[104].mxu0 %vm993_vm3, %v18517_v15  ;;  %v18523_v15 = vld [vmem:[#allocation244_spill] sm:$0xff]  ;;  %v16048_v21 = vsel %vm2569_vm6, %v2617_v40, %v2619_v31  ;;  %v16061_v58 = vsel %vm2569_vm6, %v2619_v31, %v2621_v57  ;;  %v18534_v31 = vld [vmem:[#allocation249_spill] sm:$0xff] }
 0x28c   : > { %12609 = vmatprep.mubr.msk.bf16.mxu0 %vm993_vm3, %v18518_v18  ;;  %v18524_v18 = vld [vmem:[#allocation245_spill] sm:$0xff]  ;;  %18526 = vst [vmem:[#allocation176_spill] sm:$0xff] %v16048_v21 }
 0x28f   : > { %11990 = vmatmul.mubr.msk.bf16.gmra.mrb[40].mxu1 %vm993_vm3, %v16029_v9 }
 0x290   : > { %11993 = vmatprep.mubr.msk.bf16.mxu1 %vm993_vm3, %v16032_v49  ;;  %v18528_v49 = vld [vmem:[#allocation70_spill] sm:$0xff] }
 0x291   : > { %v2623_v9 = vrot.slane %v18528_v49, 1  ;;  %v18531_v49 = vld [vmem:[#allocation75_spill] sm:$0xff] }
 0x292   : > { %v2625_v33 = vrot.slane %v18531_v49, 1  ;;  %v2631_v49 = vrot.slane %v18437_v34, 1 }
 0x293   : > { %12610 = vmatmul.mubr.msk.bf16.gmra.mrb[108].mxu0 %vm993_vm3, %v18523_v15  ;;  %v18529_v15 = vld [vmem:[#allocation246_spill] sm:$0xff]  ;;  %v16064_v40 = vsel %vm2569_vm6, %v2621_v57, %v2623_v9 }
 0x294   : > { %12613 = vmatprep.mubr.msk.bf16.mxu0 %vm993_vm3, %v18524_v18  ;;  %v18530_v18 = vld [vmem:[#allocation247_spill] sm:$0xff]  ;;  %v16077_v57 = vsel %vm2569_vm6, %v2623_v9, %v2625_v33 }
 0x295   : > { %18535 = vst [vmem:[#allocation183_spill] sm:$0xff] %v16077_v57 }
 0x297   : > { %11994 = vmatmul.mubr.msk.bf16.gmra.mrb[44].mxu1 %vm993_vm3, %v16045_v41  ;;  %v18533_v41 = vld [vmem:[#allocation248_spill] sm:$0xff] }
 0x298   : > { %11997 = vmatprep.mubr.msk.bf16.mxu1 %vm993_vm3, %v16048_v21 }
 0x29b   : > { %12614 = vmatmul.mubr.msk.bf16.gmra.mrb[112].mxu0 %vm993_vm3, %v18529_v15  ;;  %v18532_v15 = vld [vmem:[#allocation76_spill] sm:$0xff] }
 0x29c   : > { %12617 = vmatprep.mubr.msk.bf16.mxu0 %vm993_vm3, %v18530_v18  ;;  %v2627_v21 = vrot.slane %v18532_v15, 1  ;;  %v2629_v15 = vrot.slane %v18435_v52, 1 }
 0x29e   : > { %v16080_v18 = vsel %vm2569_vm6, %v2625_v33, %v2627_v21  ;;  %v16093_v33 = vsel %vm2569_vm6, %v2627_v21, %v2629_v15  ;;  %v16096_v9 = vsel %vm2569_vm6, %v2629_v15, %v2631_v49 }
 0x29f   : > { %11998 = vmatmul.mubr.msk.bf16.gmra.mrb[48].mxu1 %vm993_vm3, %v16061_v58  ;;  %18536 = vst [vmem:[#allocation184_spill] sm:$0xff] %v16080_v18  ;;  %18537 = vst [vmem:[#allocation191_spill] sm:$0xff] %v16093_v33 }
 0x2a0   : > { %12001 = vmatprep.mubr.msk.bf16.mxu1 %vm993_vm3, %v16064_v40  ;;  %18538 = vst [vmem:[#allocation192_spill] sm:$0xff] %v16096_v9 }
 0x2a3   : > { %12618 = vmatmul.mubr.msk.bf16.gmra.mrb[116].mxu0 %vm993_vm3, %v18533_v41  ;;  %v365_v41 = vld [vmem:[%s14127_s27 + $0x470] sm:$0xff] }
 0x2a4   : > { %12621 = vmatprep.mubr.msk.bf16.mxu0 %vm993_vm3, %v18534_v31  ;;  %v366_v31 = vld [vmem:[%s14127_s27 + $0x478] sm:$0xff] }
 0x2a5   : > { %v16105_v34 = vpack.c.bf16 %v366_v31, %v365_v41  ;;  %v2639_v31 = vrot.slane %v14699_v27, 1 }
 0x2a7   : > { %12002 = vmatmul.mubr.msk.bf16.gmra.mrb[52].mxu1 %vm993_vm3, %v16077_v57  ;;  %18539 = vst [vmem:[#allocation199_spill] sm:$0xff] %v16105_v34  ;;  %v6631_v15 = vrot.slane %v16105_v34, 2 }
 0x2a8   : > { %12005 = vmatprep.mubr.msk.bf16.mxu1 %vm993_vm3, %v16080_v18 }
 0x2ab   : > { %12622 = vmatmul.mubr.msk.bf16.gmra.mrb[120].mxu0 %vm993_vm3, %v15667_v24  ;;  %v2633_v24 = vrot.slane %v14658_v53, 1  ;;  %v18544_v53 = vld [vmem:[#allocation4_spill] sm:$0xff] }
 0x2ac   : > { %12625 = vmatprep.mubr.msk.bf16.mxu0 %vm993_vm3, %v15672_v35  ;;  %v2635_v35 = vrot.slane %v14663_v63, 1  ;;  %v18543_v63 = vld [vmem:[#allocation5_spill] sm:$0xff]  ;;  %v7361_v34 = vrot.slane %v18544_v53, 3 }
 0x2ad   : > { %v16113_v21 = vsel %vm2569_vm6, %v2631_v49, %v2633_v24 }
 0x2ae   : > { %18540 = vst [vmem:[#allocation200_spill] sm:$0xff] %v16113_v21  ;;  %v16117_v52 = vsel %vm2569_vm6, %v2633_v24, %v2635_v35  ;;  %v7360_v24 = vrot.slane %v18543_v63, 2 }
 0x2af   : > { %12006 = vmatmul.mubr.msk.bf16.gmra.mrb[56].mxu1 %vm993_vm3, %v16093_v33  ;;  %v18545_v33 = vld [vmem:[#allocation9_spill] sm:$0xff] }
 0x2b0   : > { %12009 = vmatprep.mubr.msk.bf16.mxu1 %vm993_vm3, %v16096_v9  ;;  %v367_v9 = vld [vmem:[%s14127_s27 + $0x480] sm:$0x3f]  ;;  %v7363_v18 = vrot.slane %v18545_v33, 2  ;;  %v7362_v63 = vor.u32 %v7361_v34, %v7360_v24  ;;  %v18547_v33 = vld [vmem:[#allocation11_spill] sm:$0xff]  ;;  %v2643_v34 = vrot.slane %v14755_v23, 1  ;;  %v18550_v24 = vld [vmem:[#allocation13_spill] sm:$0xff] }
 0x2b1   : > { %v16128_v49 = vpack.c.bf16 %v367_v9, %v367_v9 }
 0x2b3   : > { %12626 = vmatmul.mubr.msk.bf16.gmra.mrb[124].mxu0 %vm993_vm3, %v15687_v7  ;;  %v18541_v7 = vrot.slane %v15691_v0, 2  ;;  %18542 = vst [vmem:[#allocation207_spill] sm:$0xff] %v16128_v49  ;;  %v6633_v9 = vrot.slane %v16128_v49, 2  ;;  %v7372_v49 = vrot.slane %v18550_v24, 3  ;;  %v18552_v24 = vld [vmem:[#allocation16_spill] sm:$0xff] }
 0x2b4   : > { %12629 = vmatprep.mubr.msk.bf16.mxu0 %vm993_vm3, %v15694_v51  ;;  %v2637_v51 = vrot.slane %v14694_v42, 1 }
 0x2b5   : > { %v6632_v41 = vsel %vm5569_vm5, %v18541_v7, %v6631_v15  ;;  %v6634_v53 = vsel %vm5569_vm5, %v6631_v15, %v6633_v9 }
 0x2b6   : > { %v16139_v7 = vsel %vm2569_vm6, %v2635_v35, %v2637_v51  ;;  %v16143_v27 = vsel %vm2569_vm6, %v2637_v51, %v2639_v31  ;;  %v7367_v35 = vrot.slane %v18547_v33, 2 }
 0x2b7   : > { %12010 = vmatmul.mubr.msk.bf16.gmra.mrb[60].mxu1 %vm993_vm3, %v16113_v21  ;;  %v18546_v21 = vld [vmem:[#allocation8_spill] sm:$0xff] }
 0x2b8   : > { %12013 = vmatprep.mubr.msk.bf16.mxu1 %vm993_vm3, %v16117_v52  ;;  %v7364_v57 = vrot.slane %v18546_v21, 3  ;;  %v18548_v21 = vld [vmem:[#allocation10_spill] sm:$0xff] }
 0x2ba   : > { %v7365_v42 = vor.u32 %v7364_v57, %v7363_v18  ;;  %v18549_v57 = vld [vmem:[#allocation14_spill] sm:$0xff] }
 0x2bb   : > { %12630 = vmatmul.mubr.msk.bf16.gmra.mrb[128].mxu0 %vm993_vm3, %v15706_v37  ;;  %v2641_v37 = vrot.slane %v14727_v44, 1  ;;  %v7371_v18 = vrot.slane %v18549_v57, 2  ;;  %v18551_v57 = vld [vmem:[#allocation17_spill] sm:$0xff] }
 0x2bc   : > { %12633 = vmatprep.mubr.msk.bf16.mxu0 %vm993_vm3, %v6632_v41  ;;  %v7368_v41 = vrot.slane %v18548_v21, 3  ;;  %v7366_v51 = vsel %vm7359_vm7, %v7362_v63, %v7365_v42 }
 0x2bd   : > { %v16160_v15 = vsel %vm2569_vm6, %v2639_v31, %v2641_v37  ;;  %v16163_v33 = vsel %vm2569_vm6, %v2641_v37, %v2643_v34  ;;  %v7373_v21 = vor.u32 %v7372_v49, %v7371_v18  ;;  %v7376_v31 = vrot.slane %v18552_v24, 3  ;;  %v18554_v18 = vld [vmem:[#allocation20_spill] sm:$0xff] }
 0x2be   : > { %v7369_v9 = vor.u32 %v7368_v41, %v7367_v35  ;;  %v2647_v37 = vrot.slane %v14783_v2, 1  ;;  %v18553_v41 = vld [vmem:[#allocation21_spill] sm:$0xff]  ;;  %v7380_v23 = vrot.slane %v18554_v18, 3  ;;  %v18556_v18 = vld [vmem:[#allocation22_spill] sm:$0xff] }
 0x2bf   : > { %12014 = vmatmul.mubr.msk.bf16.gmra.mrb[64].mxu1 %vm993_vm3, %v16139_v7  ;;  %v7379_v49 = vrot.slane %v18553_v41, 2 }
 0x2c0   : > { %12017 = vmatprep.mubr.msk.bf16.mxu1 %vm993_vm3, %v16143_v27  ;;  %v7370_v63 = vsel %vm7359_vm7, %v7365_v42, %v7369_v9  ;;  %v7374_v35 = vsel %vm7359_vm7, %v7369_v9, %v7373_v21 }
 0x2c1   : > { %v7381_v9 = vor.u32 %v7380_v23, %v7379_v49  ;;  %v18558_v49 = vld [vmem:[#allocation25_spill] sm:$0xff] }
 0x2c2   : > { %v7388_v2 = vrot.slane %v18558_v49, 3  ;;  %v18560_v49 = vld [vmem:[#allocation29_spill] sm:$0xff] }
 0x2c3   : > { %12634 = vmatmul.mubr.msk.bf16.gmra.mrb[132].mxu0 %vm993_vm3, %v6634_v53  ;;  %v2645_v53 = vrot.slane %v14774_v12, 1  ;;  %v18612_v12 = vld [vmem:[#allocation107_spill] sm:$0xff] }
 0x2c4   : > { %12639 = vmatprep.mubr.msk.bf16.mxu0 %vm993_vm3, %v7366_v51  ;;  %v7375_v51 = vrot.slane %v18551_v57, 2 }
 0x2c5   : > { %v16181_v42 = vsel %vm2569_vm6, %v2643_v34, %v2645_v53  ;;  %v16184_v24 = vsel %vm2569_vm6, %v2645_v53, %v2647_v37  ;;  %v7384_v34 = vrot.slane %v18556_v18, 3  ;;  %v2651_v53 = vrot.slane %v14819_v3, 1 }
 0x2c6   : > { %v7377_v57 = vor.u32 %v7376_v31, %v7375_v51  ;;  %v18557_v31 = vld [vmem:[#allocation26_spill] sm:$0xff] }
 0x2c7   : > { %12018 = vmatmul.mubr.msk.bf16.gmra.mrb[68].mxu1 %vm993_vm3, %v16160_v15  ;;  %v7387_v23 = vrot.slane %v18557_v31, 2  ;;  %v18559_v31 = vld [vmem:[#allocation30_spill] sm:$0xff] }
 0x2c8   : > { %12021 = vmatprep.mubr.msk.bf16.mxu1 %vm993_vm3, %v16163_v33  ;;  %v7378_v41 = vsel %vm7359_vm7, %v7373_v21, %v7377_v57  ;;  %v7382_v51 = vsel %vm7359_vm7, %v7377_v57, %v7381_v9 }
 0x2c9   : > { %v7389_v18 = vor.u32 %v7388_v2, %v7387_v23  ;;  %v18562_v23 = vld [vmem:[#allocation31_spill] sm:$0xff] }
 0x2ca   : > { %v7396_v3 = vrot.slane %v18562_v23, 3  ;;  %v18564_v23 = vld [vmem:[#allocation35_spill] sm:$0xff] }
 0x2cb   : > { %12640 = vmatmul.mubr.msk.bf16.vlgmr.msra.gmra.mrb[0].mxu0 %vm993_vm3, %v7370_v63  ;;  %v18555_v63 = vld [vmem:[#allocation24_spill] sm:$0xff] }
 0x2cc   : > { %12776 = vmatpush3.bf16.msra.mxu0 %v15887_v36  ;;  %12643 = vmatprep.mubr.msk.bf16.mxu0 %vm993_vm3, %v7374_v35  ;;  %v2649_v36 = vrot.slane %v14809_v62, 1  ;;  %v7383_v35 = vrot.slane %v18555_v63, 2 }
 0x2ce   : > { %v16201_v21 = vsel %vm2569_vm6, %v2647_v37, %v2649_v36  ;;  %v7385_v62 = vor.u32 %v7384_v34, %v7383_v35  ;;  %v16204_v63 = vsel %vm2569_vm6, %v2649_v36, %v2651_v53  ;;  %v7392_v37 = vrot.slane %v18560_v49, 3  ;;  %v18561_v34 = vld [vmem:[#allocation32_spill] sm:$0xff] }
 0x2cf   : > { %12022 = vmatmul.mubr.msk.bf16.gmra.mrb[72].mxu1 %vm993_vm3, %v16181_v42  ;;  %v2655_v36 = vrot.slane %v14865_v47, 1  ;;  %v7395_v2 = vrot.slane %v18561_v34, 2  ;;  %v18563_v34 = vld [vmem:[#allocation36_spill] sm:$0xff] }
 0x2d0   : > { %12025 = vmatprep.mubr.msk.bf16.mxu1 %vm993_vm3, %v16184_v24  ;;  %v7386_v57 = vsel %vm7359_vm7, %v7381_v9, %v7385_v62  ;;  %v7390_v35 = vsel %vm7359_vm7, %v7385_v62, %v7389_v18 }
 0x2d1   : > { %v7397_v49 = vor.u32 %v7396_v3, %v7395_v2  ;;  %v18566_v2 = vld [vmem:[#allocation37_spill] sm:$0xff] }
 0x2d2   : > { %v7404_v47 = vrot.slane %v18566_v2, 3  ;;  %v18568_v2 = vld [vmem:[#allocation41_spill] sm:$0xff] }
 0x2d3   : > { %12644 = vmatmul.mubr.msk.bf16.gmra.mrb[4].mxu0 %vm993_vm3, %v7378_v41  ;;  %v2653_v41 = vrot.slane %v14850_v6, 1 }
 0x2d4   : > { %12647 = vmatprep.mubr.msk.bf16.mxu0 %vm993_vm3, %v7382_v51  ;;  %v7391_v51 = vrot.slane %v18559_v31, 2 }
 0x2d5   : > { %v16221_v9 = vsel %vm2569_vm6, %v2651_v53, %v2653_v41  ;;  %v16224_v31 = vsel %vm2569_vm6, %v2653_v41, %v2655_v36  ;;  %v7400_v53 = vrot.slane %v18564_v23, 3  ;;  %v2659_v41 = vrot.slane %v14906_v43, 1 }
 0x2d6   : > { %v7393_v6 = vor.u32 %v7392_v37, %v7391_v51  ;;  %v18565_v37 = vld [vmem:[#allocation38_spill] sm:$0xff] }
 0x2d7   : > { %12026 = vmatmul.mubr.msk.bf16.gmra.mrb[76].mxu1 %vm993_vm3, %v16201_v21  ;;  %v7403_v3 = vrot.slane %v18565_v37, 2  ;;  %v18567_v37 = vld [vmem:[#allocation42_spill] sm:$0xff] }
 0x2d8   : > { %12029 = vmatprep.mubr.msk.bf16.mxu1 %vm993_vm3, %v16204_v63  ;;  %v7394_v62 = vsel %vm7359_vm7, %v7389_v18, %v7393_v6  ;;  %v7398_v51 = vsel %vm7359_vm7, %v7393_v6, %v7397_v49 }
 0x2d9   : > { %v7405_v23 = vor.u32 %v7404_v47, %v7403_v3  ;;  %v18570_v3 = vld [vmem:[#allocation43_spill] sm:$0xff] }
 0x2da   : > { %v7412_v43 = vrot.slane %v18570_v3, 3  ;;  %v18572_v3 = vld [vmem:[#allocation47_spill] sm:$0xff] }
 0x2db   : > { %12648 = vmatmul.mubr.msk.bf16.gmra.mrb[8].mxu0 %vm993_vm3, %v7386_v57  ;;  %v2657_v57 = vrot.slane %v14894_v39, 1 }
 0x2dc   : > { %12651 = vmatprep.mubr.msk.bf16.mxu0 %vm993_vm3, %v7390_v35  ;;  %v7399_v35 = vrot.slane %v18563_v34, 2 }
 0x2dd   : > { %v16241_v18 = vsel %vm2569_vm6, %v2655_v36, %v2657_v57  ;;  %v16244_v34 = vsel %vm2569_vm6, %v2657_v57, %v2659_v41  ;;  %v7408_v36 = vrot.slane %v18568_v2, 3  ;;  %v2663_v57 = vrot.slane %v14946_v14, 1 }
 0x2de   : > { %v7401_v39 = vor.u32 %v7400_v53, %v7399_v35  ;;  %v18569_v53 = vld [vmem:[#allocation44_spill] sm:$0xff] }
 0x2df   : > { %12030 = vmatmul.mubr.msk.bf16.gmra.mrb[80].mxu1 %vm993_vm3, %v16221_v9  ;;  %v7411_v47 = vrot.slane %v18569_v53, 2  ;;  %v18571_v53 = vld [vmem:[#allocation48_spill] sm:$0xff] }
 0x2e0   : > { %12033 = vmatprep.mubr.msk.bf16.mxu1 %vm993_vm3, %v16224_v31  ;;  %v7402_v6 = vsel %vm7359_vm7, %v7397_v49, %v7401_v39  ;;  %v7406_v35 = vsel %vm7359_vm7, %v7401_v39, %v7405_v23 }
 0x2e1   : > { %v7413_v2 = vor.u32 %v7412_v43, %v7411_v47  ;;  %v18574_v47 = vld [vmem:[#allocation49_spill] sm:$0xff] }
 0x2e2   : > { %v7420_v14 = vrot.slane %v18574_v47, 3  ;;  %v18576_v47 = vld [vmem:[#allocation53_spill] sm:$0xff] }
 0x2e3   : > { %12652 = vmatmul.mubr.msk.bf16.gmra.mrb[12].mxu0 %vm993_vm3, %v7394_v62  ;;  %v2661_v62 = vrot.slane %v14934_v56, 1 }
 0x2e4   : > { %12655 = vmatprep.mubr.msk.bf16.mxu0 %vm993_vm3, %v7398_v51  ;;  %v7407_v51 = vrot.slane %v18567_v37, 2 }
 0x2e5   : > { %v16261_v49 = vsel %vm2569_vm6, %v2659_v41, %v2661_v62  ;;  %v16264_v37 = vsel %vm2569_vm6, %v2661_v62, %v2663_v57  ;;  %v7416_v41 = vrot.slane %v18572_v3, 3  ;;  %v2667_v62 = vrot.slane %v14986_v30, 1 }
 0x2e6   : > { %v7409_v56 = vor.u32 %v7408_v36, %v7407_v51  ;;  %v18573_v36 = vld [vmem:[#allocation50_spill] sm:$0xff] }
 0x2e7   : > { %12034 = vmatmul.mubr.msk.bf16.gmra.mrb[84].mxu1 %vm993_vm3, %v16241_v18  ;;  %v7419_v43 = vrot.slane %v18573_v36, 2  ;;  %v18575_v36 = vld [vmem:[#allocation54_spill] sm:$0xff] }
 0x2e8   : > { %12037 = vmatprep.mubr.msk.bf16.mxu1 %vm993_vm3, %v16244_v34  ;;  %v7410_v39 = vsel %vm7359_vm7, %v7405_v23, %v7409_v56  ;;  %v7414_v51 = vsel %vm7359_vm7, %v7409_v56, %v7413_v2 }
 0x2e9   : > { %v7421_v3 = vor.u32 %v7420_v14, %v7419_v43  ;;  %v18578_v43 = vld [vmem:[#allocation55_spill] sm:$0xff] }
 0x2ea   : > { %v7428_v30 = vrot.slane %v18578_v43, 3  ;;  %v18580_v43 = vld [vmem:[#allocation59_spill] sm:$0xff] }
 0x2eb   : > { %12656 = vmatmul.mubr.msk.bf16.gmra.mrb[16].mxu0 %vm993_vm3, %v7402_v6  ;;  %v2665_v6 = vrot.slane %v14974_v29, 1 }
 0x2ec   : > { %12659 = vmatprep.mubr.msk.bf16.mxu0 %vm993_vm3, %v7406_v35  ;;  %v7415_v35 = vrot.slane %v18571_v53, 2 }
 0x2ed   : > { %v16281_v23 = vsel %vm2569_vm6, %v2663_v57, %v2665_v6  ;;  %v16284_v53 = vsel %vm2569_vm6, %v2665_v6, %v2667_v62  ;;  %v7424_v57 = vrot.slane %v18576_v47, 3  ;;  %v2671_v6 = vrot.slane %v15026_v28, 1 }
 0x2ee   : > { %v7417_v29 = vor.u32 %v7416_v41, %v7415_v35  ;;  %v18577_v41 = vld [vmem:[#allocation56_spill] sm:$0xff] }
 0x2ef   : > { %12038 = vmatmul.mubr.msk.bf16.gmra.mrb[88].mxu1 %vm993_vm3, %v16261_v49  ;;  %v7427_v14 = vrot.slane %v18577_v41, 2  ;;  %v18579_v41 = vld [vmem:[#allocation60_spill] sm:$0xff] }
 0x2f0   : > { %12041 = vmatprep.mubr.msk.bf16.mxu1 %vm993_vm3, %v16264_v37  ;;  %v7418_v56 = vsel %vm7359_vm7, %v7413_v2, %v7417_v29  ;;  %v7422_v35 = vsel %vm7359_vm7, %v7417_v29, %v7421_v3 }
 0x2f1   : > { %v7429_v47 = vor.u32 %v7428_v30, %v7427_v14  ;;  %v18582_v14 = vld [vmem:[#allocation61_spill] sm:$0xff] }
 0x2f2   : > { %v7436_v28 = vrot.slane %v18582_v14, 3  ;;  %v18584_v14 = vld [vmem:[#allocation65_spill] sm:$0xff] }
 0x2f3   : > { %12660 = vmatmul.mubr.msk.bf16.gmra.mrb[20].mxu0 %vm993_vm3, %v7410_v39  ;;  %v2669_v39 = vrot.slane %v15014_v22, 1 }
 0x2f4   : > { %12663 = vmatprep.mubr.msk.bf16.mxu0 %vm993_vm3, %v7414_v51  ;;  %v7423_v51 = vrot.slane %v18575_v36, 2 }
 0x2f5   : > { %v16301_v2 = vsel %vm2569_vm6, %v2667_v62, %v2669_v39  ;;  %v16304_v36 = vsel %vm2569_vm6, %v2669_v39, %v2671_v6  ;;  %v7432_v62 = vrot.slane %v18580_v43, 3  ;;  %v2675_v39 = vrot.slane %v15066_v10, 1 }
 0x2f6   : > { %v7425_v22 = vor.u32 %v7424_v57, %v7423_v51  ;;  %v18581_v57 = vld [vmem:[#allocation62_spill] sm:$0xff] }
 0x2f7   : > { %12042 = vmatmul.mubr.msk.bf16.gmra.mrb[92].mxu1 %vm993_vm3, %v16281_v23  ;;  %v7435_v30 = vrot.slane %v18581_v57, 2  ;;  %v18583_v57 = vld [vmem:[#allocation66_spill] sm:$0xff] }
 0x2f8   : > { %12045 = vmatprep.mubr.msk.bf16.mxu1 %vm993_vm3, %v16284_v53  ;;  %v7426_v29 = vsel %vm7359_vm7, %v7421_v3, %v7425_v22  ;;  %v7430_v51 = vsel %vm7359_vm7, %v7425_v22, %v7429_v47 }
 0x2f9   : > { %v7437_v43 = vor.u32 %v7436_v28, %v7435_v30  ;;  %v18586_v30 = vld [vmem:[#allocation67_spill] sm:$0xff] }
 0x2fa   : > { %v7444_v10 = vrot.slane %v18586_v30, 3  ;;  %v18588_v30 = vld [vmem:[#allocation71_spill] sm:$0xff] }
 0x2fb   : > { %12664 = vmatmul.mubr.msk.bf16.gmra.mrb[24].mxu0 %vm993_vm3, %v7418_v56  ;;  %v2673_v56 = vrot.slane %v15054_v32, 1 }
 0x2fc   : > { %12667 = vmatprep.mubr.msk.bf16.mxu0 %vm993_vm3, %v7422_v35  ;;  %v7431_v35 = vrot.slane %v18579_v41, 2 }
 0x2fd   : > { %v16321_v3 = vsel %vm2569_vm6, %v2671_v6, %v2673_v56  ;;  %v16324_v41 = vsel %vm2569_vm6, %v2673_v56, %v2675_v39  ;;  %v7440_v6 = vrot.slane %v18584_v14, 3  ;;  %v2679_v56 = vrot.slane %v15106_v20, 1 }
 0x2fe   : > { %v7433_v32 = vor.u32 %v7432_v62, %v7431_v35  ;;  %v18585_v62 = vld [vmem:[#allocation68_spill] sm:$0xff] }
 0x2ff   : > { %12046 = vmatmul.mubr.msk.bf16.gmra.mrb[96].mxu1 %vm993_vm3, %v16301_v2  ;;  %v7443_v28 = vrot.slane %v18585_v62, 2  ;;  %v18587_v62 = vld [vmem:[#allocation72_spill] sm:$0xff] }
 0x300   : > { %12049 = vmatprep.mubr.msk.bf16.mxu1 %vm993_vm3, %v16304_v36  ;;  %v7434_v22 = vsel %vm7359_vm7, %v7429_v47, %v7433_v32  ;;  %v7438_v35 = vsel %vm7359_vm7, %v7433_v32, %v7437_v43 }
 0x301   : > { %v7445_v14 = vor.u32 %v7444_v10, %v7443_v28  ;;  %v18590_v28 = vld [vmem:[#allocation73_spill] sm:$0xff] }
 0x302   : > { %v7452_v20 = vrot.slane %v18590_v28, 3  ;;  %v18592_v28 = vld [vmem:[#allocation77_spill] sm:$0xff] }
 0x303   : > { %12668 = vmatmul.mubr.msk.bf16.gmra.mrb[28].mxu0 %vm993_vm3, %v7426_v29  ;;  %v2677_v29 = vrot.slane %v15094_v46, 1 }
 0x304   : > { %12671 = vmatprep.mubr.msk.bf16.mxu0 %vm993_vm3, %v7430_v51  ;;  %v7439_v51 = vrot.slane %v18583_v57, 2 }
 0x305   : > { %v16341_v47 = vsel %vm2569_vm6, %v2675_v39, %v2677_v29  ;;  %v16344_v57 = vsel %vm2569_vm6, %v2677_v29, %v2679_v56  ;;  %v7448_v39 = vrot.slane %v18588_v30, 3  ;;  %v2683_v29 = vrot.slane %v15146_v38, 1 }
 0x306   : > { %v7441_v46 = vor.u32 %v7440_v6, %v7439_v51  ;;  %v18589_v6 = vld [vmem:[#allocation74_spill] sm:$0xff] }
 0x307   : > { %12050 = vmatmul.mubr.msk.bf16.gmra.mrb[100].mxu1 %vm993_vm3, %v16321_v3  ;;  %v7451_v10 = vrot.slane %v18589_v6, 2  ;;  %v18591_v6 = vld [vmem:[#allocation78_spill] sm:$0xff] }
 0x308   : > { %12053 = vmatprep.mubr.msk.bf16.mxu1 %vm993_vm3, %v16324_v41  ;;  %v7442_v32 = vsel %vm7359_vm7, %v7437_v43, %v7441_v46  ;;  %v7446_v51 = vsel %vm7359_vm7, %v7441_v46, %v7445_v14 }
 0x309   : > { %v7453_v30 = vor.u32 %v7452_v20, %v7451_v10  ;;  %v18594_v10 = vld [vmem:[#allocation79_spill] sm:$0xff] }
 0x30a   : > { %v7460_v38 = vrot.slane %v18594_v10, 3  ;;  %v18596_v10 = vld [vmem:[#allocation83_spill] sm:$0xff] }
 0x30b   : > { %12672 = vmatmul.mubr.msk.bf16.gmra.mrb[32].mxu0 %vm993_vm3, %v7434_v22  ;;  %v2681_v22 = vrot.slane %v15134_v19, 1 }
 0x30c   : > { %12675 = vmatprep.mubr.msk.bf16.mxu0 %vm993_vm3, %v7438_v35  ;;  %v7447_v35 = vrot.slane %v18587_v62, 2 }
 0x30d   : > { %v16361_v43 = vsel %vm2569_vm6, %v2679_v56, %v2681_v22  ;;  %v16364_v62 = vsel %vm2569_vm6, %v2681_v22, %v2683_v29  ;;  %v7456_v56 = vrot.slane %v18592_v28, 3  ;;  %v2687_v22 = vrot.slane %v15186_v60, 1 }
 0x30e   : > { %v7449_v19 = vor.u32 %v7448_v39, %v7447_v35  ;;  %v18593_v39 = vld [vmem:[#allocation80_spill] sm:$0xff] }
 0x30f   : > { %12054 = vmatmul.mubr.msk.bf16.gmra.mrb[104].mxu1 %vm993_vm3, %v16341_v47  ;;  %v7459_v20 = vrot.slane %v18593_v39, 2  ;;  %v18595_v39 = vld [vmem:[#allocation84_spill] sm:$0xff] }
 0x310   : > { %12057 = vmatprep.mubr.msk.bf16.mxu1 %vm993_vm3, %v16344_v57  ;;  %v7450_v46 = vsel %vm7359_vm7, %v7445_v14, %v7449_v19  ;;  %v7454_v35 = vsel %vm7359_vm7, %v7449_v19, %v7453_v30 }
 0x311   : > { %v7461_v28 = vor.u32 %v7460_v38, %v7459_v20  ;;  %v18598_v20 = vld [vmem:[#allocation85_spill] sm:$0xff] }
 0x312   : > { %v7468_v60 = vrot.slane %v18598_v20, 3  ;;  %v18600_v20 = vld [vmem:[#allocation89_spill] sm:$0xff] }
 0x313   : > { %12676 = vmatmul.mubr.msk.bf16.gmra.mrb[36].mxu0 %vm993_vm3, %v7442_v32  ;;  %v2685_v32 = vrot.slane %v15174_v16, 1 }
 0x314   : > { %12679 = vmatprep.mubr.msk.bf16.mxu0 %vm993_vm3, %v7446_v51  ;;  %v7455_v51 = vrot.slane %v18591_v6, 2 }
 0x315   : > { %v16381_v14 = vsel %vm2569_vm6, %v2683_v29, %v2685_v32  ;;  %v16384_v6 = vsel %vm2569_vm6, %v2685_v32, %v2687_v22  ;;  %v7464_v29 = vrot.slane %v18596_v10, 3  ;;  %v2691_v32 = vrot.slane %v15226_v50, 1 }
 0x316   : > { %v7457_v16 = vor.u32 %v7456_v56, %v7455_v51  ;;  %v18597_v56 = vld [vmem:[#allocation86_spill] sm:$0xff] }
 0x317   : > { %12058 = vmatmul.mubr.msk.bf16.gmra.mrb[108].mxu1 %vm993_vm3, %v16361_v43  ;;  %v7467_v38 = vrot.slane %v18597_v56, 2  ;;  %v18599_v56 = vld [vmem:[#allocation90_spill] sm:$0xff] }
 0x318   : > { %12061 = vmatprep.mubr.msk.bf16.mxu1 %vm993_vm3, %v16364_v62  ;;  %v7458_v19 = vsel %vm7359_vm7, %v7453_v30, %v7457_v16  ;;  %v7462_v51 = vsel %vm7359_vm7, %v7457_v16, %v7461_v28 }
 0x319   : > { %v7469_v10 = vor.u32 %v7468_v60, %v7467_v38  ;;  %v18602_v38 = vld [vmem:[#allocation91_spill] sm:$0xff] }
 0x31a   : > { %v7476_v50 = vrot.slane %v18602_v38, 3  ;;  %v18604_v38 = vld [vmem:[#allocation95_spill] sm:$0xff] }
 0x31b   : > { %12680 = vmatmul.mubr.msk.bf16.gmra.mrb[40].mxu0 %vm993_vm3, %v7450_v46  ;;  %v2689_v46 = vrot.slane %v15214_v1, 1 }
 0x31c   : > { %12683 = vmatprep.mubr.msk.bf16.mxu0 %vm993_vm3, %v7454_v35  ;;  %v7463_v35 = vrot.slane %v18595_v39, 2 }
 0x31d   : > { %v16401_v30 = vsel %vm2569_vm6, %v2687_v22, %v2689_v46  ;;  %v16404_v39 = vsel %vm2569_vm6, %v2689_v46, %v2691_v32  ;;  %v7472_v22 = vrot.slane %v18600_v20, 3  ;;  %v2695_v46 = vrot.slane %v15266_v45, 1 }
 0x31e   : > { %v7465_v1 = vor.u32 %v7464_v29, %v7463_v35  ;;  %v18601_v29 = vld [vmem:[#allocation92_spill] sm:$0xff] }
 0x31f   : > { %12062 = vmatmul.mubr.msk.bf16.gmra.mrb[112].mxu1 %vm993_vm3, %v16381_v14  ;;  %v7475_v60 = vrot.slane %v18601_v29, 2  ;;  %v18603_v29 = vld [vmem:[#allocation96_spill] sm:$0xff] }
 0x320   : > { %12065 = vmatprep.mubr.msk.bf16.mxu1 %vm993_vm3, %v16384_v6  ;;  %v7466_v16 = vsel %vm7359_vm7, %v7461_v28, %v7465_v1  ;;  %v7470_v35 = vsel %vm7359_vm7, %v7465_v1, %v7469_v10 }
 0x321   : > { %v7477_v20 = vor.u32 %v7476_v50, %v7475_v60  ;;  %v18606_v60 = vld [vmem:[#allocation97_spill] sm:$0xff] }
 0x322   : > { %v7484_v45 = vrot.slane %v18606_v60, 3  ;;  %v18608_v60 = vld [vmem:[#allocation100_spill] sm:$0xff] }
 0x323   : > { %12684 = vmatmul.mubr.msk.bf16.gmra.mrb[44].mxu0 %vm993_vm3, %v7458_v19  ;;  %v2693_v19 = vrot.slane %v15254_v48, 1 }
 0x324   : > { %12687 = vmatprep.mubr.msk.bf16.mxu0 %vm993_vm3, %v7462_v51  ;;  %v7471_v51 = vrot.slane %v18599_v56, 2 }
 0x325   : > { %v16421_v28 = vsel %vm2569_vm6, %v2691_v32, %v2693_v19  ;;  %v16424_v56 = vsel %vm2569_vm6, %v2693_v19, %v2695_v46  ;;  %v7480_v32 = vrot.slane %v18604_v38, 3  ;;  %v2699_v19 = vrot.slane %v15306_v59, 1 }
 0x326   : > { %v7473_v48 = vor.u32 %v7472_v22, %v7471_v51  ;;  %v18605_v22 = vld [vmem:[#allocation98_spill] sm:$0xff] }
 0x327   : > { %12066 = vmatmul.mubr.msk.bf16.gmra.mrb[116].mxu1 %vm993_vm3, %v16401_v30  ;;  %v7483_v50 = vrot.slane %v18605_v22, 2  ;;  %v18607_v22 = vld [vmem:[#allocation101_spill] sm:$0xff] }
 0x328   : > { %12069 = vmatprep.mubr.msk.bf16.mxu1 %vm993_vm3, %v16404_v39  ;;  %v7474_v1 = vsel %vm7359_vm7, %v7469_v10, %v7473_v48  ;;  %v7478_v51 = vsel %vm7359_vm7, %v7473_v48, %v7477_v20 }
 0x329   : > { %v7485_v38 = vor.u32 %v7484_v45, %v7483_v50  ;;  %v18610_v50 = vld [vmem:[#allocation104_spill] sm:$0xff] }
 0x32a   : > { %v7492_v59 = vrot.slane %v18610_v50, 3  ;;  %v18614_v50 = vld [vmem:[#allocation110_spill] sm:$0xff] }
 0x32b   : > { %12688 = vmatmul.mubr.msk.bf16.gmra.mrb[48].mxu0 %vm993_vm3, %v7466_v16  ;;  %v2697_v16 = vrot.slane %v18429_v54, 1 }
 0x32c   : > { %12691 = vmatprep.mubr.msk.bf16.mxu0 %vm993_vm3, %v7470_v35  ;;  %v7479_v35 = vrot.slane %v18603_v29, 2 }
 0x32d   : > { %v16441_v10 = vsel %vm2569_vm6, %v2695_v46, %v2697_v16  ;;  %v16444_v29 = vsel %vm2569_vm6, %v2697_v16, %v2699_v19  ;;  %v7488_v46 = vrot.slane %v18608_v60, 3  ;;  %v2703_v16 = vrot.slane %v15346_v8, 1  ;;  %v18611_v8 = vld [vmem:[#allocation109_spill] sm:$0xff] }
 0x32e   : > { %v7481_v54 = vor.u32 %v7480_v32, %v7479_v35  ;;  %v18609_v32 = vld [vmem:[#allocation108_spill] sm:$0xff] }
 0x32f   : > { %12070 = vmatmul.mubr.msk.bf16.gmra.mrb[120].mxu1 %vm993_vm3, %v16421_v28  ;;  %v7491_v45 = vrot.slane %v18609_v32, 2 }
 0x330   : > { %12073 = vmatprep.mubr.msk.bf16.mxu1 %vm993_vm3, %v16424_v56  ;;  %v7482_v48 = vsel %vm7359_vm7, %v7477_v20, %v7481_v54  ;;  %v7486_v35 = vsel %vm7359_vm7, %v7481_v54, %v7485_v38 }
 0x331   : > { %v7493_v60 = vor.u32 %v7492_v59, %v7491_v45  ;;  %v7500_v59 = vrot.slane %v18614_v50, 3  ;;  %v18615_v50 = vld [vmem:[#allocation116_spill] sm:$0xff] }
 0x333   : > { %12692 = vmatmul.mubr.msk.bf16.gmra.mrb[52].mxu0 %vm993_vm3, %v7474_v1  ;;  %v2701_v1 = vrot.slane %v15334_v5, 1 }
 0x334   : > { %12695 = vmatprep.mubr.msk.bf16.mxu0 %vm993_vm3, %v7478_v51  ;;  %v7487_v51 = vrot.slane %v18607_v22, 2 }
 0x335   : > { %v16461_v20 = vsel %vm2569_vm6, %v2699_v19, %v2701_v1  ;;  %v16464_v22 = vsel %vm2569_vm6, %v2701_v1, %v2703_v16  ;;  %v7496_v19 = vrot.slane %v18612_v12, 3 }
 0x336   : > { %v7489_v5 = vor.u32 %v7488_v46, %v7487_v51  ;;  %v18613_v46 = vld [vmem:[#allocation115_spill] sm:$0xff] }
 0x337   : > { %12074 = vmatmul.mubr.msk.bf16.gmra.mrb[124].mxu1 %vm993_vm3, %v16441_v10  ;;  %v7499_v1 = vrot.slane %v18613_v46, 2  ;;  %v7503_v46 = vrot.slane %v18615_v50, 2 }
 0x338   : > { %12077 = vmatprep.mubr.msk.bf16.mxu1 %vm993_vm3, %v16444_v29  ;;  %v7490_v54 = vsel %vm7359_vm7, %v7485_v38, %v7489_v5  ;;  %v7494_v51 = vsel %vm7359_vm7, %v7489_v5, %v7493_v60 }
 0x339   : > { %v7501_v32 = vor.u32 %v7500_v59, %v7499_v1  ;;  %v18620_v59 = vld [vmem:[#allocation122_spill] sm:$0xff] }
 0x33b   : > { %12696 = vmatmul.mubr.msk.bf16.gmra.mrb[56].mxu0 %vm993_vm3, %v7482_v48  ;;  %v18158_v48 = vrot.slane %v15377_v13, 1 }
 0x33c   : > { %12699 = vmatprep.mubr.msk.bf16.mxu0 %vm993_vm3, %v7486_v35  ;;  %v7495_v35 = vrot.slane %v18611_v8, 2  ;;  %v18617_v8 = vld [vmem:[#allocation123_spill] sm:$0xff] }
 0x33d   : > { %v16482_v38 = vsel %vm2569_vm6, %v2703_v16, %v18158_v48  ;;  %v7507_v44 = vrot.slane %v18617_v8, 2  ;;  %v18618_v16 = vld [vmem:[#allocation117_spill] sm:$0xff] }
 0x33e   : > { %v7497_v45 = vor.u32 %v7496_v19, %v7495_v35  ;;  %v7508_v48 = vrot.slane %v18618_v16, 3  ;;  %v18621_v16 = vld [vmem:[#allocation131_spill] sm:$0xff] }
 0x33f   : > { %12078 = vmatmul.mubr.msk.bf16.gmra.mrb[128].mxu1 %vm993_vm3, %v16461_v20 }
 0x340   : > { %12081 = vmatprep.mubr.msk.bf16.mxu1 %vm993_vm3, %v16464_v22  ;;  %v7498_v5 = vsel %vm7359_vm7, %v7493_v60, %v7497_v45  ;;  %v7509_v19 = vor.u32 %v7508_v48, %v7507_v44  ;;  %v18619_v60 = vld [vmem:[#allocation124_spill] sm:$0xff] }
 0x341   : > { %v7511_v1 = vrot.slane %v18619_v60, 2 }
 0x343   : > { %12700 = vmatmul.mubr.msk.bf16.gmra.mrb[60].mxu0 %vm993_vm3, %v7490_v54  ;;  %v18616_v54 = vld [vmem:[#allocation114_spill] sm:$0xff] }
 0x344   : > { %12703 = vmatprep.mubr.msk.bf16.mxu0 %vm993_vm3, %v7494_v51  ;;  %v7504_v12 = vrot.slane %v18616_v54, 3  ;;  %v7502_v51 = vsel %vm7359_vm7, %v7497_v45, %v7501_v32  ;;  %v7512_v45 = vrot.slane %v18620_v59, 3  ;;  %v18626_v59 = vld [vmem:[#allocation133_spill] sm:$0xff] }
 0x346   : > { %v7505_v35 = vor.u32 %v7504_v12, %v7503_v46  ;;  %v18622_v12 = vld [vmem:[#allocation125_spill] sm:$0xff]  ;;  %v18624_v46 = vld [vmem:[#allocation130_spill] sm:$0xff] }
 0x347   : > { %12082 = vmatmul.mubr.msk.bf16.gmra.mrb[132].mxu1 %vm993_vm3, %v16482_v38  ;;  %v7516_v44 = vrot.slane %v18622_v12, 3 }
 0x348   : > { %12087 = vmatprep.mubr.msk.bf16.mxu1 %vm993_vm3, %v15864_v55  ;;  %v7506_v55 = vsel %vm7359_vm7, %v7501_v32, %v7505_v35  ;;  %v18623_v32 = vld [vmem:[#allocation132_spill] sm:$0xff] }
 0x349   : > { %v7519_v48 = vrot.slane %v18623_v32, 2 }
 0x34b   : > { %12704 = vmatmul.mubr.msk.bf16.gmra.mrb[64].mxu0 %vm993_vm3, %v7498_v5  ;;  %v7510_v5 = vsel %vm7359_vm7, %v7505_v35, %v7509_v19  ;;  %v7520_v35 = vrot.slane %v18624_v46, 3  ;;  %v18631_v46 = vld [vmem:[#allocation141_spill] sm:$0xff] }
 0x34c   : > { %12707 = vmatprep.mubr.msk.bf16.mxu0 %vm993_vm3, %v7502_v51  ;;  %v7515_v51 = vrot.slane %v18621_v16, 2  ;;  %v18625_v16 = vld [vmem:[#allocation139_spill] sm:$0xff] }
 0x34f   : > { %12088 = vmatmul.mubr.msk.bf16.vlgmr.msra.gmra.mrb[0].mxu1 %vm993_vm3, %v15878_v26  ;;  %v7517_v26 = vor.u32 %v7516_v44, %v7515_v51  ;;  %v18629_v44 = vld [vmem:[#allocation138_spill] sm:$0xff] }
 0x350   : > { %12914 = vmatpush3.bf16.msra.mxu1 %v18467_v61  ;;  %12091 = vmatprep.mubr.msk.bf16.mxu1 %vm993_vm3, %v15884_v17  ;;  %v7513_v61 = vor.u32 %v7512_v45, %v7511_v1  ;;  %v18628_v45 = vld [vmem:[#allocation140_spill] sm:$0xff] }
 0x351   : > { %v7527_v51 = vrot.slane %v18628_v45, 2  ;;  %v18637_v45 = vld [vmem:[#allocation149_spill] sm:$0xff] }
 0x352   : > { %v7514_v17 = vsel %vm7359_vm7, %v7509_v19, %v7513_v61  ;;  %v7518_v12 = vsel %vm7359_vm7, %v7513_v61, %v7517_v26  ;;  %v18627_v19 = vld [vmem:[#allocation112_spill] sm:$0xff]  ;;  %v7528_v61 = vrot.slane %v18629_v44, 3  ;;  %v18636_v44 = vld [vmem:[#allocation155_spill] sm:$0xff] }
 0x353   : > { %12708 = vmatmul.mubr.msk.bf16.gmra.mrb[68].mxu0 %vm993_vm3, %v7506_v55  ;;  %v7523_v55 = vrot.slane %v18625_v16, 2  ;;  %v18630_v16 = vld [vmem:[#allocation147_spill] sm:$0xff] }
 0x354   : > { %12711 = vmatprep.mubr.msk.bf16.mxu0 %vm993_vm3, %v7510_v5  ;;  %v7524_v5 = vrot.slane %v18626_v59, 3 }
 0x356   : > { %v7525_v1 = vor.u32 %v7524_v5, %v7523_v55  ;;  %v18633_v55 = vld [vmem:[#allocation120_spill] sm:$0xff] }
 0x357   : > { %12092 = vmatmul.mubr.msk.bf16.gmra.mrb[4].mxu1 %vm993_vm3, %v15901_v4  ;;  %v7521_v4 = vor.u32 %v7520_v35, %v7519_v48  ;;  %v18634_v5 = vld [vmem:[#allocation148_spill] sm:$0xff] }
 0x358   : > { %12095 = vmatprep.mubr.msk.bf16.mxu1 %vm993_vm3, %v15904_v25 }
 0x359   : > { %v7522_v25 = vsel %vm7359_vm7, %v7517_v26, %v7521_v4  ;;  %v7526_v59 = vsel %vm7359_vm7, %v7521_v4, %v7525_v1  ;;  %v18632_v26 = vld [vmem:[#allocation119_spill] sm:$0xff]  ;;  %v7535_v4 = vrot.slane %v18634_v5, 2  ;;  %v18643_v5 = vld [vmem:[#allocation157_spill] sm:$0xff] }
 0x35b   : > { %12712 = vmatmul.mubr.msk.bf16.gmra.mrb[72].mxu0 %vm993_vm3, %v7514_v17  ;;  %v7531_v17 = vrot.slane %v18630_v16, 2 }
 0x35c   : > { %12715 = vmatprep.mubr.msk.bf16.mxu0 %vm993_vm3, %v7518_v12  ;;  %v7532_v12 = vrot.slane %v18631_v46, 3 }
 0x35e   : > { %v7533_v48 = vor.u32 %v7532_v12, %v7531_v17  ;;  %v18639_v12 = vld [vmem:[#allocation128_spill] sm:$0xff] }
 0x35f   : > { %12096 = vmatmul.mubr.msk.bf16.gmra.mrb[8].mxu1 %vm993_vm3, %v15917_v11  ;;  %v7529_v11 = vor.u32 %v7528_v61, %v7527_v51 }
 0x360   : > { %12099 = vmatprep.mubr.msk.bf16.mxu1 %vm993_vm3, %v18627_v19  ;;  %v18635_v19 = vld [vmem:[#allocation146_spill] sm:$0xff] }
 0x361   : > { %v7530_v35 = vsel %vm7359_vm7, %v7525_v1, %v7529_v11  ;;  %v7536_v16 = vrot.slane %v18635_v19, 3  ;;  %v7534_v46 = vsel %vm7359_vm7, %v7529_v11, %v7533_v48  ;;  %v18638_v1 = vld [vmem:[#allocation127_spill] sm:$0xff] }
 0x362   : > { %v18642_v19 = vld [vmem:[#allocation163_spill] sm:$0xff] }
 0x363   : > { %12716 = vmatmul.mubr.msk.bf16.gmra.mrb[76].mxu0 %vm993_vm3, %v7522_v25  ;;  %v7539_v25 = vrot.slane %v18636_v44, 2  ;;  %v7537_v51 = vor.u32 %v7536_v16, %v7535_v4 }
 0x364   : > { %12719 = vmatprep.mubr.msk.bf16.mxu0 %vm993_vm3, %v7526_v59  ;;  %v7540_v59 = vrot.slane %v18637_v45, 3 }
 0x365   : > { %v7538_v17 = vsel %vm7359_vm7, %v7533_v48, %v7537_v51  ;;  %v18644_v48 = vld [vmem:[#allocation135_spill] sm:$0xff] }
 0x366   : > { %v7541_v61 = vor.u32 %v7540_v59, %v7539_v25  ;;  %v18645_v59 = vld [vmem:[#allocation136_spill] sm:$0xff] }
 0x367   : > { %12100 = vmatmul.mubr.msk.bf16.gmra.mrb[12].mxu1 %vm993_vm3, %v18632_v26  ;;  %v18640_v26 = vld [vmem:[#allocation156_spill] sm:$0xff] }
 0x368   : > { %12103 = vmatprep.mubr.msk.bf16.mxu1 %vm993_vm3, %v18633_v55  ;;  %v7543_v11 = vrot.slane %v18640_v26, 2  ;;  %v18641_v55 = vld [vmem:[#allocation154_spill] sm:$0xff]  ;;  %v7542_v45 = vsel %vm7359_vm7, %v7537_v51, %v7541_v61  ;;  %v18649_v26 = vld [vmem:[#allocation165_spill] sm:$0xff] }
 0x369   : > { %v7544_v44 = vrot.slane %v18641_v55, 3  ;;  %v18648_v55 = vld [vmem:[#allocation171_spill] sm:$0xff] }
 0x36b   : > { %12720 = vmatmul.mubr.msk.bf16.gmra.mrb[80].mxu0 %vm993_vm3, %v7530_v35  ;;  %v7547_v35 = vrot.slane %v18642_v19, 2  ;;  %v7545_v16 = vor.u32 %v7544_v44, %v7543_v11 }
 0x36c   : > { %12723 = vmatprep.mubr.msk.bf16.mxu0 %vm993_vm3, %v7534_v46  ;;  %v7548_v46 = vrot.slane %v18643_v5, 3 }
 0x36d   : > { %v7546_v25 = vsel %vm7359_vm7, %v7541_v61, %v7545_v16  ;;  %v18650_v61 = vld [vmem:[#allocation143_spill] sm:$0xff] }
 0x36e   : > { %v7549_v4 = vor.u32 %v7548_v46, %v7547_v35  ;;  %v18651_v46 = vld [vmem:[#allocation144_spill] sm:$0xff] }
 0x36f   : > { %12104 = vmatmul.mubr.msk.bf16.gmra.mrb[16].mxu1 %vm993_vm3, %v18638_v1  ;;  %v18646_v1 = vld [vmem:[#allocation164_spill] sm:$0xff] }
 0x370   : > { %12107 = vmatprep.mubr.msk.bf16.mxu1 %vm993_vm3, %v18639_v12  ;;  %v7551_v51 = vrot.slane %v18646_v1, 2  ;;  %v18647_v12 = vld [vmem:[#allocation162_spill] sm:$0xff]  ;;  %v7550_v5 = vsel %vm7359_vm7, %v7545_v16, %v7549_v4  ;;  %v18655_v1 = vld [vmem:[#allocation173_spill] sm:$0xff] }
 0x371   : > { %v7552_v19 = vrot.slane %v18647_v12, 3  ;;  %v18654_v12 = vld [vmem:[#allocation179_spill] sm:$0xff] }
 0x373   : > { %12724 = vmatmul.mubr.msk.bf16.gmra.mrb[84].mxu0 %vm993_vm3, %v7538_v17  ;;  %v7555_v17 = vrot.slane %v18648_v55, 2  ;;  %v7553_v44 = vor.u32 %v7552_v19, %v7551_v51 }
 0x374   : > { %12727 = vmatprep.mubr.msk.bf16.mxu0 %vm993_vm3, %v7542_v45  ;;  %v7556_v45 = vrot.slane %v18649_v26, 3 }
 0x375   : > { %v7554_v35 = vsel %vm7359_vm7, %v7549_v4, %v7553_v44  ;;  %v18656_v4 = vld [vmem:[#allocation151_spill] sm:$0xff] }
 0x376   : > { %v7557_v11 = vor.u32 %v7556_v45, %v7555_v17  ;;  %v18657_v45 = vld [vmem:[#allocation152_spill] sm:$0xff] }
 0x377   : > { %12108 = vmatmul.mubr.msk.bf16.gmra.mrb[20].mxu1 %vm993_vm3, %v18644_v48  ;;  %v18652_v48 = vld [vmem:[#allocation172_spill] sm:$0xff] }
 0x378   : > { %12111 = vmatprep.mubr.msk.bf16.mxu1 %vm993_vm3, %v18645_v59  ;;  %v7559_v16 = vrot.slane %v18652_v48, 2  ;;  %v18653_v59 = vld [vmem:[#allocation170_spill] sm:$0xff]  ;;  %v7558_v26 = vsel %vm7359_vm7, %v7553_v44, %v7557_v11  ;;  %v18661_v48 = vld [vmem:[#allocation181_spill] sm:$0xff] }
 0x379   : > { %v7560_v55 = vrot.slane %v18653_v59, 3  ;;  %v18660_v59 = vld [vmem:[#allocation187_spill] sm:$0xff] }
 0x37b   : > { %12728 = vmatmul.mubr.msk.bf16.gmra.mrb[88].mxu0 %vm993_vm3, %v7546_v25  ;;  %v7563_v25 = vrot.slane %v18654_v12, 2  ;;  %v7561_v19 = vor.u32 %v7560_v55, %v7559_v16 }
 0x37c   : > { %12731 = vmatprep.mubr.msk.bf16.mxu0 %vm993_vm3, %v7550_v5  ;;  %v7564_v5 = vrot.slane %v18655_v1, 3 }
 0x37d   : > { %v7562_v17 = vsel %vm7359_vm7, %v7557_v11, %v7561_v19  ;;  %v18662_v11 = vld [vmem:[#allocation159_spill] sm:$0xff] }
 0x37e   : > { %v7565_v51 = vor.u32 %v7564_v5, %v7563_v25  ;;  %v18663_v5 = vld [vmem:[#allocation160_spill] sm:$0xff] }
 0x37f   : > { %12112 = vmatmul.mubr.msk.bf16.gmra.mrb[24].mxu1 %vm993_vm3, %v18650_v61  ;;  %v18658_v61 = vld [vmem:[#allocation180_spill] sm:$0xff] }
 0x380   : > { %12115 = vmatprep.mubr.msk.bf16.mxu1 %vm993_vm3, %v18651_v46  ;;  %v7567_v44 = vrot.slane %v18658_v61, 2  ;;  %v18659_v46 = vld [vmem:[#allocation178_spill] sm:$0xff]  ;;  %v7566_v1 = vsel %vm7359_vm7, %v7561_v19, %v7565_v51  ;;  %v18667_v61 = vld [vmem:[#allocation189_spill] sm:$0xff] }
 0x381   : > { %v7568_v12 = vrot.slane %v18659_v46, 3  ;;  %v18666_v46 = vld [vmem:[#allocation195_spill] sm:$0xff] }
 0x383   : > { %12732 = vmatmul.mubr.msk.bf16.gmra.mrb[92].mxu0 %vm993_vm3, %v7554_v35  ;;  %v7571_v35 = vrot.slane %v18660_v59, 2  ;;  %v7569_v55 = vor.u32 %v7568_v12, %v7567_v44 }
 0x384   : > { %12735 = vmatprep.mubr.msk.bf16.mxu0 %vm993_vm3, %v7558_v26  ;;  %v7572_v26 = vrot.slane %v18661_v48, 3 }
 0x385   : > { %v7570_v25 = vsel %vm7359_vm7, %v7565_v51, %v7569_v55  ;;  %v18668_v51 = vld [vmem:[#allocation167_spill] sm:$0xff] }
 0x386   : > { %v7573_v16 = vor.u32 %v7572_v26, %v7571_v35  ;;  %v18669_v26 = vld [vmem:[#allocation168_spill] sm:$0xff] }
 0x387   : > { %12116 = vmatmul.mubr.msk.bf16.gmra.mrb[28].mxu1 %vm993_vm3, %v18656_v4  ;;  %v18664_v4 = vld [vmem:[#allocation188_spill] sm:$0xff] }
 0x388   : > { %12119 = vmatprep.mubr.msk.bf16.mxu1 %vm993_vm3, %v18657_v45  ;;  %v7575_v19 = vrot.slane %v18664_v4, 2  ;;  %v18665_v45 = vld [vmem:[#allocation186_spill] sm:$0xff]  ;;  %v7574_v48 = vsel %vm7359_vm7, %v7569_v55, %v7573_v16  ;;  %v18673_v4 = vld [vmem:[#allocation197_spill] sm:$0xff] }
 0x389   : > { %v7576_v59 = vrot.slane %v18665_v45, 3  ;;  %v18672_v45 = vld [vmem:[#allocation203_spill] sm:$0xff] }
 0x38b   : > { %12736 = vmatmul.mubr.msk.bf16.gmra.mrb[96].mxu0 %vm993_vm3, %v7562_v17  ;;  %v7579_v17 = vrot.slane %v18666_v46, 2  ;;  %v7577_v12 = vor.u32 %v7576_v59, %v7575_v19 }
 0x38c   : > { %12739 = vmatprep.mubr.msk.bf16.mxu0 %vm993_vm3, %v7566_v1  ;;  %v7580_v1 = vrot.slane %v18667_v61, 3 }
 0x38d   : > { %v7578_v35 = vsel %vm7359_vm7, %v7573_v16, %v7577_v12  ;;  %v18674_v16 = vld [vmem:[#allocation175_spill] sm:$0xff] }
 0x38e   : > { %v7581_v44 = vor.u32 %v7580_v1, %v7579_v17  ;;  %v18675_v1 = vld [vmem:[#allocation176_spill] sm:$0xff] }
 0x38f   : > { %12120 = vmatmul.mubr.msk.bf16.gmra.mrb[32].mxu1 %vm993_vm3, %v18662_v11  ;;  %v18670_v11 = vld [vmem:[#allocation196_spill] sm:$0xff] }
 0x390   : > { %12123 = vmatprep.mubr.msk.bf16.mxu1 %vm993_vm3, %v18663_v5  ;;  %v7583_v55 = vrot.slane %v18670_v11, 2  ;;  %v18671_v5 = vld [vmem:[#allocation194_spill] sm:$0xff]  ;;  %v7582_v61 = vsel %vm7359_vm7, %v7577_v12, %v7581_v44  ;;  %v18679_v11 = vld [vmem:[#allocation205_spill] sm:$0xff] }
 0x391   : > { %v7584_v46 = vrot.slane %v18671_v5, 3  ;;  %v18678_v5 = vld [vmem:[#allocation211_spill] sm:$0xff] }
 0x393   : > { %12740 = vmatmul.mubr.msk.bf16.gmra.mrb[100].mxu0 %vm993_vm3, %v7570_v25  ;;  %v7587_v25 = vrot.slane %v18672_v45, 2  ;;  %v7585_v59 = vor.u32 %v7584_v46, %v7583_v55 }
 0x394   : > { %12743 = vmatprep.mubr.msk.bf16.mxu0 %vm993_vm3, %v7574_v48  ;;  %v7588_v48 = vrot.slane %v18673_v4, 3 }
 0x395   : > { %v7586_v17 = vsel %vm7359_vm7, %v7581_v44, %v7585_v59 }
 0x396   : > { %v7589_v19 = vor.u32 %v7588_v48, %v7587_v25  ;;  %v18680_v25 = vld [vmem:[#allocation212_spill] sm:$0xff] }
 0x397   : > { %12124 = vmatmul.mubr.msk.bf16.gmra.mrb[36].mxu1 %vm993_vm3, %v18668_v51  ;;  %v18676_v51 = vld [vmem:[#allocation204_spill] sm:$0xff]  ;;  %v7599_v48 = vrot.slane %v18680_v25, 2  ;;  %v18689_v25 = vld [vmem:[#allocation221_spill] sm:$0xff] }
 0x398   : > { %12127 = vmatprep.mubr.msk.bf16.mxu1 %vm993_vm3, %v18669_v26  ;;  %v7591_v12 = vrot.slane %v18676_v51, 2  ;;  %v18677_v26 = vld [vmem:[#allocation202_spill] sm:$0xff]  ;;  %v7590_v4 = vsel %vm7359_vm7, %v7585_v59, %v7589_v19 }
 0x399   : > { %v7592_v45 = vrot.slane %v18677_v26, 3  ;;  %v18681_v59 = vld [vmem:[#allocation210_spill] sm:$0xff] }
 0x39b   : > { %12744 = vmatmul.mubr.msk.bf16.gmra.mrb[104].mxu0 %vm993_vm3, %v7578_v35  ;;  %v7595_v35 = vrot.slane %v18678_v5, 2  ;;  %v7593_v46 = vor.u32 %v7592_v45, %v7591_v12  ;;  %v18683_v5 = vld [vmem:[#allocation213_spill] sm:$0xff]  ;;  %v18685_v12 = vld [vmem:[#allocation184_spill] sm:$0xff] }
 0x39c   : > { %12747 = vmatprep.mubr.msk.bf16.mxu0 %vm993_vm3, %v7582_v61  ;;  %v7596_v61 = vrot.slane %v18679_v11, 3  ;;  %v18682_v11 = vld [vmem:[#allocation219_spill] sm:$0xff] }
 0x39d   : > { %v7594_v44 = vsel %vm7359_vm7, %v7589_v19, %v7593_v46  ;;  %v18684_v19 = vld [vmem:[#allocation183_spill] sm:$0xff] }
 0x39e   : > { %v7597_v55 = vor.u32 %v7596_v61, %v7595_v35  ;;  %v18686_v35 = vld [vmem:[#allocation220_spill] sm:$0xff] }
 0x39f   : > { %12128 = vmatmul.mubr.msk.bf16.gmra.mrb[40].mxu1 %vm993_vm3, %v18674_v16  ;;  %v7600_v16 = vrot.slane %v18681_v59, 3  ;;  %v7607_v61 = vrot.slane %v18686_v35, 2  ;;  %v18688_v59 = vld [vmem:[#allocation222_spill] sm:$0xff] }
 0x3a0   : > { %12131 = vmatprep.mubr.msk.bf16.mxu1 %vm993_vm3, %v18675_v1  ;;  %v7598_v1 = vsel %vm7359_vm7, %v7593_v46, %v7597_v55  ;;  %v18687_v46 = vld [vmem:[#allocation218_spill] sm:$0xff] }
 0x3a3   : > { %12748 = vmatmul.mubr.msk.bf16.gmra.mrb[108].mxu0 %vm993_vm3, %v7586_v17  ;;  %v7603_v17 = vrot.slane %v18682_v11, 2  ;;  %v7608_v11 = vrot.slane %v18687_v46, 3  ;;  %v18695_v46 = vld [vmem:[#allocation200_spill] sm:$0xff] }
 0x3a4   : > { %12751 = vmatprep.mubr.msk.bf16.mxu0 %vm993_vm3, %v7590_v4  ;;  %v7604_v4 = vrot.slane %v18683_v5, 3 }
 0x3a6   : > { %v7605_v45 = vor.u32 %v7604_v4, %v7603_v17  ;;  %v18690_v17 = vld [vmem:[#allocation250_spill] sm:$0xff] }
 0x3a7   : > { %12132 = vmatmul.mubr.msk.bf16.gmra.mrb[44].mxu1 %vm993_vm3, %v16061_v58  ;;  %v7601_v58 = vor.u32 %v7600_v16, %v7599_v48  ;;  %v7609_v48 = vor.u32 %v7608_v11, %v7607_v61  ;;  %v18160_v4 = vshrl.u32 %v18690_v17, 16 }
 0x3a8   : > { %12135 = vmatprep.mubr.msk.bf16.mxu1 %vm993_vm3, %v16064_v40 }
 0x3a9   : > { %v7602_v40 = vsel %vm7359_vm7, %v7597_v55, %v7601_v58  ;;  %v7606_v5 = vsel %vm7359_vm7, %v7601_v58, %v7605_v45  ;;  %v18159_v55 = vshrl.u32 %v15377_v13, 16  ;;  %v7610_v58 = vsel %vm7359_vm7, %v7605_v45, %v7609_v48 }
 0x3ab   : > { %12752 = vmatmul.mubr.msk.bf16.gmra.mrb[112].mxu0 %vm993_vm3, %v7594_v44  ;;  %v7611_v44 = vrot.slane %v18688_v59, 2  ;;  %v18692_v59 = vld [vmem:[#allocation192_spill] sm:$0xff] }
 0x3ac   : > { %12755 = vmatprep.mubr.msk.bf16.mxu0 %vm993_vm3, %v7598_v1  ;;  %v7612_v1 = vrot.slane %v18689_v25, 3  ;;  %v18694_v25 = vld [vmem:[#allocation199_spill] sm:$0xff] }
 0x3ae   : > { %v7613_v16 = vor.u32 %v7612_v1, %v7611_v44  ;;  %v7619_v44 = vrot.slane %v18160_v4, 2 }
 0x3af   : > { %12136 = vmatmul.mubr.msk.bf16.gmra.mrb[48].mxu1 %vm993_vm3, %v18684_v19  ;;  %v18161_v19 = vshll.u32 %v18690_v17, 16 }
 0x3b0   : > { %12139 = vmatprep.mubr.msk.bf16.mxu1 %vm993_vm3, %v18685_v12  ;;  %v18691_v12 = vld [vmem:[#allocation191_spill] sm:$0xff]  ;;  %v7614_v61 = vsel %vm7359_vm7, %v7609_v48, %v7613_v16  ;;  %v7631_v48 = vshll.u32 %v18694_v25, 16 }
 0x3b1   : > { %v7620_v1 = vrot.slane %v18161_v19, 3 }
 0x3b3   : > { %12756 = vmatmul.mubr.msk.bf16.gmra.mrb[116].mxu0 %vm993_vm3, %v7602_v40  ;;  %v7615_v40 = vrot.slane %v18159_v55, 2  ;;  %v7621_v55 = vor.u32 %v7620_v1, %v7619_v44  ;;  %v7633_v44 = vrot.slane %v7631_v48, 3  ;;  %v18696_v1 = vld [vmem:[#allocation207_spill] sm:$0xff] }
 0x3b4   : > { %12759 = vmatprep.mubr.msk.bf16.mxu0 %vm993_vm3, %v7606_v5  ;;  %v18693_v5 = vld [vmem:[#allocation223_spill] sm:$0xff]  ;;  %v7640_v19 = vshll.u32 %v18696_v1, 16 }
 0x3b5   : > { %v7616_v11 = vrot.slane %v18693_v5, 3  ;;  %v7628_v5 = vshrl.u32 %v18694_v25, 16 }
 0x3b7   : > { %12140 = vmatmul.mubr.msk.bf16.gmra.mrb[52].mxu1 %vm993_vm3, %v18691_v12  ;;  %v7617_v45 = vor.u32 %v7616_v11, %v7615_v40  ;;  %v18163_v12 = vshll.u32 %v15691_v0, 16 }
 0x3b8   : > { %12143 = vmatprep.mubr.msk.bf16.mxu1 %vm993_vm3, %v18692_v59  ;;  %v18162_v59 = vshrl.u32 %v15691_v0, 16 }
 0x3b9   : > { %v7618_v4 = vsel %vm7359_vm7, %v7613_v16, %v7617_v45  ;;  %v7624_v40 = vrot.slane %v18163_v12, 3  ;;  %v7622_v11 = vsel %vm7359_vm7, %v7617_v45, %v7621_v55  ;;  %v7637_v16 = vshrl.u32 %v18696_v1, 16 }
 0x3ba   : > { %v7642_v45 = vrot.slane %v7640_v19, 3 }
 0x3bb   : > { %12760 = vmatmul.mubr.msk.bf16.gmra.mrb[120].mxu0 %vm993_vm3, %v7610_v58  ;;  %v7623_v58 = vrot.slane %v18162_v59, 2 }
 0x3bc   : > { %12763 = vmatprep.mubr.msk.bf16.mxu0 %vm993_vm3, %v7614_v61  ;;  %v7630_v61 = vrot.slane %v7628_v5, 2  ;;  %v7639_v5 = vrot.slane %v7637_v16, 2 }
 0x3be   : > { %v7643_v48 = vor.u32 %v7642_v45, %v7639_v5  ;;  %v18703_v45 = vld [vmem:[#allocation19_spill] sm:$0xff] }
 0x3bf   : > { %12144 = vmatmul.mubr.msk.bf16.gmra.mrb[56].mxu1 %vm993_vm3, %v18695_v46  ;;  %v7625_v46 = vor.u32 %v7624_v40, %v7623_v58  ;;  %v18697_v58 = vld [vmem:[#allocation3_spill] sm:$0xff] }
 0x3c0   : > { %12147 = vmatprep.mubr.msk.bf16.mxu1 %vm993_vm3, %v16117_v52  ;;  %v7634_v52 = vor.u32 %v7633_v44, %v7630_v61  ;;  %v8568_v40 = vrot.slane %v18697_v58, 3 }
 0x3c1   : > { %v7626_v59 = vsel %vm7359_vm7, %v7621_v55, %v7625_v46  ;;  %v18699_v55 = vld [vmem:[#allocation7_spill] sm:$0xff] }
 0x3c2   : > { %v8571_v19 = vrot.slane %v18699_v55, 3 }
 0x3c3   : > { %12764 = vmatmul.mubr.msk.bf16.gmra.mrb[124].mxu0 %vm993_vm3, %v7618_v4  ;;  %v7635_v4 = vsel %vm7359_vm7, %v7625_v46, %v7634_v52  ;;  %v18701_v46 = vld [vmem:[#allocation15_spill] sm:$0xff] }
 0x3c4   : > { %12767 = vmatprep.mubr.msk.bf16.mxu0 %vm993_vm3, %v7622_v11  ;;  %v18698_v11 = vld [vmem:[#allocation6_spill] sm:$0xff]  ;;  %v8575_v16 = vrot.slane %v18701_v46, 3 }
 0x3c5   : > { %v8569_v61 = vrot.slane %v18698_v11, 3 }
 0x3c7   : > { %12148 = vmatmul.mubr.msk.bf16.gmra.mrb[60].mxu1 %vm993_vm3, %v16139_v7  ;;  %v7644_v7 = vsel %vm7359_vm7, %v7634_v52, %v7643_v48  ;;  %v18702_v52 = vld [vmem:[#allocation18_spill] sm:$0xff]  ;;  %v18704_v48 = vld [vmem:[#allocation23_spill] sm:$0xff] }
 0x3c8   : > { %12151 = vmatprep.mubr.msk.bf16.mxu1 %vm993_vm3, %v16143_v27  ;;  %v8570_v27 = vsel %vm8567_vm8, %v8568_v40, %v8569_v61  ;;  %v8577_v5 = vrot.slane %v18702_v52, 3  ;;  %v8581_v58 = vrot.slane %v18704_v48, 3  ;;  %v18705_v40 = vld [vmem:[#allocation27_spill] sm:$0xff] }
 0x3c9   : > { %v8583_v11 = vrot.slane %v18705_v40, 3 }
 0x3cb   : > { %12768 = vmatmul.mubr.msk.bf16.gmra.mrb[128].mxu0 %vm993_vm3, %v7626_v59  ;;  %v18700_v59 = vld [vmem:[#allocation12_spill] sm:$0xff] }
 0x3cc   : > { %12771 = vmatprep.mubr.msk.bf16.mxu0 %vm993_vm3, %v7635_v4  ;;  %v8573_v44 = vrot.slane %v18700_v59, 3  ;;  %v8579_v4 = vrot.slane %v18703_v45, 3 }
 0x3cf   : > { %12152 = vmatmul.mubr.msk.bf16.gmra.mrb[64].mxu1 %vm993_vm3, %v16160_v15  ;;  %v8572_v15 = vsel %vm8567_vm8, %v8569_v61, %v8571_v19  ;;  %v18706_v61 = vld [vmem:[#allocation28_spill] sm:$0xff] }
 0x3d0   : > { %12155 = vmatprep.mubr.msk.bf16.mxu1 %vm993_vm3, %v16163_v33  ;;  %v8574_v33 = vsel %vm8567_vm8, %v8571_v19, %v8573_v44  ;;  %v18708_v19 = vld [vmem:[#allocation34_spill] sm:$0xff] }
 0x3d1   : > { %v8589_v59 = vrot.slane %v18708_v19, 3  ;;  %v18719_v19 = vld [vmem:[#allocation69_spill] sm:$0xff] }
 0x3d3   : > { %12772 = vmatmul.mubr.msk.bf16.gmra.mrb[132].mxu0 %vm993_vm3, %v7644_v7  ;;  %v8585_v7 = vrot.slane %v18706_v61, 3 }
 0x3d4   : > { %12777 = vmatprep.mubr.msk.bf16.mxu0 %vm993_vm3, %v8570_v27  ;;  %v18707_v27 = vld [vmem:[#allocation33_spill] sm:$0xff] }
 0x3d5   : > { %v8587_v55 = vrot.slane %v18707_v27, 3 }
 0x3d7   : > { %12156 = vmatmul.mubr.msk.bf16.gmra.mrb[68].mxu1 %vm993_vm3, %v16181_v42  ;;  %v8576_v42 = vsel %vm8567_vm8, %v8573_v44, %v8575_v16  ;;  %v18709_v44 = vld [vmem:[#allocation39_spill] sm:$0xff] }
 0x3d8   : > { %12159 = vmatprep.mubr.msk.bf16.mxu1 %vm993_vm3, %v16184_v24  ;;  %v8578_v24 = vsel %vm8567_vm8, %v8575_v16, %v8577_v5  ;;  %v18711_v16 = vld [vmem:[#allocation45_spill] sm:$0xff] }
 0x3d9   : > { %v8595_v52 = vrot.slane %v18711_v16, 3  ;;  %v18722_v16 = vld [vmem:[#allocation76_spill] sm:$0xff] }
 0x3db   : > { %12778 = vmatmul.mubr.msk.bf16.vlgmr.msra.gmra.mrb[0].mxu0 %vm993_vm3, %v8572_v15  ;;  %v8591_v15 = vrot.slane %v18709_v44, 3 }
 0x3dc   : > { %12781 = vmatprep.mubr.msk.bf16.mxu0 %vm993_vm3, %v8574_v33  ;;  %v18710_v33 = vld [vmem:[#allocation40_spill] sm:$0xff] }
 0x3dd   : > { %v8593_v46 = vrot.slane %v18710_v33, 3 }
 0x3df   : > { %12160 = vmatmul.mubr.msk.bf16.gmra.mrb[72].mxu1 %vm993_vm3, %v16201_v21  ;;  %v8580_v21 = vsel %vm8567_vm8, %v8577_v5, %v8579_v4  ;;  %v18712_v5 = vld [vmem:[#allocation46_spill] sm:$0xff] }
 0x3e0   : > { %12163 = vmatprep.mubr.msk.bf16.mxu1 %vm993_vm3, %v16204_v63  ;;  %v8582_v63 = vsel %vm8567_vm8, %v8579_v4, %v8581_v58  ;;  %v18714_v4 = vld [vmem:[#allocation52_spill] sm:$0xff] }
 0x3e1   : > { %v8601_v48 = vrot.slane %v18714_v4, 3  ;;  %v18724_v4 = vld [vmem:[#allocation82_spill] sm:$0xff] }
 0x3e3   : > { %12782 = vmatmul.mubr.msk.bf16.gmra.mrb[4].mxu0 %vm993_vm3, %v8576_v42  ;;  %v8597_v42 = vrot.slane %v18712_v5, 3 }
 0x3e4   : > { %12785 = vmatprep.mubr.msk.bf16.mxu0 %vm993_vm3, %v8578_v24  ;;  %v18713_v24 = vld [vmem:[#allocation51_spill] sm:$0xff] }
 0x3e5   : > { %v8599_v45 = vrot.slane %v18713_v24, 3  ;;  %v18723_v24 = vld [vmem:[#allocation81_spill] sm:$0xff] }
 0x3e7   : > { %12164 = vmatmul.mubr.msk.bf16.gmra.mrb[76].mxu1 %vm993_vm3, %v16221_v9  ;;  %v8584_v9 = vsel %vm8567_vm8, %v8581_v58, %v8583_v11  ;;  %v18715_v58 = vld [vmem:[#allocation57_spill] sm:$0xff] }
 0x3e8   : > { %12167 = vmatprep.mubr.msk.bf16.mxu1 %vm993_vm3, %v16224_v31  ;;  %v8586_v31 = vsel %vm8567_vm8, %v8583_v11, %v8585_v7  ;;  %v18717_v11 = vld [vmem:[#allocation63_spill] sm:$0xff] }
 0x3e9   : > { %v8607_v61 = vrot.slane %v18717_v11, 3 }
 0x3eb   : > { %12786 = vmatmul.mubr.msk.bf16.gmra.mrb[8].mxu0 %vm993_vm3, %v8580_v21  ;;  %v8603_v21 = vrot.slane %v18715_v58, 3 }
 0x3ec   : > { %12789 = vmatprep.mubr.msk.bf16.mxu0 %vm993_vm3, %v8582_v63  ;;  %v18716_v63 = vld [vmem:[#allocation58_spill] sm:$0xff] }
 0x3ed   : > { %v8605_v40 = vrot.slane %v18716_v63, 3  ;;  %v18725_v63 = vld [vmem:[#allocation87_spill] sm:$0xff] }
 0x3ef   : > { %12168 = vmatmul.mubr.msk.bf16.gmra.mrb[80].mxu1 %vm993_vm3, %v16241_v18  ;;  %v8588_v18 = vsel %vm8567_vm8, %v8585_v7, %v8587_v55  ;;  %v18718_v7 = vld [vmem:[#allocation64_spill] sm:$0xff] }
 0x3f0   : > { %12171 = vmatprep.mubr.msk.bf16.mxu1 %vm993_vm3, %v16244_v34  ;;  %v8590_v34 = vsel %vm8567_vm8, %v8587_v55, %v8589_v59 }
 0x3f3   : > { %12790 = vmatmul.mubr.msk.bf16.gmra.mrb[12].mxu0 %vm993_vm3, %v8584_v9  ;;  %v8609_v9 = vrot.slane %v18718_v7, 3 }
 0x3f4   : > { %12793 = vmatprep.mubr.msk.bf16.mxu0 %vm993_vm3, %v8586_v31 }
 0x3f7   : > { %12172 = vmatmul.mubr.msk.bf16.gmra.mrb[84].mxu1 %vm993_vm3, %v16261_v49  ;;  %v8592_v49 = vsel %vm8567_vm8, %v8589_v59, %v8591_v15  ;;  %v8611_v59 = vrot.slane %v18719_v19, 3  ;;  %v18728_v19 = vld [vmem:[#allocation94_spill] sm:$0xff] }
 0x3f8   : > { %12175 = vmatprep.mubr.msk.bf16.mxu1 %vm993_vm3, %v16264_v37  ;;  %v8594_v37 = vsel %vm8567_vm8, %v8591_v15, %v8593_v46 }
 0x3fb   : > { %12794 = vmatmul.mubr.msk.bf16.gmra.mrb[16].mxu0 %vm993_vm3, %v8588_v18  ;;  %v18720_v18 = vld [vmem:[#allocation70_spill] sm:$0xff] }
 0x3fc   : > { %12797 = vmatprep.mubr.msk.bf16.mxu0 %vm993_vm3, %v8590_v34  ;;  %v8613_v34 = vrot.slane %v18720_v18, 3 }
 0x3fe   : > { %v8614_v44 = vsel %vm8567_vm8, %v8611_v59, %v8613_v34 }
 0x3ff   : > { %12176 = vmatmul.mubr.msk.bf16.gmra.mrb[88].mxu1 %vm993_vm3, %v16281_v23  ;;  %v8596_v23 = vsel %vm8567_vm8, %v8593_v46, %v8595_v52 }
 0x400   : > { %12179 = vmatprep.mubr.msk.bf16.mxu1 %vm993_vm3, %v16284_v53  ;;  %v8598_v53 = vsel %vm8567_vm8, %v8595_v52, %v8597_v42  ;;  %v8617_v52 = vrot.slane %v18722_v16, 3 }
 0x403   : > { %12798 = vmatmul.mubr.msk.bf16.gmra.mrb[20].mxu0 %vm993_vm3, %v8592_v49  ;;  %v18721_v49 = vld [vmem:[#allocation75_spill] sm:$0xff] }
 0x404   : > { %12801 = vmatprep.mubr.msk.bf16.mxu0 %vm993_vm3, %v8594_v37  ;;  %v8615_v37 = vrot.slane %v18721_v49, 3 }
 0x406   : > { %v8618_v5 = vsel %vm8567_vm8, %v8615_v37, %v8617_v52 }
 0x407   : > { %12180 = vmatmul.mubr.msk.bf16.gmra.mrb[92].mxu1 %vm993_vm3, %v16301_v2  ;;  %v8600_v2 = vsel %vm8567_vm8, %v8597_v42, %v8599_v45 }
 0x408   : > { %12183 = vmatprep.mubr.msk.bf16.mxu1 %vm993_vm3, %v16304_v36  ;;  %v8602_v36 = vsel %vm8567_vm8, %v8599_v45, %v8601_v48  ;;  %v8619_v45 = vrot.slane %v18723_v24, 3  ;;  %v18732_v24 = vld [vmem:[#allocation108_spill] sm:$0xff] }
 0x40b   : > { %12802 = vmatmul.mubr.msk.bf16.gmra.mrb[24].mxu0 %vm993_vm3, %v8596_v23 }
 0x40c   : > { %12805 = vmatprep.mubr.msk.bf16.mxu0 %vm993_vm3, %v8598_v53 }
 0x40f   : > { %12184 = vmatmul.mubr.msk.bf16.gmra.mrb[96].mxu1 %vm993_vm3, %v16321_v3  ;;  %v8604_v3 = vsel %vm8567_vm8, %v8601_v48, %v8603_v21  ;;  %v8621_v48 = vrot.slane %v18724_v4, 3  ;;  %v18733_v4 = vld [vmem:[#allocation104_spill] sm:$0xff] }
 0x410   : > { %12187 = vmatprep.mubr.msk.bf16.mxu1 %vm993_vm3, %v16324_v41  ;;  %v8606_v41 = vsel %vm8567_vm8, %v8603_v21, %v8605_v40 }
 0x413   : > { %12806 = vmatmul.mubr.msk.bf16.gmra.mrb[28].mxu0 %vm993_vm3, %v8600_v2  ;;  %v8622_v2 = vsel %vm8567_vm8, %v8619_v45, %v8621_v48 }
 0x414   : > { %12809 = vmatprep.mubr.msk.bf16.mxu0 %vm993_vm3, %v8602_v36 }
 0x417   : > { %12188 = vmatmul.mubr.msk.bf16.gmra.mrb[100].mxu1 %vm993_vm3, %v16341_v47  ;;  %v8608_v47 = vsel %vm8567_vm8, %v8605_v40, %v8607_v61  ;;  %v8623_v40 = vrot.slane %v18725_v63, 3 }
 0x418   : > { %12191 = vmatprep.mubr.msk.bf16.mxu1 %vm993_vm3, %v16344_v57  ;;  %v8610_v57 = vsel %vm8567_vm8, %v8607_v61, %v8609_v9 }
 0x41b   : > { %12810 = vmatmul.mubr.msk.bf16.gmra.mrb[32].mxu0 %vm993_vm3, %v8604_v3  ;;  %v18726_v3 = vld [vmem:[#allocation88_spill] sm:$0xff] }
 0x41c   : > { %12813 = vmatprep.mubr.msk.bf16.mxu0 %vm993_vm3, %v8606_v41  ;;  %v8625_v41 = vrot.slane %v18726_v3, 3 }
 0x41e   : > { %v8626_v11 = vsel %vm8567_vm8, %v8623_v40, %v8625_v41 }
 0x41f   : > { %12192 = vmatmul.mubr.msk.bf16.gmra.mrb[104].mxu1 %vm993_vm3, %v16361_v43 }
 0x420   : > { %12195 = vmatprep.mubr.msk.bf16.mxu1 %vm993_vm3, %v16364_v62  ;;  %v8612_v62 = vsel %vm8567_vm8, %v8609_v9, %v8611_v59  ;;  %v8629_v59 = vrot.slane %v18728_v19, 3 }
 0x422   : > { %v16805_v31 = vpop.f32.mrb[0].mxu1 }
 0x423   : > { %12814 = vmatmul.mubr.msk.bf16.gmra.mrb[36].mxu0 %vm993_vm3, %v8608_v47  ;;  %v16808_v27 = vpop.f32.mrb[1].mxu1  ;;  %v18727_v47 = vld [vmem:[#allocation93_spill] sm:$0xff] }
 0x424   : > { %v16810_v55 = vpop.f32.mrb[2].mxu1  ;;  %12817 = vmatprep.mubr.msk.bf16.mxu0 %vm993_vm3, %v8610_v57  ;;  %v8627_v57 = vrot.slane %v18727_v47, 3 }
 0x425   : > { %v16814_v43 = vpop.f32.mrb[3].mxu1 }
 0x426   : > { %v8630_v18 = vsel %vm8567_vm8, %v8627_v57, %v8629_v59 }
 0x427   : > { %12196 = vmatmul.mubr.msk.bf16.gmra.mrb[108].mxu1 %vm993_vm3, %v16381_v14 }
 0x428   : > { %12199 = vmatprep.mubr.msk.bf16.mxu1 %vm993_vm3, %v16384_v6  ;;  %v8616_v6 = vsel %vm8567_vm8, %v8613_v34, %v8615_v37  ;;  %v3631_v34 = vrot.slane %v18690_v17, 1 }
 0x42a   : > { %v16823_v15 = vpop.f32.mrb[4].mxu1 }
 0x42b   : > { %12818 = vmatmul.mubr.msk.bf16.gmra.mrb[40].mxu0 %vm993_vm3, %v8612_v62  ;;  %v16826_v33 = vpop.f32.mrb[5].mxu1 }
 0x42c   : > { %v16828_v46 = vpop.f32.mrb[6].mxu1  ;;  %12821 = vmatprep.mubr.msk.bf16.mxu0 %vm993_vm3, %v8614_v44 }
 0x42d   : > { %v16832_v14 = vpop.f32.mrb[7].mxu1 }
 0x42f   : > { %12200 = vmatmul.mubr.msk.bf16.gmra.mrb[112].mxu1 %vm993_vm3, %v16401_v30 }
 0x430   : > { %12203 = vmatprep.mubr.msk.bf16.mxu1 %vm993_vm3, %v16404_v39  ;;  %v8620_v39 = vsel %vm8567_vm8, %v8617_v52, %v8619_v45  ;;  %v4499_v45 = vrot.slane %v18732_v24, 1 }
 0x432   : > { %v16841_v42 = vpop.f32.mrb[8].mxu1 }
 0x433   : > { %12822 = vmatmul.mubr.msk.bf16.gmra.mrb[44].mxu0 %vm993_vm3, %v8616_v6  ;;  %v16844_v23 = vpop.f32.mrb[9].mxu1  ;;  %v18731_v6 = vld [vmem:[#allocation102_spill] sm:$0xff] }
 0x434   : > { %v16846_v53 = vpop.f32.mrb[10].mxu1  ;;  %12825 = vmatprep.mubr.msk.bf16.mxu0 %vm993_vm3, %v8618_v5  ;;  %v8633_v5 = vrot.slane %v18731_v6, 3  ;;  %v18739_v6 = vld [vmem:[#allocation115_spill] sm:$0xff] }
 0x435   : > { %v16850_v30 = vpop.f32.mrb[11].mxu1  ;;  %v4507_v24 = vrot.slane %v18739_v6, 1  ;;  %v4515_v6 = vrot.slane %v18617_v8, 1 }
 0x437   : > { %12204 = vmatmul.mubr.msk.bf16.gmra.mrb[116].mxu1 %vm993_vm3, %v16421_v28 }
 0x438   : > { %12207 = vmatprep.mubr.msk.bf16.mxu1 %vm993_vm3, %v16424_v56  ;;  %v8624_v56 = vsel %vm8567_vm8, %v8621_v48, %v8623_v40  ;;  %v4500_v48 = vrot.slane %v18733_v4, 2 }
 0x43a   : > { %v16859_v36 = vpop.f32.mrb[12].mxu1  ;;  %v4501_v40 = vor.u32 %v4500_v48, %v4499_v45  ;;  %v18740_v45 = vld [vmem:[#allocation110_spill] sm:$0xff] }
 0x43b   : > { %12826 = vmatmul.mubr.msk.bf16.gmra.mrb[48].mxu0 %vm993_vm3, %v8620_v39  ;;  %v16862_v58 = vpop.f32.mrb[13].mxu1  ;;  %v4508_v4 = vrot.slane %v18740_v45, 2 }
 0x43c   : > { %v16864_v21 = vpop.f32.mrb[14].mxu1  ;;  %12829 = vmatprep.mubr.msk.bf16.mxu0 %vm993_vm3, %v8622_v2  ;;  %v3633_v2 = vrot.slane %v15691_v0, 1 }
 0x43d   : > { %v16868_v28 = vpop.f32.mrb[15].mxu1 }
 0x43f   : > { %12208 = vmatmul.mubr.msk.bf16.gmra.mrb[120].mxu1 %vm993_vm3, %v16441_v10 }
 0x440   : > { %12211 = vmatprep.mubr.msk.bf16.mxu1 %vm993_vm3, %v16444_v29  ;;  %v8628_v29 = vsel %vm8567_vm8, %v8625_v41, %v8627_v57  ;;  %v18735_v57 = vld [vmem:[#allocation109_spill] sm:$0xff] }
 0x441   : > { %v4503_v19 = vrot.slane %v18735_v57, 1 }
 0x442   : > { %v16877_v61 = vpop.f32.mrb[16].mxu1 }
 0x443   : > { %12830 = vmatmul.mubr.msk.bf16.gmra.mrb[52].mxu0 %vm993_vm3, %v8624_v56  ;;  %v16880_v7 = vpop.f32.mrb[17].mxu1 }
 0x444   : > { %v16882_v9 = vpop.f32.mrb[18].mxu1  ;;  %12833 = vmatprep.mubr.msk.bf16.mxu0 %vm993_vm3, %v8626_v11  ;;  %v18734_v11 = vld [vmem:[#allocation105_spill] sm:$0xff] }
 0x445   : > { %v16886_v10 = vpop.f32.mrb[19].mxu1  ;;  %v8635_v47 = vrot.slane %v18734_v11, 3 }
 0x447   : > { %12212 = vmatmul.mubr.msk.bf16.gmra.mrb[124].mxu1 %vm993_vm3, %v16461_v20  ;;  %v18729_v20 = vld [vmem:[#allocation99_spill] sm:$0xff] }
 0x448   : > { %12215 = vmatprep.mubr.msk.bf16.mxu1 %vm993_vm3, %v16464_v22  ;;  %v8631_v37 = vrot.slane %v18729_v20, 3  ;;  %v18730_v22 = vrot.slane %v15377_v13, 1  ;;  %v18737_v20 = vld [vmem:[#allocation103_spill] sm:$0xff] }
 0x44a   : > { %v16896_v62 = vpop.f32.mrb[20].mxu1  ;;  %v3632_v52 = vsel %vm2569_vm6, %v18730_v22, %v3631_v34  ;;  %v8632_v39 = vsel %vm8567_vm8, %v8629_v59, %v8631_v37  ;;  %v8634_v63 = vsel %vm8567_vm8, %v8631_v37, %v8633_v5  ;;  %v18736_v59 = vld [vmem:[#allocation107_spill] sm:$0xff]  ;;  %v4502_v37 = vsel %vm4359_vm4, %v18737_v20, %v4501_v40  ;;  %v18738_v22 = vld [vmem:[#allocation106_spill] sm:$0xff] }
 0x44b   : > { %12834 = vmatmul.mubr.msk.bf16.gmra.mrb[56].mxu0 %vm993_vm3, %v8628_v29  ;;  %v16899_v44 = vpop.f32.mrb[21].mxu1  ;;  %v4504_v29 = vrot.slane %v18736_v59, 2  ;;  %v18741_v59 = vld [vmem:[#allocation111_spill] sm:$0xff]  ;;  %v4511_v20 = vrot.slane %v18615_v50, 1 }
 0x44c   : > { %v16901_v49 = vpop.f32.mrb[22].mxu1  ;;  %12837 = vmatprep.mubr.msk.bf16.mxu0 %vm993_vm3, %v8630_v18 }
 0x44d   : > { %v16905_v16 = vpop.f32.mrb[23].mxu1  ;;  %v4505_v48 = vor.u32 %v4504_v29, %v4503_v19  ;;  %v4512_v19 = vrot.slane %v18616_v54, 2 }
 0x44f   : > { %12216 = vmatmul.mubr.msk.bf16.gmra.mrb[128].mxu1 %vm993_vm3, %v16482_v38  ;;  %v3634_v38 = vsel %vm2569_vm6, %v3631_v34, %v3633_v2  ;;  %v8636_v34 = vsel %vm8567_vm8, %v8633_v5, %v8635_v47  ;;  %v4509_v2 = vor.u32 %v4508_v4, %v4507_v24  ;;  %v8639_v5 = vrot.slane %v18741_v59, 3  ;;  %v18743_v24 = vld [vmem:[#allocation117_spill] sm:$0xff] }
 0x450   : > { %12219 = vmatprep.mubr.msk.bf16.mxu1 %vm993_vm3, %v3632_v52  ;;  %v8637_v52 = vrot.slane %v18738_v22, 3  ;;  %v4516_v45 = vrot.slane %v18743_v24, 2  ;;  %v4513_v4 = vor.u32 %v4512_v19, %v4511_v20  ;;  %v4519_v59 = vrot.slane %v18619_v60, 1  ;;  %v18748_v20 = vld [vmem:[#allocation122_spill] sm:$0xff]  ;;  %v18751_v24 = vld [vmem:[#allocation131_spill] sm:$0xff] }
 0x451   : > { %v4510_v29 = vsel %vm4359_vm4, %v4505_v48, %v4509_v2  ;;  %v4520_v19 = vrot.slane %v18748_v20, 2 }
 0x452   : > { %v16919_v3 = vpop.f32.mrb[24].mxu1  ;;  %v4517_v54 = vor.u32 %v4516_v45, %v4515_v6  ;;  %v4514_v8 = vsel %vm4359_vm4, %v4509_v2, %v4513_v4  ;;  %v4523_v45 = vrot.slane %v18751_v24, 1  ;;  %v18756_v24 = vld [vmem:[#allocation126_spill] sm:$0xff] }
 0x453   : > { %12838 = vmatmul.mubr.msk.bf16.gmra.mrb[60].mxu0 %vm993_vm3, %v8632_v39  ;;  %v16922_v41 = vpop.f32.mrb[25].mxu1  ;;  %v8638_v39 = vsel %vm8567_vm8, %v8635_v47, %v8637_v52 }
 0x454   : > { %v16924_v56 = vpop.f32.mrb[26].mxu1  ;;  %12841 = vmatprep.mubr.msk.bf16.mxu0 %vm993_vm3, %v8634_v63 }
 0x455   : > { %v16931_v18 = vpop.f32.mrb[27].mxu1 }
 0x457   : > { %12220 = vmatmul.mubr.msk.bf16.gmra.mrb[132].mxu1 %vm993_vm3, %v3634_v38  ;;  %v4506_v38 = vsel %vm4359_vm4, %v4501_v40, %v4505_v48  ;;  %v8640_v40 = vsel %vm8567_vm8, %v8637_v52, %v8639_v5 }
 0x458   : > { %12293 = vmatprep.mubr.msk.bf16.mxu1 %vm993_vm3, %v4502_v37  ;;  %v18742_v37 = vld [vmem:[#allocation113_spill] sm:$0xff] }
 0x459   : > { %v8641_v22 = vrot.slane %v18742_v37, 3  ;;  %v18750_v37 = vld [vmem:[#allocation121_spill] sm:$0xff] }
 0x45a   : > { %v16942_v63 = vpop.f32.mrb[28].mxu1  ;;  %v8645_v6 = vrot.slane %v18750_v37, 3 }
 0x45b   : > { %12842 = vmatmul.mubr.msk.bf16.gmra.mrb[64].mxu0 %vm993_vm3, %v8636_v34  ;;  %v16945_v11 = vpop.f32.mrb[29].mxu1  ;;  %v8642_v50 = vsel %vm8567_vm8, %v8639_v5, %v8641_v22 }
 0x45c   : > { %v16947_v57 = vpop.f32.mrb[30].mxu1  ;;  %12845 = vmatprep.mubr.msk.bf16.mxu0 %vm993_vm3, %v8638_v39 }
 0x45d   : > { %v16954_v47 = vpop.f32.mrb[31].mxu1 }
 0x45f   : > { %12294 = vmatmul.mubr.msk.bf16.vlgmr.msra.gmra.mrb[68].mxu1 %vm993_vm3, %v4506_v38  ;;  %v18747_v38 = vld [vmem:[#allocation118_spill] sm:$0xff] }
 0x460   : > { %12297 = vmatprep.mubr.msk.bf16.mxu1 %vm993_vm3, %v4510_v29  ;;  %v8643_v52 = vrot.slane %v18747_v38, 3  ;;  %v4518_v29 = vsel %vm4359_vm4, %v4513_v4, %v4517_v54 }
 0x462   : > { %v16964_v34 = vpop.f32.mrb[32].mxu1  ;;  %v8644_v2 = vsel %vm8567_vm8, %v8641_v22, %v8643_v52  ;;  %v8646_v60 = vsel %vm8567_vm8, %v8643_v52, %v8645_v6  ;;  %v8647_v22 = vrot.slane %v18756_v24, 3 }
 0x463   : > { %18744 = vst [vmem:[#allocation208_spill] sm:$0xff] %v16964_v34  ;;  %12846 = vmatmul.mubr.msk.bf16.gmra.mrb[68].mxu0 %vm993_vm3, %v8640_v40  ;;  %v16967_v48 = vpop.f32.mrb[33].mxu1  ;;  %v18752_v40 = vld [vmem:[#allocation125_spill] sm:$0xff] }
 0x464   : > { %18745 = vst [vmem:[#allocation215_spill] sm:$0xff] %v16967_v48  ;;  %v16969_v39 = vpop.f32.mrb[34].mxu1  ;;  %12849 = vmatprep.mubr.msk.bf16.mxu0 %vm993_vm3, %v8642_v50  ;;  %v4524_v12 = vrot.slane %v18752_v40, 2  ;;  %v4521_v50 = vor.u32 %v4520_v19, %v4519_v59  ;;  %v18757_v59 = vld [vmem:[#allocation130_spill] sm:$0xff] }
 0x465   : > { %18746 = vst [vmem:[#allocation216_spill] sm:$0xff] %v16969_v39  ;;  %v16976_v5 = vpop.f32.mrb[35].mxu1  ;;  %v4528_v19 = vrot.slane %v18757_v59, 2 }
 0x466   : > { %18749 = vst [vmem:[#allocation2_spill] sm:$0xff] %v16976_v5  ;;  %v4525_v38 = vor.u32 %v4524_v12, %v4523_v45  ;;  %v18759_v45 = vld [vmem:[#allocation129_spill] sm:$0xff] }
 0x467   : > { %12298 = vmatmul.mubr.msk.bf16.gmra.mrb[72].mxu1 %vm993_vm3, %v4514_v8  ;;  %v4522_v8 = vsel %vm4359_vm4, %v4517_v54, %v4521_v50  ;;  %v8649_v40 = vrot.slane %v18759_v45, 3  ;;  %v8648_v54 = vsel %vm8567_vm8, %v8645_v6, %v8647_v22 }
 0x468   : > { %12301 = vmatprep.mubr.msk.bf16.mxu1 %vm993_vm3, %v4518_v29  ;;  %v4527_v29 = vrot.slane %v18623_v32, 1  ;;  %v4526_v12 = vsel %vm4359_vm4, %v4521_v50, %v4525_v38 }
 0x469   : > { %v8650_v32 = vsel %vm8567_vm8, %v8647_v22, %v8649_v40 }
 0x46a   : > { %v16986_v20 = vpop.f32.mrb[36].mxu1 }
 0x46b   : > { %18753 = vst [vmem:[#allocation224_spill] sm:$0xff] %v16986_v20  ;;  %12850 = vmatmul.mubr.msk.bf16.gmra.mrb[72].mxu0 %vm993_vm3, %v8644_v2  ;;  %v16989_v4 = vpop.f32.mrb[37].mxu1  ;;  %v18760_v2 = vld [vmem:[#allocation139_spill] sm:$0xff]  ;;  %v18761_v20 = vld [vmem:[#allocation133_spill] sm:$0xff] }
 0x46c   : > { %18754 = vst [vmem:[#allocation225_spill] sm:$0xff] %v16989_v4  ;;  %v16991_v37 = vpop.f32.mrb[38].mxu1  ;;  %12853 = vmatprep.mubr.msk.bf16.mxu0 %vm993_vm3, %v8646_v60  ;;  %v4531_v4 = vrot.slane %v18760_v2, 1  ;;  %v4529_v60 = vor.u32 %v4528_v19, %v4527_v29  ;;  %v18766_v2 = vld [vmem:[#allocation140_spill] sm:$0xff]  ;;  %v18767_v29 = vld [vmem:[#allocation138_spill] sm:$0xff] }
 0x46d   : > { %18755 = vst [vmem:[#allocation226_spill] sm:$0xff] %v16991_v37  ;;  %v16998_v52 = vpop.f32.mrb[39].mxu1  ;;  %v4532_v37 = vrot.slane %v18761_v20, 2  ;;  %v4536_v19 = vrot.slane %v18767_v29, 2 }
 0x46e   : > { %18758 = vst [vmem:[#allocation227_spill] sm:$0xff] %v16998_v52  ;;  %v4530_v20 = vsel %vm4359_vm4, %v4525_v38, %v4529_v60  ;;  %v18771_v52 = vld [vmem:[#allocation141_spill] sm:$0xff] }
 0x46f   : > { %12302 = vmatmul.mubr.msk.bf16.gmra.mrb[76].mxu1 %vm993_vm3, %v4522_v8  ;;  %v4533_v24 = vor.u32 %v4532_v37, %v4531_v4  ;;  %v18765_v8 = vld [vmem:[#allocation134_spill] sm:$0xff]  ;;  %v18769_v37 = vld [vmem:[#allocation137_spill] sm:$0xff] }
 0x470   : > { %12305 = vmatprep.mubr.msk.bf16.mxu1 %vm993_vm3, %v4526_v12  ;;  %v8651_v6 = vrot.slane %v18765_v8, 3  ;;  %v4535_v12 = vrot.slane %v18766_v2, 1 }
 0x471   : > { %v4534_v4 = vsel %vm4359_vm4, %v4529_v60, %v4533_v24 }
 0x472   : > { %v17008_v59 = vpop.f32.mrb[40].mxu1  ;;  %v8652_v38 = vsel %vm8567_vm8, %v8649_v40, %v8651_v6 }
 0x473   : > { %18762 = vst [vmem:[#allocation228_spill] sm:$0xff] %v17008_v59  ;;  %12854 = vmatmul.mubr.msk.bf16.gmra.mrb[76].mxu0 %vm993_vm3, %v8648_v54  ;;  %v17011_v50 = vpop.f32.mrb[41].mxu1  ;;  %v8653_v54 = vrot.slane %v18769_v37, 3  ;;  %v18770_v59 = vld [vmem:[#allocation147_spill] sm:$0xff] }
 0x474   : > { %18763 = vst [vmem:[#allocation229_spill] sm:$0xff] %v17011_v50  ;;  %v17013_v45 = vpop.f32.mrb[42].mxu1  ;;  %12857 = vmatprep.mubr.msk.bf16.mxu0 %vm993_vm3, %v8650_v32  ;;  %v4539_v50 = vrot.slane %v18770_v59, 1  ;;  %v4537_v32 = vor.u32 %v4536_v19, %v4535_v12  ;;  %v18775_v59 = vld [vmem:[#allocation142_spill] sm:$0xff] }
 0x475   : > { %18764 = vst [vmem:[#allocation230_spill] sm:$0xff] %v17013_v45  ;;  %v17020_v22 = vpop.f32.mrb[43].mxu1  ;;  %v4540_v45 = vrot.slane %v18771_v52, 2  ;;  %v8654_v8 = vsel %vm8567_vm8, %v8651_v6, %v8653_v54  ;;  %v8655_v40 = vrot.slane %v18775_v59, 3  ;;  %v18777_v12 = vld [vmem:[#allocation146_spill] sm:$0xff] }
 0x476   : > { %18768 = vst [vmem:[#allocation231_spill] sm:$0xff] %v17020_v22  ;;  %v4538_v52 = vsel %vm4359_vm4, %v4533_v24, %v4537_v32  ;;  %v4544_v19 = vrot.slane %v18777_v12, 2  ;;  %v18781_v22 = vld [vmem:[#allocation149_spill] sm:$0xff] }
 0x477   : > { %12306 = vmatmul.mubr.msk.bf16.gmra.mrb[80].mxu1 %vm993_vm3, %v4530_v20  ;;  %v4541_v2 = vor.u32 %v4540_v45, %v4539_v50  ;;  %v18776_v20 = vld [vmem:[#allocation148_spill] sm:$0xff]  ;;  %v18779_v45 = vld [vmem:[#allocation145_spill] sm:$0xff]  ;;  %v8656_v24 = vsel %vm8567_vm8, %v8653_v54, %v8655_v40 }
 0x478   : > { %12309 = vmatprep.mubr.msk.bf16.mxu1 %vm993_vm3, %v4534_v4  ;;  %v4543_v4 = vrot.slane %v18776_v20, 1 }
 0x479   : > { %v4542_v50 = vsel %vm4359_vm4, %v4537_v32, %v4541_v2 }
 0x47a   : > { %v17030_v29 = vpop.f32.mrb[44].mxu1 }
 0x47b   : > { %18772 = vst [vmem:[#allocation232_spill] sm:$0xff] %v17030_v29  ;;  %12858 = vmatmul.mubr.msk.bf16.gmra.mrb[80].mxu0 %vm993_vm3, %v8652_v38  ;;  %v17033_v60 = vpop.f32.mrb[45].mxu1  ;;  %v8657_v38 = vrot.slane %v18779_v45, 3  ;;  %v18780_v29 = vld [vmem:[#allocation155_spill] sm:$0xff] }
 0x47c   : > { %18773 = vst [vmem:[#allocation233_spill] sm:$0xff] %v17033_v60  ;;  %v17035_v37 = vpop.f32.mrb[46].mxu1  ;;  %12861 = vmatprep.mubr.msk.bf16.mxu0 %vm993_vm3, %v8654_v8  ;;  %v4547_v60 = vrot.slane %v18780_v29, 1  ;;  %v4545_v8 = vor.u32 %v4544_v19, %v4543_v4  ;;  %v18785_v29 = vld [vmem:[#allocation150_spill] sm:$0xff] }
 0x47d   : > { %18774 = vst [vmem:[#allocation234_spill] sm:$0xff] %v17035_v37  ;;  %v17042_v6 = vpop.f32.mrb[47].mxu1  ;;  %v4548_v37 = vrot.slane %v18781_v22, 2  ;;  %v8658_v59 = vsel %vm8567_vm8, %v8655_v40, %v8657_v38  ;;  %v8659_v54 = vrot.slane %v18785_v29, 3  ;;  %v18787_v4 = vld [vmem:[#allocation154_spill] sm:$0xff] }
 0x47e   : > { %18778 = vst [vmem:[#allocation235_spill] sm:$0xff] %v17042_v6  ;;  %v4546_v22 = vsel %vm4359_vm4, %v4541_v2, %v4545_v8  ;;  %v4552_v19 = vrot.slane %v18787_v4, 2  ;;  %v18791_v6 = vld [vmem:[#allocation157_spill] sm:$0xff] }
 0x47f   : > { %12310 = vmatmul.mubr.msk.bf16.gmra.mrb[84].mxu1 %vm993_vm3, %v4538_v52  ;;  %v4549_v20 = vor.u32 %v4548_v37, %v4547_v60  ;;  %v18786_v52 = vld [vmem:[#allocation156_spill] sm:$0xff]  ;;  %v18789_v37 = vld [vmem:[#allocation153_spill] sm:$0xff]  ;;  %v8660_v2 = vsel %vm8567_vm8, %v8657_v38, %v8659_v54 }
 0x480   : > { %12313 = vmatprep.mubr.msk.bf16.mxu1 %vm993_vm3, %v4542_v50  ;;  %v4551_v50 = vrot.slane %v18786_v52, 1 }
 0x481   : > { %v4550_v60 = vsel %vm4359_vm4, %v4545_v8, %v4549_v20 }
 0x482   : > { %v17052_v12 = vpop.f32.mrb[48].mxu1 }
 0x483   : > { %18782 = vst [vmem:[#allocation236_spill] sm:$0xff] %v17052_v12  ;;  %12862 = vmatmul.mubr.msk.bf16.gmra.mrb[84].mxu0 %vm993_vm3, %v8656_v24  ;;  %v17055_v32 = vpop.f32.mrb[49].mxu1  ;;  %v8661_v24 = vrot.slane %v18789_v37, 3  ;;  %v18790_v12 = vld [vmem:[#allocation163_spill] sm:$0xff] }
 0x484   : > { %18783 = vst [vmem:[#allocation237_spill] sm:$0xff] %v17055_v32  ;;  %v17057_v45 = vpop.f32.mrb[50].mxu1  ;;  %12865 = vmatprep.mubr.msk.bf16.mxu0 %vm993_vm3, %v8658_v59  ;;  %v4555_v32 = vrot.slane %v18790_v12, 1  ;;  %v4553_v59 = vor.u32 %v4552_v19, %v4551_v50  ;;  %v18795_v12 = vld [vmem:[#allocation158_spill] sm:$0xff] }
 0x485   : > { %18784 = vst [vmem:[#allocation238_spill] sm:$0xff] %v17057_v45  ;;  %v17064_v40 = vpop.f32.mrb[51].mxu1  ;;  %v4556_v45 = vrot.slane %v18791_v6, 2  ;;  %v8662_v29 = vsel %vm8567_vm8, %v8659_v54, %v8661_v24  ;;  %v8663_v38 = vrot.slane %v18795_v12, 3  ;;  %v18797_v50 = vld [vmem:[#allocation162_spill] sm:$0xff] }
 0x486   : > { %18788 = vst [vmem:[#allocation239_spill] sm:$0xff] %v17064_v40  ;;  %v4554_v6 = vsel %vm4359_vm4, %v4549_v20, %v4553_v59  ;;  %v4560_v19 = vrot.slane %v18797_v50, 2  ;;  %v18801_v40 = vld [vmem:[#allocation165_spill] sm:$0xff] }
 0x487   : > { %12314 = vmatmul.mubr.msk.bf16.gmra.mrb[88].mxu1 %vm993_vm3, %v4546_v22  ;;  %v4557_v52 = vor.u32 %v4556_v45, %v4555_v32  ;;  %v18796_v22 = vld [vmem:[#allocation164_spill] sm:$0xff]  ;;  %v18799_v45 = vld [vmem:[#allocation161_spill] sm:$0xff]  ;;  %v8664_v20 = vsel %vm8567_vm8, %v8661_v24, %v8663_v38 }
 0x488   : > { %12317 = vmatprep.mubr.msk.bf16.mxu1 %vm993_vm3, %v4550_v60  ;;  %v4559_v60 = vrot.slane %v18796_v22, 1 }
 0x489   : > { %v4558_v32 = vsel %vm4359_vm4, %v4553_v59, %v4557_v52 }
 0x48a   : > { %v17074_v4 = vpop.f32.mrb[52].mxu1 }
 0x48b   : > { %18792 = vst [vmem:[#allocation240_spill] sm:$0xff] %v17074_v4  ;;  %12866 = vmatmul.mubr.msk.bf16.gmra.mrb[88].mxu0 %vm993_vm3, %v8660_v2  ;;  %v17077_v8 = vpop.f32.mrb[53].mxu1  ;;  %v8665_v2 = vrot.slane %v18799_v45, 3  ;;  %v18800_v4 = vld [vmem:[#allocation171_spill] sm:$0xff] }
 0x48c   : > { %18793 = vst [vmem:[#allocation241_spill] sm:$0xff] %v17077_v8  ;;  %v17079_v37 = vpop.f32.mrb[54].mxu1  ;;  %12869 = vmatprep.mubr.msk.bf16.mxu0 %vm993_vm3, %v8662_v29  ;;  %v4563_v8 = vrot.slane %v18800_v4, 1  ;;  %v4561_v29 = vor.u32 %v4560_v19, %v4559_v60  ;;  %v18805_v4 = vld [vmem:[#allocation166_spill] sm:$0xff] }
 0x48d   : > { %18794 = vst [vmem:[#allocation242_spill] sm:$0xff] %v17079_v37  ;;  %v17086_v54 = vpop.f32.mrb[55].mxu1  ;;  %v4564_v37 = vrot.slane %v18801_v40, 2  ;;  %v8666_v12 = vsel %vm8567_vm8, %v8663_v38, %v8665_v2  ;;  %v8667_v24 = vrot.slane %v18805_v4, 3  ;;  %v18807_v60 = vld [vmem:[#allocation170_spill] sm:$0xff] }
 0x48e   : > { %18798 = vst [vmem:[#allocation243_spill] sm:$0xff] %v17086_v54  ;;  %v4562_v40 = vsel %vm4359_vm4, %v4557_v52, %v4561_v29  ;;  %v4568_v19 = vrot.slane %v18807_v60, 2  ;;  %v18811_v54 = vld [vmem:[#allocation173_spill] sm:$0xff] }
 0x48f   : > { %12318 = vmatmul.mubr.msk.bf16.gmra.mrb[92].mxu1 %vm993_vm3, %v4554_v6  ;;  %v4565_v22 = vor.u32 %v4564_v37, %v4563_v8  ;;  %v18806_v6 = vld [vmem:[#allocation172_spill] sm:$0xff]  ;;  %v18809_v37 = vld [vmem:[#allocation169_spill] sm:$0xff]  ;;  %v8668_v52 = vsel %vm8567_vm8, %v8665_v2, %v8667_v24 }
 0x490   : > { %12321 = vmatprep.mubr.msk.bf16.mxu1 %vm993_vm3, %v4558_v32  ;;  %v4567_v32 = vrot.slane %v18806_v6, 1 }
 0x491   : > { %v4566_v8 = vsel %vm4359_vm4, %v4561_v29, %v4565_v22 }
 0x492   : > { %v17096_v50 = vpop.f32.mrb[56].mxu1 }
 0x493   : > { %18802 = vst [vmem:[#allocation244_spill] sm:$0xff] %v17096_v50  ;;  %12870 = vmatmul.mubr.msk.bf16.gmra.mrb[92].mxu0 %vm993_vm3, %v8664_v20  ;;  %v17099_v59 = vpop.f32.mrb[57].mxu1  ;;  %v8669_v20 = vrot.slane %v18809_v37, 3  ;;  %v18810_v50 = vld [vmem:[#allocation179_spill] sm:$0xff] }
 0x494   : > { %18803 = vst [vmem:[#allocation245_spill] sm:$0xff] %v17099_v59  ;;  %v17101_v45 = vpop.f32.mrb[58].mxu1  ;;  %12873 = vmatprep.mubr.msk.bf16.mxu0 %vm993_vm3, %v8666_v12  ;;  %v4571_v59 = vrot.slane %v18810_v50, 1  ;;  %v4569_v12 = vor.u32 %v4568_v19, %v4567_v32  ;;  %v18815_v50 = vld [vmem:[#allocation174_spill] sm:$0xff] }
 0x495   : > { %18804 = vst [vmem:[#allocation246_spill] sm:$0xff] %v17101_v45  ;;  %v17108_v38 = vpop.f32.mrb[59].mxu1  ;;  %v4572_v45 = vrot.slane %v18811_v54, 2  ;;  %v8670_v4 = vsel %vm8567_vm8, %v8667_v24, %v8669_v20  ;;  %v8671_v2 = vrot.slane %v18815_v50, 3  ;;  %v18817_v32 = vld [vmem:[#allocation178_spill] sm:$0xff] }
 0x496   : > { %18808 = vst [vmem:[#allocation247_spill] sm:$0xff] %v17108_v38  ;;  %v4570_v54 = vsel %vm4359_vm4, %v4565_v22, %v4569_v12  ;;  %v4576_v19 = vrot.slane %v18817_v32, 2  ;;  %v18821_v38 = vld [vmem:[#allocation181_spill] sm:$0xff] }
 0x497   : > { %12322 = vmatmul.mubr.msk.bf16.gmra.mrb[96].mxu1 %vm993_vm3, %v4562_v40  ;;  %v4573_v6 = vor.u32 %v4572_v45, %v4571_v59  ;;  %v18816_v40 = vld [vmem:[#allocation180_spill] sm:$0xff]  ;;  %v18819_v45 = vld [vmem:[#allocation177_spill] sm:$0xff]  ;;  %v8672_v22 = vsel %vm8567_vm8, %v8669_v20, %v8671_v2 }
 0x498   : > { %12325 = vmatprep.mubr.msk.bf16.mxu1 %vm993_vm3, %v4566_v8  ;;  %v4575_v8 = vrot.slane %v18816_v40, 1 }
 0x499   : > { %v4574_v59 = vsel %vm4359_vm4, %v4569_v12, %v4573_v6 }
 0x49a   : > { %v17118_v60 = vpop.f32.mrb[60].mxu1 }
 0x49b   : > { %18812 = vst [vmem:[#allocation248_spill] sm:$0xff] %v17118_v60  ;;  %12874 = vmatmul.mubr.msk.bf16.gmra.mrb[96].mxu0 %vm993_vm3, %v8668_v52  ;;  %v17121_v29 = vpop.f32.mrb[61].mxu1  ;;  %v8673_v52 = vrot.slane %v18819_v45, 3  ;;  %v18820_v60 = vld [vmem:[#allocation187_spill] sm:$0xff] }
 0x49c   : > { %18813 = vst [vmem:[#allocation249_spill] sm:$0xff] %v17121_v29  ;;  %v17123_v37 = vpop.f32.mrb[62].mxu1  ;;  %12877 = vmatprep.mubr.msk.bf16.mxu0 %vm993_vm3, %v8670_v4  ;;  %v4579_v29 = vrot.slane %v18820_v60, 1  ;;  %v4577_v4 = vor.u32 %v4576_v19, %v4575_v8  ;;  %v18825_v60 = vld [vmem:[#allocation182_spill] sm:$0xff] }
 0x49d   : > { %18814 = vst [vmem:[#allocation5_spill] sm:$0xff] %v17123_v37  ;;  %v17130_v24 = vpop.f32.mrb[63].mxu1  ;;  %v4580_v37 = vrot.slane %v18821_v38, 2  ;;  %v8674_v50 = vsel %vm8567_vm8, %v8671_v2, %v8673_v52  ;;  %v8675_v20 = vrot.slane %v18825_v60, 3  ;;  %v18827_v8 = vld [vmem:[#allocation186_spill] sm:$0xff] }
 0x49e   : > { %18818 = vst [vmem:[#allocation4_spill] sm:$0xff] %v17130_v24  ;;  %v4578_v38 = vsel %vm4359_vm4, %v4573_v6, %v4577_v4  ;;  %v4584_v19 = vrot.slane %v18827_v8, 2  ;;  %v18831_v24 = vld [vmem:[#allocation189_spill] sm:$0xff]  ;;  %v18832_v8 = vld [vmem:[#allocation196_spill] sm:$0xff] }
 0x49f   : > { %12326 = vmatmul.mubr.msk.bf16.gmra.mrb[100].mxu1 %vm993_vm3, %v4570_v54  ;;  %v4581_v40 = vor.u32 %v4580_v37, %v4579_v29  ;;  %v18826_v54 = vld [vmem:[#allocation188_spill] sm:$0xff]  ;;  %v18829_v37 = vld [vmem:[#allocation185_spill] sm:$0xff]  ;;  %v8676_v6 = vsel %vm8567_vm8, %v8673_v52, %v8675_v20 }
 0x4a0   : > { %12329 = vmatprep.mubr.msk.bf16.mxu1 %vm993_vm3, %v4574_v59  ;;  %v4583_v59 = vrot.slane %v18826_v54, 1  ;;  %v18835_v52 = vld [vmem:[#allocation193_spill] sm:$0xff] }
 0x4a1   : > { %v4582_v29 = vsel %vm4359_vm4, %v4577_v4, %v4581_v40  ;;  %v18833_v4 = vld [vmem:[#allocation194_spill] sm:$0xff] }
 0x4a2   : > { %v17140_v32 = vpop.f32.mrb[64].mxu1  ;;  %v4592_v5 = vrot.slane %v18833_v4, 2  ;;  %v4599_v4 = vrot.slane %v18676_v51, 1 }
 0x4a3   : > { %18822 = vst [vmem:[#allocation9_spill] sm:$0xff] %v17140_v32  ;;  %12878 = vmatmul.mubr.msk.bf16.gmra.mrb[100].mxu0 %vm993_vm3, %v8672_v22  ;;  %v17143_v12 = vpop.f32.mrb[65].mxu1  ;;  %v8677_v22 = vrot.slane %v18829_v37, 3  ;;  %v18830_v32 = vld [vmem:[#allocation195_spill] sm:$0xff] }
 0x4a4   : > { %18823 = vst [vmem:[#allocation8_spill] sm:$0xff] %v17143_v12  ;;  %v17145_v45 = vpop.f32.mrb[66].mxu1  ;;  %12881 = vmatprep.mubr.msk.bf16.mxu0 %vm993_vm3, %v8674_v50  ;;  %v4587_v12 = vrot.slane %v18830_v32, 1  ;;  %v4585_v50 = vor.u32 %v4584_v19, %v4583_v59  ;;  %v18834_v32 = vld [vmem:[#allocation190_spill] sm:$0xff]  ;;  %v18837_v19 = vld [vmem:[#allocation197_spill] sm:$0xff] }
 0x4a5   : > { %18824 = vst [vmem:[#allocation11_spill] sm:$0xff] %v17145_v45  ;;  %v17152_v2 = vpop.f32.mrb[67].mxu1  ;;  %v4588_v45 = vrot.slane %v18831_v24, 2  ;;  %v8678_v60 = vsel %vm8567_vm8, %v8675_v20, %v8677_v22  ;;  %v8679_v37 = vrot.slane %v18834_v32, 3  ;;  %v4596_v20 = vrot.slane %v18837_v19, 2 }
 0x4a6   : > { %18828 = vst [vmem:[#allocation10_spill] sm:$0xff] %v17152_v2  ;;  %v4591_v2 = vrot.slane %v18832_v8, 1  ;;  %v4586_v24 = vsel %vm4359_vm4, %v4581_v40, %v4585_v50 }
 0x4a7   : > { %12330 = vmatmul.mubr.msk.bf16.gmra.mrb[104].mxu1 %vm993_vm3, %v4578_v38  ;;  %v4589_v54 = vor.u32 %v4588_v45, %v4587_v12  ;;  %v8681_v38 = vrot.slane %v18835_v52, 3 }
 0x4a8   : > { %12333 = vmatprep.mubr.msk.bf16.mxu1 %vm993_vm3, %v4582_v29  ;;  %v18836_v29 = vld [vmem:[#allocation203_spill] sm:$0xff]  ;;  %v4593_v45 = vor.u32 %v4592_v5, %v4591_v2 }
 0x4a9   : > { %v4595_v59 = vrot.slane %v18836_v29, 1  ;;  %v4590_v12 = vsel %vm4359_vm4, %v4585_v50, %v4589_v54  ;;  %v8680_v50 = vsel %vm8567_vm8, %v8677_v22, %v8679_v37  ;;  %v8682_v52 = vsel %vm8567_vm8, %v8679_v37, %v8681_v38  ;;  %v18838_v29 = vld [vmem:[#allocation198_spill] sm:$0xff] }
 0x4aa   : > { %v8683_v51 = vrot.slane %v18838_v29, 3  ;;  %v4594_v39 = vsel %vm4359_vm4, %v4589_v54, %v4593_v45  ;;  %v18841_v54 = vld [vmem:[#allocation205_spill] sm:$0xff] }
 0x4ab   : > { %12882 = vmatmul.mubr.msk.bf16.gmra.mrb[104].mxu0 %vm993_vm3, %v8676_v6  ;;  %v17175_v6 = vld [vmem:[%s17780_s2] ss:$0 sm:$0xff]  ;;  %v4597_v19 = vor.u32 %v4596_v20, %v4595_v59  ;;  %v4604_v59 = vrot.slane %v18841_v54, 2 }
 0x4ac   : > { %12885 = vmatprep.mubr.msk.bf16.mxu0 %vm993_vm3, %v8678_v60  ;;  %v4600_v60 = vrot.slane %v18677_v26, 2 }
 0x4ae   : > { %v12779_v8 = vpop.f32.mrb[0].mxu0 }
 0x4af   : > { %v12915_v40 = vadd.f32 %v12779_v8, %v16805_v31  ;;  %v8946_v32 = vpop.f32.mrb[1].mxu0  ;;  %12334 = vmatmul.mubr.msk.bf16.gmra.mrb[108].mxu1 %vm993_vm3, %v4586_v24  ;;  %v18839_v24 = vld [vmem:[#allocation201_spill] sm:$0xff] }
 0x4b0   : > { %v12916_v5 = vadd.f32 %v8946_v32, %v16808_v27  ;;  %v12780_v2 = vpop.f32.mrb[2].mxu0  ;;  %12337 = vmatprep.mubr.msk.bf16.mxu1 %vm993_vm3, %v4590_v12  ;;  %v8685_v48 = vrot.slane %v18839_v24, 3  ;;  %v4601_v32 = vor.u32 %v4600_v60, %v4599_v4  ;;  %v18840_v12 = vld [vmem:[#allocation211_spill] sm:$0xff]  ;;  %v4598_v4 = vsel %vm4359_vm4, %v4593_v45, %v4597_v19 }
 0x4b1   : > { %v9634_v26 = vadd.f32 %v12915_v40, %v17175_v6  ;;  %v12917_v31 = vadd.f32 %v12780_v2, %v16810_v55  ;;  %v8949_v8 = vpop.f32.mrb[3].mxu0  ;;  %v4603_v34 = vrot.slane %v18840_v12, 1 }
 0x4b2   : > { %v9632_v22 = vadd.f32 %v12916_v5, %v17175_v6  ;;  %v12918_v27 = vadd.f32 %v8949_v8, %v16814_v43  ;;  %v18842_v5 = vld [vmem:[#allocation212_spill] sm:$0xff]  ;;  %v18843_v8 = vld [vmem:[#allocation210_spill] sm:$0xff] }
 0x4b3   : > { %vm9770_vm10 = vcmp.ge.f32.partialorder %v9634_v26, 0.0  ;;  %v9906_v55 = vmul.f32 0.01, %v9634_v26  ;;  %v9635_v37 = vadd.f32 %v12917_v31, %v17175_v6  ;;  %12886 = vmatmul.mubr.msk.bf16.gmra.mrb[108].mxu0 %vm993_vm3, %v8680_v50  ;;  %v4607_v2 = vrot.slane %v18842_v5, 1 }
 0x4b4   : > { %vm9768_vm11 = vcmp.ge.f32.partialorder %v9632_v22, 0.0  ;;  %v9904_v43 = vmul.f32 0.01, %v9632_v22  ;;  %v9633_v20 = vadd.f32 %v12918_v27, %v17175_v6  ;;  %12889 = vmatprep.mubr.msk.bf16.mxu0 %vm993_vm3, %v8682_v52  ;;  %v4608_v12 = vrot.slane %v18843_v8, 2 }
 0x4b5   : > { %v10042_v60 = vsel %vm9770_vm10, %v9634_v26, %v9906_v55  ;;  %vm9771_vm12 = vcmp.ge.f32.partialorder %v9635_v37, 0.0  ;;  %v9907_v40 = vmul.f32 0.01, %v9635_v37  ;;  %v4605_v27 = vor.u32 %v4604_v59, %v4603_v34 }
 0x4b6   : > { %10179 = vst.msk [vmem:[%s17197_s19 + $0x10] sm:$0xff] %vm10176_vm9, %v10042_v60  ;;  %v10040_v50 = vsel %vm9768_vm11, %v9632_v22, %v9904_v43  ;;  %vm9769_vm13 = vcmp.ge.f32.partialorder %v9633_v20, 0.0  ;;  %v9905_v29 = vmul.f32 0.01, %v9633_v20  ;;  %v12783_v31 = vpop.f32.mrb[4].mxu0  ;;  %v8684_v43 = vsel %vm8567_vm8, %v8681_v38, %v8683_v51  ;;  %v18844_v60 = vld [vmem:[#allocation206_spill] sm:$0xff] }
 0x4b7   : > { %10177 = vst.msk [vmem:[%s17197_s19] sm:$0xff] %vm10176_vm9, %v10040_v50  ;;  %v10043_v52 = vsel %vm9771_vm12, %v9635_v37, %v9907_v40  ;;  %v12919_v45 = vadd.f32 %v12783_v31, %v16823_v15  ;;  %v8962_v26 = vpop.f32.mrb[5].mxu0  ;;  %12338 = vmatmul.mubr.msk.bf16.gmra.mrb[112].mxu1 %vm993_vm3, %v4594_v39  ;;  %v8687_v5 = vrot.slane %v18844_v60, 3  ;;  %v8686_v34 = vsel %vm8567_vm8, %v8683_v51, %v8685_v48 }
 0x4b8   : > { %10180 = vst.msk [vmem:[%s17197_s19 + $0x18] sm:$0xff] %vm10176_vm9, %v10043_v52  ;;  %v10041_v55 = vsel %vm9769_vm13, %v9633_v20, %v9905_v29  ;;  %v12920_v22 = vadd.f32 %v8962_v26, %v16826_v33  ;;  %v12784_v54 = vpop.f32.mrb[6].mxu0  ;;  %12341 = vmatprep.mubr.msk.bf16.mxu1 %vm993_vm3, %v4598_v4  ;;  %v4602_v33 = vsel %vm4359_vm4, %v4597_v19, %v4601_v32  ;;  %v18845_v20 = vld [vmem:[#allocation209_spill] sm:$0xff] }
 0x4b9   : > { %10178 = vst.msk [vmem:[%s17197_s19 + $0x8] sm:$0xff] %vm10176_vm9, %v10041_v55  ;;  %v9638_v15 = vadd.f32 %v12919_v45, %v17175_v6  ;;  %v12921_v37 = vadd.f32 %v12784_v54, %v16828_v46  ;;  %v8965_v39 = vpop.f32.mrb[7].mxu0  ;;  %v8689_v4 = vrot.slane %v18845_v20, 3  ;;  %v4609_v40 = vor.u32 %v4608_v12, %v4607_v2  ;;  %v18847_v12 = vld [vmem:[#allocation213_spill] sm:$0xff] }
 0x4ba   : > { %v9636_v59 = vadd.f32 %v12920_v22, %v17175_v6  ;;  %v12922_v38 = vadd.f32 %v8965_v39, %v16832_v14  ;;  %v4606_v46 = vsel %vm4359_vm4, %v4601_v32, %v4605_v27  ;;  %v18846_v14 = vld [vmem:[#allocation219_spill] sm:$0xff]  ;;  %v4612_v52 = vrot.slane %v18847_v12, 2 }
 0x4bb   : > { %vm9774_vm14 = vcmp.ge.f32.partialorder %v9638_v15, 0.0  ;;  %v9910_v50 = vmul.f32 0.01, %v9638_v15  ;;  %v9639_v29 = vadd.f32 %v12921_v37, %v17175_v6  ;;  %12890 = vmatmul.mubr.msk.bf16.gmra.mrb[112].mxu0 %vm993_vm3, %v8684_v43  ;;  %v4611_v31 = vrot.slane %v18846_v14, 1  ;;  %v18851_v14 = vld [vmem:[#allocation222_spill] sm:$0xff] }
 0x4bc   : > { %vm9772_vm15 = vcmp.ge.f32.partialorder %v9636_v59, 0.0  ;;  %v9908_v51 = vmul.f32 0.01, %v9636_v59  ;;  %v9637_v19 = vadd.f32 %v12922_v38, %v17175_v6  ;;  %12893 = vmatprep.mubr.msk.bf16.mxu0 %vm993_vm3, %v8686_v34  ;;  %v8688_v55 = vsel %vm8567_vm8, %v8685_v48, %v8687_v5 }
 0x4bd   : > { %v10046_v8 = vsel %vm9774_vm14, %v9638_v15, %v9910_v50  ;;  %vm9775_vm0 = vcmp.ge.f32.partialorder %v9639_v29, 0.0  ;;  %v9911_v2 = vmul.f32 0.01, %v9639_v29  ;;  %v8690_v60 = vsel %vm8567_vm8, %v8687_v5, %v8689_v4  ;;  %v18848_v15 = vld [vmem:[#allocation214_spill] sm:$0xff] }
 0x4be   : > { %10183 = vst.msk [vmem:[%s17197_s19 + $0x30] sm:$0xff] %vm10176_vm9, %v10046_v8  ;;  %v10044_v45 = vsel %vm9772_vm15, %v9636_v59, %v9908_v51  ;;  %vm9773_vm1 = vcmp.ge.f32.partialorder %v9637_v19, 0.0  ;;  %v9909_v32 = vmul.f32 0.01, %v9637_v19  ;;  %v12787_v26 = vpop.f32.mrb[8].mxu0  ;;  %v8691_v37 = vrot.slane %v18848_v15, 3 }
 0x4bf   : > { %10181 = vst.msk [vmem:[%s17197_s19 + $0x20] sm:$0xff] %vm10176_vm9, %v10044_v45  ;;  %v10047_v22 = vsel %vm9775_vm0, %v9639_v29, %v9911_v2  ;;  %v12923_v54 = vadd.f32 %v12787_v26, %v16841_v42  ;;  %v8978_v43 = vpop.f32.mrb[9].mxu0  ;;  %12342 = vmatmul.mubr.msk.bf16.gmra.mrb[116].mxu1 %vm993_vm3, %v4602_v33  ;;  %v4615_v34 = vrot.slane %v18686_v35, 1  ;;  %v18849_v42 = vld [vmem:[#allocation218_spill] sm:$0xff]  ;;  %v4610_v50 = vsel %vm4359_vm4, %v4605_v27, %v4609_v40 }
 0x4c0   : > { %10184 = vst.msk [vmem:[%s17197_s19 + $0x38] sm:$0xff] %vm10176_vm9, %v10047_v22  ;;  %v10045_v24 = vsel %vm9773_vm1, %v9637_v19, %v9909_v32  ;;  %v12924_v39 = vadd.f32 %v8978_v43, %v16844_v23  ;;  %v12788_v48 = vpop.f32.mrb[10].mxu0  ;;  %12345 = vmatprep.mubr.msk.bf16.mxu1 %vm993_vm3, %v4606_v46  ;;  %v4616_v59 = vrot.slane %v18849_v42, 2  ;;  %v4613_v29 = vor.u32 %v4612_v52, %v4611_v31  ;;  %v18850_v19 = vld [vmem:[#allocation217_spill] sm:$0xff] }
 0x4c1   : > { %10182 = vst.msk [vmem:[%s17197_s19 + $0x28] sm:$0xff] %vm10176_vm9, %v10045_v24  ;;  %v9642_v33 = vadd.f32 %v12923_v54, %v17175_v6  ;;  %v12925_v5 = vadd.f32 %v12788_v48, %v16846_v53  ;;  %v8981_v38 = vpop.f32.mrb[11].mxu0  ;;  %v8693_v46 = vrot.slane %v18850_v19, 3  ;;  %v4619_v35 = vrot.slane %v18851_v14, 1  ;;  %v18852_v53 = vld [vmem:[#allocation221_spill] sm:$0xff] }
 0x4c2   : > { %v9640_v51 = vadd.f32 %v12924_v39, %v17175_v6  ;;  %v12926_v23 = vadd.f32 %v8981_v38, %v16850_v30  ;;  %v4620_v12 = vrot.slane %v18852_v53, 2  ;;  %v4617_v30 = vor.u32 %v4616_v59, %v4615_v34 }
 0x4c3   : > { %vm9778_vm2 = vcmp.ge.f32.partialorder %v9642_v33, 0.0  ;;  %v9914_v8 = vmul.f32 0.01, %v9642_v33  ;;  %v9643_v2 = vadd.f32 %v12925_v5, %v17175_v6  ;;  %12894 = vmatmul.mubr.msk.bf16.gmra.mrb[116].mxu0 %vm993_vm3, %v8688_v55  ;;  %v4614_v32 = vsel %vm4359_vm4, %v4609_v40, %v4613_v29 }
 0x4c4   : > { %vm9776_vm5 = vcmp.ge.f32.partialorder %v9640_v51, 0.0  ;;  %v9912_v27 = vmul.f32 0.01, %v9640_v51  ;;  %v9641_v31 = vadd.f32 %v12926_v23, %v17175_v6  ;;  %12897 = vmatprep.mubr.msk.bf16.mxu0 %vm993_vm3, %v8690_v60  ;;  %v8692_v15 = vsel %vm8567_vm8, %v8689_v4, %v8691_v37 }
 0x4c5   : > { %v10050_v52 = vsel %vm9778_vm2, %v9642_v33, %v9914_v8  ;;  %vm9779_vm6 = vcmp.ge.f32.partialorder %v9643_v2, 0.0  ;;  %v9915_v45 = vmul.f32 0.01, %v9643_v2  ;;  %v4621_v40 = vor.u32 %v4620_v12, %v4619_v35 }
 0x4c6   : > { %10187 = vst.msk [vmem:[%s17197_s19 + $0x50] sm:$0xff] %vm10176_vm9, %v10050_v52  ;;  %v10048_v26 = vsel %vm9776_vm5, %v9640_v51, %v9912_v27  ;;  %vm9777_vm7 = vcmp.ge.f32.partialorder %v9641_v31, 0.0  ;;  %v9913_v55 = vmul.f32 0.01, %v9641_v31  ;;  %v12791_v22 = vpop.f32.mrb[12].mxu0  ;;  %v8695_v34 = vrot.slane %v15377_v13, 3 }
 0x4c7   : > { %10185 = vst.msk [vmem:[%s17197_s19 + $0x40] sm:$0xff] %vm10176_vm9, %v10048_v26  ;;  %v10051_v54 = vsel %vm9779_vm6, %v9643_v2, %v9915_v45  ;;  %v12927_v43 = vadd.f32 %v12791_v22, %v16859_v36  ;;  %v8994_v60 = vpop.f32.mrb[13].mxu0  ;;  %12346 = vmatmul.mubr.msk.bf16.gmra.mrb[120].mxu1 %vm993_vm3, %v4610_v50  ;;  %v8694_v36 = vsel %vm8567_vm8, %v8691_v37, %v8693_v46  ;;  %v8697_v37 = vrot.slane %v18690_v17, 3  ;;  %v18854_v50 = vld [vmem:[#allocation223_spill] sm:$0xff] }
 0x4c8   : > { %10188 = vst.msk [vmem:[%s17197_s19 + $0x58] sm:$0xff] %vm10176_vm9, %v10051_v54  ;;  %v10049_v24 = vsel %vm9777_vm7, %v9641_v31, %v9913_v55  ;;  %v12928_v39 = vadd.f32 %v8994_v60, %v16862_v58  ;;  %v12792_v48 = vpop.f32.mrb[14].mxu0  ;;  %12349 = vmatprep.mubr.msk.bf16.mxu1 %vm993_vm3, %v4614_v32  ;;  %v4618_v59 = vsel %vm4359_vm4, %v4613_v29, %v4617_v30  ;;  %v18853_v58 = vshrl.u32 %v15377_v13, 16 }
 0x4c9   : > { %10186 = vst.msk [vmem:[%s17197_s19 + $0x48] sm:$0xff] %vm10176_vm9, %v10049_v24  ;;  %v9646_v20 = vadd.f32 %v12927_v43, %v17175_v6  ;;  %v12929_v4 = vadd.f32 %v12792_v48, %v16864_v21  ;;  %v8997_v42 = vpop.f32.mrb[15].mxu0  ;;  %v4626_v51 = vrot.slane %v18854_v50, 2  ;;  %v4622_v21 = vsel %vm4359_vm4, %v4617_v30, %v4621_v40 }
 0x4ca   : > { %v4625_v33 = vrot.slane %v18853_v58, 1  ;;  %v9644_v5 = vadd.f32 %v12928_v39, %v17175_v6  ;;  %v12930_v38 = vadd.f32 %v8997_v42, %v16868_v28  ;;  %v18855_v28 = vshrl.u32 %v18690_v17, 16 }
 0x4cb   : > { %vm9782_vm10 = vcmp.ge.f32.partialorder %v9646_v20, 0.0  ;;  %v9918_v23 = vmul.f32 0.01, %v9646_v20  ;;  %v9647_v14 = vadd.f32 %v12929_v4, %v17175_v6  ;;  %12898 = vmatmul.mubr.msk.bf16.gmra.mrb[120].mxu0 %vm993_vm3, %v8692_v15  ;;  %v18856_v53 = vshll.u32 %v18690_v17, 16 }
 0x4cc   : > { %vm9780_vm11 = vcmp.ge.f32.partialorder %v9644_v5, 0.0  ;;  %v9916_v13 = vmul.f32 0.01, %v9644_v5  ;;  %v9645_v29 = vadd.f32 %v12930_v38, %v17175_v6  ;;  %12901 = vmatprep.mubr.msk.bf16.mxu0 %vm993_vm3, %v8694_v36  ;;  %v4632_v35 = vrot.slane %v18855_v28, 1 }
 0x4cd   : > { %v10054_v8 = vsel %vm9782_vm10, %v9646_v20, %v9918_v23  ;;  %vm9783_vm12 = vcmp.ge.f32.partialorder %v9647_v14, 0.0  ;;  %v9919_v2 = vmul.f32 0.01, %v9647_v14  ;;  %v4635_v12 = vrot.slane %v18856_v53, 2 }
 0x4ce   : > { %10191 = vst.msk [vmem:[%s17197_s19 + $0x70] sm:$0xff] %vm10176_vm9, %v10054_v8  ;;  %v10052_v27 = vsel %vm9780_vm11, %v9644_v5, %v9916_v13  ;;  %vm9781_vm13 = vcmp.ge.f32.partialorder %v9645_v29, 0.0  ;;  %v9917_v31 = vmul.f32 0.01, %v9645_v29  ;;  %v12795_v30 = vpop.f32.mrb[16].mxu0  ;;  %v4627_v52 = vor.u32 %v4626_v51, %v4625_v33 }
 0x4cf   : > { %10189 = vst.msk [vmem:[%s17197_s19 + $0x60] sm:$0xff] %vm10176_vm9, %v10052_v27  ;;  %v10055_v45 = vsel %vm9783_vm12, %v9647_v14, %v9919_v2  ;;  %v12931_v32 = vadd.f32 %v12795_v30, %v16877_v61  ;;  %v9010_v26 = vpop.f32.mrb[17].mxu0  ;;  %12350 = vmatmul.mubr.msk.bf16.gmra.mrb[124].mxu1 %vm993_vm3, %v4618_v59  ;;  %v8696_v43 = vsel %vm8567_vm8, %v8693_v46, %v8695_v34  ;;  %v8699_v60 = vrot.slane %v15691_v0, 3 }
 0x4d0   : > { %10192 = vst.msk [vmem:[%s17197_s19 + $0x78] sm:$0xff] %vm10176_vm9, %v10055_v45  ;;  %v10053_v55 = vsel %vm9781_vm13, %v9645_v29, %v9917_v31  ;;  %v12932_v22 = vadd.f32 %v9010_v26, %v16880_v7  ;;  %v12796_v54 = vpop.f32.mrb[18].mxu0  ;;  %12353 = vmatprep.mubr.msk.bf16.mxu1 %vm993_vm3, %v4622_v21  ;;  %v8698_v7 = vsel %vm8567_vm8, %v8695_v34, %v8697_v37  ;;  %v18857_v36 = vshrl.u32 %v15691_v0, 16 }
 0x4d1   : > { %10190 = vst.msk [vmem:[%s17197_s19 + $0x68] sm:$0xff] %vm10176_vm9, %v10053_v55  ;;  %v9650_v61 = vadd.f32 %v12931_v32, %v17175_v6  ;;  %v12933_v15 = vadd.f32 %v12796_v54, %v16882_v9  ;;  %v9013_v24 = vpop.f32.mrb[19].mxu0  ;;  %v4636_v39 = vor.u32 %v4635_v12, %v4632_v35  ;;  %v4628_v48 = vsel %vm4359_vm4, %v4621_v40, %v4627_v52 }
 0x4d2   : > { %v9648_v19 = vadd.f32 %v12932_v22, %v17175_v6  ;;  %v12934_v46 = vadd.f32 %v9013_v24, %v16886_v10  ;;  %v4641_v20 = vrot.slane %v18857_v36, 1  ;;  %v18858_v42 = vshll.u32 %v15691_v0, 16 }
 0x4d3   : > { %vm9786_vm14 = vcmp.ge.f32.partialorder %v9650_v61, 0.0  ;;  %v9922_v4 = vmul.f32 0.01, %v9650_v61  ;;  %v9651_v9 = vadd.f32 %v12933_v15, %v17175_v6  ;;  %12902 = vmatmul.mubr.msk.bf16.gmra.mrb[124].mxu0 %vm993_vm3, %v8696_v43  ;;  %v8701_v40 = vrot.slane %v18694_v25, 3 }
 0x4d4   : > { %v4644_v34 = vrot.slane %v18858_v42, 2  ;;  %vm9784_vm15 = vcmp.ge.f32.partialorder %v9648_v19, 0.0  ;;  %v9920_v59 = vmul.f32 0.01, %v9648_v19  ;;  %v9649_v10 = vadd.f32 %v12934_v46, %v17175_v6  ;;  %12905 = vmatprep.mubr.msk.bf16.mxu0 %vm993_vm3, %v8698_v7 }
 0x4d5   : > { %v10058_v58 = vsel %vm9786_vm14, %v9650_v61, %v9922_v4  ;;  %vm9787_vm0 = vcmp.ge.f32.partialorder %v9651_v9, 0.0  ;;  %v9923_v33 = vmul.f32 0.01, %v9651_v9  ;;  %v4637_v5 = vsel %vm4359_vm4, %v4627_v52, %v4636_v39 }
 0x4d6   : > { %10195 = vst.msk [vmem:[%s17197_s19 + $0x90] sm:$0xff] %vm10176_vm9, %v10058_v58  ;;  %v10056_v38 = vsel %vm9784_vm15, %v9648_v19, %v9920_v59  ;;  %vm9785_vm1 = vcmp.ge.f32.partialorder %v9649_v10, 0.0  ;;  %v9921_v0 = vmul.f32 0.01, %v9649_v10  ;;  %v12799_v50 = vpop.f32.mrb[20].mxu0  ;;  %v8700_v29 = vsel %vm8567_vm8, %v8697_v37, %v8699_v60 }
 0x4d7   : > { %10193 = vst.msk [vmem:[%s17197_s19 + $0x80] sm:$0xff] %vm10176_vm9, %v10056_v38  ;;  %v10059_v51 = vsel %vm9787_vm0, %v9651_v9, %v9923_v33  ;;  %v12935_v23 = vadd.f32 %v12799_v50, %v16896_v62  ;;  %v9026_v14 = vpop.f32.mrb[21].mxu0  ;;  %12354 = vmatmul.mubr.msk.bf16.gmra.mrb[128].mxu1 %vm993_vm3, %v4628_v48  ;;  %v4645_v28 = vor.u32 %v4644_v34, %v4641_v20  ;;  %v8703_v12 = vrot.slane %v18696_v1, 3 }
 0x4d8   : > { %10196 = vst.msk [vmem:[%s17197_s19 + $0x98] sm:$0xff] %vm10176_vm9, %v10059_v51  ;;  %v10057_v25 = vsel %vm9785_vm1, %v9649_v10, %v9921_v0  ;;  %v12936_v21 = vadd.f32 %v9026_v14, %v16899_v44  ;;  %v12800_v13 = vpop.f32.mrb[22].mxu0  ;;  %12357 = vmatprep.mubr.msk.bf16.mxu1 %vm993_vm3, %v4637_v5  ;;  %v8702_v2 = vsel %vm8567_vm8, %v8699_v60, %v8701_v40 }
 0x4d9   : > { %10194 = vst.msk [vmem:[%s17197_s19 + $0x88] sm:$0xff] %vm10176_vm9, %v10057_v25  ;;  %v9654_v62 = vadd.f32 %v12935_v23, %v17175_v6  ;;  %v12937_v35 = vadd.f32 %v12800_v13, %v16901_v49  ;;  %v9029_v8 = vpop.f32.mrb[23].mxu0  ;;  %v4646_v31 = vsel %vm4359_vm4, %v4636_v39, %v4645_v28  ;;  %v8704_v60 = vsel %vm8567_vm8, %v8701_v40, %v8703_v12  ;;  %v18862_v12 = vld [vmem:[#allocation2_spill] sm:$0xff] }
 0x4da   : > { %v9652_v44 = vadd.f32 %v12936_v21, %v17175_v6  ;;  %v12938_v53 = vadd.f32 %v9029_v8, %v16905_v16  ;;  %v18859_v21 = vld [vmem:[#allocation208_spill] sm:$0xff] }
 0x4db   : > { %vm9790_vm2 = vcmp.ge.f32.partialorder %v9654_v62, 0.0  ;;  %v9926_v17 = vmul.f32 0.01, %v9654_v62  ;;  %v9655_v37 = vadd.f32 %v12937_v35, %v17175_v6  ;;  %12906 = vmatmul.mubr.msk.bf16.gmra.mrb[128].mxu0 %vm993_vm3, %v8700_v29 }
 0x4dc   : > { %vm9788_vm5 = vcmp.ge.f32.partialorder %v9652_v44, 0.0  ;;  %v9924_v27 = vmul.f32 0.01, %v9652_v44  ;;  %v9653_v49 = vadd.f32 %v12938_v53, %v17175_v6  ;;  %12909 = vmatprep.mubr.msk.bf16.mxu0 %vm993_vm3, %v8702_v2 }
 0x4dd   : > { %v10062_v30 = vsel %vm9790_vm2, %v9654_v62, %v9926_v17  ;;  %vm9791_vm6 = vcmp.ge.f32.partialorder %v9655_v37, 0.0  ;;  %v9927_v16 = vmul.f32 0.01, %v9655_v37  ;;  %v18860_v62 = vld [vmem:[#allocation215_spill] sm:$0xff] }
 0x4de   : > { %10199 = vst.msk [vmem:[%s17197_s19 + $0xb0] sm:$0xff] %vm10176_vm9, %v10062_v30  ;;  %v10060_v52 = vsel %vm9788_vm5, %v9652_v44, %v9924_v27  ;;  %vm9789_vm7 = vcmp.ge.f32.partialorder %v9653_v49, 0.0  ;;  %v9925_v45 = vmul.f32 0.01, %v9653_v49  ;;  %v12803_v32 = vpop.f32.mrb[24].mxu0  ;;  %v18861_v44 = vld [vmem:[#allocation216_spill] sm:$0xff] }
 0x4df   : > { %10197 = vst.msk [vmem:[%s17197_s19 + $0xa0] sm:$0xff] %vm10176_vm9, %v10060_v52  ;;  %v10063_v1 = vsel %vm9791_vm6, %v9655_v37, %v9927_v16  ;;  %v12939_v26 = vadd.f32 %v12803_v32, %v16919_v3  ;;  %v9042_v55 = vpop.f32.mrb[25].mxu0  ;;  %12358 = vmatmul.mubr.msk.bf16.gmra.mrb[132].mxu1 %vm993_vm3, %v4646_v31 }
 0x4e0   : > { %10200 = vst.msk [vmem:[%s17197_s19 + $0xb8] sm:$0xff] %vm10176_vm9, %v10063_v1  ;;  %v10061_v22 = vsel %vm9789_vm7, %v9653_v49, %v9925_v45  ;;  %v12940_v54 = vadd.f32 %v9042_v55, %v16922_v41  ;;  %v12804_v43 = vpop.f32.mrb[26].mxu0 }
 0x4e1   : > { %10198 = vst.msk [vmem:[%s17197_s19 + $0xa8] sm:$0xff] %vm10176_vm9, %v10061_v22  ;;  %v9658_v61 = vadd.f32 %v12939_v26, %v17175_v6  ;;  %v12941_v15 = vadd.f32 %v12804_v43, %v16924_v56  ;;  %v9045_v24 = vpop.f32.mrb[27].mxu0  ;;  %v18863_v22 = vld [vmem:[#allocation224_spill] sm:$0xff] }
 0x4e2   : > { %v9656_v3 = vadd.f32 %v12940_v54, %v17175_v6  ;;  %v12942_v7 = vadd.f32 %v9045_v24, %v16931_v18 }
 0x4e3   : > { %vm9794_vm4 = vcmp.ge.f32.partialorder %v9658_v61, 0.0  ;;  %v9930_v39 = vmul.f32 0.01, %v9658_v61  ;;  %v9659_v41 = vadd.f32 %v12941_v15, %v17175_v6  ;;  %12910 = vmatmul.mubr.msk.bf16.gmra.mrb[132].mxu0 %vm993_vm3, %v8704_v60 }
 0x4e4   : > { %vm9792_vm8 = vcmp.ge.f32.partialorder %v9656_v3, 0.0  ;;  %v9928_v19 = vmul.f32 0.01, %v9656_v3  ;;  %v9657_v46 = vadd.f32 %v12942_v7, %v17175_v6  ;;  %v18865_v7 = vld [vmem:[#allocation226_spill] sm:$0xff] }
 0x4e5   : > { %v10066_v48 = vsel %vm9794_vm4, %v9658_v61, %v9930_v39  ;;  %vm9795_vm10 = vcmp.ge.f32.partialorder %v9659_v41, 0.0  ;;  %v9931_v56 = vmul.f32 0.01, %v9659_v41  ;;  %v18864_v61 = vld [vmem:[#allocation225_spill] sm:$0xff] }
 0x4e6   : > { %10203 = vst.msk [vmem:[%s17197_s19 + $0xd0] sm:$0xff] %vm10176_vm9, %v10066_v48  ;;  %v10064_v36 = vsel %vm9792_vm8, %v9656_v3, %v9928_v19  ;;  %vm9793_vm11 = vcmp.ge.f32.partialorder %v9657_v46, 0.0  ;;  %v9929_v18 = vmul.f32 0.01, %v9657_v46  ;;  %v12807_v20 = vpop.f32.mrb[28].mxu0 }
 0x4e7   : > { %10201 = vst.msk [vmem:[%s17197_s19 + $0xc0] sm:$0xff] %vm10176_vm9, %v10064_v36  ;;  %v10067_v4 = vsel %vm9795_vm10, %v9659_v41, %v9931_v56  ;;  %v12943_v9 = vadd.f32 %v12807_v20, %v16942_v63  ;;  %v9058_v42 = vpop.f32.mrb[29].mxu0 }
 0x4e8   : > { %10204 = vst.msk [vmem:[%s17197_s19 + $0xd8] sm:$0xff] %vm10176_vm9, %v10067_v4  ;;  %v10065_v34 = vsel %vm9793_vm11, %v9657_v46, %v9929_v18  ;;  %v12944_v59 = vadd.f32 %v9058_v42, %v16945_v11  ;;  %v12808_v10 = vpop.f32.mrb[30].mxu0  ;;  %v18866_v46 = vld [vmem:[#allocation227_spill] sm:$0xff] }
 0x4e9   : > { %10202 = vst.msk [vmem:[%s17197_s19 + $0xc8] sm:$0xff] %vm10176_vm9, %v10065_v34  ;;  %v9662_v40 = vadd.f32 %v12943_v9, %v17175_v6  ;;  %v12945_v58 = vadd.f32 %v12808_v10, %v16947_v57  ;;  %v9061_v33 = vpop.f32.mrb[31].mxu0 }
 0x4ea   : > { %v9660_v5 = vadd.f32 %v12944_v59, %v17175_v6  ;;  %v12946_v63 = vadd.f32 %v9061_v33, %v16954_v47 }
 0x4eb   : > { %vm9798_vm3 = vcmp.ge.f32.partialorder %v9662_v40, 0.0  ;;  %v9934_v38 = vmul.f32 0.01, %v9662_v40  ;;  %v9663_v0 = vadd.f32 %v12945_v58, %v17175_v6 }
 0x4ec   : > { %vm9796_vm12 = vcmp.ge.f32.partialorder %v9660_v5, 0.0  ;;  %v9932_v11 = vmul.f32 0.01, %v9660_v5  ;;  %v9661_v50 = vadd.f32 %v12946_v63, %v17175_v6  ;;  %v18868_v63 = vld [vmem:[#allocation229_spill] sm:$0xff] }
 0x4ed   : > { %v10070_v51 = vsel %vm9798_vm3, %v9662_v40, %v9934_v38  ;;  %vm9799_vm13 = vcmp.ge.f32.partialorder %v9663_v0, 0.0  ;;  %v9935_v23 = vmul.f32 0.01, %v9663_v0  ;;  %v18867_v40 = vld [vmem:[#allocation228_spill] sm:$0xff] }
 0x4ee   : > { %10207 = vst.msk [vmem:[%s17197_s19 + $0xf0] sm:$0xff] %vm10176_vm9, %v10070_v51  ;;  %v10068_v57 = vsel %vm9796_vm12, %v9660_v5, %v9932_v11  ;;  %vm9797_vm14 = vcmp.ge.f32.partialorder %v9661_v50, 0.0  ;;  %v9933_v14 = vmul.f32 0.01, %v9661_v50  ;;  %v12811_v25 = vpop.f32.mrb[32].mxu0 }
 0x4ef   : > { %10205 = vst.msk [vmem:[%s17197_s19 + $0xe0] sm:$0xff] %vm10176_vm9, %v10068_v57  ;;  %v10071_v47 = vsel %vm9799_vm13, %v9663_v0, %v9935_v23  ;;  %v12947_v13 = vadd.f32 %v12811_v25, %v18859_v21  ;;  %v9074_v29 = vpop.f32.mrb[33].mxu0 }
 0x4f0   : > { %10208 = vst.msk [vmem:[%s17197_s19 + $0xf8] sm:$0xff] %vm10176_vm9, %v10071_v47  ;;  %v10069_v28 = vsel %vm9797_vm14, %v9661_v50, %v9933_v14  ;;  %v12948_v35 = vadd.f32 %v9074_v29, %v18860_v62  ;;  %v12812_v8 = vpop.f32.mrb[34].mxu0  ;;  %v18869_v50 = vld [vmem:[#allocation230_spill] sm:$0xff]  ;;  %v18870_v14 = vld [vmem:[#allocation231_spill] sm:$0xff] }
 0x4f1   : > { %10206 = vst.msk [vmem:[%s17197_s19 + $0xe8] sm:$0xff] %vm10176_vm9, %v10069_v28  ;;  %v9666_v2 = vadd.f32 %v12947_v13, %v17175_v6  ;;  %v12949_v53 = vadd.f32 %v12812_v8, %v18861_v44  ;;  %v9077_v17 = vpop.f32.mrb[35].mxu0 }
 0x4f2   : > { %v9664_v37 = vadd.f32 %v12948_v35, %v17175_v6  ;;  %v12950_v27 = vadd.f32 %v9077_v17, %v18862_v12 }
 0x4f3   : > { %vm9802_vm15 = vcmp.ge.f32.partialorder %v9666_v2, 0.0  ;;  %v9938_v49 = vmul.f32 0.01, %v9666_v2  ;;  %v9667_v31 = vadd.f32 %v12949_v53, %v17175_v6  ;;  %v18871_v53 = vld [vmem:[#allocation232_spill] sm:$0xff] }
 0x4f4   : > { %vm9800_vm0 = vcmp.ge.f32.partialorder %v9664_v37, 0.0  ;;  %v9936_v30 = vmul.f32 0.01, %v9664_v37  ;;  %v9665_v16 = vadd.f32 %v12950_v27, %v17175_v6  ;;  %v18872_v27 = vld [vmem:[#allocation233_spill] sm:$0xff] }
 0x4f5   : > { %v10074_v52 = vsel %vm9802_vm15, %v9666_v2, %v9938_v49  ;;  %vm9803_vm1 = vcmp.ge.f32.partialorder %v9667_v31, 0.0  ;;  %v9939_v45 = vmul.f32 0.01, %v9667_v31 }
 0x4f6   : > { %10211 = vst.msk [vmem:[%s17197_s19 + $0x110] sm:$0xff] %vm10176_vm9, %v10074_v52  ;;  %v10072_v32 = vsel %vm9800_vm0, %v9664_v37, %v9936_v30  ;;  %vm9801_vm2 = vcmp.ge.f32.partialorder %v9665_v16, 0.0  ;;  %v9937_v1 = vmul.f32 0.01, %v9665_v16  ;;  %v12815_v26 = vpop.f32.mrb[36].mxu0 }
 0x4f7   : > { %10209 = vst.msk [vmem:[%s17197_s19 + $0x100] sm:$0xff] %vm10176_vm9, %v10072_v32  ;;  %v10075_v55 = vsel %vm9803_vm1, %v9667_v31, %v9939_v45  ;;  %v12951_v54 = vadd.f32 %v12815_v26, %v18863_v22  ;;  %v9090_v43 = vpop.f32.mrb[37].mxu0 }
 0x4f8   : > { %10212 = vst.msk [vmem:[%s17197_s19 + $0x118] sm:$0xff] %vm10176_vm9, %v10075_v55  ;;  %v10073_v60 = vsel %vm9801_vm2, %v9665_v16, %v9937_v1  ;;  %v12952_v15 = vadd.f32 %v9090_v43, %v18864_v61  ;;  %v12816_v24 = vpop.f32.mrb[38].mxu0  ;;  %v18873_v16 = vld [vmem:[#allocation234_spill] sm:$0xff]  ;;  %v18874_v1 = vld [vmem:[#allocation235_spill] sm:$0xff] }
 0x4f9   : > { %10210 = vst.msk [vmem:[%s17197_s19 + $0x108] sm:$0xff] %vm10176_vm9, %v10073_v60  ;;  %v9670_v3 = vadd.f32 %v12951_v54, %v17175_v6  ;;  %v12953_v39 = vadd.f32 %v12816_v24, %v18865_v7  ;;  %v9093_v41 = vpop.f32.mrb[39].mxu0 }
 0x4fa   : > { %v9668_v19 = vadd.f32 %v12952_v15, %v17175_v6  ;;  %v12954_v48 = vadd.f32 %v9093_v41, %v18866_v46 }
 0x4fb   : > { %vm9806_vm5 = vcmp.ge.f32.partialorder %v9670_v3, 0.0  ;;  %v9942_v56 = vmul.f32 0.01, %v9670_v3  ;;  %v9671_v36 = vadd.f32 %v12953_v39, %v17175_v6  ;;  %v18875_v39 = vld [vmem:[#allocation236_spill] sm:$0xff] }
 0x4fc   : > { %vm9804_vm6 = vcmp.ge.f32.partialorder %v9668_v19, 0.0  ;;  %v9940_v18 = vmul.f32 0.01, %v9668_v19  ;;  %v9669_v20 = vadd.f32 %v12954_v48, %v17175_v6  ;;  %v18876_v48 = vld [vmem:[#allocation237_spill] sm:$0xff] }
 0x4fd   : > { %v10078_v4 = vsel %vm9806_vm5, %v9670_v3, %v9942_v56  ;;  %vm9807_vm7 = vcmp.ge.f32.partialorder %v9671_v36, 0.0  ;;  %v9943_v9 = vmul.f32 0.01, %v9671_v36 }
 0x4fe   : > { %10215 = vst.msk [vmem:[%s17197_s19 + $0x130] sm:$0xff] %vm10176_vm9, %v10078_v4  ;;  %v10076_v42 = vsel %vm9804_vm6, %v9668_v19, %v9940_v18  ;;  %vm9805_vm4 = vcmp.ge.f32.partialorder %v9669_v20, 0.0  ;;  %v9941_v34 = vmul.f32 0.01, %v9669_v20  ;;  %v12819_v59 = vpop.f32.mrb[40].mxu0 }
 0x4ff   : > { %10213 = vst.msk [vmem:[%s17197_s19 + $0x120] sm:$0xff] %vm10176_vm9, %v10076_v42  ;;  %v10079_v10 = vsel %vm9807_vm7, %v9671_v36, %v9943_v9  ;;  %v12955_v58 = vadd.f32 %v12819_v59, %v18867_v40  ;;  %v9106_v33 = vpop.f32.mrb[41].mxu0 }
 0x500   : > { %10216 = vst.msk [vmem:[%s17197_s19 + $0x138] sm:$0xff] %vm10176_vm9, %v10079_v10  ;;  %v10077_v5 = vsel %vm9805_vm4, %v9669_v20, %v9941_v34  ;;  %v12956_v38 = vadd.f32 %v9106_v33, %v18868_v63  ;;  %v12820_v0 = vpop.f32.mrb[42].mxu0  ;;  %v18877_v20 = vld [vmem:[#allocation238_spill] sm:$0xff]  ;;  %v18878_v34 = vld [vmem:[#allocation239_spill] sm:$0xff] }
 0x501   : > { %10214 = vst.msk [vmem:[%s17197_s19 + $0x128] sm:$0xff] %vm10176_vm9, %v10077_v5  ;;  %v9674_v11 = vadd.f32 %v12955_v58, %v17175_v6  ;;  %v12957_v51 = vadd.f32 %v12820_v0, %v18869_v50  ;;  %v9109_v23 = vpop.f32.mrb[43].mxu0 }
 0x502   : > { %v9672_v57 = vadd.f32 %v12956_v38, %v17175_v6  ;;  %v12958_v25 = vadd.f32 %v9109_v23, %v18870_v14 }
 0x503   : > { %vm9810_vm8 = vcmp.ge.f32.partialorder %v9674_v11, 0.0  ;;  %v9946_v47 = vmul.f32 0.01, %v9674_v11  ;;  %v9675_v21 = vadd.f32 %v12957_v51, %v17175_v6  ;;  %v18879_v51 = vld [vmem:[#allocation240_spill] sm:$0xff] }
 0x504   : > { %vm9808_vm10 = vcmp.ge.f32.partialorder %v9672_v57, 0.0  ;;  %v9944_v13 = vmul.f32 0.01, %v9672_v57  ;;  %v9673_v29 = vadd.f32 %v12958_v25, %v17175_v6  ;;  %v18880_v25 = vld [vmem:[#allocation241_spill] sm:$0xff] }
 0x505   : > { %v10082_v28 = vsel %vm9810_vm8, %v9674_v11, %v9946_v47  ;;  %vm9811_vm11 = vcmp.ge.f32.partialorder %v9675_v21, 0.0  ;;  %v9947_v62 = vmul.f32 0.01, %v9675_v21 }
 0x506   : > { %10219 = vst.msk [vmem:[%s17197_s19 + $0x150] sm:$0xff] %vm10176_vm9, %v10082_v28  ;;  %v10080_v35 = vsel %vm9808_vm10, %v9672_v57, %v9944_v13  ;;  %vm9809_vm3 = vcmp.ge.f32.partialorder %v9673_v29, 0.0  ;;  %v9945_v8 = vmul.f32 0.01, %v9673_v29  ;;  %v12823_v2 = vpop.f32.mrb[44].mxu0 }
 0x507   : > { %10217 = vst.msk [vmem:[%s17197_s19 + $0x140] sm:$0xff] %vm10176_vm9, %v10080_v35  ;;  %v10083_v44 = vsel %vm9811_vm11, %v9675_v21, %v9947_v62  ;;  %v12959_v17 = vadd.f32 %v12823_v2, %v18871_v53  ;;  %v9122_v37 = vpop.f32.mrb[45].mxu0 }
 0x508   : > { %10220 = vst.msk [vmem:[%s17197_s19 + $0x158] sm:$0xff] %vm10176_vm9, %v10083_v44  ;;  %v10081_v12 = vsel %vm9809_vm3, %v9673_v29, %v9945_v8  ;;  %v12960_v49 = vadd.f32 %v9122_v37, %v18872_v27  ;;  %v12824_v31 = vpop.f32.mrb[46].mxu0  ;;  %v18881_v29 = vld [vmem:[#allocation242_spill] sm:$0xff]  ;;  %v18882_v8 = vld [vmem:[#allocation243_spill] sm:$0xff] }
 0x509   : > { %10218 = vst.msk [vmem:[%s17197_s19 + $0x148] sm:$0xff] %vm10176_vm9, %v10081_v12  ;;  %v9678_v30 = vadd.f32 %v12959_v17, %v17175_v6  ;;  %v12961_v52 = vadd.f32 %v12824_v31, %v18873_v16  ;;  %v9125_v45 = vpop.f32.mrb[47].mxu0 }
 0x50a   : > { %v9676_v32 = vadd.f32 %v12960_v49, %v17175_v6  ;;  %v12962_v26 = vadd.f32 %v9125_v45, %v18874_v1 }
 0x50b   : > { %vm9814_vm12 = vcmp.ge.f32.partialorder %v9678_v30, 0.0  ;;  %v9950_v55 = vmul.f32 0.01, %v9678_v30  ;;  %v9679_v22 = vadd.f32 %v12961_v52, %v17175_v6  ;;  %v18883_v52 = vld [vmem:[#allocation244_spill] sm:$0xff] }
 0x50c   : > { %vm9812_vm13 = vcmp.ge.f32.partialorder %v9676_v32, 0.0  ;;  %v9948_v54 = vmul.f32 0.01, %v9676_v32  ;;  %v9677_v43 = vadd.f32 %v12962_v26, %v17175_v6  ;;  %v18884_v26 = vld [vmem:[#allocation245_spill] sm:$0xff] }
 0x50d   : > { %v10086_v60 = vsel %vm9814_vm12, %v9678_v30, %v9950_v55  ;;  %vm9815_vm14 = vcmp.ge.f32.partialorder %v9679_v22, 0.0  ;;  %v9951_v61 = vmul.f32 0.01, %v9679_v22 }
 0x50e   : > { %10223 = vst.msk [vmem:[%s17197_s19 + $0x170] sm:$0xff] %vm10176_vm9, %v10086_v60  ;;  %v10084_v15 = vsel %vm9812_vm13, %v9676_v32, %v9948_v54  ;;  %vm9813_vm15 = vcmp.ge.f32.partialorder %v9677_v43, 0.0  ;;  %v9949_v24 = vmul.f32 0.01, %v9677_v43  ;;  %v12827_v3 = vpop.f32.mrb[48].mxu0 }
 0x50f   : > { %10221 = vst.msk [vmem:[%s17197_s19 + $0x160] sm:$0xff] %vm10176_vm9, %v10084_v15  ;;  %v10087_v7 = vsel %vm9815_vm14, %v9679_v22, %v9951_v61  ;;  %v12963_v41 = vadd.f32 %v12827_v3, %v18875_v39  ;;  %v9138_v19 = vpop.f32.mrb[49].mxu0 }
 0x510   : > { %10224 = vst.msk [vmem:[%s17197_s19 + $0x178] sm:$0xff] %vm10176_vm9, %v10087_v7  ;;  %v10085_v46 = vsel %vm9813_vm15, %v9677_v43, %v9949_v24  ;;  %v12964_v56 = vadd.f32 %v9138_v19, %v18876_v48  ;;  %v12828_v36 = vpop.f32.mrb[50].mxu0  ;;  %v18885_v43 = vld [vmem:[#allocation246_spill] sm:$0xff]  ;;  %v18886_v24 = vld [vmem:[#allocation247_spill] sm:$0xff] }
 0x511   : > { %10222 = vst.msk [vmem:[%s17197_s19 + $0x168] sm:$0xff] %vm10176_vm9, %v10085_v46  ;;  %v9682_v18 = vadd.f32 %v12963_v41, %v17175_v6  ;;  %v12965_v4 = vadd.f32 %v12828_v36, %v18877_v20  ;;  %v9141_v9 = vpop.f32.mrb[51].mxu0 }
 0x512   : > { %v9680_v42 = vadd.f32 %v12964_v56, %v17175_v6  ;;  %v12966_v59 = vadd.f32 %v9141_v9, %v18878_v34 }
 0x513   : > { %vm9818_vm0 = vcmp.ge.f32.partialorder %v9682_v18, 0.0  ;;  %v9954_v10 = vmul.f32 0.01, %v9682_v18  ;;  %v9683_v40 = vadd.f32 %v12965_v4, %v17175_v6  ;;  %v18887_v4 = vld [vmem:[#allocation248_spill] sm:$0xff] }
 0x514   : > { %vm9816_vm1 = vcmp.ge.f32.partialorder %v9680_v42, 0.0  ;;  %v9952_v58 = vmul.f32 0.01, %v9680_v42  ;;  %v9681_v33 = vadd.f32 %v12966_v59, %v17175_v6 }
 0x515   : > { %v10090_v5 = vsel %vm9818_vm0, %v9682_v18, %v9954_v10  ;;  %vm9819_vm2 = vcmp.ge.f32.partialorder %v9683_v40, 0.0  ;;  %v9955_v63 = vmul.f32 0.01, %v9683_v40 }
 0x516   : > { %10227 = vst.msk [vmem:[%s17197_s19 + $0x190] sm:$0xff] %vm10176_vm9, %v10090_v5  ;;  %v10088_v38 = vsel %vm9816_vm1, %v9680_v42, %v9952_v58  ;;  %vm9817_vm5 = vcmp.ge.f32.partialorder %v9681_v33, 0.0  ;;  %v9953_v0 = vmul.f32 0.01, %v9681_v33  ;;  %v12831_v11 = vpop.f32.mrb[52].mxu0 }
 0x517   : > { %10225 = vst.msk [vmem:[%s17197_s19 + $0x180] sm:$0xff] %vm10176_vm9, %v10088_v38  ;;  %v10091_v50 = vsel %vm9819_vm2, %v9683_v40, %v9955_v63  ;;  %v12967_v23 = vadd.f32 %v12831_v11, %v18879_v51  ;;  %v9154_v57 = vpop.f32.mrb[53].mxu0  ;;  %v17528_v40 = vld [vmem:[%s17780_s2] ss:$0 sm:$0xff] }
 0x518   : > { %10228 = vst.msk [vmem:[%s17197_s19 + $0x198] sm:$0xff] %vm10176_vm9, %v10091_v50  ;;  %v10089_v14 = vsel %vm9817_vm5, %v9681_v33, %v9953_v0  ;;  %v12968_v47 = vadd.f32 %v9154_v57, %v18880_v25  ;;  %v12832_v21 = vpop.f32.mrb[54].mxu0  ;;  %v18889_v33 = vld [vmem:[#allocation5_spill] sm:$0xff]  ;;  %v18890_v0 = vld [vmem:[#allocation4_spill] sm:$0xff] }
 0x519   : > { %10226 = vst.msk [vmem:[%s17197_s19 + $0x188] sm:$0xff] %vm10176_vm9, %v10089_v14  ;;  %v9686_v13 = vadd.f32 %v12967_v23, %v17175_v6  ;;  %v12969_v28 = vadd.f32 %v12832_v21, %v18881_v29  ;;  %v9157_v62 = vpop.f32.mrb[55].mxu0 }
 0x51a   : > { %v9684_v35 = vadd.f32 %v12968_v47, %v17175_v6  ;;  %v12970_v2 = vadd.f32 %v9157_v62, %v18882_v8 }
 0x51b   : > { %vm9822_vm6 = vcmp.ge.f32.partialorder %v9686_v13, 0.0  ;;  %v9958_v44 = vmul.f32 0.01, %v9686_v13  ;;  %v9687_v53 = vadd.f32 %v12969_v28, %v17175_v6  ;;  %v18891_v28 = vld [vmem:[#allocation9_spill] sm:$0xff] }
 0x51c   : > { %vm9820_vm7 = vcmp.ge.f32.partialorder %v9684_v35, 0.0  ;;  %v9956_v17 = vmul.f32 0.01, %v9684_v35  ;;  %v9685_v37 = vadd.f32 %v12970_v2, %v17175_v6  ;;  %v18892_v2 = vld [vmem:[#allocation8_spill] sm:$0xff] }
 0x51d   : > { %v10094_v12 = vsel %vm9822_vm6, %v9686_v13, %v9958_v44  ;;  %vm9823_vm4 = vcmp.ge.f32.partialorder %v9687_v53, 0.0  ;;  %v9959_v27 = vmul.f32 0.01, %v9687_v53 }
 0x51e   : > { %10231 = vst.msk [vmem:[%s17197_s19 + $0x1b0] sm:$0xff] %vm10176_vm9, %v10094_v12  ;;  %v10092_v49 = vsel %vm9820_vm7, %v9684_v35, %v9956_v17  ;;  %vm9821_vm8 = vcmp.ge.f32.partialorder %v9685_v37, 0.0  ;;  %v9957_v31 = vmul.f32 0.01, %v9685_v37  ;;  %v12835_v30 = vpop.f32.mrb[56].mxu0 }
 0x51f   : > { %10229 = vst.msk [vmem:[%s17197_s19 + $0x1a0] sm:$0xff] %vm10176_vm9, %v10092_v49  ;;  %v10095_v16 = vsel %vm9823_vm4, %v9687_v53, %v9959_v27  ;;  %v12971_v45 = vadd.f32 %v12835_v30, %v18883_v52  ;;  %v9170_v32 = vpop.f32.mrb[57].mxu0 }
 0x520   : > { %10232 = vst.msk [vmem:[%s17197_s19 + $0x1b8] sm:$0xff] %vm10176_vm9, %v10095_v16  ;;  %v10093_v1 = vsel %vm9821_vm8, %v9685_v37, %v9957_v31  ;;  %v12972_v55 = vadd.f32 %v9170_v32, %v18884_v26  ;;  %v12836_v22 = vpop.f32.mrb[58].mxu0  ;;  %v18893_v37 = vld [vmem:[#allocation11_spill] sm:$0xff]  ;;  %v18894_v31 = vld [vmem:[#allocation10_spill] sm:$0xff] }
 0x521   : > { %10230 = vst.msk [vmem:[%s17197_s19 + $0x1a8] sm:$0xff] %vm10176_vm9, %v10093_v1  ;;  %v9690_v54 = vadd.f32 %v12971_v45, %v17175_v6  ;;  %v12973_v60 = vadd.f32 %v12836_v22, %v18885_v43  ;;  %v9173_v61 = vpop.f32.mrb[59].mxu0 }
 0x522   : > { %v9688_v15 = vadd.f32 %v12972_v55, %v17175_v6  ;;  %v12974_v3 = vadd.f32 %v9173_v61, %v18886_v24 }
 0x523   : > { %vm9826_vm10 = vcmp.ge.f32.partialorder %v9690_v54, 0.0  ;;  %v9962_v7 = vmul.f32 0.01, %v9690_v54  ;;  %v9691_v39 = vadd.f32 %v12973_v60, %v17175_v6 }
 0x524   : > { %vm9824_vm11 = vcmp.ge.f32.partialorder %v9688_v15, 0.0  ;;  %v9960_v41 = vmul.f32 0.01, %v9688_v15  ;;  %v9689_v19 = vadd.f32 %v12974_v3, %v17175_v6  ;;  %v18888_v6 = vld [vmem:[#allocation249_spill] sm:$0xff] }
 0x525   : > { %v10098_v46 = vsel %vm9826_vm10, %v9690_v54, %v9962_v7  ;;  %vm9827_vm3 = vcmp.ge.f32.partialorder %v9691_v39, 0.0  ;;  %v9963_v48 = vmul.f32 0.01, %v9691_v39 }
 0x526   : > { %10235 = vst.msk [vmem:[%s17197_s19 + $0x1d0] sm:$0xff] %vm10176_vm9, %v10098_v46  ;;  %v10096_v56 = vsel %vm9824_vm11, %v9688_v15, %v9960_v41  ;;  %vm9825_vm12 = vcmp.ge.f32.partialorder %v9689_v19, 0.0  ;;  %v9961_v36 = vmul.f32 0.01, %v9689_v19  ;;  %v12839_v18 = vpop.f32.mrb[60].mxu0 }
 0x527   : > { %10233 = vst.msk [vmem:[%s17197_s19 + $0x1c0] sm:$0xff] %vm10176_vm9, %v10096_v56  ;;  %v10099_v20 = vsel %vm9827_vm3, %v9691_v39, %v9963_v48  ;;  %v12975_v9 = vadd.f32 %v12839_v18, %v18887_v4  ;;  %v9186_v42 = vpop.f32.mrb[61].mxu0 }
 0x528   : > { %10236 = vst.msk [vmem:[%s17197_s19 + $0x1d8] sm:$0xff] %vm10176_vm9, %v10099_v20  ;;  %v10097_v34 = vsel %vm9825_vm12, %v9689_v19, %v9961_v36  ;;  %v12976_v59 = vadd.f32 %v9186_v42, %v18888_v6  ;;  %v12840_v10 = vpop.f32.mrb[62].mxu0 }
 0x529   : > { %10234 = vst.msk [vmem:[%s17197_s19 + $0x1c8] sm:$0xff] %vm10176_vm9, %v10097_v34  ;;  %v9694_v58 = vadd.f32 %v17528_v40, %v12975_v9  ;;  %v12977_v5 = vadd.f32 %v12840_v10, %v18889_v33  ;;  %v9189_v63 = vpop.f32.mrb[63].mxu0 }
 0x52a   : > { %v9692_v38 = vadd.f32 %v17528_v40, %v12976_v59  ;;  %v12978_v11 = vadd.f32 %v9189_v63, %v18890_v0 }
 0x52b   : > { %vm9830_vm13 = vcmp.ge.f32.partialorder %v9694_v58, 0.0  ;;  %v9966_v50 = vmul.f32 0.01, %v9694_v58  ;;  %v9695_v51 = vadd.f32 %v17528_v40, %v12977_v5 }
 0x52c   : > { %vm9828_vm14 = vcmp.ge.f32.partialorder %v9692_v38, 0.0  ;;  %v9964_v23 = vmul.f32 0.01, %v9692_v38  ;;  %v9693_v57 = vadd.f32 %v17528_v40, %v12978_v11 }
 0x52d   : > { %v10102_v14 = vsel %vm9830_vm13, %v9694_v58, %v9966_v50  ;;  %vm9831_vm15 = vcmp.ge.f32.partialorder %v9695_v51, 0.0  ;;  %v9967_v25 = vmul.f32 0.01, %v9695_v51 }
 0x52e   : > { %10239 = vst.msk [vmem:[%s17197_s19 + $0x1f0] sm:$0xff] %vm10176_vm9, %v10102_v14  ;;  %v10100_v47 = vsel %vm9828_vm14, %v9692_v38, %v9964_v23  ;;  %vm9829_vm0 = vcmp.ge.f32.partialorder %v9693_v57, 0.0  ;;  %v9965_v21 = vmul.f32 0.01, %v9693_v57  ;;  %v12843_v13 = vpop.f32.mrb[64].mxu0 }
 0x52f   : > { %10237 = vst.msk [vmem:[%s17197_s19 + $0x1e0] sm:$0xff] %vm10176_vm9, %v10100_v47  ;;  %v10103_v29 = vsel %vm9831_vm15, %v9695_v51, %v9967_v25  ;;  %v12979_v62 = vadd.f32 %v12843_v13, %v18891_v28  ;;  %v9202_v35 = vpop.f32.mrb[65].mxu0 }
 0x530   : > { %10240 = vst.msk [vmem:[%s17197_s19 + $0x1f8] sm:$0xff] %vm10176_vm9, %v10103_v29  ;;  %v10101_v8 = vsel %vm9829_vm0, %v9693_v57, %v9965_v21  ;;  %v12980_v44 = vadd.f32 %v9202_v35, %v18892_v2  ;;  %v12844_v53 = vpop.f32.mrb[66].mxu0 }
 0x531   : > { %10238 = vst.msk [vmem:[%s17197_s19 + $0x1e8] sm:$0xff] %vm10176_vm9, %v10101_v8  ;;  %v9698_v17 = vadd.f32 %v17528_v40, %v12979_v62  ;;  %v12981_v12 = vadd.f32 %v12844_v53, %v18893_v37  ;;  %v9205_v27 = vpop.f32.mrb[67].mxu0 }
 0x532   : > { %v9696_v49 = vadd.f32 %v17528_v40, %v12980_v44  ;;  %v12982_v30 = vadd.f32 %v9205_v27, %v18894_v31  ;;  %v12295_v16 = vpop.f32.mrb[68].mxu1 }
 0x533   : > { %vm9834_vm1 = vcmp.ge.f32.partialorder %v9698_v17, 0.0  ;;  %v9970_v52 = vmul.f32 0.01, %v9698_v17  ;;  %v9699_v45 = vadd.f32 %v17528_v40, %v12981_v12  ;;  %v5160_v32 = vpop.f32.mrb[69].mxu1 }
 0x534   : > { %vm9832_vm2 = vcmp.ge.f32.partialorder %v9696_v49, 0.0  ;;  %v9968_v1 = vmul.f32 0.01, %v9696_v49  ;;  %v9697_v26 = vadd.f32 %v17528_v40, %v12982_v30  ;;  %v12296_v55 = vpop.f32.mrb[70].mxu1 }
 0x535   : > { %v10106_v22 = vsel %vm9834_vm1, %v9698_v17, %v9970_v52  ;;  %vm9835_vm5 = vcmp.ge.f32.partialorder %v9699_v45, 0.0  ;;  %v9971_v54 = vmul.f32 0.01, %v9699_v45  ;;  %v5163_v43 = vpop.f32.mrb[71].mxu1 }
 0x536   : > { %10243 = vst.msk [vmem:[%s17197_s19 + $0x210] sm:$0xff] %vm10176_vm9, %v10106_v22  ;;  %v10104_v60 = vsel %vm9832_vm2, %v9696_v49, %v9968_v1  ;;  %vm9833_vm6 = vcmp.ge.f32.partialorder %v9697_v26, 0.0  ;;  %v9969_v61 = vmul.f32 0.01, %v9697_v26  ;;  %v12847_v15 = vpop.f32.mrb[68].mxu0 }
 0x537   : > { %10241 = vst.msk [vmem:[%s17197_s19 + $0x200] sm:$0xff] %vm10176_vm9, %v10104_v60  ;;  %v10107_v24 = vsel %vm9835_vm5, %v9699_v45, %v9971_v54  ;;  %v12983_v3 = vadd.f32 %v12847_v15, %v12295_v16  ;;  %v9218_v7 = vpop.f32.mrb[69].mxu0 }
 0x538   : > { %10244 = vst.msk [vmem:[%s17197_s19 + $0x218] sm:$0xff] %vm10176_vm9, %v10107_v24  ;;  %v10105_v39 = vsel %vm9833_vm6, %v9697_v26, %v9969_v61  ;;  %v12984_v41 = vadd.f32 %v9218_v7, %v5160_v32  ;;  %v12848_v19 = vpop.f32.mrb[70].mxu0 }
 0x539   : > { %10242 = vst.msk [vmem:[%s17197_s19 + $0x208] sm:$0xff] %vm10176_vm9, %v10105_v39  ;;  %v9702_v46 = vadd.f32 %v17528_v40, %v12983_v3  ;;  %v12985_v48 = vadd.f32 %v12848_v19, %v12296_v55  ;;  %v9221_v56 = vpop.f32.mrb[71].mxu0 }
 0x53a   : > { %v9700_v36 = vadd.f32 %v17528_v40, %v12984_v41  ;;  %v12986_v18 = vadd.f32 %v9221_v56, %v5163_v43  ;;  %v12299_v20 = vpop.f32.mrb[72].mxu1 }
 0x53b   : > { %vm9838_vm7 = vcmp.ge.f32.partialorder %v9702_v46, 0.0  ;;  %v9974_v4 = vmul.f32 0.01, %v9702_v46  ;;  %v9703_v9 = vadd.f32 %v17528_v40, %v12985_v48  ;;  %v5176_v42 = vpop.f32.mrb[73].mxu1 }
 0x53c   : > { %vm9836_vm4 = vcmp.ge.f32.partialorder %v9700_v36, 0.0  ;;  %v9972_v34 = vmul.f32 0.01, %v9700_v36  ;;  %v9701_v6 = vadd.f32 %v17528_v40, %v12986_v18  ;;  %v12300_v59 = vpop.f32.mrb[74].mxu1 }
 0x53d   : > { %v10110_v10 = vsel %vm9838_vm7, %v9702_v46, %v9974_v4  ;;  %vm9839_vm8 = vcmp.ge.f32.partialorder %v9703_v9, 0.0  ;;  %v9975_v58 = vmul.f32 0.01, %v9703_v9  ;;  %v5179_v33 = vpop.f32.mrb[75].mxu1 }
 0x53e   : > { %10247 = vst.msk [vmem:[%s17197_s19 + $0x230] sm:$0xff] %vm10176_vm9, %v10110_v10  ;;  %v10108_v5 = vsel %vm9836_vm4, %v9700_v36, %v9972_v34  ;;  %vm9837_vm10 = vcmp.ge.f32.partialorder %v9701_v6, 0.0  ;;  %v9973_v63 = vmul.f32 0.01, %v9701_v6  ;;  %v12851_v38 = vpop.f32.mrb[72].mxu0 }
 0x53f   : > { %10245 = vst.msk [vmem:[%s17197_s19 + $0x220] sm:$0xff] %vm10176_vm9, %v10108_v5  ;;  %v10111_v0 = vsel %vm9839_vm8, %v9703_v9, %v9975_v58  ;;  %v12987_v11 = vadd.f32 %v12851_v38, %v12299_v20  ;;  %v9234_v50 = vpop.f32.mrb[73].mxu0 }
 0x540   : > { %10248 = vst.msk [vmem:[%s17197_s19 + $0x238] sm:$0xff] %vm10176_vm9, %v10111_v0  ;;  %v10109_v51 = vsel %vm9837_vm10, %v9701_v6, %v9973_v63  ;;  %v12988_v23 = vadd.f32 %v9234_v50, %v5176_v42  ;;  %v12852_v57 = vpop.f32.mrb[74].mxu0 }
 0x541   : > { %10246 = vst.msk [vmem:[%s17197_s19 + $0x228] sm:$0xff] %vm10176_vm9, %v10109_v51  ;;  %v9706_v14 = vadd.f32 %v17528_v40, %v12987_v11  ;;  %v12989_v25 = vadd.f32 %v12852_v57, %v12300_v59  ;;  %v9237_v47 = vpop.f32.mrb[75].mxu0 }
 0x542   : > { %v9704_v21 = vadd.f32 %v17528_v40, %v12988_v23  ;;  %v12990_v13 = vadd.f32 %v9237_v47, %v5179_v33  ;;  %v12303_v29 = vpop.f32.mrb[76].mxu1 }
 0x543   : > { %vm9842_vm11 = vcmp.ge.f32.partialorder %v9706_v14, 0.0  ;;  %v9978_v28 = vmul.f32 0.01, %v9706_v14  ;;  %v9707_v62 = vadd.f32 %v17528_v40, %v12989_v25  ;;  %v5192_v35 = vpop.f32.mrb[77].mxu1 }
 0x544   : > { %vm9840_vm3 = vcmp.ge.f32.partialorder %v9704_v21, 0.0  ;;  %v9976_v8 = vmul.f32 0.01, %v9704_v21  ;;  %v9705_v2 = vadd.f32 %v17528_v40, %v12990_v13  ;;  %v12304_v44 = vpop.f32.mrb[78].mxu1 }
 0x545   : > { %v10114_v53 = vsel %vm9842_vm11, %v9706_v14, %v9978_v28  ;;  %vm9843_vm12 = vcmp.ge.f32.partialorder %v9707_v62, 0.0  ;;  %v9979_v17 = vmul.f32 0.01, %v9707_v62  ;;  %v5195_v37 = vpop.f32.mrb[79].mxu1 }
 0x546   : > { %10251 = vst.msk [vmem:[%s17197_s19 + $0x250] sm:$0xff] %vm10176_vm9, %v10114_v53  ;;  %v10112_v12 = vsel %vm9840_vm3, %v9704_v21, %v9976_v8  ;;  %vm9841_vm13 = vcmp.ge.f32.partialorder %v9705_v2, 0.0  ;;  %v9977_v27 = vmul.f32 0.01, %v9705_v2  ;;  %v12855_v49 = vpop.f32.mrb[76].mxu0 }
 0x547   : > { %10249 = vst.msk [vmem:[%s17197_s19 + $0x240] sm:$0xff] %vm10176_vm9, %v10112_v12  ;;  %v10115_v31 = vsel %vm9843_vm12, %v9707_v62, %v9979_v17  ;;  %v12991_v30 = vadd.f32 %v12855_v49, %v12303_v29  ;;  %v9250_v16 = vpop.f32.mrb[77].mxu0 }
 0x548   : > { %10252 = vst.msk [vmem:[%s17197_s19 + $0x258] sm:$0xff] %vm10176_vm9, %v10115_v31  ;;  %v10113_v52 = vsel %vm9841_vm13, %v9705_v2, %v9977_v27  ;;  %v12992_v45 = vadd.f32 %v9250_v16, %v5192_v35  ;;  %v12856_v32 = vpop.f32.mrb[78].mxu0 }
 0x549   : > { %10250 = vst.msk [vmem:[%s17197_s19 + $0x248] sm:$0xff] %vm10176_vm9, %v10113_v52  ;;  %v9710_v1 = vadd.f32 %v17528_v40, %v12991_v30  ;;  %v12993_v26 = vadd.f32 %v12856_v32, %v12304_v44  ;;  %v9253_v55 = vpop.f32.mrb[79].mxu0 }
 0x54a   : > { %v9708_v22 = vadd.f32 %v17528_v40, %v12992_v45  ;;  %v12994_v54 = vadd.f32 %v9253_v55, %v5195_v37  ;;  %v12307_v43 = vpop.f32.mrb[80].mxu1 }
 0x54b   : > { %vm9846_vm14 = vcmp.ge.f32.partialorder %v9710_v1, 0.0  ;;  %v9982_v60 = vmul.f32 0.01, %v9710_v1  ;;  %v9711_v61 = vadd.f32 %v17528_v40, %v12993_v26  ;;  %v5208_v15 = vpop.f32.mrb[81].mxu1 }
 0x54c   : > { %vm9844_vm15 = vcmp.ge.f32.partialorder %v9708_v22, 0.0  ;;  %v9980_v24 = vmul.f32 0.01, %v9708_v22  ;;  %v9709_v3 = vadd.f32 %v17528_v40, %v12994_v54  ;;  %v12308_v7 = vpop.f32.mrb[82].mxu1 }
 0x54d   : > { %v10118_v39 = vsel %vm9846_vm14, %v9710_v1, %v9982_v60  ;;  %vm9847_vm0 = vcmp.ge.f32.partialorder %v9711_v61, 0.0  ;;  %v9983_v41 = vmul.f32 0.01, %v9711_v61  ;;  %v5211_v19 = vpop.f32.mrb[83].mxu1 }
 0x54e   : > { %10255 = vst.msk [vmem:[%s17197_s19 + $0x270] sm:$0xff] %vm10176_vm9, %v10118_v39  ;;  %v10116_v46 = vsel %vm9844_vm15, %v9708_v22, %v9980_v24  ;;  %vm9845_vm1 = vcmp.ge.f32.partialorder %v9709_v3, 0.0  ;;  %v9981_v48 = vmul.f32 0.01, %v9709_v3  ;;  %v12859_v56 = vpop.f32.mrb[80].mxu0 }
 0x54f   : > { %10253 = vst.msk [vmem:[%s17197_s19 + $0x260] sm:$0xff] %vm10176_vm9, %v10116_v46  ;;  %v10119_v36 = vsel %vm9847_vm0, %v9711_v61, %v9983_v41  ;;  %v12995_v18 = vadd.f32 %v12859_v56, %v12307_v43  ;;  %v9266_v20 = vpop.f32.mrb[81].mxu0 }
 0x550   : > { %10256 = vst.msk [vmem:[%s17197_s19 + $0x278] sm:$0xff] %vm10176_vm9, %v10119_v36  ;;  %v10117_v4 = vsel %vm9845_vm1, %v9709_v3, %v9981_v48  ;;  %v12996_v9 = vadd.f32 %v9266_v20, %v5208_v15  ;;  %v12860_v42 = vpop.f32.mrb[82].mxu0 }
 0x551   : > { %10254 = vst.msk [vmem:[%s17197_s19 + $0x268] sm:$0xff] %vm10176_vm9, %v10117_v4  ;;  %v9714_v34 = vadd.f32 %v17528_v40, %v12995_v18  ;;  %v12997_v6 = vadd.f32 %v12860_v42, %v12308_v7  ;;  %v9269_v59 = vpop.f32.mrb[83].mxu0 }
 0x552   : > { %v9712_v10 = vadd.f32 %v17528_v40, %v12996_v9  ;;  %v12998_v58 = vadd.f32 %v9269_v59, %v5211_v19  ;;  %v12311_v33 = vpop.f32.mrb[84].mxu1 }
 0x553   : > { %vm9850_vm2 = vcmp.ge.f32.partialorder %v9714_v34, 0.0  ;;  %v9986_v5 = vmul.f32 0.01, %v9714_v34  ;;  %v9715_v63 = vadd.f32 %v17528_v40, %v12997_v6  ;;  %v5224_v38 = vpop.f32.mrb[85].mxu1 }
 0x554   : > { %vm9848_vm5 = vcmp.ge.f32.partialorder %v9712_v10, 0.0  ;;  %v9984_v0 = vmul.f32 0.01, %v9712_v10  ;;  %v9713_v11 = vadd.f32 %v17528_v40, %v12998_v58  ;;  %v12312_v50 = vpop.f32.mrb[86].mxu1 }
 0x555   : > { %v10122_v51 = vsel %vm9850_vm2, %v9714_v34, %v9986_v5  ;;  %vm9851_vm6 = vcmp.ge.f32.partialorder %v9715_v63, 0.0  ;;  %v9987_v23 = vmul.f32 0.01, %v9715_v63  ;;  %v5227_v57 = vpop.f32.mrb[87].mxu1 }
 0x556   : > { %10259 = vst.msk [vmem:[%s17197_s19 + $0x290] sm:$0xff] %vm10176_vm9, %v10122_v51  ;;  %v10120_v14 = vsel %vm9848_vm5, %v9712_v10, %v9984_v0  ;;  %vm9849_vm7 = vcmp.ge.f32.partialorder %v9713_v11, 0.0  ;;  %v9985_v25 = vmul.f32 0.01, %v9713_v11  ;;  %v12863_v47 = vpop.f32.mrb[84].mxu0 }
 0x557   : > { %10257 = vst.msk [vmem:[%s17197_s19 + $0x280] sm:$0xff] %vm10176_vm9, %v10120_v14  ;;  %v10123_v21 = vsel %vm9851_vm6, %v9715_v63, %v9987_v23  ;;  %v12999_v13 = vadd.f32 %v12863_v47, %v12311_v33  ;;  %v9282_v29 = vpop.f32.mrb[85].mxu0 }
 0x558   : > { %10260 = vst.msk [vmem:[%s17197_s19 + $0x298] sm:$0xff] %vm10176_vm9, %v10123_v21  ;;  %v10121_v28 = vsel %vm9849_vm7, %v9713_v11, %v9985_v25  ;;  %v13000_v62 = vadd.f32 %v9282_v29, %v5224_v38  ;;  %v12864_v35 = vpop.f32.mrb[86].mxu0 }
 0x559   : > { %10258 = vst.msk [vmem:[%s17197_s19 + $0x288] sm:$0xff] %vm10176_vm9, %v10121_v28  ;;  %v9718_v8 = vadd.f32 %v17528_v40, %v12999_v13  ;;  %v13001_v2 = vadd.f32 %v12864_v35, %v12312_v50  ;;  %v9285_v44 = vpop.f32.mrb[87].mxu0 }
 0x55a   : > { %v9716_v53 = vadd.f32 %v17528_v40, %v13000_v62  ;;  %v13002_v17 = vadd.f32 %v9285_v44, %v5227_v57  ;;  %v12315_v37 = vpop.f32.mrb[88].mxu1 }
 0x55b   : > { %vm9854_vm4 = vcmp.ge.f32.partialorder %v9718_v8, 0.0  ;;  %v9990_v12 = vmul.f32 0.01, %v9718_v8  ;;  %v9719_v27 = vadd.f32 %v17528_v40, %v13001_v2  ;;  %v5240_v49 = vpop.f32.mrb[89].mxu1 }
 0x55c   : > { %vm9852_vm8 = vcmp.ge.f32.partialorder %v9716_v53, 0.0  ;;  %v9988_v31 = vmul.f32 0.01, %v9716_v53  ;;  %v9717_v30 = vadd.f32 %v17528_v40, %v13002_v17  ;;  %v12316_v16 = vpop.f32.mrb[90].mxu1 }
 0x55d   : > { %v10126_v52 = vsel %vm9854_vm4, %v9718_v8, %v9990_v12  ;;  %vm9855_vm10 = vcmp.ge.f32.partialorder %v9719_v27, 0.0  ;;  %v9991_v45 = vmul.f32 0.01, %v9719_v27  ;;  %v5243_v32 = vpop.f32.mrb[91].mxu1 }
 0x55e   : > { %10263 = vst.msk [vmem:[%s17197_s19 + $0x2b0] sm:$0xff] %vm10176_vm9, %v10126_v52  ;;  %v10124_v1 = vsel %vm9852_vm8, %v9716_v53, %v9988_v31  ;;  %vm9853_vm11 = vcmp.ge.f32.partialorder %v9717_v30, 0.0  ;;  %v9989_v26 = vmul.f32 0.01, %v9717_v30  ;;  %v12867_v55 = vpop.f32.mrb[88].mxu0 }
 0x55f   : > { %10261 = vst.msk [vmem:[%s17197_s19 + $0x2a0] sm:$0xff] %vm10176_vm9, %v10124_v1  ;;  %v10127_v22 = vsel %vm9855_vm10, %v9719_v27, %v9991_v45  ;;  %v13003_v54 = vadd.f32 %v12867_v55, %v12315_v37  ;;  %v9298_v43 = vpop.f32.mrb[89].mxu0 }
 0x560   : > { %10264 = vst.msk [vmem:[%s17197_s19 + $0x2b8] sm:$0xff] %vm10176_vm9, %v10127_v22  ;;  %v10125_v60 = vsel %vm9853_vm11, %v9717_v30, %v9989_v26  ;;  %v13004_v61 = vadd.f32 %v9298_v43, %v5240_v49  ;;  %v12868_v15 = vpop.f32.mrb[90].mxu0 }
 0x561   : > { %10262 = vst.msk [vmem:[%s17197_s19 + $0x2a8] sm:$0xff] %vm10176_vm9, %v10125_v60  ;;  %v9722_v24 = vadd.f32 %v17528_v40, %v13003_v54  ;;  %v13005_v3 = vadd.f32 %v12868_v15, %v12316_v16  ;;  %v9301_v7 = vpop.f32.mrb[91].mxu0 }
 0x562   : > { %v9720_v39 = vadd.f32 %v17528_v40, %v13004_v61  ;;  %v13006_v41 = vadd.f32 %v9301_v7, %v5243_v32  ;;  %v12319_v19 = vpop.f32.mrb[92].mxu1 }
 0x563   : > { %vm9858_vm3 = vcmp.ge.f32.partialorder %v9722_v24, 0.0  ;;  %v9994_v46 = vmul.f32 0.01, %v9722_v24  ;;  %v9723_v48 = vadd.f32 %v17528_v40, %v13005_v3  ;;  %v5256_v56 = vpop.f32.mrb[93].mxu1 }
 0x564   : > { %vm9856_vm12 = vcmp.ge.f32.partialorder %v9720_v39, 0.0  ;;  %v9992_v36 = vmul.f32 0.01, %v9720_v39  ;;  %v9721_v18 = vadd.f32 %v17528_v40, %v13006_v41  ;;  %v12320_v20 = vpop.f32.mrb[94].mxu1 }
 0x565   : > { %v10130_v4 = vsel %vm9858_vm3, %v9722_v24, %v9994_v46  ;;  %vm9859_vm13 = vcmp.ge.f32.partialorder %v9723_v48, 0.0  ;;  %v9995_v9 = vmul.f32 0.01, %v9723_v48  ;;  %v5259_v42 = vpop.f32.mrb[95].mxu1 }
 0x566   : > { %10267 = vst.msk [vmem:[%s17197_s19 + $0x2d0] sm:$0xff] %vm10176_vm9, %v10130_v4  ;;  %v10128_v34 = vsel %vm9856_vm12, %v9720_v39, %v9992_v36  ;;  %vm9857_vm14 = vcmp.ge.f32.partialorder %v9721_v18, 0.0  ;;  %v9993_v6 = vmul.f32 0.01, %v9721_v18  ;;  %v12871_v59 = vpop.f32.mrb[92].mxu0 }
 0x567   : > { %10265 = vst.msk [vmem:[%s17197_s19 + $0x2c0] sm:$0xff] %vm10176_vm9, %v10128_v34  ;;  %v10131_v10 = vsel %vm9859_vm13, %v9723_v48, %v9995_v9  ;;  %v13007_v58 = vadd.f32 %v12871_v59, %v12319_v19  ;;  %v9314_v33 = vpop.f32.mrb[93].mxu0 }
 0x568   : > { %10268 = vst.msk [vmem:[%s17197_s19 + $0x2d8] sm:$0xff] %vm10176_vm9, %v10131_v10  ;;  %v10129_v5 = vsel %vm9857_vm14, %v9721_v18, %v9993_v6  ;;  %v13008_v63 = vadd.f32 %v9314_v33, %v5256_v56  ;;  %v12872_v38 = vpop.f32.mrb[94].mxu0 }
 0x569   : > { %10266 = vst.msk [vmem:[%s17197_s19 + $0x2c8] sm:$0xff] %vm10176_vm9, %v10129_v5  ;;  %v9726_v0 = vadd.f32 %v17528_v40, %v13007_v58  ;;  %v13009_v11 = vadd.f32 %v12872_v38, %v12320_v20  ;;  %v9317_v50 = vpop.f32.mrb[95].mxu0 }
 0x56a   : > { %v9724_v51 = vadd.f32 %v17528_v40, %v13008_v63  ;;  %v13010_v23 = vadd.f32 %v9317_v50, %v5259_v42  ;;  %v12323_v57 = vpop.f32.mrb[96].mxu1 }
 0x56b   : > { %vm9862_vm15 = vcmp.ge.f32.partialorder %v9726_v0, 0.0  ;;  %v9998_v14 = vmul.f32 0.01, %v9726_v0  ;;  %v9727_v25 = vadd.f32 %v17528_v40, %v13009_v11  ;;  %v5272_v47 = vpop.f32.mrb[97].mxu1 }
 0x56c   : > { %vm9860_vm0 = vcmp.ge.f32.partialorder %v9724_v51, 0.0  ;;  %v9996_v21 = vmul.f32 0.01, %v9724_v51  ;;  %v9725_v13 = vadd.f32 %v17528_v40, %v13010_v23  ;;  %v12324_v29 = vpop.f32.mrb[98].mxu1 }
 0x56d   : > { %v10134_v28 = vsel %vm9862_vm15, %v9726_v0, %v9998_v14  ;;  %vm9863_vm1 = vcmp.ge.f32.partialorder %v9727_v25, 0.0  ;;  %v9999_v62 = vmul.f32 0.01, %v9727_v25  ;;  %v5275_v35 = vpop.f32.mrb[99].mxu1 }
 0x56e   : > { %10271 = vst.msk [vmem:[%s17197_s19 + $0x2f0] sm:$0xff] %vm10176_vm9, %v10134_v28  ;;  %v10132_v8 = vsel %vm9860_vm0, %v9724_v51, %v9996_v21  ;;  %vm9861_vm2 = vcmp.ge.f32.partialorder %v9725_v13, 0.0  ;;  %v9997_v2 = vmul.f32 0.01, %v9725_v13  ;;  %v12875_v44 = vpop.f32.mrb[96].mxu0 }
 0x56f   : > { %10269 = vst.msk [vmem:[%s17197_s19 + $0x2e0] sm:$0xff] %vm10176_vm9, %v10132_v8  ;;  %v10135_v53 = vsel %vm9863_vm1, %v9727_v25, %v9999_v62  ;;  %v13011_v17 = vadd.f32 %v12875_v44, %v12323_v57  ;;  %v9330_v37 = vpop.f32.mrb[97].mxu0 }
 0x570   : > { %10272 = vst.msk [vmem:[%s17197_s19 + $0x2f8] sm:$0xff] %vm10176_vm9, %v10135_v53  ;;  %v10133_v12 = vsel %vm9861_vm2, %v9725_v13, %v9997_v2  ;;  %v13012_v27 = vadd.f32 %v9330_v37, %v5272_v47  ;;  %v12876_v49 = vpop.f32.mrb[98].mxu0 }
 0x571   : > { %10270 = vst.msk [vmem:[%s17197_s19 + $0x2e8] sm:$0xff] %vm10176_vm9, %v10133_v12  ;;  %v9730_v31 = vadd.f32 %v17528_v40, %v13011_v17  ;;  %v13013_v30 = vadd.f32 %v12876_v49, %v12324_v29  ;;  %v9333_v16 = vpop.f32.mrb[99].mxu0 }
 0x572   : > { %v9728_v52 = vadd.f32 %v17528_v40, %v13012_v27  ;;  %v13014_v45 = vadd.f32 %v9333_v16, %v5275_v35  ;;  %v12327_v32 = vpop.f32.mrb[100].mxu1 }
 0x573   : > { %vm9866_vm5 = vcmp.ge.f32.partialorder %v9730_v31, 0.0  ;;  %v10002_v1 = vmul.f32 0.01, %v9730_v31  ;;  %v9731_v26 = vadd.f32 %v17528_v40, %v13013_v30  ;;  %v5288_v55 = vpop.f32.mrb[101].mxu1 }
 0x574   : > { %vm9864_vm6 = vcmp.ge.f32.partialorder %v9728_v52, 0.0  ;;  %v10000_v22 = vmul.f32 0.01, %v9728_v52  ;;  %v9729_v54 = vadd.f32 %v17528_v40, %v13014_v45  ;;  %v12328_v43 = vpop.f32.mrb[102].mxu1 }
 0x575   : > { %v10138_v60 = vsel %vm9866_vm5, %v9730_v31, %v10002_v1  ;;  %vm9867_vm7 = vcmp.ge.f32.partialorder %v9731_v26, 0.0  ;;  %v10003_v61 = vmul.f32 0.01, %v9731_v26  ;;  %v5291_v15 = vpop.f32.mrb[103].mxu1 }
 0x576   : > { %10275 = vst.msk [vmem:[%s17197_s19 + $0x310] sm:$0xff] %vm10176_vm9, %v10138_v60  ;;  %v10136_v24 = vsel %vm9864_vm6, %v9728_v52, %v10000_v22  ;;  %vm9865_vm4 = vcmp.ge.f32.partialorder %v9729_v54, 0.0  ;;  %v10001_v3 = vmul.f32 0.01, %v9729_v54  ;;  %v12879_v7 = vpop.f32.mrb[100].mxu0 }
 0x577   : > { %10273 = vst.msk [vmem:[%s17197_s19 + $0x300] sm:$0xff] %vm10176_vm9, %v10136_v24  ;;  %v10139_v39 = vsel %vm9867_vm7, %v9731_v26, %v10003_v61  ;;  %v13015_v41 = vadd.f32 %v12879_v7, %v12327_v32  ;;  %v9346_v19 = vpop.f32.mrb[101].mxu0 }
 0x578   : > { %10276 = vst.msk [vmem:[%s17197_s19 + $0x318] sm:$0xff] %vm10176_vm9, %v10139_v39  ;;  %v10137_v46 = vsel %vm9865_vm4, %v9729_v54, %v10001_v3  ;;  %v13016_v48 = vadd.f32 %v9346_v19, %v5288_v55  ;;  %v12880_v56 = vpop.f32.mrb[102].mxu0 }
 0x579   : > { %10274 = vst.msk [vmem:[%s17197_s19 + $0x308] sm:$0xff] %vm10176_vm9, %v10137_v46  ;;  %v9734_v36 = vadd.f32 %v17528_v40, %v13015_v41  ;;  %v13017_v18 = vadd.f32 %v12880_v56, %v12328_v43  ;;  %v9349_v20 = vpop.f32.mrb[103].mxu0 }
 0x57a   : > { %v9732_v4 = vadd.f32 %v17528_v40, %v13016_v48  ;;  %v13018_v9 = vadd.f32 %v9349_v20, %v5291_v15  ;;  %v12331_v42 = vpop.f32.mrb[104].mxu1 }
 0x57b   : > { %vm9870_vm8 = vcmp.ge.f32.partialorder %v9734_v36, 0.0  ;;  %v10006_v34 = vmul.f32 0.01, %v9734_v36  ;;  %v9735_v6 = vadd.f32 %v17528_v40, %v13017_v18  ;;  %v5304_v59 = vpop.f32.mrb[105].mxu1 }
 0x57c   : > { %vm9868_vm10 = vcmp.ge.f32.partialorder %v9732_v4, 0.0  ;;  %v10004_v10 = vmul.f32 0.01, %v9732_v4  ;;  %v9733_v58 = vadd.f32 %v17528_v40, %v13018_v9  ;;  %v12332_v33 = vpop.f32.mrb[106].mxu1 }
 0x57d   : > { %v10142_v5 = vsel %vm9870_vm8, %v9734_v36, %v10006_v34  ;;  %vm9871_vm11 = vcmp.ge.f32.partialorder %v9735_v6, 0.0  ;;  %v10007_v63 = vmul.f32 0.01, %v9735_v6  ;;  %v5307_v38 = vpop.f32.mrb[107].mxu1 }
 0x57e   : > { %10279 = vst.msk [vmem:[%s17197_s19 + $0x330] sm:$0xff] %vm10176_vm9, %v10142_v5  ;;  %v10140_v0 = vsel %vm9868_vm10, %v9732_v4, %v10004_v10  ;;  %vm9869_vm3 = vcmp.ge.f32.partialorder %v9733_v58, 0.0  ;;  %v10005_v11 = vmul.f32 0.01, %v9733_v58  ;;  %v12883_v50 = vpop.f32.mrb[104].mxu0 }
 0x57f   : > { %10277 = vst.msk [vmem:[%s17197_s19 + $0x320] sm:$0xff] %vm10176_vm9, %v10140_v0  ;;  %v10143_v51 = vsel %vm9871_vm11, %v9735_v6, %v10007_v63  ;;  %v13019_v23 = vadd.f32 %v12883_v50, %v12331_v42  ;;  %v9362_v57 = vpop.f32.mrb[105].mxu0 }
 0x580   : > { %10280 = vst.msk [vmem:[%s17197_s19 + $0x338] sm:$0xff] %vm10176_vm9, %v10143_v51  ;;  %v10141_v14 = vsel %vm9869_vm3, %v9733_v58, %v10005_v11  ;;  %v13020_v25 = vadd.f32 %v9362_v57, %v5304_v59  ;;  %v12884_v47 = vpop.f32.mrb[106].mxu0 }
 0x581   : > { %10278 = vst.msk [vmem:[%s17197_s19 + $0x328] sm:$0xff] %vm10176_vm9, %v10141_v14  ;;  %v9738_v21 = vadd.f32 %v17528_v40, %v13019_v23  ;;  %v13021_v13 = vadd.f32 %v12884_v47, %v12332_v33  ;;  %v9365_v29 = vpop.f32.mrb[107].mxu0 }
 0x582   : > { %v9736_v28 = vadd.f32 %v17528_v40, %v13020_v25  ;;  %v13022_v62 = vadd.f32 %v9365_v29, %v5307_v38  ;;  %v12335_v35 = vpop.f32.mrb[108].mxu1 }
 0x583   : > { %vm9874_vm12 = vcmp.ge.f32.partialorder %v9738_v21, 0.0  ;;  %v10010_v8 = vmul.f32 0.01, %v9738_v21  ;;  %v9739_v2 = vadd.f32 %v17528_v40, %v13021_v13  ;;  %v5320_v44 = vpop.f32.mrb[109].mxu1 }
 0x584   : > { %vm9872_vm13 = vcmp.ge.f32.partialorder %v9736_v28, 0.0  ;;  %v10008_v53 = vmul.f32 0.01, %v9736_v28  ;;  %v9737_v17 = vadd.f32 %v17528_v40, %v13022_v62  ;;  %v12336_v37 = vpop.f32.mrb[110].mxu1 }
 0x585   : > { %v10146_v12 = vsel %vm9874_vm12, %v9738_v21, %v10010_v8  ;;  %vm9875_vm14 = vcmp.ge.f32.partialorder %v9739_v2, 0.0  ;;  %v10011_v27 = vmul.f32 0.01, %v9739_v2  ;;  %v5323_v49 = vpop.f32.mrb[111].mxu1 }
 0x586   : > { %10283 = vst.msk [vmem:[%s17197_s19 + $0x350] sm:$0xff] %vm10176_vm9, %v10146_v12  ;;  %v10144_v31 = vsel %vm9872_vm13, %v9736_v28, %v10008_v53  ;;  %vm9873_vm15 = vcmp.ge.f32.partialorder %v9737_v17, 0.0  ;;  %v10009_v30 = vmul.f32 0.01, %v9737_v17  ;;  %v12887_v16 = vpop.f32.mrb[108].mxu0 }
 0x587   : > { %10281 = vst.msk [vmem:[%s17197_s19 + $0x340] sm:$0xff] %vm10176_vm9, %v10144_v31  ;;  %v10147_v52 = vsel %vm9875_vm14, %v9739_v2, %v10011_v27  ;;  %v13023_v45 = vadd.f32 %v12887_v16, %v12335_v35  ;;  %v9378_v32 = vpop.f32.mrb[109].mxu0 }
 0x588   : > { %10284 = vst.msk [vmem:[%s17197_s19 + $0x358] sm:$0xff] %vm10176_vm9, %v10147_v52  ;;  %v10145_v1 = vsel %vm9873_vm15, %v9737_v17, %v10009_v30  ;;  %v13024_v26 = vadd.f32 %v9378_v32, %v5320_v44  ;;  %v12888_v55 = vpop.f32.mrb[110].mxu0 }
 0x589   : > { %10282 = vst.msk [vmem:[%s17197_s19 + $0x348] sm:$0xff] %vm10176_vm9, %v10145_v1  ;;  %v9742_v22 = vadd.f32 %v17528_v40, %v13023_v45  ;;  %v13025_v54 = vadd.f32 %v12888_v55, %v12336_v37  ;;  %v9381_v43 = vpop.f32.mrb[111].mxu0 }
 0x58a   : > { %v9740_v60 = vadd.f32 %v17528_v40, %v13024_v26  ;;  %v13026_v61 = vadd.f32 %v9381_v43, %v5323_v49  ;;  %v12339_v15 = vpop.f32.mrb[112].mxu1 }
 0x58b   : > { %vm9878_vm0 = vcmp.ge.f32.partialorder %v9742_v22, 0.0  ;;  %v10014_v24 = vmul.f32 0.01, %v9742_v22  ;;  %v9743_v3 = vadd.f32 %v17528_v40, %v13025_v54  ;;  %v5336_v7 = vpop.f32.mrb[113].mxu1 }
 0x58c   : > { %vm9876_vm1 = vcmp.ge.f32.partialorder %v9740_v60, 0.0  ;;  %v10012_v39 = vmul.f32 0.01, %v9740_v60  ;;  %v9741_v41 = vadd.f32 %v17528_v40, %v13026_v61  ;;  %v12340_v19 = vpop.f32.mrb[114].mxu1 }
 0x58d   : > { %v10150_v46 = vsel %vm9878_vm0, %v9742_v22, %v10014_v24  ;;  %vm9879_vm2 = vcmp.ge.f32.partialorder %v9743_v3, 0.0  ;;  %v10015_v48 = vmul.f32 0.01, %v9743_v3  ;;  %v5339_v56 = vpop.f32.mrb[115].mxu1 }
 0x58e   : > { %10287 = vst.msk [vmem:[%s17197_s19 + $0x370] sm:$0xff] %vm10176_vm9, %v10150_v46  ;;  %v10148_v36 = vsel %vm9876_vm1, %v9740_v60, %v10012_v39  ;;  %vm9877_vm5 = vcmp.ge.f32.partialorder %v9741_v41, 0.0  ;;  %v10013_v18 = vmul.f32 0.01, %v9741_v41  ;;  %v12891_v20 = vpop.f32.mrb[112].mxu0 }
 0x58f   : > { %10285 = vst.msk [vmem:[%s17197_s19 + $0x360] sm:$0xff] %vm10176_vm9, %v10148_v36  ;;  %v10151_v4 = vsel %vm9879_vm2, %v9743_v3, %v10015_v48  ;;  %v13027_v9 = vadd.f32 %v12891_v20, %v12339_v15  ;;  %v9394_v42 = vpop.f32.mrb[113].mxu0 }
 0x590   : > { %10288 = vst.msk [vmem:[%s17197_s19 + $0x378] sm:$0xff] %vm10176_vm9, %v10151_v4  ;;  %v10149_v34 = vsel %vm9877_vm5, %v9741_v41, %v10013_v18  ;;  %v13028_v6 = vadd.f32 %v9394_v42, %v5336_v7  ;;  %v12892_v59 = vpop.f32.mrb[114].mxu0 }
 0x591   : > { %10286 = vst.msk [vmem:[%s17197_s19 + $0x368] sm:$0xff] %vm10176_vm9, %v10149_v34  ;;  %v9746_v10 = vadd.f32 %v17528_v40, %v13027_v9  ;;  %v13029_v58 = vadd.f32 %v12892_v59, %v12340_v19  ;;  %v9397_v33 = vpop.f32.mrb[115].mxu0 }
 0x592   : > { %v9744_v5 = vadd.f32 %v17528_v40, %v13028_v6  ;;  %v13030_v63 = vadd.f32 %v9397_v33, %v5339_v56  ;;  %v12343_v38 = vpop.f32.mrb[116].mxu1 }
 0x593   : > { %vm9882_vm6 = vcmp.ge.f32.partialorder %v9746_v10, 0.0  ;;  %v10018_v0 = vmul.f32 0.01, %v9746_v10  ;;  %v9747_v11 = vadd.f32 %v17528_v40, %v13029_v58  ;;  %v5352_v50 = vpop.f32.mrb[117].mxu1 }
 0x594   : > { %vm9880_vm7 = vcmp.ge.f32.partialorder %v9744_v5, 0.0  ;;  %v10016_v51 = vmul.f32 0.01, %v9744_v5  ;;  %v9745_v23 = vadd.f32 %v17528_v40, %v13030_v63  ;;  %v12344_v57 = vpop.f32.mrb[118].mxu1 }
 0x595   : > { %v10154_v14 = vsel %vm9882_vm6, %v9746_v10, %v10018_v0  ;;  %vm9883_vm4 = vcmp.ge.f32.partialorder %v9747_v11, 0.0  ;;  %v10019_v25 = vmul.f32 0.01, %v9747_v11  ;;  %v5355_v47 = vpop.f32.mrb[119].mxu1 }
 0x596   : > { %10291 = vst.msk [vmem:[%s17197_s19 + $0x390] sm:$0xff] %vm10176_vm9, %v10154_v14  ;;  %v10152_v21 = vsel %vm9880_vm7, %v9744_v5, %v10016_v51  ;;  %vm9881_vm8 = vcmp.ge.f32.partialorder %v9745_v23, 0.0  ;;  %v10017_v13 = vmul.f32 0.01, %v9745_v23  ;;  %v12895_v29 = vpop.f32.mrb[116].mxu0 }
 0x597   : > { %10289 = vst.msk [vmem:[%s17197_s19 + $0x380] sm:$0xff] %vm10176_vm9, %v10152_v21  ;;  %v10155_v28 = vsel %vm9883_vm4, %v9747_v11, %v10019_v25  ;;  %v13031_v62 = vadd.f32 %v12895_v29, %v12343_v38  ;;  %v9410_v35 = vpop.f32.mrb[117].mxu0 }
 0x598   : > { %10292 = vst.msk [vmem:[%s17197_s19 + $0x398] sm:$0xff] %vm10176_vm9, %v10155_v28  ;;  %v10153_v8 = vsel %vm9881_vm8, %v9745_v23, %v10017_v13  ;;  %v13032_v2 = vadd.f32 %v9410_v35, %v5352_v50  ;;  %v12896_v44 = vpop.f32.mrb[118].mxu0  ;;  %v17733_v13 = vld [vmem:[%s17780_s2] ss:$0 sm:$0xff] }
 0x599   : > { %10290 = vst.msk [vmem:[%s17197_s19 + $0x388] sm:$0xff] %vm10176_vm9, %v10153_v8  ;;  %v9750_v53 = vadd.f32 %v17528_v40, %v13031_v62  ;;  %v13033_v17 = vadd.f32 %v12896_v44, %v12344_v57  ;;  %v9413_v37 = vpop.f32.mrb[119].mxu0 }
 0x59a   : > { %v9748_v12 = vadd.f32 %v17528_v40, %v13032_v2  ;;  %v13034_v27 = vadd.f32 %v9413_v37, %v5355_v47  ;;  %v12347_v49 = vpop.f32.mrb[120].mxu1 }
 0x59b   : > { %vm9886_vm10 = vcmp.ge.f32.partialorder %v9750_v53, 0.0  ;;  %v10022_v31 = vmul.f32 0.01, %v9750_v53  ;;  %v9751_v30 = vadd.f32 %v17528_v40, %v13033_v17  ;;  %v5368_v16 = vpop.f32.mrb[121].mxu1 }
 0x59c   : > { %vm9884_vm11 = vcmp.ge.f32.partialorder %v9748_v12, 0.0  ;;  %v10020_v52 = vmul.f32 0.01, %v9748_v12  ;;  %v9749_v45 = vadd.f32 %v17528_v40, %v13034_v27  ;;  %v12348_v32 = vpop.f32.mrb[122].mxu1 }
 0x59d   : > { %v10158_v1 = vsel %vm9886_vm10, %v9750_v53, %v10022_v31  ;;  %vm9887_vm3 = vcmp.ge.f32.partialorder %v9751_v30, 0.0  ;;  %v10023_v26 = vmul.f32 0.01, %v9751_v30  ;;  %v5371_v55 = vpop.f32.mrb[123].mxu1 }
 0x59e   : > { %10295 = vst.msk [vmem:[%s17197_s19 + $0x3b0] sm:$0xff] %vm10176_vm9, %v10158_v1  ;;  %v10156_v22 = vsel %vm9884_vm11, %v9748_v12, %v10020_v52  ;;  %vm9885_vm12 = vcmp.ge.f32.partialorder %v9749_v45, 0.0  ;;  %v10021_v54 = vmul.f32 0.01, %v9749_v45  ;;  %v12899_v43 = vpop.f32.mrb[120].mxu0 }
 0x59f   : > { %10293 = vst.msk [vmem:[%s17197_s19 + $0x3a0] sm:$0xff] %vm10176_vm9, %v10156_v22  ;;  %v10159_v60 = vsel %vm9887_vm3, %v9751_v30, %v10023_v26  ;;  %v13035_v61 = vadd.f32 %v12899_v43, %v12347_v49  ;;  %v9426_v15 = vpop.f32.mrb[121].mxu0 }
 0x5a0   : > { %10296 = vst.msk [vmem:[%s17197_s19 + $0x3b8] sm:$0xff] %vm10176_vm9, %v10159_v60  ;;  %v10157_v24 = vsel %vm9885_vm12, %v9749_v45, %v10021_v54  ;;  %v13036_v3 = vadd.f32 %v9426_v15, %v5368_v16  ;;  %v12900_v7 = vpop.f32.mrb[122].mxu0 }
 0x5a1   : > { %10294 = vst.msk [vmem:[%s17197_s19 + $0x3a8] sm:$0xff] %vm10176_vm9, %v10157_v24  ;;  %v9754_v39 = vadd.f32 %v17528_v40, %v13035_v61  ;;  %v13037_v41 = vadd.f32 %v12900_v7, %v12348_v32  ;;  %v9429_v19 = vpop.f32.mrb[123].mxu0 }
 0x5a2   : > { %v9752_v46 = vadd.f32 %v17528_v40, %v13036_v3  ;;  %v13038_v48 = vadd.f32 %v9429_v19, %v5371_v55  ;;  %v12351_v56 = vpop.f32.mrb[124].mxu1 }
 0x5a3   : > { %vm9890_vm13 = vcmp.ge.f32.partialorder %v9754_v39, 0.0  ;;  %v10026_v36 = vmul.f32 0.01, %v9754_v39  ;;  %v9755_v18 = vadd.f32 %v17528_v40, %v13037_v41  ;;  %v5384_v20 = vpop.f32.mrb[125].mxu1 }
 0x5a4   : > { %vm9888_vm14 = vcmp.ge.f32.partialorder %v9752_v46, 0.0  ;;  %v10024_v4 = vmul.f32 0.01, %v9752_v46  ;;  %v9753_v9 = vadd.f32 %v17528_v40, %v13038_v48  ;;  %v12352_v42 = vpop.f32.mrb[126].mxu1 }
 0x5a5   : > { %v10162_v34 = vsel %vm9890_vm13, %v9754_v39, %v10026_v36  ;;  %vm9891_vm15 = vcmp.ge.f32.partialorder %v9755_v18, 0.0  ;;  %v10027_v6 = vmul.f32 0.01, %v9755_v18  ;;  %v5387_v59 = vpop.f32.mrb[127].mxu1 }
 0x5a6   : > { %10299 = vst.msk [vmem:[%s17197_s19 + $0x3d0] sm:$0xff] %vm10176_vm9, %v10162_v34  ;;  %v10160_v10 = vsel %vm9888_vm14, %v9752_v46, %v10024_v4  ;;  %vm9889_vm0 = vcmp.ge.f32.partialorder %v9753_v9, 0.0  ;;  %v10025_v58 = vmul.f32 0.01, %v9753_v9  ;;  %v12903_v33 = vpop.f32.mrb[124].mxu0 }
 0x5a7   : > { %10297 = vst.msk [vmem:[%s17197_s19 + $0x3c0] sm:$0xff] %vm10176_vm9, %v10160_v10  ;;  %v10163_v5 = vsel %vm9891_vm15, %v9755_v18, %v10027_v6  ;;  %v13039_v63 = vadd.f32 %v12903_v33, %v12351_v56  ;;  %v9442_v38 = vpop.f32.mrb[125].mxu0 }
 0x5a8   : > { %10300 = vst.msk [vmem:[%s17197_s19 + $0x3d8] sm:$0xff] %vm10176_vm9, %v10163_v5  ;;  %v10161_v0 = vsel %vm9889_vm0, %v9753_v9, %v10025_v58  ;;  %v13040_v11 = vadd.f32 %v9442_v38, %v5384_v20  ;;  %v12904_v50 = vpop.f32.mrb[126].mxu0 }
 0x5a9   : > { %10298 = vst.msk [vmem:[%s17197_s19 + $0x3c8] sm:$0xff] %vm10176_vm9, %v10161_v0  ;;  %v9758_v51 = vadd.f32 %v17528_v40, %v13039_v63  ;;  %v13041_v23 = vadd.f32 %v12904_v50, %v12352_v42  ;;  %v9445_v57 = vpop.f32.mrb[127].mxu0 }
 0x5aa   : > { %v9756_v14 = vadd.f32 %v17528_v40, %v13040_v11  ;;  %v13042_v25 = vadd.f32 %v9445_v57, %v5387_v59  ;;  %v12355_v47 = vpop.f32.mrb[128].mxu1 }
 0x5ab   : > { %vm9894_vm1 = vcmp.ge.f32.partialorder %v9758_v51, 0.0  ;;  %v10030_v21 = vmul.f32 0.01, %v9758_v51  ;;  %v9759_v29 = vadd.f32 %v17733_v13, %v13041_v23  ;;  %v5400_v28 = vpop.f32.mrb[129].mxu1 }
 0x5ac   : > { %vm9892_vm2 = vcmp.ge.f32.partialorder %v9756_v14, 0.0  ;;  %v10028_v62 = vmul.f32 0.01, %v9756_v14  ;;  %v9757_v35 = vadd.f32 %v17733_v13, %v13042_v25  ;;  %v12356_v40 = vpop.f32.mrb[130].mxu1 }
 0x5ad   : > { %v10166_v8 = vsel %vm9894_vm1, %v9758_v51, %v10030_v21  ;;  %vm9895_vm5 = vcmp.ge.f32.partialorder %v9759_v29, 0.0  ;;  %v10031_v2 = vmul.f32 0.01, %v9759_v29  ;;  %v5403_v44 = vpop.f32.mrb[131].mxu1 }
 0x5ae   : > { %10303 = vst.msk [vmem:[%s17197_s19 + $0x3f0] sm:$0xff] %vm10176_vm9, %v10166_v8  ;;  %v10164_v53 = vsel %vm9892_vm2, %v9756_v14, %v10028_v62  ;;  %vm9893_vm6 = vcmp.ge.f32.partialorder %v9757_v35, 0.0  ;;  %v10029_v17 = vmul.f32 0.01, %v9757_v35  ;;  %v12907_v37 = vpop.f32.mrb[128].mxu0 }
 0x5af   : > { %10301 = vst.msk [vmem:[%s17197_s19 + $0x3e0] sm:$0xff] %vm10176_vm9, %v10164_v53  ;;  %v10167_v12 = vsel %vm9895_vm5, %v9759_v29, %v10031_v2  ;;  %v13043_v27 = vadd.f32 %v12907_v37, %v12355_v47  ;;  %v9458_v49 = vpop.f32.mrb[129].mxu0 }
 0x5b0   : > { %10304 = vst.msk [vmem:[%s17197_s19 + $0x3f8] sm:$0xff] %vm10176_vm9, %v10167_v12  ;;  %v10165_v31 = vsel %vm9893_vm6, %v9757_v35, %v10029_v17  ;;  %v13044_v30 = vadd.f32 %v9458_v49, %v5400_v28  ;;  %v12908_v16 = vpop.f32.mrb[130].mxu0 }
 0x5b1   : > { %10302 = vst.msk [vmem:[%s17197_s19 + $0x3e8] sm:$0xff] %vm10176_vm9, %v10165_v31  ;;  %v9762_v52 = vadd.f32 %v17733_v13, %v13043_v27  ;;  %v13045_v45 = vadd.f32 %v12908_v16, %v12356_v40  ;;  %v9461_v32 = vpop.f32.mrb[131].mxu0 }
 0x5b2   : > { %v9760_v1 = vadd.f32 %v17733_v13, %v13044_v30  ;;  %v13046_v26 = vadd.f32 %v9461_v32, %v5403_v44  ;;  %v12359_v55 = vpop.f32.mrb[132].mxu1 }
 0x5b3   : > { %vm9898_vm7 = vcmp.ge.f32.partialorder %v9762_v52, 0.0  ;;  %v10034_v22 = vmul.f32 0.01, %v9762_v52  ;;  %v9763_v54 = vadd.f32 %v17733_v13, %v13045_v45  ;;  %v5416_v43 = vpop.f32.mrb[133].mxu1 }
 0x5b4   : > { %vm9896_vm4 = vcmp.ge.f32.partialorder %v9760_v1, 0.0  ;;  %v10032_v60 = vmul.f32 0.01, %v9760_v1  ;;  %v9761_v61 = vadd.f32 %v17733_v13, %v13046_v26  ;;  %v12360_v15 = vpop.f32.mrb[134].mxu1 }
 0x5b5   : > { %v10170_v24 = vsel %vm9898_vm7, %v9762_v52, %v10034_v22  ;;  %vm9899_vm8 = vcmp.ge.f32.partialorder %v9763_v54, 0.0  ;;  %v10035_v3 = vmul.f32 0.01, %v9763_v54  ;;  %v5419_v7 = vpop.f32.mrb[135].mxu1 }
 0x5b6   : > { %10307 = vst.msk [vmem:[%s17197_s19 + $0x410] sm:$0xff] %vm10176_vm9, %v10170_v24  ;;  %v10168_v39 = vsel %vm9896_vm4, %v9760_v1, %v10032_v60  ;;  %vm9897_vm10 = vcmp.ge.f32.partialorder %v9761_v61, 0.0  ;;  %v10033_v41 = vmul.f32 0.01, %v9761_v61  ;;  %v12911_v19 = vpop.f32.mrb[132].mxu0 }
 0x5b7   : > { %10305 = vst.msk [vmem:[%s17197_s19 + $0x400] sm:$0xff] %vm10176_vm9, %v10168_v39  ;;  %v10171_v46 = vsel %vm9899_vm8, %v9763_v54, %v10035_v3  ;;  %v13047_v48 = vadd.f32 %v12911_v19, %v12359_v55  ;;  %v9474_v56 = vpop.f32.mrb[133].mxu0 }
 0x5b8   : > { %10308 = vst.msk [vmem:[%s17197_s19 + $0x418] sm:$0xff] %vm10176_vm9, %v10171_v46  ;;  %v10169_v36 = vsel %vm9897_vm10, %v9761_v61, %v10033_v41  ;;  %v13048_v18 = vadd.f32 %v9474_v56, %v5416_v43  ;;  %v12912_v20 = vpop.f32.mrb[134].mxu0 }
 0x5b9   : > { %10306 = vst.msk [vmem:[%s17197_s19 + $0x408] sm:$0xff] %vm10176_vm9, %v10169_v36  ;;  %v9766_v4 = vadd.f32 %v17733_v13, %v13047_v48  ;;  %v13049_v9 = vadd.f32 %v12912_v20, %v12360_v15  ;;  %v9477_v42 = vpop.f32.mrb[135].mxu0 }
 0x5ba   : > { %v9764_v34 = vadd.f32 %v17733_v13, %v13048_v18  ;;  %v13050_v6 = vadd.f32 %v9477_v42, %v5419_v7 }
 0x5bb   : > { %vm9902_vm11 = vcmp.ge.f32.partialorder %v9766_v4, 0.0  ;;  %v10038_v59 = vmul.f32 0.01, %v9766_v4  ;;  %v9767_v10 = vadd.f32 %v17733_v13, %v13049_v9 }
 0x5bc   : > { %vm9900_vm3 = vcmp.ge.f32.partialorder %v9764_v34, 0.0  ;;  %v10036_v58 = vmul.f32 0.01, %v9764_v34  ;;  %v9765_v33 = vadd.f32 %v17733_v13, %v13050_v6 }
 0x5bd   : > { %v10174_v5 = vsel %vm9902_vm11, %v9766_v4, %v10038_v59  ;;  %vm9903_vm12 = vcmp.ge.f32.partialorder %v9767_v10, 0.0  ;;  %v10039_v63 = vmul.f32 0.01, %v9767_v10 }
 0x5be   : > { %10311 = vst.msk [vmem:[%s17197_s19 + $0x430] sm:$0xff] %vm10176_vm9, %v10174_v5  ;;  %v10172_v38 = vsel %vm9900_vm3, %v9764_v34, %v10036_v58  ;;  %vm9901_vm13 = vcmp.ge.f32.partialorder %v9765_v33, 0.0  ;;  %v10037_v0 = vmul.f32 0.01, %v9765_v33 }
 0x5bf   : > { %10309 = vst.msk [vmem:[%s17197_s19 + $0x420] sm:$0xff] %vm10176_vm9, %v10172_v38  ;;  %v10175_v11 = vsel %vm9903_vm12, %v9767_v10, %v10039_v63 }
 0x5c0   : > { %10312 = vst.msk [vmem:[%s17197_s19 + $0x438] sm:$0xff] %vm10176_vm9, %v10175_v11  ;;  %v10173_v50 = vsel %vm9901_vm13, %v9765_v33, %v10037_v0 }
 0x5c1   : > { %10310 = vst.msk [vmem:[%s17197_s19 + $0x428] sm:$0xff] %vm10176_vm9, %v10173_v50 }
 0x5c2 PF: > { %s13_s14 = sadd.s32 1, %s14054_s14   ;;  %s18895_s12 = smov %s14050_s13 }
 0x5c3   : > { %p10_p5 = scmp.ge.s32.totalorder %s13_s14, 4   ;;  %s18896_s13 = smov %s18898_s15 }
 0x5c5   :  { %12 = sbr.rel (!%p10_p5) target bundleno = 2 (0x2), region = 76 }

</bundles_post_ra>
